<compile_context>
chip_gen: v6e
topology: v6e:2x2x1
jax: 0.10.0
libtpu: 0.0.40
codegen_flags: <defaults>
</compile_context>

<pallas_src>
import functools

import jax
import jax.numpy as jnp
from jax import lax
from jax.experimental import pallas as pl
from jax.experimental.pallas import tpu as pltpu

NUM_EMBEDDINGS = 100   # vocabulary size of each embedding table
NUM_FEATURES = 9       # number of embedding tables in the module
LANE = 128             # TPU lane width; vocab is padded up to this


# --------------------------------------------------------------------------
# One-time parameter packing (hoisted off the forward critical path).
# --------------------------------------------------------------------------
def pack_atom_encoder_weights(weights, *, lane_groups=None,
                              compute_dtype=jnp.bfloat16):
    """Pack (F, vocab, H) f32 tables into the kernel's block-diagonal RHS.

    Returns a (G*F*Vp, G*H) array where Vp = vocab padded to 128 and
    G = 128 // H (lane groups) when H divides 128, else 1.  Column block
    c = g*F + f holds table f placed at output columns [g*H, (g+1)*H).
    Pass compute_dtype=jnp.float32 for a bit-exact (vs f32 torch) gather.
    """
    f, vocab, hidden = weights.shape
    vocab_p = LANE * pl.cdiv(vocab, LANE)
    if lane_groups is None:
        lane_groups = LANE // hidden if (hidden < LANE and LANE % hidden == 0) else 1
    g = lane_groups
    w = jnp.zeros((g, f, vocab_p, g * hidden), jnp.float32)
    for gi in range(g):
        w = w.at[gi, :, :vocab, gi * hidden:(gi + 1) * hidden].set(weights)
    return w.reshape(g * f * vocab_p, g * hidden).astype(compute_dtype)


# --------------------------------------------------------------------------
# Kernel
# --------------------------------------------------------------------------
def _atom_encoder_kernel(x_ref, w_ref, o_ref, *, n_cols, vocab_padded,
                         sub_rows, n_sub, pair_k, compute_dtype):
    # x_ref: (n_sub*sub_rows, n_cols) int32 grouped indices
    # w_ref: (n_cols*vocab_padded, out_width) compute_dtype block-diag tables
    # o_ref: (n_sub*sub_rows, out_width) output
    # Hoisted lane iota, reused by every one-hot block (Mosaic keeps it cheap).
    lane_ids = lax.broadcasted_iota(jnp.int32, (sub_rows, vocab_padded), 1)

    for t in range(n_sub):                       # static unroll over sub-tiles
        r0 = t * sub_rows
        acc = None
        for c0 in range(0, n_cols, pair_k):      # static unroll over K chunks
            k = min(pair_k, n_cols - c0)
            # One 128-lane one-hot block per feature column; pair to K = k*128.
            blocks = []
            for j in range(k):
                idx = x_ref[r0:r0 + sub_rows, c0 + j:c0 + j + 1]   # (sub_rows, 1)
                blocks.append((idx == lane_ids).astype(compute_dtype))
            lhs = blocks[0] if k == 1 else jnp.concatenate(blocks, axis=-1)
            rhs = w_ref[c0 * vocab_padded:(c0 + k) * vocab_padded, :]
            part = jnp.dot(lhs, rhs, preferred_element_type=jnp.float32)
            acc = part if acc is None else acc + part
        o_ref[r0:r0 + sub_rows, :] = acc.astype(o_ref.dtype)


# --------------------------------------------------------------------------
# Forward wrapper
# --------------------------------------------------------------------------
@functools.partial(jax.jit, static_argnames=(
    "hidden", "num_features", "sub_rows", "max_sub_tiles", "pair_k", "out_dtype"))
def atom_encoder(x, w_packed, *, hidden, num_features=NUM_FEATURES,
                 sub_rows=128, max_sub_tiles=4, pair_k=2,
                 out_dtype=jnp.float32):
    """out[n] = sum_f table_f[x[n, f]]   (Pallas one-hot-matmul gather).

    x:        (N,) or (N, F) integer indices
    w_packed: output of pack_atom_encoder_weights (built for the same F)
    pair_k:   feature columns per MXU dot (2 -> K=256 for v6e/v7x; use 1 on v5e)
    """
    if x.ndim == 1:
        x = x[:, None]
    x = x.astype(jnp.int32)
    n, f = x.shape
    assert f == num_features, "x feature count must match the packed table"

    out_width = w_packed.shape[1]
    g = out_width // hidden                      # nodes packed per output row
    assert g * hidden == out_width
    vocab_p = w_packed.shape[0] // (g * num_features)
    assert g * num_features * vocab_p == w_packed.shape[0]
    n_cols = g * num_features

    # Tile sizing: up to max_sub_tiles x sub_rows grouped rows per grid step
    # (shrinks for small N so we do not compute mostly padding).
    n_groups_min = pl.cdiv(n, g)
    n_sub = max(1, min(max_sub_tiles, pl.cdiv(n_groups_min, sub_rows)))
    tile_rows = n_sub * sub_rows                 # grouped rows per grid step
    nodes_per_tile = tile_rows * g
    grid_n = pl.cdiv(n, nodes_per_tile)
    n_pad = grid_n * nodes_per_tile
    if n_pad != n:
        x = jnp.pad(x, ((0, n_pad - n), (0, 0)))
    # Row-major regroup: (n_pad, F) -> (n_pad/G, G*F); pure view, no data move.
    xg = x.reshape(n_pad // g, n_cols)

    kernel = functools.partial(
        _atom_encoder_kernel,
        n_cols=n_cols, vocab_padded=vocab_p, sub_rows=sub_rows, n_sub=n_sub,
        pair_k=pair_k, compute_dtype=w_packed.dtype)

    out = pl.pallas_call(
        kernel,
        out_shape=jax.ShapeDtypeStruct((n_pad // g, out_width), out_dtype),
        grid_spec=pltpu.PrefetchScalarGridSpec(
            num_scalar_prefetch=0,
            grid=(grid_n,),
            in_specs=[
                # grouped indices tile: (tile_rows, G*F); last dim = full dim.
                pl.BlockSpec((tile_rows, n_cols), lambda i: (i, 0)),
                # full block-diagonal packed tables; grid-invariant block.
                pl.BlockSpec((n_cols * vocab_p, out_width), lambda i: (0, 0)),
            ],
            # lane-dense output: out_width = G*hidden = 128 -> unmasked stores.
            out_specs=pl.BlockSpec((tile_rows, out_width), lambda i: (i, 0)),
        ),
        compiler_params=pltpu.CompilerParams(
            dimension_semantics=("parallel",),   # shards rows across TCs
        ),
    )(xg, w_packed)

    # (n_pad/G, G*H) is memory-identical to (n_pad, H): free reshape, then slice.
    return out.reshape(n_pad, hidden)[:n]


def atom_encoder_ref(x, weights):
    """Pure-JAX reference (matches the PyTorch forward)."""
    if x.ndim == 1:
        x = x[:, None]
    out = 0
    for i in range(x.shape[1]):
        out = out + jnp.take(weights[i], x[:, i], axis=0)
    return out


if __name__ == "__main__":
    key = jax.random.PRNGKey(0)
    k_w, k_x1, k_x2 = jax.random.split(key, 3)

    hidden_channels = 32

    # Deterministic parameter init: torch.nn.Embedding default is N(0, 1).
    weights = jax.random.normal(
        k_w, (NUM_FEATURES, NUM_EMBEDDINGS, hidden_channels), dtype=jnp.float32)
    # One-time repack (bf16 block-diagonal, vocab padded to 128).
    w_packed = pack_atom_encoder_weights(weights)

    # The gather + sum is exact; only the bf16 rounding of the weight values
    # differs from the f32 PyTorch forward.
    w_bf16_as_f32 = weights.astype(jnp.bfloat16).astype(jnp.float32)

    for k_x, n in ((k_x1, 200), (k_x2, 5000)):   # ragged + multi-tile paths
        x = jax.random.randint(k_x, (n, NUM_FEATURES), 0, NUM_EMBEDDINGS,
                               dtype=jnp.int32)
        out = jax.block_until_ready(
            atom_encoder(x, w_packed, hidden=hidden_channels))
        assert out.shape == (n, hidden_channels)

        ref_bf16 = atom_encoder_ref(x, w_bf16_as_f32)
        ref_f32 = atom_encoder_ref(x, weights)
        assert jnp.allclose(out, ref_bf16, atol=1e-4, rtol=1e-4), \
            f"mismatch vs bf16-weight reference (n={n})"
        assert jnp.allclose(out, ref_f32, atol=1e-1, rtol=1e-1), \
            f"mismatch vs f32 reference (n={n})"

    print("KERNEL_OK")
</pallas_src>

<mosaic_0001>
module attributes {stable_mosaic.version = 11 : i64} {
  func.func @_atom_encoder_kernel(%arg0: i32, %arg1: memref<128x36xi32, #tpu.memory_space<vmem>>, %arg2: memref<4608x128xbf16, #tpu.memory_space<vmem>>, %arg3: memref<128x128xf32, #tpu.memory_space<vmem>>) attributes {dimension_semantics = [#tpu.dimension_semantics<parallel>], iteration_bounds = array<i64: 1>, scalar_prefetch = 0 : i64, scratch_operands = 0 : i64, tpu.core_type = #tpu.core_type<tc>, window_params = [{transform_indices = @transform_0, window_bounds = array<i64: 128, 36>}, {pipeline_mode = #tpu.pipeline_mode<synchronous>, transform_indices = @transform_1, window_bounds = array<i64: 4608, 128>}, {transform_indices = @transform_2, window_bounds = array<i64: 128, 128>}]} {
    %0 = tpu.iota {dimensions = array<i32: 1>} : vector<128x128xi32>
    %c0 = arith.constant 0 : index
    %c0_0 = arith.constant 0 : index
    %1 = vector.load %arg1[%c0, %c0_0] : memref<128x36xi32, #tpu.memory_space<vmem>>, vector<128x1xi32>
    %2 = vector.broadcast %1 : vector<128x1xi32> to vector<128x128xi32>
    %3 = arith.cmpi eq, %2, %0 : vector<128x128xi32>
    %4 = arith.extui %3 : vector<128x128xi1> to vector<128x128xi32>
    %5 = arith.sitofp %4 : vector<128x128xi32> to vector<128x128xf32>
    %6 = arith.truncf %5 : vector<128x128xf32> to vector<128x128xbf16>
    %c0_1 = arith.constant 0 : index
    %c1 = arith.constant 1 : index
    %7 = vector.load %arg1[%c0_1, %c1] : memref<128x36xi32, #tpu.memory_space<vmem>>, vector<128x1xi32>
    %8 = vector.broadcast %7 : vector<128x1xi32> to vector<128x128xi32>
    %9 = arith.cmpi eq, %8, %0 : vector<128x128xi32>
    %10 = arith.extui %9 : vector<128x128xi1> to vector<128x128xi32>
    %11 = arith.sitofp %10 : vector<128x128xi32> to vector<128x128xf32>
    %12 = arith.truncf %11 : vector<128x128xf32> to vector<128x128xbf16>
    %13 = tpu.concatenate %6, %12 in 1 : vector<128x128xbf16>, vector<128x128xbf16> -> vector<128x256xbf16>
    %c0_2 = arith.constant 0 : index
    %c0_3 = arith.constant 0 : index
    %14 = vector.load %arg2[%c0_2, %c0_3] : memref<4608x128xbf16, #tpu.memory_space<vmem>>, vector<256x128xbf16>
    %cst = arith.constant dense<0.000000e+00> : vector<128x128xf32>
    %15 = tpu.matmul %13, %14, %cst {dimension_numbers = #tpu.dot_dimension_numbers<[1], [0], [0], [1], [0, 0, 1, 1], [], []>} : vector<128x256xbf16>, vector<256x128xbf16>, vector<128x128xf32> -> vector<128x128xf32>
    %c0_4 = arith.constant 0 : index
    %c2 = arith.constant 2 : index
    %16 = vector.load %arg1[%c0_4, %c2] : memref<128x36xi32, #tpu.memory_space<vmem>>, vector<128x1xi32>
    %17 = vector.broadcast %16 : vector<128x1xi32> to vector<128x128xi32>
    %18 = arith.cmpi eq, %17, %0 : vector<128x128xi32>
    %19 = arith.extui %18 : vector<128x128xi1> to vector<128x128xi32>
    %20 = arith.sitofp %19 : vector<128x128xi32> to vector<128x128xf32>
    %21 = arith.truncf %20 : vector<128x128xf32> to vector<128x128xbf16>
    %c0_5 = arith.constant 0 : index
    %c3 = arith.constant 3 : index
    %22 = vector.load %arg1[%c0_5, %c3] : memref<128x36xi32, #tpu.memory_space<vmem>>, vector<128x1xi32>
    %23 = vector.broadcast %22 : vector<128x1xi32> to vector<128x128xi32>
    %24 = arith.cmpi eq, %23, %0 : vector<128x128xi32>
    %25 = arith.extui %24 : vector<128x128xi1> to vector<128x128xi32>
    %26 = arith.sitofp %25 : vector<128x128xi32> to vector<128x128xf32>
    %27 = arith.truncf %26 : vector<128x128xf32> to vector<128x128xbf16>
    %28 = tpu.concatenate %21, %27 in 1 : vector<128x128xbf16>, vector<128x128xbf16> -> vector<128x256xbf16>
    %c256 = arith.constant 256 : index
    %c0_6 = arith.constant 0 : index
    %29 = vector.load %arg2[%c256, %c0_6] : memref<4608x128xbf16, #tpu.memory_space<vmem>>, vector<256x128xbf16>
    %cst_7 = arith.constant dense<0.000000e+00> : vector<128x128xf32>
    %30 = tpu.matmul %28, %29, %cst_7 {dimension_numbers = #tpu.dot_dimension_numbers<[1], [0], [0], [1], [0, 0, 1, 1], [], []>} : vector<128x256xbf16>, vector<256x128xbf16>, vector<128x128xf32> -> vector<128x128xf32>
    %31 = arith.addf %15, %30 : vector<128x128xf32>
    %c0_8 = arith.constant 0 : index
    %c4 = arith.constant 4 : index
    %32 = vector.load %arg1[%c0_8, %c4] : memref<128x36xi32, #tpu.memory_space<vmem>>, vector<128x1xi32>
    %33 = vector.broadcast %32 : vector<128x1xi32> to vector<128x128xi32>
    %34 = arith.cmpi eq, %33, %0 : vector<128x128xi32>
    %35 = arith.extui %34 : vector<128x128xi1> to vector<128x128xi32>
    %36 = arith.sitofp %35 : vector<128x128xi32> to vector<128x128xf32>
    %37 = arith.truncf %36 : vector<128x128xf32> to vector<128x128xbf16>
    %c0_9 = arith.constant 0 : index
    %c5 = arith.constant 5 : index
    %38 = vector.load %arg1[%c0_9, %c5] : memref<128x36xi32, #tpu.memory_space<vmem>>, vector<128x1xi32>
    %39 = vector.broadcast %38 : vector<128x1xi32> to vector<128x128xi32>
    %40 = arith.cmpi eq, %39, %0 : vector<128x128xi32>
    %41 = arith.extui %40 : vector<128x128xi1> to vector<128x128xi32>
    %42 = arith.sitofp %41 : vector<128x128xi32> to vector<128x128xf32>
    %43 = arith.truncf %42 : vector<128x128xf32> to vector<128x128xbf16>
    %44 = tpu.concatenate %37, %43 in 1 : vector<128x128xbf16>, vector<128x128xbf16> -> vector<128x256xbf16>
    %c512 = arith.constant 512 : index
    %c0_10 = arith.constant 0 : index
    %45 = vector.load %arg2[%c512, %c0_10] : memref<4608x128xbf16, #tpu.memory_space<vmem>>, vector<256x128xbf16>
    %cst_11 = arith.constant dense<0.000000e+00> : vector<128x128xf32>
    %46 = tpu.matmul %44, %45, %cst_11 {dimension_numbers = #tpu.dot_dimension_numbers<[1], [0], [0], [1], [0, 0, 1, 1], [], []>} : vector<128x256xbf16>, vector<256x128xbf16>, vector<128x128xf32> -> vector<128x128xf32>
    %47 = arith.addf %31, %46 : vector<128x128xf32>
    %c0_12 = arith.constant 0 : index
    %c6 = arith.constant 6 : index
    %48 = vector.load %arg1[%c0_12, %c6] : memref<128x36xi32, #tpu.memory_space<vmem>>, vector<128x1xi32>
    %49 = vector.broadcast %48 : vector<128x1xi32> to vector<128x128xi32>
    %50 = arith.cmpi eq, %49, %0 : vector<128x128xi32>
    %51 = arith.extui %50 : vector<128x128xi1> to vector<128x128xi32>
    %52 = arith.sitofp %51 : vector<128x128xi32> to vector<128x128xf32>
    %53 = arith.truncf %52 : vector<128x128xf32> to vector<128x128xbf16>
    %c0_13 = arith.constant 0 : index
    %c7 = arith.constant 7 : index
    %54 = vector.load %arg1[%c0_13, %c7] : memref<128x36xi32, #tpu.memory_space<vmem>>, vector<128x1xi32>
    %55 = vector.broadcast %54 : vector<128x1xi32> to vector<128x128xi32>
    %56 = arith.cmpi eq, %55, %0 : vector<128x128xi32>
    %57 = arith.extui %56 : vector<128x128xi1> to vector<128x128xi32>
    %58 = arith.sitofp %57 : vector<128x128xi32> to vector<128x128xf32>
    %59 = arith.truncf %58 : vector<128x128xf32> to vector<128x128xbf16>
    %60 = tpu.concatenate %53, %59 in 1 : vector<128x128xbf16>, vector<128x128xbf16> -> vector<128x256xbf16>
    %c768 = arith.constant 768 : index
    %c0_14 = arith.constant 0 : index
    %61 = vector.load %arg2[%c768, %c0_14] : memref<4608x128xbf16, #tpu.memory_space<vmem>>, vector<256x128xbf16>
    %cst_15 = arith.constant dense<0.000000e+00> : vector<128x128xf32>
    %62 = tpu.matmul %60, %61, %cst_15 {dimension_numbers = #tpu.dot_dimension_numbers<[1], [0], [0], [1], [0, 0, 1, 1], [], []>} : vector<128x256xbf16>, vector<256x128xbf16>, vector<128x128xf32> -> vector<128x128xf32>
    %63 = arith.addf %47, %62 : vector<128x128xf32>
    %c0_16 = arith.constant 0 : index
    %c8 = arith.constant 8 : index
    %64 = vector.load %arg1[%c0_16, %c8] : memref<128x36xi32, #tpu.memory_space<vmem>>, vector<128x1xi32>
    %65 = vector.broadcast %64 : vector<128x1xi32> to vector<128x128xi32>
    %66 = arith.cmpi eq, %65, %0 : vector<128x128xi32>
    %67 = arith.extui %66 : vector<128x128xi1> to vector<128x128xi32>
    %68 = arith.sitofp %67 : vector<128x128xi32> to vector<128x128xf32>
    %69 = arith.truncf %68 : vector<128x128xf32> to vector<128x128xbf16>
    %c0_17 = arith.constant 0 : index
    %c9 = arith.constant 9 : index
    %70 = vector.load %arg1[%c0_17, %c9] : memref<128x36xi32, #tpu.memory_space<vmem>>, vector<128x1xi32>
    %71 = vector.broadcast %70 : vector<128x1xi32> to vector<128x128xi32>
    %72 = arith.cmpi eq, %71, %0 : vector<128x128xi32>
    %73 = arith.extui %72 : vector<128x128xi1> to vector<128x128xi32>
    %74 = arith.sitofp %73 : vector<128x128xi32> to vector<128x128xf32>
    %75 = arith.truncf %74 : vector<128x128xf32> to vector<128x128xbf16>
    %76 = tpu.concatenate %69, %75 in 1 : vector<128x128xbf16>, vector<128x128xbf16> -> vector<128x256xbf16>
    %c1024 = arith.constant 1024 : index
    %c0_18 = arith.constant 0 : index
    %77 = vector.load %arg2[%c1024, %c0_18] : memref<4608x128xbf16, #tpu.memory_space<vmem>>, vector<256x128xbf16>
    %cst_19 = arith.constant dense<0.000000e+00> : vector<128x128xf32>
    %78 = tpu.matmul %76, %77, %cst_19 {dimension_numbers = #tpu.dot_dimension_numbers<[1], [0], [0], [1], [0, 0, 1, 1], [], []>} : vector<128x256xbf16>, vector<256x128xbf16>, vector<128x128xf32> -> vector<128x128xf32>
    %79 = arith.addf %63, %78 : vector<128x128xf32>
    %c0_20 = arith.constant 0 : index
    %c10 = arith.constant 10 : index
    %80 = vector.load %arg1[%c0_20, %c10] : memref<128x36xi32, #tpu.memory_space<vmem>>, vector<128x1xi32>
    %81 = vector.broadcast %80 : vector<128x1xi32> to vector<128x128xi32>
    %82 = arith.cmpi eq, %81, %0 : vector<128x128xi32>
    %83 = arith.extui %82 : vector<128x128xi1> to vector<128x128xi32>
    %84 = arith.sitofp %83 : vector<128x128xi32> to vector<128x128xf32>
    %85 = arith.truncf %84 : vector<128x128xf32> to vector<128x128xbf16>
    %c0_21 = arith.constant 0 : index
    %c11 = arith.constant 11 : index
    %86 = vector.load %arg1[%c0_21, %c11] : memref<128x36xi32, #tpu.memory_space<vmem>>, vector<128x1xi32>
    %87 = vector.broadcast %86 : vector<128x1xi32> to vector<128x128xi32>
    %88 = arith.cmpi eq, %87, %0 : vector<128x128xi32>
    %89 = arith.extui %88 : vector<128x128xi1> to vector<128x128xi32>
    %90 = arith.sitofp %89 : vector<128x128xi32> to vector<128x128xf32>
    %91 = arith.truncf %90 : vector<128x128xf32> to vector<128x128xbf16>
    %92 = tpu.concatenate %85, %91 in 1 : vector<128x128xbf16>, vector<128x128xbf16> -> vector<128x256xbf16>
    %c1280 = arith.constant 1280 : index
    %c0_22 = arith.constant 0 : index
    %93 = vector.load %arg2[%c1280, %c0_22] : memref<4608x128xbf16, #tpu.memory_space<vmem>>, vector<256x128xbf16>
    %cst_23 = arith.constant dense<0.000000e+00> : vector<128x128xf32>
    %94 = tpu.matmul %92, %93, %cst_23 {dimension_numbers = #tpu.dot_dimension_numbers<[1], [0], [0], [1], [0, 0, 1, 1], [], []>} : vector<128x256xbf16>, vector<256x128xbf16>, vector<128x128xf32> -> vector<128x128xf32>
    %95 = arith.addf %79, %94 : vector<128x128xf32>
    %c0_24 = arith.constant 0 : index
    %c12 = arith.constant 12 : index
    %96 = vector.load %arg1[%c0_24, %c12] : memref<128x36xi32, #tpu.memory_space<vmem>>, vector<128x1xi32>
    %97 = vector.broadcast %96 : vector<128x1xi32> to vector<128x128xi32>
    %98 = arith.cmpi eq, %97, %0 : vector<128x128xi32>
    %99 = arith.extui %98 : vector<128x128xi1> to vector<128x128xi32>
    %100 = arith.sitofp %99 : vector<128x128xi32> to vector<128x128xf32>
    %101 = arith.truncf %100 : vector<128x128xf32> to vector<128x128xbf16>
    %c0_25 = arith.constant 0 : index
    %c13 = arith.constant 13 : index
    %102 = vector.load %arg1[%c0_25, %c13] : memref<128x36xi32, #tpu.memory_space<vmem>>, vector<128x1xi32>
    %103 = vector.broadcast %102 : vector<128x1xi32> to vector<128x128xi32>
    %104 = arith.cmpi eq, %103, %0 : vector<128x128xi32>
    %105 = arith.extui %104 : vector<128x128xi1> to vector<128x128xi32>
    %106 = arith.sitofp %105 : vector<128x128xi32> to vector<128x128xf32>
    %107 = arith.truncf %106 : vector<128x128xf32> to vector<128x128xbf16>
    %108 = tpu.concatenate %101, %107 in 1 : vector<128x128xbf16>, vector<128x128xbf16> -> vector<128x256xbf16>
    %c1536 = arith.constant 1536 : index
    %c0_26 = arith.constant 0 : index
    %109 = vector.load %arg2[%c1536, %c0_26] : memref<4608x128xbf16, #tpu.memory_space<vmem>>, vector<256x128xbf16>
    %cst_27 = arith.constant dense<0.000000e+00> : vector<128x128xf32>
    %110 = tpu.matmul %108, %109, %cst_27 {dimension_numbers = #tpu.dot_dimension_numbers<[1], [0], [0], [1], [0, 0, 1, 1], [], []>} : vector<128x256xbf16>, vector<256x128xbf16>, vector<128x128xf32> -> vector<128x128xf32>
    %111 = arith.addf %95, %110 : vector<128x128xf32>
    %c0_28 = arith.constant 0 : index
    %c14 = arith.constant 14 : index
    %112 = vector.load %arg1[%c0_28, %c14] : memref<128x36xi32, #tpu.memory_space<vmem>>, vector<128x1xi32>
    %113 = vector.broadcast %112 : vector<128x1xi32> to vector<128x128xi32>
    %114 = arith.cmpi eq, %113, %0 : vector<128x128xi32>
    %115 = arith.extui %114 : vector<128x128xi1> to vector<128x128xi32>
    %116 = arith.sitofp %115 : vector<128x128xi32> to vector<128x128xf32>
    %117 = arith.truncf %116 : vector<128x128xf32> to vector<128x128xbf16>
    %c0_29 = arith.constant 0 : index
    %c15 = arith.constant 15 : index
    %118 = vector.load %arg1[%c0_29, %c15] : memref<128x36xi32, #tpu.memory_space<vmem>>, vector<128x1xi32>
    %119 = vector.broadcast %118 : vector<128x1xi32> to vector<128x128xi32>
    %120 = arith.cmpi eq, %119, %0 : vector<128x128xi32>
    %121 = arith.extui %120 : vector<128x128xi1> to vector<128x128xi32>
    %122 = arith.sitofp %121 : vector<128x128xi32> to vector<128x128xf32>
    %123 = arith.truncf %122 : vector<128x128xf32> to vector<128x128xbf16>
    %124 = tpu.concatenate %117, %123 in 1 : vector<128x128xbf16>, vector<128x128xbf16> -> vector<128x256xbf16>
    %c1792 = arith.constant 1792 : index
    %c0_30 = arith.constant 0 : index
    %125 = vector.load %arg2[%c1792, %c0_30] : memref<4608x128xbf16, #tpu.memory_space<vmem>>, vector<256x128xbf16>
    %cst_31 = arith.constant dense<0.000000e+00> : vector<128x128xf32>
    %126 = tpu.matmul %124, %125, %cst_31 {dimension_numbers = #tpu.dot_dimension_numbers<[1], [0], [0], [1], [0, 0, 1, 1], [], []>} : vector<128x256xbf16>, vector<256x128xbf16>, vector<128x128xf32> -> vector<128x128xf32>
    %127 = arith.addf %111, %126 : vector<128x128xf32>
    %c0_32 = arith.constant 0 : index
    %c16 = arith.constant 16 : index
    %128 = vector.load %arg1[%c0_32, %c16] : memref<128x36xi32, #tpu.memory_space<vmem>>, vector<128x1xi32>
    %129 = vector.broadcast %128 : vector<128x1xi32> to vector<128x128xi32>
    %130 = arith.cmpi eq, %129, %0 : vector<128x128xi32>
    %131 = arith.extui %130 : vector<128x128xi1> to vector<128x128xi32>
    %132 = arith.sitofp %131 : vector<128x128xi32> to vector<128x128xf32>
    %133 = arith.truncf %132 : vector<128x128xf32> to vector<128x128xbf16>
    %c0_33 = arith.constant 0 : index
    %c17 = arith.constant 17 : index
    %134 = vector.load %arg1[%c0_33, %c17] : memref<128x36xi32, #tpu.memory_space<vmem>>, vector<128x1xi32>
    %135 = vector.broadcast %134 : vector<128x1xi32> to vector<128x128xi32>
    %136 = arith.cmpi eq, %135, %0 : vector<128x128xi32>
    %137 = arith.extui %136 : vector<128x128xi1> to vector<128x128xi32>
    %138 = arith.sitofp %137 : vector<128x128xi32> to vector<128x128xf32>
    %139 = arith.truncf %138 : vector<128x128xf32> to vector<128x128xbf16>
    %140 = tpu.concatenate %133, %139 in 1 : vector<128x128xbf16>, vector<128x128xbf16> -> vector<128x256xbf16>
    %c2048 = arith.constant 2048 : index
    %c0_34 = arith.constant 0 : index
    %141 = vector.load %arg2[%c2048, %c0_34] : memref<4608x128xbf16, #tpu.memory_space<vmem>>, vector<256x128xbf16>
    %cst_35 = arith.constant dense<0.000000e+00> : vector<128x128xf32>
    %142 = tpu.matmul %140, %141, %cst_35 {dimension_numbers = #tpu.dot_dimension_numbers<[1], [0], [0], [1], [0, 0, 1, 1], [], []>} : vector<128x256xbf16>, vector<256x128xbf16>, vector<128x128xf32> -> vector<128x128xf32>
    %143 = arith.addf %127, %142 : vector<128x128xf32>
    %c0_36 = arith.constant 0 : index
    %c18 = arith.constant 18 : index
    %144 = vector.load %arg1[%c0_36, %c18] : memref<128x36xi32, #tpu.memory_space<vmem>>, vector<128x1xi32>
    %145 = vector.broadcast %144 : vector<128x1xi32> to vector<128x128xi32>
    %146 = arith.cmpi eq, %145, %0 : vector<128x128xi32>
    %147 = arith.extui %146 : vector<128x128xi1> to vector<128x128xi32>
    %148 = arith.sitofp %147 : vector<128x128xi32> to vector<128x128xf32>
    %149 = arith.truncf %148 : vector<128x128xf32> to vector<128x128xbf16>
    %c0_37 = arith.constant 0 : index
    %c19 = arith.constant 19 : index
    %150 = vector.load %arg1[%c0_37, %c19] : memref<128x36xi32, #tpu.memory_space<vmem>>, vector<128x1xi32>
    %151 = vector.broadcast %150 : vector<128x1xi32> to vector<128x128xi32>
    %152 = arith.cmpi eq, %151, %0 : vector<128x128xi32>
    %153 = arith.extui %152 : vector<128x128xi1> to vector<128x128xi32>
    %154 = arith.sitofp %153 : vector<128x128xi32> to vector<128x128xf32>
    %155 = arith.truncf %154 : vector<128x128xf32> to vector<128x128xbf16>
    %156 = tpu.concatenate %149, %155 in 1 : vector<128x128xbf16>, vector<128x128xbf16> -> vector<128x256xbf16>
    %c2304 = arith.constant 2304 : index
    %c0_38 = arith.constant 0 : index
    %157 = vector.load %arg2[%c2304, %c0_38] : memref<4608x128xbf16, #tpu.memory_space<vmem>>, vector<256x128xbf16>
    %cst_39 = arith.constant dense<0.000000e+00> : vector<128x128xf32>
    %158 = tpu.matmul %156, %157, %cst_39 {dimension_numbers = #tpu.dot_dimension_numbers<[1], [0], [0], [1], [0, 0, 1, 1], [], []>} : vector<128x256xbf16>, vector<256x128xbf16>, vector<128x128xf32> -> vector<128x128xf32>
    %159 = arith.addf %143, %158 : vector<128x128xf32>
    %c0_40 = arith.constant 0 : index
    %c20 = arith.constant 20 : index
    %160 = vector.load %arg1[%c0_40, %c20] : memref<128x36xi32, #tpu.memory_space<vmem>>, vector<128x1xi32>
    %161 = vector.broadcast %160 : vector<128x1xi32> to vector<128x128xi32>
    %162 = arith.cmpi eq, %161, %0 : vector<128x128xi32>
    %163 = arith.extui %162 : vector<128x128xi1> to vector<128x128xi32>
    %164 = arith.sitofp %163 : vector<128x128xi32> to vector<128x128xf32>
    %165 = arith.truncf %164 : vector<128x128xf32> to vector<128x128xbf16>
    %c0_41 = arith.constant 0 : index
    %c21 = arith.constant 21 : index
    %166 = vector.load %arg1[%c0_41, %c21] : memref<128x36xi32, #tpu.memory_space<vmem>>, vector<128x1xi32>
    %167 = vector.broadcast %166 : vector<128x1xi32> to vector<128x128xi32>
    %168 = arith.cmpi eq, %167, %0 : vector<128x128xi32>
    %169 = arith.extui %168 : vector<128x128xi1> to vector<128x128xi32>
    %170 = arith.sitofp %169 : vector<128x128xi32> to vector<128x128xf32>
    %171 = arith.truncf %170 : vector<128x128xf32> to vector<128x128xbf16>
    %172 = tpu.concatenate %165, %171 in 1 : vector<128x128xbf16>, vector<128x128xbf16> -> vector<128x256xbf16>
    %c2560 = arith.constant 2560 : index
    %c0_42 = arith.constant 0 : index
    %173 = vector.load %arg2[%c2560, %c0_42] : memref<4608x128xbf16, #tpu.memory_space<vmem>>, vector<256x128xbf16>
    %cst_43 = arith.constant dense<0.000000e+00> : vector<128x128xf32>
    %174 = tpu.matmul %172, %173, %cst_43 {dimension_numbers = #tpu.dot_dimension_numbers<[1], [0], [0], [1], [0, 0, 1, 1], [], []>} : vector<128x256xbf16>, vector<256x128xbf16>, vector<128x128xf32> -> vector<128x128xf32>
    %175 = arith.addf %159, %174 : vector<128x128xf32>
    %c0_44 = arith.constant 0 : index
    %c22 = arith.constant 22 : index
    %176 = vector.load %arg1[%c0_44, %c22] : memref<128x36xi32, #tpu.memory_space<vmem>>, vector<128x1xi32>
    %177 = vector.broadcast %176 : vector<128x1xi32> to vector<128x128xi32>
    %178 = arith.cmpi eq, %177, %0 : vector<128x128xi32>
    %179 = arith.extui %178 : vector<128x128xi1> to vector<128x128xi32>
    %180 = arith.sitofp %179 : vector<128x128xi32> to vector<128x128xf32>
    %181 = arith.truncf %180 : vector<128x128xf32> to vector<128x128xbf16>
    %c0_45 = arith.constant 0 : index
    %c23 = arith.constant 23 : index
    %182 = vector.load %arg1[%c0_45, %c23] : memref<128x36xi32, #tpu.memory_space<vmem>>, vector<128x1xi32>
    %183 = vector.broadcast %182 : vector<128x1xi32> to vector<128x128xi32>
    %184 = arith.cmpi eq, %183, %0 : vector<128x128xi32>
    %185 = arith.extui %184 : vector<128x128xi1> to vector<128x128xi32>
    %186 = arith.sitofp %185 : vector<128x128xi32> to vector<128x128xf32>
    %187 = arith.truncf %186 : vector<128x128xf32> to vector<128x128xbf16>
    %188 = tpu.concatenate %181, %187 in 1 : vector<128x128xbf16>, vector<128x128xbf16> -> vector<128x256xbf16>
    %c2816 = arith.constant 2816 : index
    %c0_46 = arith.constant 0 : index
    %189 = vector.load %arg2[%c2816, %c0_46] : memref<4608x128xbf16, #tpu.memory_space<vmem>>, vector<256x128xbf16>
    %cst_47 = arith.constant dense<0.000000e+00> : vector<128x128xf32>
    %190 = tpu.matmul %188, %189, %cst_47 {dimension_numbers = #tpu.dot_dimension_numbers<[1], [0], [0], [1], [0, 0, 1, 1], [], []>} : vector<128x256xbf16>, vector<256x128xbf16>, vector<128x128xf32> -> vector<128x128xf32>
    %191 = arith.addf %175, %190 : vector<128x128xf32>
    %c0_48 = arith.constant 0 : index
    %c24 = arith.constant 24 : index
    %192 = vector.load %arg1[%c0_48, %c24] : memref<128x36xi32, #tpu.memory_space<vmem>>, vector<128x1xi32>
    %193 = vector.broadcast %192 : vector<128x1xi32> to vector<128x128xi32>
    %194 = arith.cmpi eq, %193, %0 : vector<128x128xi32>
    %195 = arith.extui %194 : vector<128x128xi1> to vector<128x128xi32>
    %196 = arith.sitofp %195 : vector<128x128xi32> to vector<128x128xf32>
    %197 = arith.truncf %196 : vector<128x128xf32> to vector<128x128xbf16>
    %c0_49 = arith.constant 0 : index
    %c25 = arith.constant 25 : index
    %198 = vector.load %arg1[%c0_49, %c25] : memref<128x36xi32, #tpu.memory_space<vmem>>, vector<128x1xi32>
    %199 = vector.broadcast %198 : vector<128x1xi32> to vector<128x128xi32>
    %200 = arith.cmpi eq, %199, %0 : vector<128x128xi32>
    %201 = arith.extui %200 : vector<128x128xi1> to vector<128x128xi32>
    %202 = arith.sitofp %201 : vector<128x128xi32> to vector<128x128xf32>
    %203 = arith.truncf %202 : vector<128x128xf32> to vector<128x128xbf16>
    %204 = tpu.concatenate %197, %203 in 1 : vector<128x128xbf16>, vector<128x128xbf16> -> vector<128x256xbf16>
    %c3072 = arith.constant 3072 : index
    %c0_50 = arith.constant 0 : index
    %205 = vector.load %arg2[%c3072, %c0_50] : memref<4608x128xbf16, #tpu.memory_space<vmem>>, vector<256x128xbf16>
    %cst_51 = arith.constant dense<0.000000e+00> : vector<128x128xf32>
    %206 = tpu.matmul %204, %205, %cst_51 {dimension_numbers = #tpu.dot_dimension_numbers<[1], [0], [0], [1], [0, 0, 1, 1], [], []>} : vector<128x256xbf16>, vector<256x128xbf16>, vector<128x128xf32> -> vector<128x128xf32>
    %207 = arith.addf %191, %206 : vector<128x128xf32>
    %c0_52 = arith.constant 0 : index
    %c26 = arith.constant 26 : index
    %208 = vector.load %arg1[%c0_52, %c26] : memref<128x36xi32, #tpu.memory_space<vmem>>, vector<128x1xi32>
    %209 = vector.broadcast %208 : vector<128x1xi32> to vector<128x128xi32>
    %210 = arith.cmpi eq, %209, %0 : vector<128x128xi32>
    %211 = arith.extui %210 : vector<128x128xi1> to vector<128x128xi32>
    %212 = arith.sitofp %211 : vector<128x128xi32> to vector<128x128xf32>
    %213 = arith.truncf %212 : vector<128x128xf32> to vector<128x128xbf16>
    %c0_53 = arith.constant 0 : index
    %c27 = arith.constant 27 : index
    %214 = vector.load %arg1[%c0_53, %c27] : memref<128x36xi32, #tpu.memory_space<vmem>>, vector<128x1xi32>
    %215 = vector.broadcast %214 : vector<128x1xi32> to vector<128x128xi32>
    %216 = arith.cmpi eq, %215, %0 : vector<128x128xi32>
    %217 = arith.extui %216 : vector<128x128xi1> to vector<128x128xi32>
    %218 = arith.sitofp %217 : vector<128x128xi32> to vector<128x128xf32>
    %219 = arith.truncf %218 : vector<128x128xf32> to vector<128x128xbf16>
    %220 = tpu.concatenate %213, %219 in 1 : vector<128x128xbf16>, vector<128x128xbf16> -> vector<128x256xbf16>
    %c3328 = arith.constant 3328 : index
    %c0_54 = arith.constant 0 : index
    %221 = vector.load %arg2[%c3328, %c0_54] : memref<4608x128xbf16, #tpu.memory_space<vmem>>, vector<256x128xbf16>
    %cst_55 = arith.constant dense<0.000000e+00> : vector<128x128xf32>
    %222 = tpu.matmul %220, %221, %cst_55 {dimension_numbers = #tpu.dot_dimension_numbers<[1], [0], [0], [1], [0, 0, 1, 1], [], []>} : vector<128x256xbf16>, vector<256x128xbf16>, vector<128x128xf32> -> vector<128x128xf32>
    %223 = arith.addf %207, %222 : vector<128x128xf32>
    %c0_56 = arith.constant 0 : index
    %c28 = arith.constant 28 : index
    %224 = vector.load %arg1[%c0_56, %c28] : memref<128x36xi32, #tpu.memory_space<vmem>>, vector<128x1xi32>
    %225 = vector.broadcast %224 : vector<128x1xi32> to vector<128x128xi32>
    %226 = arith.cmpi eq, %225, %0 : vector<128x128xi32>
    %227 = arith.extui %226 : vector<128x128xi1> to vector<128x128xi32>
    %228 = arith.sitofp %227 : vector<128x128xi32> to vector<128x128xf32>
    %229 = arith.truncf %228 : vector<128x128xf32> to vector<128x128xbf16>
    %c0_57 = arith.constant 0 : index
    %c29 = arith.constant 29 : index
    %230 = vector.load %arg1[%c0_57, %c29] : memref<128x36xi32, #tpu.memory_space<vmem>>, vector<128x1xi32>
    %231 = vector.broadcast %230 : vector<128x1xi32> to vector<128x128xi32>
    %232 = arith.cmpi eq, %231, %0 : vector<128x128xi32>
    %233 = arith.extui %232 : vector<128x128xi1> to vector<128x128xi32>
    %234 = arith.sitofp %233 : vector<128x128xi32> to vector<128x128xf32>
    %235 = arith.truncf %234 : vector<128x128xf32> to vector<128x128xbf16>
    %236 = tpu.concatenate %229, %235 in 1 : vector<128x128xbf16>, vector<128x128xbf16> -> vector<128x256xbf16>
    %c3584 = arith.constant 3584 : index
    %c0_58 = arith.constant 0 : index
    %237 = vector.load %arg2[%c3584, %c0_58] : memref<4608x128xbf16, #tpu.memory_space<vmem>>, vector<256x128xbf16>
    %cst_59 = arith.constant dense<0.000000e+00> : vector<128x128xf32>
    %238 = tpu.matmul %236, %237, %cst_59 {dimension_numbers = #tpu.dot_dimension_numbers<[1], [0], [0], [1], [0, 0, 1, 1], [], []>} : vector<128x256xbf16>, vector<256x128xbf16>, vector<128x128xf32> -> vector<128x128xf32>
    %239 = arith.addf %223, %238 : vector<128x128xf32>
    %c0_60 = arith.constant 0 : index
    %c30 = arith.constant 30 : index
    %240 = vector.load %arg1[%c0_60, %c30] : memref<128x36xi32, #tpu.memory_space<vmem>>, vector<128x1xi32>
    %241 = vector.broadcast %240 : vector<128x1xi32> to vector<128x128xi32>
    %242 = arith.cmpi eq, %241, %0 : vector<128x128xi32>
    %243 = arith.extui %242 : vector<128x128xi1> to vector<128x128xi32>
    %244 = arith.sitofp %243 : vector<128x128xi32> to vector<128x128xf32>
    %245 = arith.truncf %244 : vector<128x128xf32> to vector<128x128xbf16>
    %c0_61 = arith.constant 0 : index
    %c31 = arith.constant 31 : index
    %246 = vector.load %arg1[%c0_61, %c31] : memref<128x36xi32, #tpu.memory_space<vmem>>, vector<128x1xi32>
    %247 = vector.broadcast %246 : vector<128x1xi32> to vector<128x128xi32>
    %248 = arith.cmpi eq, %247, %0 : vector<128x128xi32>
    %249 = arith.extui %248 : vector<128x128xi1> to vector<128x128xi32>
    %250 = arith.sitofp %249 : vector<128x128xi32> to vector<128x128xf32>
    %251 = arith.truncf %250 : vector<128x128xf32> to vector<128x128xbf16>
    %252 = tpu.concatenate %245, %251 in 1 : vector<128x128xbf16>, vector<128x128xbf16> -> vector<128x256xbf16>
    %c3840 = arith.constant 3840 : index
    %c0_62 = arith.constant 0 : index
    %253 = vector.load %arg2[%c3840, %c0_62] : memref<4608x128xbf16, #tpu.memory_space<vmem>>, vector<256x128xbf16>
    %cst_63 = arith.constant dense<0.000000e+00> : vector<128x128xf32>
    %254 = tpu.matmul %252, %253, %cst_63 {dimension_numbers = #tpu.dot_dimension_numbers<[1], [0], [0], [1], [0, 0, 1, 1], [], []>} : vector<128x256xbf16>, vector<256x128xbf16>, vector<128x128xf32> -> vector<128x128xf32>
    %255 = arith.addf %239, %254 : vector<128x128xf32>
    %c0_64 = arith.constant 0 : index
    %c32 = arith.constant 32 : index
    %256 = vector.load %arg1[%c0_64, %c32] : memref<128x36xi32, #tpu.memory_space<vmem>>, vector<128x1xi32>
    %257 = vector.broadcast %256 : vector<128x1xi32> to vector<128x128xi32>
    %258 = arith.cmpi eq, %257, %0 : vector<128x128xi32>
    %259 = arith.extui %258 : vector<128x128xi1> to vector<128x128xi32>
    %260 = arith.sitofp %259 : vector<128x128xi32> to vector<128x128xf32>
    %261 = arith.truncf %260 : vector<128x128xf32> to vector<128x128xbf16>
    %c0_65 = arith.constant 0 : index
    %c33 = arith.constant 33 : index
    %262 = vector.load %arg1[%c0_65, %c33] : memref<128x36xi32, #tpu.memory_space<vmem>>, vector<128x1xi32>
    %263 = vector.broadcast %262 : vector<128x1xi32> to vector<128x128xi32>
    %264 = arith.cmpi eq, %263, %0 : vector<128x128xi32>
    %265 = arith.extui %264 : vector<128x128xi1> to vector<128x128xi32>
    %266 = arith.sitofp %265 : vector<128x128xi32> to vector<128x128xf32>
    %267 = arith.truncf %266 : vector<128x128xf32> to vector<128x128xbf16>
    %268 = tpu.concatenate %261, %267 in 1 : vector<128x128xbf16>, vector<128x128xbf16> -> vector<128x256xbf16>
    %c4096 = arith.constant 4096 : index
    %c0_66 = arith.constant 0 : index
    %269 = vector.load %arg2[%c4096, %c0_66] : memref<4608x128xbf16, #tpu.memory_space<vmem>>, vector<256x128xbf16>
    %cst_67 = arith.constant dense<0.000000e+00> : vector<128x128xf32>
    %270 = tpu.matmul %268, %269, %cst_67 {dimension_numbers = #tpu.dot_dimension_numbers<[1], [0], [0], [1], [0, 0, 1, 1], [], []>} : vector<128x256xbf16>, vector<256x128xbf16>, vector<128x128xf32> -> vector<128x128xf32>
    %271 = arith.addf %255, %270 : vector<128x128xf32>
    %c0_68 = arith.constant 0 : index
    %c34 = arith.constant 34 : index
    %272 = vector.load %arg1[%c0_68, %c34] : memref<128x36xi32, #tpu.memory_space<vmem>>, vector<128x1xi32>
    %273 = vector.broadcast %272 : vector<128x1xi32> to vector<128x128xi32>
    %274 = arith.cmpi eq, %273, %0 : vector<128x128xi32>
    %275 = arith.extui %274 : vector<128x128xi1> to vector<128x128xi32>
    %276 = arith.sitofp %275 : vector<128x128xi32> to vector<128x128xf32>
    %277 = arith.truncf %276 : vector<128x128xf32> to vector<128x128xbf16>
    %c0_69 = arith.constant 0 : index
    %c35 = arith.constant 35 : index
    %278 = vector.load %arg1[%c0_69, %c35] : memref<128x36xi32, #tpu.memory_space<vmem>>, vector<128x1xi32>
    %279 = vector.broadcast %278 : vector<128x1xi32> to vector<128x128xi32>
    %280 = arith.cmpi eq, %279, %0 : vector<128x128xi32>
    %281 = arith.extui %280 : vector<128x128xi1> to vector<128x128xi32>
    %282 = arith.sitofp %281 : vector<128x128xi32> to vector<128x128xf32>
    %283 = arith.truncf %282 : vector<128x128xf32> to vector<128x128xbf16>
    %284 = tpu.concatenate %277, %283 in 1 : vector<128x128xbf16>, vector<128x128xbf16> -> vector<128x256xbf16>
    %c4352 = arith.constant 4352 : index
    %c0_70 = arith.constant 0 : index
    %285 = vector.load %arg2[%c4352, %c0_70] : memref<4608x128xbf16, #tpu.memory_space<vmem>>, vector<256x128xbf16>
    %cst_71 = arith.constant dense<0.000000e+00> : vector<128x128xf32>
    %286 = tpu.matmul %284, %285, %cst_71 {dimension_numbers = #tpu.dot_dimension_numbers<[1], [0], [0], [1], [0, 0, 1, 1], [], []>} : vector<128x256xbf16>, vector<256x128xbf16>, vector<128x128xf32> -> vector<128x128xf32>
    %287 = arith.addf %271, %286 : vector<128x128xf32>
    %c0_72 = arith.constant 0 : index
    %c0_73 = arith.constant 0 : index
    %288 = vector.load %arg3[%c0_72, %c0_73] : memref<128x128xf32, #tpu.memory_space<vmem>>, vector<128x128xf32>
    tpu.vector_store %arg3[%c0_72, %c0_73], %287 {strides = array<i32>} : memref<128x128xf32, #tpu.memory_space<vmem>>, vector<128x128xf32>,
    return
  }
  func.func @transform_0(%arg0: i32) -> (i32, i32) {
    %c0_i32 = arith.constant 0 : i32
    %c0_i32_0 = arith.constant 0 : i32
    return %arg0, %c0_i32 : i32, i32
  }
  func.func @transform_1(%arg0: i32) -> (i32, i32) {
    %c0_i32 = arith.constant 0 : i32
    %c0_i32_0 = arith.constant 0 : i32
    %c0_i32_1 = arith.constant 0 : i32
    return %c0_i32, %c0_i32_0 : i32, i32
  }
  func.func @transform_2(%arg0: i32) -> (i32, i32) {
    %c0_i32 = arith.constant 0 : i32
    %c0_i32_0 = arith.constant 0 : i32
    return %arg0, %c0_i32 : i32, i32
  }
}

</mosaic_0001>

<bundles_post_ra>
// kernel: atom_encoder.1
= control target key start
LH: loop header
LB: loop body
LE: loop exit
PB: predicated region body
PF: predicated region fallthrough
CT: control target
= control target key end

     0   :  { %7 = vsyncpa [#allocation3], 0  ;;  %s11281_s9 = smov [#allocation2]   ;;  %s15482_s0 = inlined_call_operand.vmem [shape: s32[128,36], index: 0, kind: input, shape index: {}]   ;;  %s15483_s1 = inlined_call_operand.hbm [shape: bf16[4608,128], index: 1, kind: input, shape index: {}]   ;;  %s15484_s2 = inlined_call_operand.vmem [shape: f32[128,128], index: 2, kind: output, shape index: {}]  }
   0x1   :  { %s15_s10 = sshll.u32 %s11281_s9, 4  ;;  %s16_s10 = int_to_ptr.vmem [resolvable:$true] %s15_s10 }
   0x2   :  { %s11267_s11 = scalar_lea.vmem %s16_s10, 36864  ;;  %p11272_p1 = scmp.lt.s32.totalorder %s16_s10, %s16_s10 }
   0x3   :  { %p11268_p0 = scmp.ne.s32.totalorder %s16_s10, %s11267_s11  ;;  %p11273_p2 = scmp.lt.s32.totalorder %s11267_s11, %s11267_s11 }
   0x5   :  { %p11274_p3 = por %p11273_p2, %p11272_p1 }
   0x7   :  { %p11275_p4 = pnand %p11274_p3, %p11268_p0 }
   0x9   :  { %11278 = shalt.err (!%p11275_p4)
}
   0xa   :  { %s11282_s12 = smov 64   ;;  %s11283_s13 = smov 4  }
   0xb   :  { %21 = dma.hbm_to_vmem [thread:$0]  %s15483_s1, 36864, %s16_s10, [#allocation3], %s11282_s12, %s11282_s12, %s11283_s13  }
   0xc   :  { %11279 = dma.done.wait [#allocation3], 36864  }
   0xd   :  { %11280 = vsyncadd [#allocation3], 4294930432  ;;  %v11284_v0 = vmov 0   ;;  %v11342_v1 = vld [vmem:[%s15482_s0 + $0x10] sm:$0xff]  ;;  %v11347_v2 = vld [vmem:[%s15482_s0] sm:$0xff]  ;;  %v11285_v32 = vmov 1  }
   0xe   :  { %10748 = vset.pattern.permute.xlu1 %v11284_v0  ;;  %10747 = vset.pattern.permute.xlu0 %v11284_v0  ;;  %v11354_v3 = vld [vmem:[%s15482_s0 + $0x18] sm:$0xff]  ;;  %v11359_v4 = vld [vmem:[%s15482_s0 + $0x8] sm:$0xff]  ;;  %v11371_v6 = vld [vmem:[%s15482_s0 + $0x20] sm:$0xff]  ;;  %v11286_v34 = vmov 2   ;;  %v11287_v49 = vmov 3   ;;  %v11288_v56 = vmov 4  }
   0xf   :  { %51 = vperm.xlu1 %10748, %v11342_v1   ;;  %45 = vperm.xlu0 %10747, %v11347_v2   ;;  %v11364_v5 = vld [vmem:[%s15482_s0 + $0x28] sm:$0xff]  ;;  %v10867_v7 = vld [vmem:[#allocation2 + $0x78] sm:$0xff]   ;;  %v10869_v10 = vld [vmem:[#allocation2 + $0x70] sm:$0xff]  }
  0x10   :  { %v10868_v8 = vld [vmem:[#allocation2 + $0x38] sm:$0xff]   ;;  %9619 = vmatprep.subr.bf16.mxu1 %v10867_v7  ;;  %v11383_v11 = vld [vmem:[%s15482_s0 + $0x30] sm:$0xff]  ;;  %v10871_v13 = vld [vmem:[#allocation2 + $0x68] sm:$0xff]  }
  0x11   :  { %v11376_v9 = vld [vmem:[%s15482_s0 + $0x38] sm:$0xff]  ;;  %9620 = vmatpush3.bf16.msra.mxu1 %v10868_v8  ;;  %v10870_v12 = vld [vmem:[#allocation2 + $0x30] sm:$0xff]   ;;  %v11388_v14 = vld [vmem:[%s15482_s0 + $0x48] sm:$0xff] }
  0x12   :  { %9621 = vmatprep.subr.bf16.mxu1 %v10869_v10  ;;  %v11393_v15 = vld [vmem:[%s15482_s0 + $0x40] sm:$0xff]  ;;  %v10872_v16 = vld [vmem:[#allocation2 + $0x28] sm:$0xff]   ;;  %v11400_v18 = vld [vmem:[%s15482_s0 + $0x58] sm:$0xff] }
  0x13   :  { %54 = vperm.xlu1 %10748, %v11354_v3   ;;  %48 = vperm.xlu0 %10747, %v11359_v4   ;;  %v10873_v17 = vld [vmem:[#allocation2 + $0x60] sm:$0xff]   ;;  %v11405_v19 = vld [vmem:[%s15482_s0 + $0x50] sm:$0xff]  ;;  %v10875_v21 = vld [vmem:[#allocation2 + $0x58] sm:$0xff]  }
  0x14   :  { %v10874_v20 = vld [vmem:[#allocation2 + $0x20] sm:$0xff]   ;;  %v11412_v22 = vld [vmem:[%s15482_s0 + $0x68] sm:$0xff]  ;;  %v10876_v24 = vld [vmem:[#allocation2 + $0x18] sm:$0xff]  }
  0x15   :  { %9622 = vmatpush3.bf16.msra.mxu1 %v10870_v12  ;;  %v11417_v23 = vld [vmem:[%s15482_s0 + $0x60] sm:$0xff]  ;;  %v10877_v25 = vld [vmem:[#allocation2 + $0x50] sm:$0xff]   ;;  %v11424_v26 = vld [vmem:[%s15482_s0 + $0x78] sm:$0xff] }
  0x16   :  { %9623 = vmatprep.subr.bf16.mxu1 %v10871_v13  ;;  %v11429_v27 = vld [vmem:[%s15482_s0 + $0x70] sm:$0xff]  ;;  %v10879_v29 = vld [vmem:[#allocation2 + $0x48] sm:$0xff]   ;;  %v10881_v31 = vld [vmem:[#allocation2 + $0x40] sm:$0xff]  }
  0x17   :  { %60 = vperm.xlu1 %10748, %v11364_v5   ;;  %57 = vperm.xlu0 %10747, %v11371_v6   ;;  %v10878_v28 = vld [vmem:[#allocation2 + $0x10] sm:$0xff]   ;;  %v10880_v30 = vld [vmem:[#allocation2 + $0x8] sm:$0xff]   ;;  %v10882_v33 = vld [vmem:[#allocation2] sm:$0xff]  }
  0x18   :  { %v10883_v35 = vld [vmem:[#allocation2 + $0xf8] sm:$0xff]   ;;  %v10885_v37 = vld [vmem:[#allocation2 + $0xf0] sm:$0xff]   ;;  %v10887_v39 = vld [vmem:[#allocation2 + $0xe8] sm:$0xff]  }
  0x19   :  { %9624 = vmatpush3.bf16.msra.mxu1 %v10872_v16  ;;  %v10884_v36 = vld [vmem:[#allocation2 + $0xb8] sm:$0xff]   ;;  %9555 = vmatprep.subr.bf16.mxu0 %v10883_v35  ;;  %v10886_v38 = vld [vmem:[#allocation2 + $0xb0] sm:$0xff]   ;;  %v10888_v40 = vld [vmem:[#allocation2 + $0xa8] sm:$0xff]  }
  0x1a   :  { %9625 = vmatprep.subr.bf16.mxu1 %v10873_v17  ;;  %9556 = vmatpush3.bf16.msra.mxu0 %v10884_v36  ;;  %v10889_v41 = vld [vmem:[#allocation2 + $0xe0] sm:$0xff]   ;;  %v10891_v43 = vld [vmem:[#allocation2 + $0xd8] sm:$0xff]   ;;  %v10893_v45 = vld [vmem:[#allocation2 + $0xd0] sm:$0xff]   ;;  %v11289_v17 = vmov 5  }
  0x1b   :  { %66 = vperm.xlu1 %10748, %v11376_v9   ;;  %63 = vperm.xlu0 %10747, %v11383_v11   ;;  %v10890_v42 = vld [vmem:[#allocation2 + $0xa0] sm:$0xff]   ;;  %v10892_v44 = vld [vmem:[#allocation2 + $0x98] sm:$0xff]   ;;  %v10894_v46 = vld [vmem:[#allocation2 + $0x90] sm:$0xff]  }
  0x1c   :  { %9557 = vmatprep.subr.bf16.mxu0 %v10885_v37  ;;  %v10895_v47 = vld [vmem:[#allocation2 + $0xc8] sm:$0xff]   ;;  %v10897_v50 = vld [vmem:[#allocation2 + $0xc0] sm:$0xff]   ;;  %v10899_v62 = vld [vmem:[#allocation2 + $0x178] sm:$0xff]  }
  0x1d   :  { %9626 = vmatpush3.bf16.msra.mxu1 %v10874_v20  ;;  %v10896_v48 = vld [vmem:[#allocation2 + $0x88] sm:$0xff]   ;;  %v10898_v51 = vld [vmem:[#allocation2 + $0x80] sm:$0xff]   ;;  %v11548_v12 = vld [vmem:[%s15482_s0 + $0x38] sm:$0xff] }
  0x1e   :  { %9627 = vmatprep.subr.bf16.mxu1 %v10875_v21  ;;  %9558 = vmatpush3.bf16.msra.mxu0 %v10886_v38  ;;  %v11500_v61 = vld [vmem:[%s15482_s0] sm:$0xff]  ;;  %v11533_v8 = vld [vmem:[%s15482_s0 + $0x28] sm:$0xff]  ;;  %v11569_v20 = vld [vmem:[%s15482_s0 + $0x58] sm:$0xff] }
  0x1f   :  { %72 = vperm.xlu1 %10748, %v11388_v14   ;;  %69 = vperm.xlu0 %10747, %v11393_v15   ;;  %v11627_v35 = vld [vmem:[%s15482_s0 + $0x20] sm:$0xff]  ;;  %v11639_v38 = vld [vmem:[%s15482_s0 + $0x30] sm:$0xff] }
  0x20   :  { %9559 = vmatprep.subr.bf16.mxu0 %v10887_v39  ;;  %v11653_v39 = vld [vmem:[%s15482_s0 + $0x40] sm:$0xff] }
  0x21   :  { %9628 = vmatpush3.bf16.msra.mxu1 %v10876_v24 }
  0x22   :  { %9629 = vmatprep.subr.bf16.mxu1 %v10877_v25  ;;  %9560 = vmatpush3.bf16.msra.mxu0 %v10888_v40 }
  0x23   :  { %78 = vperm.xlu1 %10748, %v11400_v18   ;;  %75 = vperm.xlu0 %10747, %v11405_v19  }
  0x24   :  { %9561 = vmatprep.subr.bf16.mxu0 %v10889_v41 }
  0x25   :  { %9630 = vmatpush3.bf16.msra.mxu1 %v10878_v28 }
  0x26   :  { %9631 = vmatprep.subr.bf16.mxu1 %v10879_v29  ;;  %9562 = vmatpush3.bf16.msra.mxu0 %v10890_v42  ;;  %v11291_v42 = vmov 6  }
  0x27   :  { %84 = vperm.xlu1 %10748, %v11412_v22   ;;  %81 = vperm.xlu0 %10747, %v11417_v23  }
  0x28   :  { %9563 = vmatprep.subr.bf16.mxu0 %v10891_v43 }
  0x29   :  { %9632 = vmatpush3.bf16.msra.mxu1 %v10880_v30  ;;  %v11610_v30 = vld [vmem:[%s15482_s0 + $0x8] sm:$0xff] }
  0x2a   :  { %9633 = vmatprep.subr.bf16.mxu1 %v10881_v31  ;;  %9564 = vmatpush3.bf16.msra.mxu0 %v10892_v44  ;;  %v11669_v44 = vld [vmem:[%s15482_s0 + $0x50] sm:$0xff] }
  0x2b   :  { %90 = vperm.xlu1 %10748, %v11424_v26   ;;  %87 = vperm.xlu0 %10747, %v11429_v27  }
  0x2c   :  { %9565 = vmatprep.subr.bf16.mxu0 %v10893_v45 }
  0x2d   :  { %9634 = vmatpush3.bf16.msra.mxu1 %v10882_v33 }
  0x2e   :  { %9566 = vmatpush3.bf16.msra.mxu0 %v10894_v46 }
  0x2f   :  { %10750 = vset.pattern.permute.xlu1 %v11285_v32  ;;  %10749 = vset.pattern.permute.xlu0 %v11285_v32 }
  0x30   :  { %152 = vperm.xlu1 %10750, %v11359_v4   ;;  %149 = vperm.xlu0 %10749, %v11347_v2  }
  0x31   :  { %9567 = vmatprep.subr.bf16.mxu0 %v10895_v47  ;;  %v11683_v47 = vld [vmem:[%s15482_s0 + $0x60] sm:$0xff] }
  0x32   :  { %9568 = vmatpush3.bf16.msra.mxu0 %v10896_v48 }
  0x33   :  { %9569 = vmatprep.subr.bf16.mxu0 %v10897_v50  ;;  %v11701_v50 = vld [vmem:[%s15482_s0 + $0x70] sm:$0xff] }
  0x34   :  { %155 = vperm.xlu1 %10750, %v11342_v1   ;;  %158 = vperm.xlu0 %10749, %v11354_v3  }
  0x36   :  { %9570 = vmatpush3.bf16.msra.mxu0 %v10898_v51 }
  0x37   :  { %9683 = vmatprep.subr.bf16.mxu0 %v10899_v62 }
  0x38   :  { %161 = vperm.xlu1 %10750, %v11371_v6   ;;  %164 = vperm.xlu0 %10749, %v11364_v5  }
  0x3c   :  { %167 = vperm.xlu1 %10750, %v11383_v11   ;;  %170 = vperm.xlu0 %10749, %v11376_v9  }
  0x40   :  { %173 = vperm.xlu1 %10750, %v11393_v15   ;;  %176 = vperm.xlu0 %10749, %v11388_v14  }
  0x44   :  { %179 = vperm.xlu1 %10750, %v11405_v19   ;;  %182 = vperm.xlu0 %10749, %v11400_v18  }
  0x48   :  { %185 = vperm.xlu1 %10750, %v11417_v23   ;;  %188 = vperm.xlu0 %10749, %v11412_v22  }
  0x4c   :  { %191 = vperm.xlu1 %10750, %v11429_v27   ;;  %194 = vperm.xlu0 %10749, %v11424_v26  }
  0x50   :  { %10751 = vset.pattern.permute.xlu1 %v11286_v34  ;;  %10752 = vset.pattern.permute.xlu0 %v11286_v34 }
  0x51   :  { %285 = vperm.xlu1 %10751, %v11347_v2   ;;  %288 = vperm.xlu0 %10752, %v11359_v4  }
  0x55   :  { %291 = vperm.xlu1 %10751, %v11342_v1   ;;  %297 = vperm.xlu0 %10752, %v11371_v6  }
  0x59   :  { %294 = vperm.xlu1 %10751, %v11354_v3   ;;  %303 = vperm.xlu0 %10752, %v11383_v11  }
  0x5d   :  { %300 = vperm.xlu1 %10751, %v11364_v5   ;;  %309 = vperm.xlu0 %10752, %v11393_v15  }
  0x61   :  { %306 = vperm.xlu1 %10751, %v11376_v9   ;;  %315 = vperm.xlu0 %10752, %v11405_v19  }
  0x65   :  { %312 = vperm.xlu1 %10751, %v11388_v14   ;;  %321 = vperm.xlu0 %10752, %v11417_v23  }
  0x69   :  { %318 = vperm.xlu1 %10751, %v11400_v18   ;;  %327 = vperm.xlu0 %10752, %v11429_v27  }
  0x6d   :  { %324 = vperm.xlu1 %10751, %v11412_v22   ;;  %10753 = vset.pattern.permute.xlu0 %v11287_v49 }
  0x6e   :  { %389 = vperm.xlu0 %10753, %v11347_v2  }
  0x71   :  { %330 = vperm.xlu1 %10751, %v11424_v26  }
  0x72   :  { %398 = vperm.xlu0 %10753, %v11354_v3  }
  0x75   :  { %10754 = vset.pattern.permute.xlu1 %v11287_v49 }
  0x76   :  { %392 = vperm.xlu1 %10754, %v11359_v4   ;;  %404 = vperm.xlu0 %10753, %v11364_v5   ;;  %v26_v5 = vlaneseq }
  0x7a   :  { %395 = vperm.xlu1 %10754, %v11342_v1   ;;  %410 = vperm.xlu0 %10753, %v11376_v9   ;;  %v11511_v1 = vld [vmem:[%s15482_s0 + $0x10] sm:$0xff]  ;;  %v11537_v9 = vand.u32 127, %v26_v5 }
  0x7e   :  { %401 = vperm.xlu1 %10754, %v11371_v6   ;;  %416 = vperm.xlu0 %10753, %v11388_v14  }
  0x82   :  { %407 = vperm.xlu1 %10754, %v11383_v11   ;;  %422 = vperm.xlu0 %10753, %v11400_v18   ;;  %v15486_v18 = vmov 1.0|1.0  }
  0x86   :  { %413 = vperm.xlu1 %10754, %v11393_v15   ;;  %428 = vperm.xlu0 %10753, %v11412_v22  }
  0x8a   :  { %v11479_v52 = vpop.permute.xlu1 %51  ;;  %419 = vperm.xlu1 %10754, %v11405_v19   ;;  %v46_v53 = vpop.permute.xlu0 %45  ;;  %434 = vperm.xlu0 %10753, %v11424_v26   ;;  %v11599_v26 = vld [vmem:[%s15482_s0 + $0x78] sm:$0xff] }
  0x8b   :  { %vm92_vm0 = vcmp.eq.s32.totalorder %v46_v53, %v11537_v9  ;;  %vm94_vm10 = vcmp.eq.s32.totalorder %v11479_v52, %v11537_v9 }
  0x8e   :  { %v11483_v54 = vpop.permute.xlu1 %54  ;;  %425 = vperm.xlu1 %10754, %v11417_v23   ;;  %v49_v55 = vpop.permute.xlu0 %48  ;;  %10756 = vset.pattern.permute.xlu0 %v11288_v56 }
  0x8f   :  { %914 = vperm.xlu0 %10756, %v11359_v4   ;;  %v11522_v4 = vld [vmem:[%s15482_s0 + $0x18] sm:$0xff]  ;;  %vm93_vm1 = vcmp.eq.s32.totalorder %v49_v55, %v11537_v9  ;;  %vm95_vm9 = vcmp.eq.s32.totalorder %v11483_v54, %v11537_v9 }
  0x90   :  { %vm11552_vm2 = vmpackc.low %vm93_vm1, %vm92_vm0  ;;  %v10915_v55 = vld [vmem:[#allocation2 + $0x1f8] sm:$0xff]  }
  0x91   :  { %vm8249_vm13 = vmpackc.low %vm95_vm9, %vm94_vm10  ;;  %9747 = vmatprep.subr.bf16.mxu1 %v10915_v55  ;;  %v10910_v55 = vld [vmem:[#allocation2 + $0x110] sm:$0xff]  }
  0x92   :  { %v11487_v57 = vpop.permute.xlu1 %60  ;;  %431 = vperm.xlu1 %10754, %v11429_v27   ;;  %v11490_v58 = vpop.permute.xlu0 %57 }
  0x93   :  { %923 = vperm.xlu0 %10756, %v11371_v6   ;;  %vm97_vm14 = vcmp.eq.s32.totalorder %v11487_v57, %v11537_v9  ;;  %vm96_vm15 = vcmp.eq.s32.totalorder %v11490_v58, %v11537_v9  ;;  %v10916_v58 = vld [vmem:[#allocation2 + $0x1b8] sm:$0xff]  }
  0x94   :  { %vm8253_vm1 = vmpackc.low %vm97_vm14, %vm96_vm15 }
  0x96   :  { %v11493_v59 = vpop.permute.xlu1 %66  ;;  %10755 = vset.pattern.permute.xlu1 %v11288_v56  ;;  %v11495_v60 = vpop.permute.xlu0 %63 }
  0x97   :  { %911 = vperm.xlu1 %10755, %v11500_v61   ;;  %929 = vperm.xlu0 %10756, %v11383_v11  }
  0x9a   :  { %v11504_v63 = vpop.permute.xlu1 %72  ;;  %v11506_v0 = vpop.permute.xlu0 %69 }
  0x9b   :  { %917 = vperm.xlu1 %10755, %v11511_v1   ;;  %935 = vperm.xlu0 %10756, %v11393_v15   ;;  %v11559_v15 = vld [vmem:[%s15482_s0 + $0x48] sm:$0xff] }
  0x9e   :  { %v11515_v2 = vpop.permute.xlu1 %78  ;;  %v11517_v3 = vpop.permute.xlu0 %75 }
  0x9f   :  { %920 = vperm.xlu1 %10755, %v11522_v4   ;;  %941 = vperm.xlu0 %10756, %v11405_v19   ;;  %vm103_vm14 = vcmp.eq.s32.totalorder %v11515_v2, %v11537_v9  ;;  %vm102_vm15 = vcmp.eq.s32.totalorder %v11517_v3, %v11537_v9  ;;  %v10920_v3 = vld [vmem:[#allocation2 + $0x1a8] sm:$0xff]  }
  0xa2   :  { %v11526_v6 = vpop.permute.xlu1 %84  ;;  %v11528_v7 = vpop.permute.xlu0 %81 }
  0xa3   :  { %926 = vperm.xlu1 %10755, %v11533_v8   ;;  %947 = vperm.xlu0 %10756, %v11417_v23   ;;  %v11584_v23 = vld [vmem:[%s15482_s0 + $0x68] sm:$0xff] }
  0xa6   :  { %v11539_v10 = vpop.permute.xlu1 %90  ;;  %v11541_v11 = vpop.permute.xlu0 %87 }
  0xa7   :  { %932 = vperm.xlu1 %10755, %v11548_v12   ;;  %953 = vperm.xlu0 %10756, %v11429_v27  }
  0xab   :  { %v153_v14 = vpop.permute.xlu1 %152  ;;  %938 = vperm.xlu1 %10755, %v11559_v15   ;;  %v150_v16 = vpop.permute.xlu0 %149  ;;  %10757 = vset.pattern.permute.xlu0 %v11289_v17 }
  0xac   :  { %vm196_vm3 = vcmp.eq.s32.totalorder %v150_v16, %v11537_v9  ;;  %vm197_vm4 = vcmp.eq.s32.totalorder %v153_v14, %v11537_v9  ;;  %1015 = vperm.xlu0 %10757, %v11500_v61   ;;  %v10923_v14 = vld [vmem:[#allocation2 + $0x1d8] sm:$0xff]  }
  0xad   :  { %vm8243_vm5 = vmpackc.low %vm197_vm4, %vm196_vm3  ;;  %v10924_v16 = vld [vmem:[#allocation2 + $0x198] sm:$0xff]  }
  0xae   :  { %8244 = vmatprep.mubr.msk.bf16.mxu1 %vm8243_vm5, %v15486_v18  ;;  %vm99_vm5 = vcmp.eq.s32.totalorder %v11493_v59, %v11537_v9  ;;  %v10917_v59 = vld [vmem:[#allocation2 + $0x1f0] sm:$0xff]  }
  0xaf   :  { %v156_v19 = vpop.permute.xlu1 %155  ;;  %944 = vperm.xlu1 %10755, %v11569_v20   ;;  %8246 = vmatmul.mubr.msk.bf16.vlgmr.msra.gmra.mxu1 %vm11552_vm2, %v15486_v18  ;;  %v159_v21 = vpop.permute.xlu0 %158 }
  0xb0   :  { %vm198_vm6 = vcmp.eq.s32.totalorder %v156_v19, %v11537_v9  ;;  %vm199_vm7 = vcmp.eq.s32.totalorder %v159_v21, %v11537_v9  ;;  %1024 = vperm.xlu0 %10757, %v11522_v4   ;;  %9748 = vmatpush3.bf16.msra.mxu1 %v10916_v58  ;;  %v10900_v19 = vld [vmem:[#allocation2 + $0x138] sm:$0xff]   ;;  %v10925_v21 = vld [vmem:[#allocation2 + $0x1d0] sm:$0xff]   ;;  %v10911_v58 = vld [vmem:[#allocation2 + $0x148] sm:$0xff]  }
  0xb1   :  { %vm8247_vm8 = vmpackc.low %vm199_vm7, %vm198_vm6  ;;  %vm98_vm6 = vcmp.eq.s32.totalorder %v11495_v60, %v11537_v9  ;;  %9749 = vmatprep.subr.bf16.mxu1 %v10917_v59 }
  0xb2   :  { %8248 = vmatprep.mubr.msk.bf16.mxu1 %vm8247_vm8, %v15486_v18  ;;  %vm8257_vm7 = vmpackc.low %vm99_vm5, %vm98_vm6 }
  0xb3   :  { %v162_v22 = vpop.permute.xlu1 %161  ;;  %950 = vperm.xlu1 %10755, %v11584_v23   ;;  %v165_v24 = vpop.permute.xlu0 %164 }
  0xb4   :  { %vm200_vm11 = vcmp.eq.s32.totalorder %v162_v22, %v11537_v9  ;;  %vm201_vm12 = vcmp.eq.s32.totalorder %v165_v24, %v11537_v9  ;;  %1030 = vperm.xlu0 %10757, %v11533_v8   ;;  %v10926_v22 = vld [vmem:[#allocation2 + $0x190] sm:$0xff]  }
  0xb5   :  { %vm8251_vm0 = vmpackc.low %vm201_vm12, %vm200_vm11  ;;  %vm101_vm11 = vcmp.eq.s32.totalorder %v11504_v63, %v11537_v9  ;;  %vm100_vm12 = vcmp.eq.s32.totalorder %v11506_v0, %v11537_v9  ;;  %v10918_v63 = vld [vmem:[#allocation2 + $0x1b0] sm:$0xff]   ;;  %v10919_v0 = vld [vmem:[#allocation2 + $0x1e8] sm:$0xff]  }
  0xb6   :  { %9750 = vmatpush3.bf16.msra.mxu1 %v10918_v63  ;;  %v11293_v63 = vmov 8  }
  0xb7   :  { %v168_v25 = vpop.permute.xlu1 %167  ;;  %956 = vperm.xlu1 %10755, %v11599_v26   ;;  %8250 = vmatmul.mubr.msk.bf16.gmra.mxu1 %vm8249_vm13, %v15486_v18  ;;  %v171_v27 = vpop.permute.xlu0 %170  ;;  %vm8261_vm13 = vmpackc.low %vm101_vm11, %vm100_vm12 }
  0xb8   :  { %8252 = vmatprep.mubr.msk.bf16.mxu1 %vm8251_vm0, %v15486_v18  ;;  %1036 = vperm.xlu0 %10757, %v11548_v12   ;;  %vm202_vm2 = vcmp.eq.s32.totalorder %v168_v25, %v11537_v9  ;;  %vm203_vm3 = vcmp.eq.s32.totalorder %v171_v27, %v11537_v9  ;;  %v10902_v27 = vld [vmem:[#allocation2 + $0x130] sm:$0xff]  }
  0xb9   :  { %vm8255_vm4 = vmpackc.low %vm203_vm3, %vm202_vm2  ;;  %9751 = vmatprep.subr.bf16.mxu1 %v10919_v0  ;;  %v10912_v0 = vld [vmem:[#allocation2 + $0x108] sm:$0xff]  }
  0xba   :  { %vm11660_vm2 = vmpackc.low %vm103_vm14, %vm102_vm15  ;;  %vm106_vm14 = vcmp.eq.s32.totalorder %v11541_v11, %v11537_v9  ;;  %9752 = vmatpush3.bf16.msra.mxu1 %v10920_v3  ;;  %v10922_v11 = vld [vmem:[#allocation2 + $0x1a0] sm:$0xff]  }
  0xbb   :  { %v174_v28 = vpop.permute.xlu1 %173  ;;  %10758 = vset.pattern.permute.xlu1 %v11289_v17  ;;  %v177_v29 = vpop.permute.xlu0 %176 }
  0xbc   :  { %1018 = vperm.xlu1 %10758, %v11610_v30   ;;  %1042 = vperm.xlu0 %10757, %v11559_v15   ;;  %vm204_vm8 = vcmp.eq.s32.totalorder %v174_v28, %v11537_v9  ;;  %vm205_vm9 = vcmp.eq.s32.totalorder %v177_v29, %v11537_v9  ;;  %v10927_v28 = vld [vmem:[#allocation2 + $0x1c8] sm:$0xff]  }
  0xbd   :  { %vm8259_vm10 = vmpackc.low %vm205_vm9, %vm204_vm8  ;;  %vm104_vm8 = vcmp.eq.s32.totalorder %v11528_v7, %v11537_v9  ;;  %v10921_v7 = vld [vmem:[#allocation2 + $0x1e0] sm:$0xff]   ;;  %v10928_v29 = vld [vmem:[#allocation2 + $0x188] sm:$0xff]  }
  0xbe   :  { %9753 = vmatprep.subr.bf16.mxu1 %v10921_v7 }
  0xbf   :  { %v180_v31 = vpop.permute.xlu1 %179  ;;  %8254 = vmatmul.mubr.msk.bf16.gmra.mxu1 %vm8253_vm1, %v15486_v18  ;;  %v183_v32 = vpop.permute.xlu0 %182 }
  0xc0   :  { %1021 = vperm.xlu1 %10758, %v11511_v1   ;;  %8256 = vmatprep.mubr.msk.bf16.mxu1 %vm8255_vm4, %v15486_v18  ;;  %vm206_vm0 = vcmp.eq.s32.totalorder %v180_v31, %v11537_v9  ;;  %vm207_vm1 = vcmp.eq.s32.totalorder %v183_v32, %v11537_v9 }
  0xc1   :  { %1048 = vperm.xlu0 %10757, %v11569_v20   ;;  %vm8263_vm3 = vmpackc.low %vm207_vm1, %vm206_vm0  ;;  %9754 = vmatpush3.bf16.msra.mxu1 %v10922_v11 }
  0xc2   :  { %9755 = vmatprep.subr.bf16.mxu1 %v10923_v14 }
  0xc3   :  { %v186_v33 = vpop.permute.xlu1 %185  ;;  %v189_v34 = vpop.permute.xlu0 %188 }
  0xc4   :  { %1027 = vperm.xlu1 %10758, %v11627_v35   ;;  %vm208_vm4 = vcmp.eq.s32.totalorder %v186_v33, %v11537_v9  ;;  %vm209_vm5 = vcmp.eq.s32.totalorder %v189_v34, %v11537_v9  ;;  %v10905_v33 = vld [vmem:[#allocation2 + $0x160] sm:$0xff]  }
  0xc5   :  { %1054 = vperm.xlu0 %10757, %v11584_v23   ;;  %vm8267_vm6 = vmpackc.low %vm209_vm5, %vm208_vm4  ;;  %9756 = vmatpush3.bf16.msra.mxu1 %v10924_v16  ;;  %v10929_v34 = vld [vmem:[#allocation2 + $0x1c0] sm:$0xff]  }
  0xc6   :  { %9757 = vmatprep.subr.bf16.mxu1 %v10925_v21 }
  0xc7   :  { %v192_v36 = vpop.permute.xlu1 %191  ;;  %8258 = vmatmul.mubr.msk.bf16.gmra.mxu1 %vm8257_vm7, %v15486_v18  ;;  %v195_v37 = vpop.permute.xlu0 %194  ;;  %vm105_vm7 = vcmp.eq.s32.totalorder %v11526_v6, %v11537_v9  ;;  %v11292_v6 = vmov 7  }
  0xc8   :  { %1033 = vperm.xlu1 %10758, %v11639_v38   ;;  %8260 = vmatprep.mubr.msk.bf16.mxu1 %vm8259_vm10, %v15486_v18  ;;  %vm8269_vm9 = vmpackc.low %vm105_vm7, %vm104_vm8  ;;  %vm210_vm10 = vcmp.eq.s32.totalorder %v192_v36, %v11537_v9  ;;  %vm211_vm11 = vcmp.eq.s32.totalorder %v195_v37, %v11537_v9 }
  0xc9   :  { %1060 = vperm.xlu0 %10757, %v11599_v26   ;;  %vm8271_vm12 = vmpackc.low %vm211_vm11, %vm210_vm10  ;;  %9758 = vmatpush3.bf16.msra.mxu1 %v10926_v22  ;;  %v11892_v22 = vld [vmem:[%s15482_s0 + $0x18] sm:$0xff] }
  0xca   :  { %9759 = vmatprep.subr.bf16.mxu1 %v10927_v28 }
  0xcc   :  { %1039 = vperm.xlu1 %10758, %v11653_v39   ;;  %v11656_v40 = vpop.permute.xlu1 %285  ;;  %v11658_v41 = vpop.permute.xlu0 %288 }
  0xcd   :  { %10760 = vset.pattern.permute.xlu0 %v11291_v42  ;;  %vm332_vm1 = vcmp.eq.s32.totalorder %v11656_v40, %v11537_v9  ;;  %9760 = vmatpush3.bf16.msra.mxu1 %v10928_v29  ;;  %v10930_v40 = vld [vmem:[#allocation2 + $0x180] sm:$0xff]   ;;  %v11925_v29 = vld [vmem:[%s15482_s0 + $0x48] sm:$0xff] }
  0xce   :  { %1363 = vperm.xlu0 %10760, %v11610_v30   ;;  %9761 = vmatprep.subr.bf16.mxu1 %v10929_v34 }
  0xcf   :  { %8262 = vmatmul.mubr.msk.bf16.gmra.mxu1 %vm8261_vm13, %v15486_v18  ;;  %vm107_vm13 = vcmp.eq.s32.totalorder %v11539_v10, %v11537_v9 }
  0xd0   :  { %1045 = vperm.xlu1 %10758, %v11669_v44   ;;  %v11672_v45 = vpop.permute.xlu1 %291  ;;  %8264 = vmatprep.mubr.msk.bf16.mxu1 %vm8263_vm3, %v15486_v18  ;;  %v11675_v46 = vpop.permute.xlu0 %297  ;;  %vm8273_vm15 = vmpackc.low %vm107_vm13, %vm106_vm14 }
  0xd1   :  { %9762 = vmatpush3.bf16.msra.mxu1 %v10930_v40  ;;  %v11942_v40 = vld [vmem:[%s15482_s0 + $0x58] sm:$0xff] }
  0xd2   :  { %1372 = vperm.xlu0 %10760, %v11627_v35  }
  0xd4   :  { %1051 = vperm.xlu1 %10758, %v11683_v47   ;;  %v11686_v48 = vpop.permute.xlu1 %294  ;;  %v11688_v49 = vpop.permute.xlu0 %303 }
  0xd6   :  { %1378 = vperm.xlu0 %10760, %v11639_v38  }
  0xd7   :  { %8266 = vmatmul.mubr.msk.bf16.gmra.mxu1 %vm11660_vm2, %v15486_v18  ;;  %vm333_vm2 = vcmp.eq.s32.totalorder %v11658_v41, %v11537_v9  ;;  %v10906_v41 = vld [vmem:[#allocation2 + $0x120] sm:$0xff]  }
  0xd8   :  { %1057 = vperm.xlu1 %10758, %v11701_v50   ;;  %v11704_v51 = vpop.permute.xlu1 %300  ;;  %8268 = vmatprep.mubr.msk.bf16.mxu1 %vm8267_vm6, %v15486_v18  ;;  %v11707_v52 = vpop.permute.xlu0 %309  ;;  %vm8197_vm5 = vmpackc.low %vm333_vm2, %vm332_vm1 }
  0xda   :  { %1384 = vperm.xlu0 %10760, %v11653_v39  }
  0xdc   :  { %10759 = vset.pattern.permute.xlu1 %v11291_v42  ;;  %v11712_v53 = vpop.permute.xlu1 %306  ;;  %v11714_v54 = vpop.permute.xlu0 %315 }
  0xdd   :  { %1360 = vperm.xlu1 %10759, %v11500_v61  }
  0xde   :  { %1390 = vperm.xlu0 %10760, %v11669_v44  }
  0xdf   :  { %8270 = vmatmul.mubr.msk.bf16.gmra.mxu1 %vm8269_vm9, %v15486_v18  ;;  %vm335_vm9 = vcmp.eq.s32.totalorder %v11686_v48, %v11537_v9  ;;  %v10909_v48 = vld [vmem:[#allocation2 + $0x150] sm:$0xff]  }
  0xe0   :  { %v11719_v56 = vpop.permute.xlu1 %312  ;;  %8272 = vmatprep.mubr.msk.bf16.mxu1 %vm8271_vm12, %v15486_v18  ;;  %v11722_v57 = vpop.permute.xlu0 %321  ;;  %vm334_vm12 = vcmp.eq.s32.totalorder %v11672_v45, %v11537_v9  ;;  %v10908_v45 = vld [vmem:[#allocation2 + $0x118] sm:$0xff]  }
  0xe1   :  { %1366 = vperm.xlu1 %10759, %v11511_v1   ;;  %vm8201_vm13 = vmpackc.low %vm335_vm9, %vm334_vm12  ;;  %vm340_vm12 = vcmp.eq.s32.totalorder %v11707_v52, %v11537_v9 }
  0xe2   :  { %1396 = vperm.xlu0 %10760, %v11683_v47  }
  0xe4   :  { %v11730_v60 = vpop.permute.xlu1 %318  ;;  %v11732_v62 = vpop.permute.xlu0 %327 }
  0xe5   :  { %1369 = vperm.xlu1 %10759, %v11522_v4  }
  0xe6   :  { %1402 = vperm.xlu0 %10760, %v11701_v50  }
  0xe7   :  { %8274 = vmatmul.mubr.msk.bf16.gmra.mxu1 %vm8273_vm15, %v15486_v18  ;;  %vm337_vm15 = vcmp.eq.s32.totalorder %v11704_v51, %v11537_v9 }
  0xe8   :  { %v11737_v2 = vpop.permute.xlu1 %324 }
  0xe9   :  { %1375 = vperm.xlu1 %10759, %v11533_v8   ;;  %v390_v5 = vpop.permute.xlu0 %389 }
  0xea   :  { %10761 = vset.pattern.permute.xlu0 %v11292_v6  ;;  %vm436_vm0 = vcmp.eq.s32.totalorder %v390_v5, %v11537_v9  ;;  %v10914_v5 = vld [vmem:[#allocation2 + $0x100] sm:$0xff]  }
  0xeb   :  { %1464 = vperm.xlu0 %10761, %v11500_v61  }
  0xec   :  { %v11742_v10 = vpop.permute.xlu1 %330 }
  0xed   :  { %1381 = vperm.xlu1 %10759, %v11548_v12   ;;  %v399_v13 = vpop.permute.xlu0 %398 }
  0xee   :  { %vm439_vm6 = vcmp.eq.s32.totalorder %v399_v13, %v11537_v9 }
  0xef   :  { %1473 = vperm.xlu0 %10761, %v11522_v4   ;;  %v10901_v4 = vld [vmem:[#allocation2 + $0x170] sm:$0xff]  }
  0xf1   :  { %1387 = vperm.xlu1 %10759, %v11559_v15   ;;  %v393_v61 = vpop.permute.xlu1 %392  ;;  %v405_v17 = vpop.permute.xlu0 %404 }
  0xf2   :  { %vm437_vm3 = vcmp.eq.s32.totalorder %v393_v61, %v11537_v9  ;;  %vm441_vm11 = vcmp.eq.s32.totalorder %v405_v17, %v11537_v9  ;;  %v11867_v61 = vld [vmem:[%s15482_s0] sm:$0xff]  ;;  %v11878_v17 = vld [vmem:[%s15482_s0 + $0x10] sm:$0xff] }
  0xf3   :  { %vm8195_vm4 = vmpackc.low %vm437_vm3, %vm436_vm0  ;;  %1479 = vperm.xlu0 %10761, %v11533_v8   ;;  %v10903_v8 = vld [vmem:[#allocation2 + $0x168] sm:$0xff]   ;;  %vm336_vm0 = vcmp.eq.s32.totalorder %v11675_v46, %v11537_v9 }
  0xf4   :  { %8196 = vmatprep.mubr.msk.bf16.mxu0 %vm8195_vm4, %v15486_v18  ;;  %vm8205_vm3 = vmpackc.low %vm337_vm15, %vm336_vm0 }
  0xf5   :  { %1393 = vperm.xlu1 %10759, %v11569_v20   ;;  %v396_v24 = vpop.permute.xlu1 %395  ;;  %8198 = vmatmul.mubr.msk.bf16.vlgmr.msra.gmra.mxu0 %vm8197_vm5, %v15486_v18  ;;  %v411_v25 = vpop.permute.xlu0 %410  ;;  %vm339_vm5 = vcmp.eq.s32.totalorder %v11712_v53, %v11537_v9  ;;  %v10913_v53 = vld [vmem:[#allocation2 + $0x140] sm:$0xff]  }
  0xf6   :  { %vm438_vm7 = vcmp.eq.s32.totalorder %v396_v24, %v11537_v9  ;;  %9684 = vmatpush3.bf16.msra.mxu0 %v10900_v19  ;;  %vm443_vm2 = vcmp.eq.s32.totalorder %v411_v25, %v11537_v9 }
  0xf7   :  { %vm8199_vm8 = vmpackc.low %vm439_vm6, %vm438_vm7  ;;  %1485 = vperm.xlu0 %10761, %v11548_v12   ;;  %9685 = vmatprep.subr.bf16.mxu0 %v10901_v4  ;;  %v10904_v12 = vld [vmem:[#allocation2 + $0x128] sm:$0xff]   ;;  %vm338_vm6 = vcmp.eq.s32.totalorder %v11688_v49, %v11537_v9  ;;  %v11294_v4 = vmov 9  }
  0xf8   :  { %8200 = vmatprep.mubr.msk.bf16.mxu0 %vm8199_vm8, %v15486_v18  ;;  %vm8209_vm9 = vmpackc.low %vm339_vm5, %vm338_vm6 }
  0xf9   :  { %1399 = vperm.xlu1 %10759, %v11584_v23   ;;  %v402_v31 = vpop.permute.xlu1 %401  ;;  %v11764_v32 = vpop.permute.xlu0 %416 }
  0xfa   :  { %vm440_vm10 = vcmp.eq.s32.totalorder %v402_v31, %v11537_v9  ;;  %9686 = vmatpush3.bf16.msra.mxu0 %v10902_v27  ;;  %vm445_vm8 = vcmp.eq.s32.totalorder %v11764_v32, %v11537_v9 }
  0xfb   :  { %1491 = vperm.xlu0 %10761, %v11559_v15   ;;  %9687 = vmatprep.subr.bf16.mxu0 %v10903_v8  ;;  %vm8203_vm14 = vmpackc.low %vm441_vm11, %vm440_vm10  ;;  %v10907_v15 = vld [vmem:[#allocation2 + $0x158] sm:$0xff]   ;;  %vm341_vm11 = vcmp.eq.s32.totalorder %v11719_v56, %v11537_v9 }
  0xfc   :  { %vm8213_vm15 = vmpackc.low %vm341_vm11, %vm340_vm12  ;;  %v11911_v8 = vld [vmem:[%s15482_s0 + $0x38] sm:$0xff] }
  0xfd   :  { %1405 = vperm.xlu1 %10759, %v11599_v26   ;;  %v408_v36 = vpop.permute.xlu1 %407  ;;  %8202 = vmatmul.mubr.msk.bf16.gmra.mxu0 %vm8201_vm13, %v15486_v18  ;;  %v11773_v37 = vpop.permute.xlu0 %422 }
  0xfe   :  { %8204 = vmatprep.mubr.msk.bf16.mxu0 %vm8203_vm14, %v15486_v18  ;;  %9688 = vmatpush3.bf16.msra.mxu0 %v10904_v12  ;;  %vm442_vm1 = vcmp.eq.s32.totalorder %v408_v36, %v11537_v9  ;;  %vm447_vm14 = vcmp.eq.s32.totalorder %v11773_v37, %v11537_v9  ;;  %v10932_v12 = vld [vmem:[#allocation2 + $0x238] sm:$0xff]   ;;  %v10934_v37 = vld [vmem:[#allocation2 + $0x230] sm:$0xff]  }
  0xff   :  { %1497 = vperm.xlu0 %10761, %v11569_v20   ;;  %9689 = vmatprep.subr.bf16.mxu0 %v10905_v33  ;;  %vm8207_vm4 = vmpackc.low %vm443_vm2, %vm442_vm1  ;;  %vm343_vm1 = vcmp.eq.s32.totalorder %v11730_v60, %v11537_v9  ;;  %vm342_vm2 = vcmp.eq.s32.totalorder %v11714_v54, %v11537_v9  ;;  %v10933_v33 = vld [vmem:[#allocation2 + $0x270] sm:$0xff]  }
 0x100   :  { %vm8217_vm5 = vmpackc.low %vm343_vm1, %vm342_vm2 }
 0x101   :  { %10762 = vset.pattern.permute.xlu1 %v11292_v6  ;;  %v414_v42 = vpop.permute.xlu1 %413  ;;  %v11782_v43 = vpop.permute.xlu0 %428 }
 0x102   :  { %1467 = vperm.xlu1 %10762, %v11610_v30   ;;  %9690 = vmatpush3.bf16.msra.mxu0 %v10906_v41  ;;  %vm444_vm7 = vcmp.eq.s32.totalorder %v414_v42, %v11537_v9  ;;  %v10935_v41 = vld [vmem:[#allocation2 + $0x268] sm:$0xff]  }
 0x103   :  { %1503 = vperm.xlu0 %10761, %v11584_v23   ;;  %9691 = vmatprep.subr.bf16.mxu0 %v10907_v15  ;;  %vm8211_vm10 = vmpackc.low %vm445_vm8, %vm444_vm7  ;;  %vm345_vm7 = vcmp.eq.s32.totalorder %v11737_v2, %v11537_v9  ;;  %vm344_vm8 = vcmp.eq.s32.totalorder %v11722_v57, %v11537_v9  ;;  %v10931_v57 = vld [vmem:[#allocation2 + $0x278] sm:$0xff]   ;;  %v10936_v42 = vld [vmem:[#allocation2 + $0x228] sm:$0xff]  }
 0x104   :  { %vm8221_vm11 = vmpackc.low %vm345_vm7, %vm344_vm8 }
 0x105   :  { %v420_v46 = vpop.permute.xlu1 %419  ;;  %8206 = vmatmul.mubr.msk.bf16.gmra.mxu0 %vm8205_vm3, %v15486_v18  ;;  %v11789_v51 = vpop.permute.xlu0 %434 }
 0x106   :  { %1470 = vperm.xlu1 %10762, %v11511_v1   ;;  %8208 = vmatprep.mubr.msk.bf16.mxu0 %vm8207_vm4, %v15486_v18  ;;  %vm446_vm13 = vcmp.eq.s32.totalorder %v420_v46, %v11537_v9  ;;  %vm449_vm4 = vcmp.eq.s32.totalorder %v11782_v43, %v11537_v9  ;;  %v10937_v43 = vld [vmem:[#allocation2 + $0x260] sm:$0xff]  }
 0x107   :  { %1509 = vperm.xlu0 %10761, %v11599_v26   ;;  %9692 = vmatpush3.bf16.msra.mxu0 %v10908_v45  ;;  %vm8215_vm0 = vmpackc.low %vm447_vm14, %vm446_vm13  ;;  %vm347_vm13 = vcmp.eq.s32.totalorder %v11742_v10, %v11537_v9  ;;  %vm346_vm14 = vcmp.eq.s32.totalorder %v11732_v62, %v11537_v9  ;;  %v11902_v62 = vld [vmem:[%s15482_s0 + $0x28] sm:$0xff]  ;;  %v10938_v46 = vld [vmem:[#allocation2 + $0x220] sm:$0xff]  }
 0x108   :  { %9693 = vmatprep.subr.bf16.mxu0 %v10909_v48 }
 0x109   :  { %v426_v59 = vpop.permute.xlu1 %425 }
 0x10a   :  { %1476 = vperm.xlu1 %10762, %v11627_v35   ;;  %v11802_v1 = vpop.permute.xlu0 %914  ;;  %vm448_vm3 = vcmp.eq.s32.totalorder %v426_v59, %v11537_v9  ;;  %v10941_v59 = vld [vmem:[#allocation2 + $0x250] sm:$0xff]  }
 0x10b   :  { %10764 = vset.pattern.permute.xlu0 %v11293_v63  ;;  %9694 = vmatpush3.bf16.msra.mxu0 %v10910_v55  ;;  %vm8219_vm6 = vmpackc.low %vm449_vm4, %vm448_vm3  ;;  %vm959_vm2 = vcmp.eq.s32.totalorder %v11802_v1, %v11537_v9  ;;  %v11295_v55 = vmov 10  }
 0x10c   :  { %1812 = vperm.xlu0 %10764, %v11610_v30   ;;  %9695 = vmatprep.subr.bf16.mxu0 %v10911_v58  ;;  %v10940_v58 = vld [vmem:[#allocation2 + $0x218] sm:$0xff]  }
 0x10d   :  { %v432_v49 = vpop.permute.xlu1 %431  ;;  %8210 = vmatmul.mubr.msk.bf16.gmra.mxu0 %vm8209_vm9, %v15486_v18 }
 0x10e   :  { %1482 = vperm.xlu1 %10762, %v11639_v38   ;;  %8212 = vmatprep.mubr.msk.bf16.mxu0 %vm8211_vm10, %v15486_v18  ;;  %v11808_v3 = vpop.permute.xlu0 %923  ;;  %vm450_vm9 = vcmp.eq.s32.totalorder %v432_v49, %v11537_v9  ;;  %vm451_vm10 = vcmp.eq.s32.totalorder %v11789_v51, %v11537_v9  ;;  %v10939_v51 = vld [vmem:[#allocation2 + $0x258] sm:$0xff]  }
 0x10f   :  { %9696 = vmatpush3.bf16.msra.mxu0 %v10912_v0  ;;  %vm8223_vm12 = vmpackc.low %vm451_vm10, %vm450_vm9  ;;  %v10942_v0 = vld [vmem:[#allocation2 + $0x210] sm:$0xff]  }
 0x110   :  { %1821 = vperm.xlu0 %10764, %v11627_v35   ;;  %9697 = vmatprep.subr.bf16.mxu0 %v10913_v53  ;;  %v10943_v53 = vld [vmem:[#allocation2 + $0x248] sm:$0xff]  }
 0x112   :  { %1488 = vperm.xlu1 %10762, %v11653_v39   ;;  %v11819_v6 = vpop.permute.xlu1 %911  ;;  %v11821_v7 = vpop.permute.xlu0 %929 }
 0x113   :  { %9698 = vmatpush3.bf16.msra.mxu0 %v10914_v5  ;;  %vm958_vm1 = vcmp.eq.s32.totalorder %v11819_v6, %v11537_v9  ;;  %v10945_v5 = vld [vmem:[#allocation2 + $0x240] sm:$0xff]  }
 0x114   :  { %1827 = vperm.xlu0 %10764, %v11639_v38   ;;  %9811 = vmatprep.subr.bf16.mxu0 %v10931_v57 }
 0x115   :  { %8214 = vmatmul.mubr.msk.bf16.gmra.mxu0 %vm8213_vm15, %v15486_v18  ;;  %vm8225_vm15 = vmpackc.low %vm347_vm13, %vm346_vm14 }
 0x116   :  { %1494 = vperm.xlu1 %10762, %v11669_v44   ;;  %v11826_v52 = vpop.permute.xlu1 %917  ;;  %8216 = vmatprep.mubr.msk.bf16.mxu0 %vm8215_vm0, %v15486_v18  ;;  %v11829_v56 = vpop.permute.xlu0 %935 }
 0x118   :  { %1833 = vperm.xlu0 %10764, %v11653_v39  }
 0x11a   :  { %1500 = vperm.xlu1 %10762, %v11683_v47   ;;  %v11840_v11 = vpop.permute.xlu1 %920  ;;  %v11842_v13 = vpop.permute.xlu0 %941 }
 0x11b   :  { %vm961_vm9 = vcmp.eq.s32.totalorder %v11840_v11, %v11537_v9 }
 0x11c   :  { %1839 = vperm.xlu0 %10764, %v11669_v44  }
 0x11d   :  { %8218 = vmatmul.mubr.msk.bf16.gmra.mxu0 %vm8217_vm5, %v15486_v18  ;;  %vm8325_vm5 = vmpackc.low %vm959_vm2, %vm958_vm1 }
 0x11e   :  { %1506 = vperm.xlu1 %10762, %v11701_v50   ;;  %v11847_v54 = vpop.permute.xlu1 %926  ;;  %8220 = vmatprep.mubr.msk.bf16.mxu0 %vm8219_vm6, %v15486_v18  ;;  %v11850_v60 = vpop.permute.xlu0 %947 }
 0x120   :  { %1845 = vperm.xlu0 %10764, %v11683_v47  }
 0x122   :  { %10763 = vset.pattern.permute.xlu1 %v11293_v63  ;;  %v11860_v14 = vpop.permute.xlu1 %932  ;;  %v11862_v16 = vpop.permute.xlu0 %953 }
 0x123   :  { %1809 = vperm.xlu1 %10763, %v11867_v61  }
 0x124   :  { %1851 = vperm.xlu0 %10764, %v11701_v50  }
 0x125   :  { %8222 = vmatmul.mubr.msk.bf16.gmra.mxu0 %vm8221_vm11, %v15486_v18 }
 0x126   :  { %v11872_v2 = vpop.permute.xlu1 %938  ;;  %8224 = vmatprep.mubr.msk.bf16.mxu0 %vm8223_vm12, %v15486_v18  ;;  %vm960_vm12 = vcmp.eq.s32.totalorder %v11826_v52, %v11537_v9 }
 0x127   :  { %1815 = vperm.xlu1 %10763, %v11878_v17   ;;  %v1016_v19 = vpop.permute.xlu0 %1015  ;;  %vm8329_vm13 = vmpackc.low %vm961_vm9, %vm960_vm12  ;;  %vm966_vm12 = vcmp.eq.s32.totalorder %v11829_v56, %v11537_v9 }
 0x128   :  { %10765 = vset.pattern.permute.xlu0 %v11294_v4  ;;  %vm1062_vm0 = vcmp.eq.s32.totalorder %v1016_v19, %v11537_v9 }
 0x129   :  { %1913 = vperm.xlu0 %10765, %v11867_v61  }
 0x12a   :  { %v11887_v21 = vpop.permute.xlu1 %944 }
 0x12b   :  { %1818 = vperm.xlu1 %10763, %v11892_v22   ;;  %v1025_v24 = vpop.permute.xlu0 %1024 }
 0x12c   :  { %vm1065_vm6 = vcmp.eq.s32.totalorder %v1025_v24, %v11537_v9 }
 0x12d   :  { %8226 = vmatmul.mubr.msk.bf16.gmra.mxu0 %vm8225_vm15, %v15486_v18  ;;  %1922 = vperm.xlu0 %10765, %v11892_v22   ;;  %vm963_vm15 = vcmp.eq.s32.totalorder %v11847_v54, %v11537_v9 }
 0x12e   :  { %v11897_v10 = vpop.permute.xlu1 %950 }
 0x12f   :  { %1824 = vperm.xlu1 %10763, %v11902_v62   ;;  %v1031_v25 = vpop.permute.xlu0 %1030 }
 0x130   :  { %vm1067_vm11 = vcmp.eq.s32.totalorder %v1031_v25, %v11537_v9 }
 0x131   :  { %1928 = vperm.xlu0 %10765, %v11902_v62  }
 0x132   :  { %v11906_v27 = vpop.permute.xlu1 %956 }
 0x133   :  { %1830 = vperm.xlu1 %10763, %v11911_v8   ;;  %v11914_v28 = vpop.permute.xlu0 %1036 }
 0x134   :  { %vm1069_vm2 = vcmp.eq.s32.totalorder %v11914_v28, %v11537_v9 }
 0x135   :  { %1934 = vperm.xlu0 %10765, %v11911_v8  }
 0x137   :  { %1836 = vperm.xlu1 %10763, %v11925_v29   ;;  %v1019_v31 = vpop.permute.xlu1 %1018  ;;  %v11928_v32 = vpop.permute.xlu0 %1042 }
 0x138   :  { %vm1063_vm3 = vcmp.eq.s32.totalorder %v1019_v31, %v11537_v9 }
 0x139   :  { %vm8323_vm4 = vmpackc.low %vm1063_vm3, %vm1062_vm0  ;;  %1940 = vperm.xlu0 %10765, %v11925_v29   ;;  %vm962_vm0 = vcmp.eq.s32.totalorder %v11808_v3, %v11537_v9  ;;  %v10944_v3 = vld [vmem:[#allocation2 + $0x208] sm:$0xff]  }
 0x13a   :  { %8324 = vmatprep.mubr.msk.bf16.mxu0 %vm8323_vm4, %v15486_v18  ;;  %vm8333_vm3 = vmpackc.low %vm963_vm15, %vm962_vm0 }
 0x13b   :  { %1842 = vperm.xlu1 %10763, %v11569_v20   ;;  %v1022_v34 = vpop.permute.xlu1 %1021  ;;  %8326 = vmatmul.mubr.msk.bf16.vlgmr.msra.gmra.mxu0 %vm8325_vm5, %v15486_v18  ;;  %vm965_vm5 = vcmp.eq.s32.totalorder %v11860_v14, %v11537_v9  ;;  %v11296_v14 = vmov 11  }
 0x13c   :  { %vm1064_vm7 = vcmp.eq.s32.totalorder %v1022_v34, %v11537_v9  ;;  %v11937_v36 = vpop.permute.xlu0 %1048  ;;  %9812 = vmatpush3.bf16.msra.mxu0 %v10932_v12 }
 0x13d   :  { %vm8327_vm8 = vmpackc.low %vm1065_vm6, %vm1064_vm7  ;;  %1946 = vperm.xlu0 %10765, %v11942_v40   ;;  %9813 = vmatprep.subr.bf16.mxu0 %v10933_v33  ;;  %vm964_vm6 = vcmp.eq.s32.totalorder %v11821_v7, %v11537_v9 }
 0x13e   :  { %8328 = vmatprep.mubr.msk.bf16.mxu0 %vm8327_vm8, %v15486_v18  ;;  %vm1071_vm8 = vcmp.eq.s32.totalorder %v11928_v32, %v11537_v9  ;;  %vm8337_vm9 = vmpackc.low %vm965_vm5, %vm964_vm6 }
 0x13f   :  { %1848 = vperm.xlu1 %10763, %v11584_v23   ;;  %v1028_v20 = vpop.permute.xlu1 %1027 }
 0x140   :  { %vm1066_vm10 = vcmp.eq.s32.totalorder %v1028_v20, %v11537_v9  ;;  %v11951_v15 = vpop.permute.xlu0 %1054  ;;  %9814 = vmatpush3.bf16.msra.mxu0 %v10934_v37 }
 0x141   :  { %1952 = vperm.xlu0 %10765, %v11584_v23   ;;  %9815 = vmatprep.subr.bf16.mxu0 %v10935_v41  ;;  %vm8331_vm14 = vmpackc.low %vm1067_vm11, %vm1066_vm10  ;;  %vm967_vm11 = vcmp.eq.s32.totalorder %v11872_v2, %v11537_v9 }
 0x142   :  { %vm8341_vm15 = vmpackc.low %vm967_vm11, %vm966_vm12 }
 0x143   :  { %1854 = vperm.xlu1 %10763, %v11599_v26   ;;  %v1034_v45 = vpop.permute.xlu1 %1033  ;;  %8330 = vmatmul.mubr.msk.bf16.gmra.mxu0 %vm8329_vm13, %v15486_v18 }
 0x144   :  { %8332 = vmatprep.mubr.msk.bf16.mxu0 %vm8331_vm14, %v15486_v18  ;;  %v11959_v48 = vpop.permute.xlu0 %1060  ;;  %9816 = vmatpush3.bf16.msra.mxu0 %v10936_v42  ;;  %vm1068_vm1 = vcmp.eq.s32.totalorder %v1034_v45, %v11537_v9  ;;  %vm1073_vm14 = vcmp.eq.s32.totalorder %v11937_v36, %v11537_v9  ;;  %v10949_v45 = vld [vmem:[#allocation2 + $0x2f0] sm:$0xff]  }
 0x145   :  { %1958 = vperm.xlu0 %10765, %v11599_v26   ;;  %9817 = vmatprep.subr.bf16.mxu0 %v10937_v43  ;;  %vm8335_vm4 = vmpackc.low %vm1069_vm2, %vm1068_vm1  ;;  %vm969_vm1 = vcmp.eq.s32.totalorder %v11887_v21, %v11537_v9  ;;  %vm968_vm2 = vcmp.eq.s32.totalorder %v11842_v13, %v11537_v9  ;;  %v12106_v43 = vld [vmem:[%s15482_s0 + $0x68] sm:$0xff] }
 0x146   :  { %vm8345_vm5 = vmpackc.low %vm969_vm1, %vm968_vm2 }
 0x147   :  { %10766 = vset.pattern.permute.xlu1 %v11294_v4  ;;  %v1040_v23 = vpop.permute.xlu1 %1039 }
 0x148   :  { %1916 = vperm.xlu1 %10766, %v11610_v30   ;;  %9818 = vmatpush3.bf16.msra.mxu0 %v10938_v46  ;;  %vm1070_vm7 = vcmp.eq.s32.totalorder %v1040_v23, %v11537_v9 }
 0x149   :  { %v11971_v26 = vpop.permute.xlu0 %1363  ;;  %10768 = vset.pattern.permute.xlu0 %v11295_v55  ;;  %9819 = vmatprep.subr.bf16.mxu0 %v10939_v51  ;;  %vm8339_vm10 = vmpackc.low %vm1071_vm8, %vm1070_vm7  ;;  %vm971_vm7 = vcmp.eq.s32.totalorder %v11897_v10, %v11537_v9  ;;  %vm970_vm8 = vcmp.eq.s32.totalorder %v11850_v60, %v11537_v9  ;;  %v10947_v60 = vld [vmem:[#allocation2 + $0x2f8] sm:$0xff]  }
 0x14a   :  { %2261 = vperm.xlu0 %10768, %v11610_v30   ;;  %vm8349_vm11 = vmpackc.low %vm971_vm7, %vm970_vm8  ;;  %9875 = vmatprep.subr.bf16.mxu1 %v10947_v60  ;;  %vm1408_vm2 = vcmp.eq.s32.totalorder %v11971_v26, %v11537_v9  ;;  %v10950_v26 = vld [vmem:[#allocation2 + $0x2b0] sm:$0xff]  }
 0x14b   :  { %v1046_v1 = vpop.permute.xlu1 %1045  ;;  %8334 = vmatmul.mubr.msk.bf16.gmra.mxu0 %vm8333_vm3, %v15486_v18 }
 0x14c   :  { %1919 = vperm.xlu1 %10766, %v11878_v17   ;;  %8336 = vmatprep.mubr.msk.bf16.mxu0 %vm8335_vm4, %v15486_v18  ;;  %vm1072_vm13 = vcmp.eq.s32.totalorder %v1046_v1, %v11537_v9  ;;  %vm1075_vm4 = vcmp.eq.s32.totalorder %v11951_v15, %v11537_v9  ;;  %v10948_v15 = vld [vmem:[#allocation2 + $0x2b8] sm:$0xff]  }
 0x14d   :  { %v11978_v63 = vpop.permute.xlu0 %1372  ;;  %9820 = vmatpush3.bf16.msra.mxu0 %v10940_v58  ;;  %vm8343_vm0 = vmpackc.low %vm1073_vm14, %vm1072_vm13  ;;  %vm973_vm13 = vcmp.eq.s32.totalorder %v11906_v27, %v11537_v9  ;;  %vm972_vm14 = vcmp.eq.s32.totalorder %v11862_v16, %v11537_v9  ;;  %v12123_v58 = vld [vmem:[%s15482_s0 + $0x78] sm:$0xff] }
 0x14e   :  { %2270 = vperm.xlu0 %10768, %v11627_v35   ;;  %9821 = vmatprep.subr.bf16.mxu0 %v10941_v59  ;;  %v10951_v59 = vld [vmem:[#allocation2 + $0x2e8] sm:$0xff]  }
 0x14f   :  { %v1052_v30 = vpop.permute.xlu1 %1051 }
 0x150   :  { %1925 = vperm.xlu1 %10766, %v11627_v35   ;;  %v10946_v35 = vld [vmem:[#allocation2 + $0x200] sm:$0xff]   ;;  %vm1074_vm3 = vcmp.eq.s32.totalorder %v1052_v30, %v11537_v9 }
 0x151   :  { %v11989_v49 = vpop.permute.xlu0 %1378  ;;  %9822 = vmatpush3.bf16.msra.mxu0 %v10942_v0  ;;  %vm8347_vm6 = vmpackc.low %vm1075_vm4, %vm1074_vm3 }
 0x152   :  { %2276 = vperm.xlu0 %10768, %v11639_v38   ;;  %9823 = vmatprep.subr.bf16.mxu0 %v10943_v53  ;;  %v10952_v53 = vld [vmem:[#allocation2 + $0x2a8] sm:$0xff]  }
 0x153   :  { %v1058_v6 = vpop.permute.xlu1 %1057  ;;  %8338 = vmatmul.mubr.msk.bf16.gmra.mxu0 %vm8337_vm9, %v15486_v18 }
 0x154   :  { %1931 = vperm.xlu1 %10766, %v11639_v38   ;;  %8340 = vmatprep.mubr.msk.bf16.mxu0 %vm8339_vm10, %v15486_v18  ;;  %vm1076_vm9 = vcmp.eq.s32.totalorder %v1058_v6, %v11537_v9  ;;  %vm1077_vm10 = vcmp.eq.s32.totalorder %v11959_v48, %v11537_v9  ;;  %v10953_v6 = vld [vmem:[#allocation2 + $0x2e0] sm:$0xff]  }
 0x155   :  { %v11995_v7 = vpop.permute.xlu0 %1384  ;;  %9824 = vmatpush3.bf16.msra.mxu0 %v10944_v3  ;;  %vm8351_vm12 = vmpackc.low %vm1077_vm10, %vm1076_vm9 }
 0x156   :  { %2282 = vperm.xlu0 %10768, %v11653_v39   ;;  %9825 = vmatprep.subr.bf16.mxu0 %v10945_v5  ;;  %v11297_v5 = vmov 12  }
 0x158   :  { %1937 = vperm.xlu1 %10766, %v11653_v39   ;;  %v12006_v38 = vpop.permute.xlu1 %1360 }
 0x159   :  { %v12008_v52 = vpop.permute.xlu0 %1390  ;;  %9826 = vmatpush3.bf16.msra.mxu0 %v10946_v35  ;;  %vm1407_vm1 = vcmp.eq.s32.totalorder %v12006_v38, %v11537_v9  ;;  %v12146_v35 = vld [vmem:[%s15482_s0 + $0x8] sm:$0xff] }
 0x15a   :  { %2288 = vperm.xlu0 %10768, %v11669_v44  }
 0x15b   :  { %8342 = vmatmul.mubr.msk.bf16.gmra.mxu0 %vm8341_vm15, %v15486_v18  ;;  %vm8353_vm15 = vmpackc.low %vm973_vm13, %vm972_vm14 }
 0x15c   :  { %1943 = vperm.xlu1 %10766, %v11669_v44   ;;  %v12013_v56 = vpop.permute.xlu1 %1366  ;;  %8344 = vmatprep.mubr.msk.bf16.mxu0 %vm8343_vm0, %v15486_v18 }
 0x15d   :  { %v12016_v11 = vpop.permute.xlu0 %1396 }
 0x15e   :  { %2294 = vperm.xlu0 %10768, %v11683_v47  }
 0x160   :  { %1949 = vperm.xlu1 %10766, %v11683_v47   ;;  %v12027_v39 = vpop.permute.xlu1 %1369 }
 0x161   :  { %v12029_v44 = vpop.permute.xlu0 %1402  ;;  %vm1410_vm9 = vcmp.eq.s32.totalorder %v12027_v39, %v11537_v9  ;;  %v10954_v39 = vld [vmem:[#allocation2 + $0x2a0] sm:$0xff]  }
 0x162   :  { %2300 = vperm.xlu0 %10768, %v11701_v50  }
 0x163   :  { %8346 = vmatmul.mubr.msk.bf16.gmra.mxu0 %vm8345_vm5, %v15486_v18  ;;  %vm8405_vm5 = vmpackc.low %vm1408_vm2, %vm1407_vm1 }
 0x164   :  { %1955 = vperm.xlu1 %10766, %v11701_v50   ;;  %v12034_v13 = vpop.permute.xlu1 %1375  ;;  %8348 = vmatprep.mubr.msk.bf16.mxu0 %vm8347_vm6, %v15486_v18 }
 0x166   :  { %v1465_v54 = vpop.permute.xlu0 %1464  ;;  %10769 = vset.pattern.permute.xlu0 %v11296_v14 }
 0x167   :  { %2362 = vperm.xlu0 %10769, %v11867_v61   ;;  %vm1511_vm0 = vcmp.eq.s32.totalorder %v1465_v54, %v11537_v9 }
 0x168   :  { %10767 = vset.pattern.permute.xlu1 %v11295_v55  ;;  %v12047_v47 = vpop.permute.xlu1 %1381 }
 0x169   :  { %2258 = vperm.xlu1 %10767, %v11867_v61  }
 0x16a   :  { %v1474_v50 = vpop.permute.xlu0 %1473 }
 0x16b   :  { %8350 = vmatmul.mubr.msk.bf16.gmra.mxu0 %vm8349_vm11, %v15486_v18  ;;  %2371 = vperm.xlu0 %10769, %v11892_v22   ;;  %vm1514_vm6 = vcmp.eq.s32.totalorder %v1474_v50, %v11537_v9 }
 0x16c   :  { %v12052_v57 = vpop.permute.xlu1 %1387  ;;  %8352 = vmatprep.mubr.msk.bf16.mxu0 %vm8351_vm12, %v15486_v18  ;;  %vm1409_vm12 = vcmp.eq.s32.totalorder %v12013_v56, %v11537_v9 }
 0x16d   :  { %2264 = vperm.xlu1 %10767, %v11878_v17   ;;  %vm8409_vm13 = vmpackc.low %vm1410_vm9, %vm1409_vm12  ;;  %vm1415_vm12 = vcmp.eq.s32.totalorder %v11995_v7, %v11537_v9  ;;  %v12252_v7 = vld [vmem:[%s15482_s0 + $0x70] sm:$0xff] }
 0x16e   :  { %v12056_v2 = vpop.permute.xlu0 %1479 }
 0x16f   :  { %v9635_v19 = vpop.f32.mrf.mxu1  ;;  %2377 = vperm.xlu0 %10769, %v11902_v62   ;;  %vm1516_vm11 = vcmp.eq.s32.totalorder %v12056_v2, %v11537_v9  ;;  %v10955_v2 = vld [vmem:[#allocation2 + $0x2d8] sm:$0xff]  }
 0x170   :  { %v12063_v4 = vpop.permute.xlu1 %1393 }
 0x171   :  { %2267 = vperm.xlu1 %10767, %v11892_v22   ;;  %v9636_v21 = vpop.f32.mrf.mxu1 }
 0x172   :  { %v12066_v24 = vadd.f32 %v9636_v21, %v9635_v19  ;;  %v12068_v10 = vpop.permute.xlu0 %1485  ;;  %v12161_v19 = vld [vmem:[%s15482_s0 + $0x20] sm:$0xff] }
 0x173   :  { %v12070_v25 = vpop.f32.mrf.mxu1  ;;  %8354 = vmatmul.mubr.msk.bf16.gmra.mxu0 %vm8353_vm15, %v15486_v18  ;;  %2383 = vperm.xlu0 %10769, %v11911_v8   ;;  %vm1412_vm15 = vcmp.eq.s32.totalorder %v12034_v13, %v11537_v9  ;;  %vm1518_vm2 = vcmp.eq.s32.totalorder %v12068_v10, %v11537_v9  ;;  %v10956_v13 = vld [vmem:[#allocation2 + $0x298] sm:$0xff]  }
 0x174   :  { %v12074_v16 = vpop.permute.xlu1 %1399 }
 0x175   :  { %2273 = vperm.xlu1 %10767, %v11902_v62   ;;  %v12077_v27 = vpop.f32.mrf.mxu1 }
 0x176   :  { %v12079_v28 = vpop.permute.xlu0 %1491 }
 0x177   :  { %v9641_v31 = vpop.f32.mrf.mxu1  ;;  %2389 = vperm.xlu0 %10769, %v11925_v29  }
 0x178   :  { %v12082_v32 = vpop.permute.xlu1 %1405 }
 0x179   :  { %2279 = vperm.xlu1 %10767, %v11911_v8   ;;  %v9642_v12 = vpop.f32.mrf.mxu1 }
 0x17a   :  { %v12085_v33 = vadd.f32 %v9642_v12, %v9641_v31  ;;  %v12087_v34 = vpop.permute.xlu0 %1497 }
 0x17b   :  { %v12089_v36 = vpop.f32.mrf.mxu1  ;;  %2395 = vperm.xlu0 %10769, %v11942_v40  }
 0x17d   :  { %2285 = vperm.xlu1 %10767, %v11925_v29   ;;  %v1468_v37 = vpop.permute.xlu1 %1467  ;;  %v12098_v41 = vpop.f32.mrf.mxu1 }
 0x17e   :  { %vm1512_vm3 = vcmp.eq.s32.totalorder %v1468_v37, %v11537_v9  ;;  %v12101_v20 = vpop.permute.xlu0 %1503 }
 0x17f   :  { %vm8403_vm4 = vmpackc.low %vm1512_vm3, %vm1511_vm0  ;;  %v9647_v42 = vpop.f32.mrf.mxu1  ;;  %2401 = vperm.xlu0 %10769, %v12106_v43   ;;  %vm1411_vm0 = vcmp.eq.s32.totalorder %v11978_v63, %v11537_v9  ;;  %v12180_v63 = vld [vmem:[%s15482_s0 + $0x30] sm:$0xff] }
 0x180   :  { %8404 = vmatprep.mubr.msk.bf16.mxu1 %vm8403_vm4, %v15486_v18  ;;  %vm8413_vm3 = vmpackc.low %vm1412_vm15, %vm1411_vm0 }
 0x181   :  { %2291 = vperm.xlu1 %10767, %v11942_v40   ;;  %v1471_v48 = vpop.permute.xlu1 %1470  ;;  %v9648_v46 = vpop.f32.mrf.mxu1  ;;  %8406 = vmatmul.mubr.msk.bf16.vlgmr.msra.gmra.mxu1 %vm8405_vm5, %v15486_v18  ;;  %vm1414_vm5 = vcmp.eq.s32.totalorder %v12047_v47, %v11537_v9  ;;  %v10961_v47 = vld [vmem:[#allocation2 + $0x2c0] sm:$0xff]  }
 0x182   :  { %vm1513_vm7 = vcmp.eq.s32.totalorder %v1471_v48, %v11537_v9  ;;  %v12114_v51 = vadd.f32 %v9648_v46, %v9647_v42  ;;  %v12116_v23 = vpop.permute.xlu0 %1509  ;;  %9876 = vmatpush3.bf16.msra.mxu1 %v10948_v15  ;;  %v10958_v46 = vld [vmem:[#allocation2 + $0x290] sm:$0xff]  }
 0x183   :  { %vm8407_vm8 = vmpackc.low %vm1514_vm6, %vm1513_vm7  ;;  %v12118_v55 = vpop.f32.mrf.mxu1  ;;  %2407 = vperm.xlu0 %10769, %v12123_v58   ;;  %9877 = vmatprep.subr.bf16.mxu1 %v10949_v45  ;;  %vm1413_vm6 = vcmp.eq.s32.totalorder %v11989_v49, %v11537_v9  ;;  %v12215_v49 = vld [vmem:[%s15482_s0 + $0x50] sm:$0xff] }
 0x184   :  { %8408 = vmatprep.mubr.msk.bf16.mxu1 %vm8407_vm8, %v15486_v18  ;;  %vm1520_vm8 = vcmp.eq.s32.totalorder %v12079_v28, %v11537_v9  ;;  %vm8417_vm9 = vmpackc.low %vm1414_vm5, %vm1413_vm6 }
 0x185   :  { %2297 = vperm.xlu1 %10767, %v12106_v43   ;;  %v1477_v1 = vpop.permute.xlu1 %1476  ;;  %v12130_v0 = vpop.f32.mrf.mxu1 }
 0x186   :  { %vm1515_vm10 = vcmp.eq.s32.totalorder %v1477_v1, %v11537_v9  ;;  %9878 = vmatpush3.bf16.msra.mxu1 %v10950_v26  ;;  %v12195_v26 = vld [vmem:[%s15482_s0 + $0x40] sm:$0xff] }
 0x187   :  { %v9653_v30 = vpop.f32.mrf.mxu1  ;;  %v12137_v3 = vpop.permute.xlu0 %1812  ;;  %10772 = vset.pattern.permute.xlu0 %v11297_v5  ;;  %9879 = vmatprep.subr.bf16.mxu1 %v10951_v59  ;;  %vm8411_vm14 = vmpackc.low %vm1516_vm11, %vm1515_vm10  ;;  %v10959_v59 = vld [vmem:[#allocation2 + $0x2c8] sm:$0xff]   ;;  %vm1416_vm11 = vcmp.eq.s32.totalorder %v12052_v57, %v11537_v9 }
 0x188   :  { %2710 = vperm.xlu0 %10772, %v12146_v35   ;;  %vm8421_vm15 = vmpackc.low %vm1416_vm11, %vm1415_vm12 }
 0x189   :  { %2303 = vperm.xlu1 %10767, %v12123_v58   ;;  %v1483_v38 = vpop.permute.xlu1 %1482  ;;  %v9654_v56 = vpop.f32.mrf.mxu1  ;;  %8410 = vmatmul.mubr.msk.bf16.gmra.mxu1 %vm8409_vm13, %v15486_v18 }
 0x18a   :  { %v12151_v54 = vadd.f32 %v9654_v56, %v9653_v30  ;;  %8412 = vmatprep.mubr.msk.bf16.mxu1 %vm8411_vm14, %v15486_v18  ;;  %9880 = vmatpush3.bf16.msra.mxu1 %v10952_v53  ;;  %vm1517_vm1 = vcmp.eq.s32.totalorder %v1483_v38, %v11537_v9  ;;  %v10960_v38 = vld [vmem:[#allocation2 + $0x288] sm:$0xff]   ;;  %vm1522_vm14 = vcmp.eq.s32.totalorder %v12087_v34, %v11537_v9 }
 0x18b   :  { %v12154_v50 = vpop.f32.mrf.mxu1  ;;  %v12156_v60 = vpop.permute.xlu0 %1821  ;;  %9881 = vmatprep.subr.bf16.mxu1 %v10953_v6  ;;  %vm8415_vm4 = vmpackc.low %vm1518_vm2, %vm1517_vm1  ;;  %vm1418_vm1 = vcmp.eq.s32.totalorder %v12063_v4, %v11537_v9  ;;  %vm1417_vm2 = vcmp.eq.s32.totalorder %v12008_v52, %v11537_v9 }
 0x18c   :  { %2719 = vperm.xlu0 %10772, %v12161_v19   ;;  %vm8425_vm5 = vmpackc.low %vm1418_vm1, %vm1417_vm2  ;;  %vm1857_vm2 = vcmp.eq.s32.totalorder %v12137_v3, %v11537_v9 }
 0x18d   :  { %10770 = vset.pattern.permute.xlu1 %v11296_v14  ;;  %v1489_v21 = vpop.permute.xlu1 %1488  ;;  %v12169_v31 = vpop.f32.mrf.mxu1  ;;  %v10957_v14 = vld [vmem:[#allocation2 + $0x2d0] sm:$0xff]  }
 0x18e   :  { %2365 = vperm.xlu1 %10770, %v12146_v35   ;;  %9882 = vmatpush3.bf16.msra.mxu1 %v10954_v39  ;;  %vm1519_vm7 = vcmp.eq.s32.totalorder %v1489_v21, %v11537_v9 }
 0x18f   :  { %v9659_v12 = vpop.f32.mrf.mxu1  ;;  %v12175_v37 = vpop.permute.xlu0 %1827  ;;  %9883 = vmatprep.subr.bf16.mxu1 %v10955_v2  ;;  %vm8419_vm10 = vmpackc.low %vm1520_vm8, %vm1519_vm7  ;;  %vm1420_vm7 = vcmp.eq.s32.totalorder %v12074_v16, %v11537_v9  ;;  %vm1419_vm8 = vcmp.eq.s32.totalorder %v12016_v11, %v11537_v9  ;;  %v10963_v11 = vld [vmem:[#allocation2 + $0x378] sm:$0xff]  }
 0x190   :  { %2725 = vperm.xlu0 %10772, %v12180_v63   ;;  %vm8429_vm11 = vmpackc.low %vm1420_vm7, %vm1419_vm8  ;;  %9939 = vmatprep.subr.bf16.mxu0 %v10963_v11 }
 0x191   :  { %v1495_v15 = vpop.permute.xlu1 %1494  ;;  %v9660_v10 = vpop.f32.mrf.mxu1  ;;  %8414 = vmatmul.mubr.msk.bf16.gmra.mxu1 %vm8413_vm3, %v15486_v18 }
 0x192   :  { %v12184_v42 = vadd.f32 %v9660_v10, %v9659_v12  ;;  %2368 = vperm.xlu1 %10770, %v11878_v17   ;;  %8416 = vmatprep.mubr.msk.bf16.mxu1 %vm8415_vm4, %v15486_v18  ;;  %v10962_v12 = vld [vmem:[#allocation2 + $0x280] sm:$0xff]   ;;  %vm1521_vm13 = vcmp.eq.s32.totalorder %v1495_v15, %v11537_v9  ;;  %vm1524_vm4 = vcmp.eq.s32.totalorder %v12101_v20, %v11537_v9 }
 0x193   :  { %v12188_v45 = vpop.f32.mrf.mxu1  ;;  %v12190_v48 = vpop.permute.xlu0 %1833  ;;  %9884 = vmatpush3.bf16.msra.mxu1 %v10956_v13  ;;  %v12232_v13 = vld [vmem:[%s15482_s0 + $0x60] sm:$0xff]  ;;  %vm8423_vm0 = vmpackc.low %vm1522_vm14, %vm1521_vm13  ;;  %vm1422_vm13 = vcmp.eq.s32.totalorder %v12082_v32, %v11537_v9  ;;  %vm1421_vm14 = vcmp.eq.s32.totalorder %v12029_v44, %v11537_v9  ;;  %v9640_v44 = vadd.f32 %v12077_v27, %v12070_v25 }
 0x194   :  { %2731 = vperm.xlu0 %10772, %v12195_v26   ;;  %9885 = vmatprep.subr.bf16.mxu1 %v10957_v14 }
 0x195   :  { %v12202_v1 = vpop.permute.xlu1 %1500  ;;  %v12204_v53 = vpop.f32.mrf.mxu1 }
 0x196   :  { %2374 = vperm.xlu1 %10770, %v12161_v19   ;;  %vm1523_vm3 = vcmp.eq.s32.totalorder %v12202_v1, %v11537_v9 }
 0x197   :  { %v9665_v30 = vpop.f32.mrf.mxu1  ;;  %v12210_v6 = vpop.permute.xlu0 %1839  ;;  %9886 = vmatpush3.bf16.msra.mxu1 %v10958_v46  ;;  %vm8427_vm6 = vmpackc.low %vm1524_vm4, %vm1523_vm3 }
 0x198   :  { %2737 = vperm.xlu0 %10772, %v12215_v49   ;;  %9887 = vmatprep.subr.bf16.mxu1 %v10959_v59 }
 0x199   :  { %v12218_v56 = vpop.permute.xlu1 %1506  ;;  %v9666_v28 = vpop.f32.mrf.mxu1  ;;  %8418 = vmatmul.mubr.msk.bf16.gmra.mxu1 %vm8417_vm9, %v15486_v18 }
 0x19a   :  { %v12221_v39 = vadd.f32 %v9666_v28, %v9665_v30  ;;  %2380 = vperm.xlu1 %10770, %v12180_v63   ;;  %8420 = vmatprep.mubr.msk.bf16.mxu1 %vm8419_vm10, %v15486_v18  ;;  %vm1525_vm9 = vcmp.eq.s32.totalorder %v12218_v56, %v11537_v9  ;;  %vm1526_vm10 = vcmp.eq.s32.totalorder %v12116_v23, %v11537_v9 }
 0x19b   :  { %v12225_v2 = vpop.f32.mrf.mxu1  ;;  %v12227_v21 = vpop.permute.xlu0 %1845  ;;  %9888 = vmatpush3.bf16.msra.mxu1 %v10960_v38  ;;  %vm8431_vm12 = vmpackc.low %vm1526_vm10, %vm1525_vm9 }
 0x19c   :  { %15520 = vst [vmem:[#allocation5_spill] sm:$0xff] %v12227_v21  ;;  %2743 = vperm.xlu0 %10772, %v12232_v13   ;;  %9889 = vmatprep.subr.bf16.mxu1 %v10961_v47  ;;  %v15485_v47 = vmov 13  }
 0x19d   :  { %v12239_v14 = vpop.f32.mrf.mxu1 }
 0x19e   :  { %2386 = vperm.xlu1 %10770, %v12195_v26   ;;  %v12245_v10 = vpop.permute.xlu1 %1809 }
 0x19f   :  { %v9671_v46 = vpop.f32.mrf.mxu1  ;;  %v12247_v59 = vpop.permute.xlu0 %1851  ;;  %9890 = vmatpush3.bf16.msra.mxu1 %v10962_v12  ;;  %vm1856_vm1 = vcmp.eq.s32.totalorder %v12245_v10, %v11537_v9  ;;  %v10966_v10 = vld [vmem:[#allocation2 + $0x330] sm:$0xff]  }
 0x1a0   :  { %15521 = vst [vmem:[#allocation6_spill] sm:$0xff] %v12247_v59  ;;  %2749 = vperm.xlu0 %10772, %v12252_v7   ;;  %v15525_v59 = vmov 1.0|1.0  }
 0x1a1   :  { %v9672_v57 = vpop.f32.mrf.mxu1  ;;  %8422 = vmatmul.mubr.msk.bf16.gmra.mxu1 %vm8421_vm15, %v15486_v18  ;;  %vm8433_vm15 = vmpackc.low %vm1422_vm13, %vm1421_vm14 }
 0x1a2   :  { %v12256_v34 = vadd.f32 %v9672_v57, %v9671_v46  ;;  %2392 = vperm.xlu1 %10770, %v12215_v49   ;;  %v12259_v15 = vpop.permute.xlu1 %1815  ;;  %8424 = vmatprep.mubr.msk.bf16.mxu1 %vm8423_vm0, %v15486_v18 }
 0x1a3   :  { %v12262_v30 = vpop.f32.mrf.mxu1 }
 0x1a4   :  { %15522 = vst [vmem:[#allocation7_spill] sm:$0xff] %v12262_v30  ;;  %v12264_v38 = vpop.permute.xlu0 %1913  ;;  %10773 = vset.pattern.permute.xlu0 %v15485_v47 }
 0x1a5   :  { %v12271_v28 = vpop.f32.mrf.mxu1  ;;  %2811 = vperm.xlu0 %10773, %v11867_v61   ;;  %vm1960_vm0 = vcmp.eq.s32.totalorder %v12264_v38, %v11537_v9 }
 0x1a6   :  { %15523 = vst [vmem:[#allocation8_spill] sm:$0xff] %v12271_v28  ;;  %2398 = vperm.xlu1 %10770, %v12232_v13   ;;  %v12279_v12 = vpop.permute.xlu1 %1818 }
 0x1a7   :  { %v9677_v46 = vpop.f32.mrf.mxu1  ;;  %vm1859_vm9 = vcmp.eq.s32.totalorder %v12279_v12, %v11537_v9  ;;  %v10971_v12 = vld [vmem:[#allocation2 + $0x358] sm:$0xff]  }
 0x1a8   :  { %v12281_v4 = vpop.permute.xlu0 %1922 }
 0x1a9   :  { %v9678_v52 = vpop.f32.mrf.mxu1  ;;  %8426 = vmatmul.mubr.msk.bf16.gmra.mxu1 %vm8425_vm5, %v15486_v18  ;;  %2820 = vperm.xlu0 %10773, %v11892_v22   ;;  %vm8485_vm5 = vmpackc.low %vm1857_vm2, %vm1856_vm1 }
 0x1aa   :  { %v12285_v57 = vadd.f32 %v9678_v52, %v9677_v46  ;;  %2404 = vperm.xlu1 %10770, %v12252_v7   ;;  %v12288_v1 = vpop.permute.xlu1 %1824  ;;  %8428 = vmatprep.mubr.msk.bf16.mxu1 %vm8427_vm6, %v15486_v18  ;;  %vm1963_vm6 = vcmp.eq.s32.totalorder %v12281_v4, %v11537_v9 }
 0x1ac   :  { %15524 = vst [vmem:[#allocation9_spill] sm:$0xff] %v12285_v57  ;;  %v12291_v20 = vpop.permute.xlu0 %1928 }
 0x1ad   :  { %2826 = vperm.xlu0 %10773, %v11902_v62  }
 0x1ae   :  { %10771 = vset.pattern.permute.xlu1 %v11297_v5  ;;  %v12303_v46 = vpop.permute.xlu1 %1830 }
 0x1af   :  { %2707 = vperm.xlu1 %10771, %v11867_v61  }
 0x1b0   :  { %v12306_v52 = vpop.permute.xlu0 %1934 }
 0x1b1   :  { %8430 = vmatmul.mubr.msk.bf16.gmra.mxu1 %vm8429_vm11, %v15486_v18  ;;  %2832 = vperm.xlu0 %10773, %v11911_v8   ;;  %vm1965_vm11 = vcmp.eq.s32.totalorder %v12291_v20, %v11537_v9  ;;  %vm1967_vm2 = vcmp.eq.s32.totalorder %v12306_v52, %v11537_v9 }
 0x1b2   :  { %v12310_v16 = vpop.permute.xlu1 %1836  ;;  %8432 = vmatprep.mubr.msk.bf16.mxu1 %vm8431_vm12, %v15486_v18  ;;  %vm1858_vm12 = vcmp.eq.s32.totalorder %v12259_v15, %v11537_v9 }
 0x1b3   :  { %2713 = vperm.xlu1 %10771, %v11878_v17   ;;  %vm8489_vm13 = vmpackc.low %vm1859_vm9, %vm1858_vm12  ;;  %vm1864_vm12 = vcmp.eq.s32.totalorder %v12190_v48, %v11537_v9 }
 0x1b4   :  { %v12314_v23 = vpop.permute.xlu0 %1940 }
 0x1b5   :  { %v9571_v61 = vpop.f32.mrf.mxu0  ;;  %2838 = vperm.xlu0 %10773, %v11925_v29  }
 0x1b6   :  { %v12321_v5 = vpop.permute.xlu1 %1842 }
 0x1b7   :  { %2716 = vperm.xlu1 %10771, %v11892_v22   ;;  %v9572_v56 = vpop.f32.mrf.mxu0 }
 0x1b8   :  { %v9573_v47 = vadd.f32 %v9572_v56, %v9571_v61  ;;  %v12324_v18 = vpop.permute.xlu0 %1946 }
 0x1b9   :  { %v9574_v11 = vpop.f32.mrf.mxu0  ;;  %8434 = vmatmul.mubr.msk.bf16.gmra.mxu1 %vm8433_vm15, %v15525_v59  ;;  %2844 = vperm.xlu0 %10773, %v11942_v40   ;;  %vm1861_vm15 = vcmp.eq.s32.totalorder %v12288_v1, %v11537_v9  ;;  %v10972_v1 = vld [vmem:[#allocation2 + $0x318] sm:$0xff]  }
 0x1ba   :  { %v12331_v32 = vadd.f32 %v12066_v24, %v9573_v47  ;;  %v12333_v21 = vpop.permute.xlu1 %1848 }
 0x1bb   :  { %2722 = vperm.xlu1 %10771, %v11902_v62   ;;  %v9575_v22 = vpop.f32.mrf.mxu0 }
 0x1bc   :  { %v9576_v57 = vadd.f32 %v9575_v22, %v9574_v11  ;;  %v12336_v61 = vpop.permute.xlu0 %1952  ;;  %v9646_v11 = vadd.f32 %v12098_v41, %v12089_v36 }
 0x1bd   :  { %v9577_v56 = vpop.f32.mrf.mxu0  ;;  %2850 = vperm.xlu0 %10773, %v12106_v43  }
 0x1be   :  { %v12339_v28 = vadd.f32 %v9640_v44, %v9576_v57  ;;  %v12341_v30 = vpop.permute.xlu1 %1854  ;;  %v10964_v44 = vld [vmem:[#allocation2 + $0x338] sm:$0xff]  }
 0x1bf   :  { %2728 = vperm.xlu1 %10771, %v11911_v8   ;;  %v9578_v25 = vpop.f32.mrf.mxu0 }
 0x1c0   :  { %v9579_v24 = vadd.f32 %v9578_v25, %v9577_v56  ;;  %v12344_v27 = vpop.permute.xlu0 %1958  ;;  %v11299_v56 = vmov 14   ;;  %v10965_v25 = vld [vmem:[#allocation2 + $0x370] sm:$0xff]  }
 0x1c1   :  { %v9580_v47 = vpop.f32.mrf.mxu0  ;;  %2856 = vperm.xlu0 %10773, %v12123_v58  }
 0x1c2   :  { %v12348_v62 = vadd.f32 %v12085_v33, %v9579_v24 }
 0x1c3   :  { %2734 = vperm.xlu1 %10771, %v11925_v29   ;;  %v1917_v8 = vpop.permute.xlu1 %1916  ;;  %v9581_v57 = vpop.f32.mrf.mxu0 }
 0x1c4   :  { %vm1961_vm3 = vcmp.eq.s32.totalorder %v1917_v8, %v11537_v9  ;;  %v9582_v33 = vadd.f32 %v9581_v57, %v9580_v47  ;;  %v10967_v8 = vld [vmem:[#allocation2 + $0x368] sm:$0xff]  }
 0x1c5   :  { %vm8483_vm4 = vmpackc.low %vm1961_vm3, %vm1960_vm0  ;;  %v9583_v22 = vpop.f32.mrf.mxu0  ;;  %v12360_v38 = vpop.permute.xlu0 %2261  ;;  %10776 = vset.pattern.permute.xlu0 %v11299_v56  ;;  %vm1860_vm0 = vcmp.eq.s32.totalorder %v12156_v60, %v11537_v9 }
 0x1c6   :  { %v12366_v29 = vadd.f32 %v9646_v11, %v9582_v33  ;;  %8484 = vmatprep.mubr.msk.bf16.mxu0 %vm8483_vm4, %v15525_v59  ;;  %3159 = vperm.xlu0 %10776, %v12146_v35   ;;  %v9652_v11 = vadd.f32 %v12130_v0, %v12118_v55  ;;  %vm8493_vm3 = vmpackc.low %vm1861_vm15, %vm1860_vm0 }
 0x1c7   :  { %2740 = vperm.xlu1 %10771, %v11942_v40   ;;  %v1920_v36 = vpop.permute.xlu1 %1919  ;;  %v9584_v41 = vpop.f32.mrf.mxu0  ;;  %8486 = vmatmul.mubr.msk.bf16.vlgmr.msra.gmra.mxu0 %vm8485_vm5, %v15525_v59  ;;  %vm1863_vm5 = vcmp.eq.s32.totalorder %v12303_v46, %v11537_v9  ;;  %v10976_v46 = vld [vmem:[#allocation2 + $0x308] sm:$0xff]  }
 0x1c8   :  { %vm1962_vm7 = vcmp.eq.s32.totalorder %v1920_v36, %v11537_v9  ;;  %v9585_v3 = vadd.f32 %v9584_v41, %v9583_v22  ;;  %9940 = vmatpush3.bf16.msra.mxu0 %v10964_v44  ;;  %v10970_v36 = vld [vmem:[#allocation2 + $0x320] sm:$0xff]  }
 0x1c9   :  { %vm8487_vm8 = vmpackc.low %vm1963_vm6, %vm1962_vm7  ;;  %v9586_v24 = vpop.f32.mrf.mxu0  ;;  %v12375_v47 = vpop.permute.xlu0 %2270  ;;  %9941 = vmatprep.subr.bf16.mxu0 %v10965_v25  ;;  %v10969_v25 = vld [vmem:[#allocation2 + $0x360] sm:$0xff]   ;;  %vm1862_vm6 = vcmp.eq.s32.totalorder %v12175_v37, %v11537_v9 }
 0x1ca   :  { %v12378_v4 = vadd.f32 %v12114_v51, %v9585_v3  ;;  %8488 = vmatprep.mubr.msk.bf16.mxu0 %vm8487_vm8, %v15525_v59  ;;  %3168 = vperm.xlu0 %10776, %v12161_v19   ;;  %v10968_v51 = vld [vmem:[#allocation2 + $0x328] sm:$0xff]   ;;  %vm1969_vm8 = vcmp.eq.s32.totalorder %v12314_v23, %v11537_v9  ;;  %vm8497_vm9 = vmpackc.low %vm1863_vm5, %vm1862_vm6 }
 0x1cb   :  { %2746 = vperm.xlu1 %10771, %v12106_v43   ;;  %v1926_v40 = vpop.permute.xlu1 %1925  ;;  %v9587_v57 = vpop.f32.mrf.mxu0 }
 0x1cc   :  { %vm1964_vm10 = vcmp.eq.s32.totalorder %v1926_v40, %v11537_v9  ;;  %v9588_v33 = vadd.f32 %v9587_v57, %v9586_v24  ;;  %9942 = vmatpush3.bf16.msra.mxu0 %v10966_v10  ;;  %v9658_v24 = vadd.f32 %v12169_v31, %v12154_v50 }
 0x1cd   :  { %v9589_v44 = vpop.f32.mrf.mxu0  ;;  %v12392_v22 = vpop.permute.xlu0 %2276  ;;  %9943 = vmatprep.subr.bf16.mxu0 %v10967_v8  ;;  %vm8491_vm14 = vmpackc.low %vm1965_vm11, %vm1964_vm10  ;;  %v15526_v8 = vmov 13   ;;  %vm1865_vm11 = vcmp.eq.s32.totalorder %v12310_v16, %v11537_v9 }
 0x1ce   :  { %v12397_v55 = vadd.f32 %v9652_v11, %v9588_v33  ;;  %3174 = vperm.xlu0 %10776, %v12180_v63   ;;  %v10973_v11 = vld [vmem:[#allocation2 + $0x350] sm:$0xff]   ;;  %vm8501_vm15 = vmpackc.low %vm1865_vm11, %vm1864_vm12 }
 0x1cf   :  { %2752 = vperm.xlu1 %10771, %v12123_v58   ;;  %v1932_v0 = vpop.permute.xlu1 %1931  ;;  %v9590_v20 = vpop.f32.mrf.mxu0  ;;  %8490 = vmatmul.mubr.msk.bf16.gmra.mxu0 %vm8489_vm13, %v15525_v59 }
 0x1d0   :  { %v9591_v15 = vadd.f32 %v9590_v20, %v9589_v44  ;;  %8492 = vmatprep.mubr.msk.bf16.mxu0 %vm8491_vm14, %v15525_v59  ;;  %9944 = vmatpush3.bf16.msra.mxu0 %v10968_v51  ;;  %vm1966_vm1 = vcmp.eq.s32.totalorder %v1932_v0, %v11537_v9  ;;  %v10974_v0 = vld [vmem:[#allocation2 + $0x310] sm:$0xff]   ;;  %vm1971_vm14 = vcmp.eq.s32.totalorder %v12324_v18, %v11537_v9  ;;  %v12491_v18 = vld [vmem:[%s15482_s0 + $0x18] sm:$0xff] }
 0x1d1   :  { %v9592_v41 = vpop.f32.mrf.mxu0  ;;  %v12403_v3 = vpop.permute.xlu0 %2282  ;;  %9945 = vmatprep.subr.bf16.mxu0 %v10969_v25  ;;  %vm8495_vm4 = vmpackc.low %vm1967_vm2, %vm1966_vm1  ;;  %vm1867_vm1 = vcmp.eq.s32.totalorder %v12321_v5, %v11537_v9  ;;  %vm1866_vm2 = vcmp.eq.s32.totalorder %v12210_v6, %v11537_v9 }
 0x1d2   :  { %v12406_v10 = vadd.f32 %v12151_v54, %v9591_v15  ;;  %3180 = vperm.xlu0 %10776, %v12195_v26   ;;  %v10975_v15 = vld [vmem:[#allocation2 + $0x348] sm:$0xff]   ;;  %vm8505_vm5 = vmpackc.low %vm1867_vm1, %vm1866_vm2  ;;  %vm2306_vm2 = vcmp.eq.s32.totalorder %v12360_v38, %v11537_v9 }
 0x1d3   :  { %10774 = vset.pattern.permute.xlu1 %v15526_v8  ;;  %v1938_v40 = vpop.permute.xlu1 %1937  ;;  %v9593_v57 = vpop.f32.mrf.mxu0 }
 0x1d4   :  { %v9594_v54 = vadd.f32 %v9593_v57, %v9592_v41  ;;  %2814 = vperm.xlu1 %10774, %v12146_v35   ;;  %9946 = vmatpush3.bf16.msra.mxu0 %v10970_v36  ;;  %v9664_v41 = vadd.f32 %v12204_v53, %v12188_v45  ;;  %vm1968_vm7 = vcmp.eq.s32.totalorder %v1938_v40, %v11537_v9  ;;  %v10977_v45 = vld [vmem:[#allocation2 + $0x340] sm:$0xff]  }
 0x1d5   :  { %v9595_v50 = vpop.f32.mrf.mxu0  ;;  %v12420_v31 = vpop.permute.xlu0 %2288  ;;  %9947 = vmatprep.subr.bf16.mxu0 %v10971_v12  ;;  %vm8499_vm10 = vmpackc.low %vm1969_vm8, %vm1968_vm7  ;;  %v10978_v57 = vld [vmem:[#allocation2 + $0x300] sm:$0xff]   ;;  %vm1869_vm7 = vcmp.eq.s32.totalorder %v12333_v21, %v11537_v9 }
 0x1d6   :  { %v12422_v60 = vadd.f32 %v9658_v24, %v9594_v54  ;;  %3186 = vperm.xlu0 %10776, %v12215_v49  }
 0x1d7   :  { %v12425_v33 = vpop.permute.xlu1 %1943  ;;  %v9596_v51 = vpop.f32.mrf.mxu0  ;;  %8494 = vmatmul.mubr.msk.bf16.gmra.mxu0 %vm8493_vm3, %v15525_v59 }
 0x1d8   :  { %v9597_v52 = vadd.f32 %v9596_v51, %v9595_v50  ;;  %2817 = vperm.xlu1 %10774, %v11878_v17   ;;  %8496 = vmatprep.mubr.msk.bf16.mxu0 %vm8495_vm4, %v15525_v59  ;;  %v12471_v51 = vld [vmem:[%s15482_s0] sm:$0xff]  ;;  %vm1970_vm13 = vcmp.eq.s32.totalorder %v12425_v33, %v11537_v9  ;;  %vm1973_vm4 = vcmp.eq.s32.totalorder %v12336_v61, %v11537_v9  ;;  %v12530_v61 = vld [vmem:[%s15482_s0 + $0x38] sm:$0xff] }
 0x1d9   :  { %v9598_v44 = vpop.f32.mrf.mxu0  ;;  %v12430_v25 = vpop.permute.xlu0 %2294  ;;  %9948 = vmatpush3.bf16.msra.mxu0 %v10972_v1  ;;  %v15488_v1 = vmov 15   ;;  %vm8503_vm0 = vmpackc.low %vm1971_vm14, %vm1970_vm13  ;;  %vm1871_vm13 = vcmp.eq.s32.totalorder %v12341_v30, %v11537_v9 }
 0x1da   :  { %15527 = vst [vmem:[#allocation10_spill] sm:$0xff] %v12430_v25  ;;  %v12433_v20 = vadd.f32 %v12184_v42, %v9597_v52  ;;  %3192 = vperm.xlu0 %10776, %v12232_v13   ;;  %9949 = vmatprep.subr.bf16.mxu0 %v10973_v11 }
 0x1db   :  { %v12440_v17 = vpop.permute.xlu1 %1949  ;;  %v9599_v36 = vpop.f32.mrf.mxu0 }
 0x1dc   :  { %v9600_v42 = vadd.f32 %v9599_v36, %v9598_v44  ;;  %2823 = vperm.xlu1 %10774, %v12161_v19   ;;  %vm1972_vm3 = vcmp.eq.s32.totalorder %v12440_v17, %v11537_v9 }
 0x1dd   :  { %v9601_v12 = vpop.f32.mrf.mxu0  ;;  %v12448_v24 = vpop.permute.xlu0 %2300  ;;  %9950 = vmatpush3.bf16.msra.mxu0 %v10974_v0  ;;  %vm8507_vm6 = vmpackc.low %vm1973_vm4, %vm1972_vm3 }
 0x1de   :  { %15528 = vst [vmem:[#allocation11_spill] sm:$0xff] %v12448_v24  ;;  %v12450_v37 = vadd.f32 %v9664_v41, %v9600_v42  ;;  %3198 = vperm.xlu0 %10776, %v12252_v7   ;;  %9951 = vmatprep.subr.bf16.mxu0 %v10975_v15 }
 0x1df   :  { %v12453_v53 = vpop.permute.xlu1 %1955  ;;  %v9602_v8 = vpop.f32.mrf.mxu0  ;;  %8498 = vmatmul.mubr.msk.bf16.gmra.mxu0 %vm8497_vm9, %v15525_v59 }
 0x1e0   :  { %v9603_v23 = vadd.f32 %v9602_v8, %v9601_v12  ;;  %2829 = vperm.xlu1 %10774, %v12180_v63   ;;  %8500 = vmatprep.mubr.msk.bf16.mxu0 %vm8499_vm10, %v15525_v59  ;;  %v12510_v12 = vld [vmem:[%s15482_s0 + $0x28] sm:$0xff]  ;;  %v9680_v8 = vpop.f32.mrf.mxu1  ;;  %vm1974_vm9 = vcmp.eq.s32.totalorder %v12453_v53, %v11537_v9  ;;  %vm1975_vm10 = vcmp.eq.s32.totalorder %v12344_v27, %v11537_v9  ;;  %v12568_v53 = vld [vmem:[%s15482_s0 + $0x58] sm:$0xff] }
 0x1e1   :  { %v9604_v40 = vpop.f32.mrf.mxu0  ;;  %9952 = vmatpush3.bf16.msra.mxu0 %v10976_v46  ;;  %v15529_v46 = vld [vmem:[#allocation7_spill] sm:$0xff]  ;;  %vm8511_vm12 = vmpackc.low %vm1975_vm10, %vm1974_vm9  ;;  %v10979_v27 = vld [vmem:[#allocation2 + $0x3f8] sm:$0xff]  }
 0x1e2   :  { %v12459_v54 = vadd.f32 %v12221_v39, %v9603_v23  ;;  %v12461_v50 = vpop.permute.xlu0 %2362  ;;  %10777 = vset.pattern.permute.xlu0 %v15488_v1  ;;  %9953 = vmatprep.subr.bf16.mxu0 %v10977_v45  ;;  %v9670_v39 = vadd.f32 %v12239_v14, %v12225_v2  ;;  %v15530_v45 = vld [vmem:[#allocation8_spill] sm:$0xff] }
 0x1e3   :  { %v9605_v11 = vpop.f32.mrf.mxu0  ;;  %3260 = vperm.xlu0 %10777, %v12471_v51   ;;  %10003 = vmatprep.subr.bf16.mxu1 %v10979_v27 }
 0x1e4   :  { %v9606_v16 = vadd.f32 %v9605_v11, %v9604_v40  ;;  %2835 = vperm.xlu1 %10774, %v12195_v26   ;;  %v12481_v48 = vpop.permute.xlu1 %2258 }
 0x1e5   :  { %v9607_v52 = vpop.f32.mrf.mxu0  ;;  %9954 = vmatpush3.bf16.msra.mxu0 %v10978_v57  ;;  %vm2305_vm1 = vcmp.eq.s32.totalorder %v12481_v48, %v11537_v9 }
 0x1e6   :  { %v12483_v44 = vadd.f32 %v9670_v39, %v9606_v16  ;;  %v12485_v0 = vpop.permute.xlu0 %2371  ;;  %v9681_v16 = vpop.f32.mrf.mxu1 }
 0x1e7   :  { %v9608_v2 = vpop.f32.mrf.mxu0  ;;  %8502 = vmatmul.mubr.msk.bf16.gmra.mxu0 %vm8501_vm15, %v15525_v59  ;;  %3269 = vperm.xlu0 %10777, %v12491_v18  }
 0x1e8   :  { %v9609_v14 = vadd.f32 %v9608_v2, %v9607_v52  ;;  %2841 = vperm.xlu1 %10774, %v12215_v49   ;;  %v12495_v33 = vpop.permute.xlu1 %2264  ;;  %8504 = vmatprep.mubr.msk.bf16.mxu0 %vm8503_vm0, %v15525_v59  ;;  %v15531_v2 = vld [vmem:[#allocation9_spill] sm:$0xff]  ;;  %vm2409_vm0 = vcmp.eq.s32.totalorder %v12461_v50, %v11537_v9  ;;  %v10981_v50 = vld [vmem:[#allocation2 + $0x3f0] sm:$0xff]  }
 0x1e9   :  { %v9610_v15 = vpop.f32.mrf.mxu0 }
 0x1ea   :  { %v12499_v36 = vadd.f32 %v12256_v34, %v9609_v14  ;;  %v12501_v41 = vpop.permute.xlu0 %2377  ;;  %v9676_v34 = vadd.f32 %v15530_v45, %v15529_v46  ;;  %v12549_v45 = vld [vmem:[%s15482_s0 + $0x48] sm:$0xff] }
 0x1eb   :  { %v9611_v42 = vpop.f32.mrf.mxu0  ;;  %3275 = vperm.xlu0 %10777, %v12510_v12  }
 0x1ec   :  { %v9612_v5 = vadd.f32 %v9611_v42, %v9610_v15  ;;  %2847 = vperm.xlu1 %10774, %v12232_v13   ;;  %v12520_v6 = vpop.permute.xlu1 %2267  ;;  %v15532_v42 = vld [vmem:[#allocation5_spill] sm:$0xff] }
 0x1ed   :  { %v9613_v23 = vpop.f32.mrf.mxu0  ;;  %vm1868_vm8 = vcmp.eq.s32.totalorder %v15532_v42, %v11537_v9  ;;  %vm2308_vm9 = vcmp.eq.s32.totalorder %v12520_v6, %v11537_v9  ;;  %v10985_v6 = vld [vmem:[#allocation2 + $0x3e0] sm:$0xff]  }
 0x1ee   :  { %v12522_v40 = vadd.f32 %v9676_v34, %v9612_v5  ;;  %v12524_v57 = vpop.permute.xlu0 %2383  ;;  %v9682_v34 = vadd.f32 %v9681_v16, %v9680_v8  ;;  %vm8509_vm11 = vmpackc.low %vm1869_vm7, %vm1868_vm8  ;;  %v12577_v8 = vld [vmem:[%s15482_s0 + $0x10] sm:$0xff]  ;;  %v15534_v16 = vld [vmem:[#allocation6_spill] sm:$0xff] }
 0x1ef   :  { %v9614_v11 = vpop.f32.mrf.mxu0  ;;  %8506 = vmatmul.mubr.msk.bf16.gmra.mxu0 %vm8505_vm5, %v15525_v59  ;;  %3281 = vperm.xlu0 %10777, %v12530_v61   ;;  %vm1870_vm14 = vcmp.eq.s32.totalorder %v15534_v16, %v11537_v9  ;;  %vm8565_vm5 = vmpackc.low %vm2306_vm2, %vm2305_vm1  ;;  %vm2416_vm2 = vcmp.eq.s32.totalorder %v12524_v57, %v11537_v9 }
 0x1f0   :  { %v9615_v17 = vadd.f32 %v9614_v11, %v9613_v23  ;;  %2853 = vperm.xlu1 %10774, %v12252_v7   ;;  %v12534_v39 = vpop.permute.xlu1 %2273  ;;  %8508 = vmatprep.mubr.msk.bf16.mxu0 %vm8507_vm6, %v15525_v59  ;;  %vm8513_vm15 = vmpackc.low %vm1871_vm13, %vm1870_vm14  ;;  %vm2412_vm6 = vcmp.eq.s32.totalorder %v12485_v0, %v11537_v9 }
 0x1f1   :  { %v9616_v52 = vpop.f32.mrf.mxu0 }
 0x1f2   :  { %v12538_v14 = vadd.f32 %v15531_v2, %v9615_v17  ;;  %v12540_v15 = vpop.permute.xlu0 %2389 }
 0x1f3   :  { %v9617_v46 = vpop.f32.mrf.mxu0  ;;  %3287 = vperm.xlu0 %10777, %v12549_v45  }
 0x1f4   :  { %v9618_v5 = vadd.f32 %v9617_v46, %v9616_v52  ;;  %10775 = vset.pattern.permute.xlu1 %v11299_v56  ;;  %v12557_v21 = vpop.permute.xlu1 %2279 }
 0x1f5   :  { %3156 = vperm.xlu1 %10775, %v12471_v51  }
 0x1f6   :  { %v12560_v23 = vadd.f32 %v9682_v34, %v9618_v5  ;;  %v12562_v11 = vpop.permute.xlu0 %2395 }
 0x1f7   :  { %8510 = vmatmul.mubr.msk.bf16.gmra.mxu0 %vm8509_vm11, %v15525_v59  ;;  %3293 = vperm.xlu0 %10777, %v12568_v53   ;;  %vm2414_vm11 = vcmp.eq.s32.totalorder %v12501_v41, %v11537_v9 }
 0x1f8   :  { %15533 = vst [vmem:[#allocation7_spill] sm:$0xff] %v12560_v23  ;;  %v12571_v56 = vpop.permute.xlu1 %2285  ;;  %8512 = vmatprep.mubr.msk.bf16.mxu0 %vm8511_vm12, %v15525_v59  ;;  %vm2307_vm12 = vcmp.eq.s32.totalorder %v12495_v33, %v11537_v9  ;;  %v10986_v33 = vld [vmem:[#allocation2 + $0x3a0] sm:$0xff]  }
 0x1f9   :  { %3162 = vperm.xlu1 %10775, %v12577_v8   ;;  %vm8569_vm13 = vmpackc.low %vm2308_vm9, %vm2307_vm12  ;;  %vm2313_vm12 = vcmp.eq.s32.totalorder %v12403_v3, %v11537_v9 }
 0x1fa   :  { %v12580_v17 = vpop.permute.xlu0 %2401 }
 0x1fb   :  { %v9699_v52 = vpop.f32.mrf.mxu0  ;;  %3299 = vperm.xlu0 %10777, %v12106_v43  }
 0x1fc   :  { %v12587_v2 = vpop.permute.xlu1 %2291 }
 0x1fd   :  { %3165 = vperm.xlu1 %10775, %v12491_v18   ;;  %v9700_v42 = vpop.f32.mrf.mxu0 }
 0x1fe   :  { %v9701_v46 = vadd.f32 %v9700_v42, %v9699_v52  ;;  %v12590_v34 = vpop.permute.xlu0 %2407  ;;  %v11301_v52 = vmov 16  }
 0x1ff   :  { %15535 = vst [vmem:[#allocation8_spill] sm:$0xff] %v12590_v34  ;;  %v9702_v5 = vpop.f32.mrf.mxu0  ;;  %8514 = vmatmul.mubr.msk.bf16.gmra.mxu0 %vm8513_vm15, %v15525_v59  ;;  %3305 = vperm.xlu0 %10777, %v12123_v58   ;;  %vm2310_vm15 = vcmp.eq.s32.totalorder %v12534_v39, %v11537_v9  ;;  %v10988_v39 = vld [vmem:[#allocation2 + $0x398] sm:$0xff]  }
 0x200   :  { %v12595_v30 = vadd.f32 %v9701_v46, %v12331_v32  ;;  %v12597_v27 = vpop.permute.xlu1 %2297 }
 0x201   :  { %3171 = vperm.xlu1 %10775, %v12510_v12   ;;  %v9703_v16 = vpop.f32.mrf.mxu0 }
 0x202   :  { %15536 = vst [vmem:[#allocation9_spill] sm:$0xff] %v12595_v30  ;;  %v9704_v1 = vadd.f32 %v9703_v16, %v9702_v5 }
 0x203   :  { %v9705_v24 = vpop.f32.mrf.mxu0  ;;  %v12600_v23 = vpop.permute.xlu0 %2710  ;;  %10780 = vset.pattern.permute.xlu0 %v11301_v52 }
 0x204   :  { %v12604_v42 = vadd.f32 %v9704_v1, %v12339_v28  ;;  %v12606_v34 = vpop.permute.xlu1 %2303  ;;  %3608 = vperm.xlu0 %10780, %v12146_v35  }
 0x205   :  { %3177 = vperm.xlu1 %10775, %v12530_v61   ;;  %v9706_v32 = vpop.f32.mrf.mxu0 }
 0x206   :  { %v9707_v46 = vadd.f32 %v9706_v32, %v9705_v24 }
 0x207   :  { %v9708_v30 = vpop.f32.mrf.mxu0  ;;  %v12610_v25 = vpop.permute.xlu0 %2719 }
 0x208   :  { %v12613_v5 = vadd.f32 %v9707_v46, %v12348_v62  ;;  %3617 = vperm.xlu0 %10780, %v12161_v19   ;;  %v10980_v62 = vld [vmem:[#allocation2 + $0x3b8] sm:$0xff]  }
 0x209   :  { %3183 = vperm.xlu1 %10775, %v12549_v45   ;;  %v2366_v28 = vpop.permute.xlu1 %2365  ;;  %v9709_v24 = vpop.f32.mrf.mxu0 }
 0x20a   :  { %vm2410_vm3 = vcmp.eq.s32.totalorder %v2366_v28, %v11537_v9  ;;  %v9710_v1 = vadd.f32 %v9709_v24, %v9708_v30  ;;  %v10982_v28 = vld [vmem:[#allocation2 + $0x3b0] sm:$0xff]  }
 0x20b   :  { %vm8563_vm4 = vmpackc.low %vm2410_vm3, %vm2409_vm0  ;;  %v9711_v16 = vpop.f32.mrf.mxu0  ;;  %v12624_v32 = vpop.permute.xlu0 %2725  ;;  %vm2309_vm0 = vcmp.eq.s32.totalorder %v12375_v47, %v11537_v9 }
 0x20c   :  { %v12627_v46 = vadd.f32 %v9710_v1, %v12366_v29  ;;  %8564 = vmatprep.mubr.msk.bf16.mxu1 %vm8563_vm4, %v15525_v59  ;;  %3623 = vperm.xlu0 %10780, %v12180_v63   ;;  %v10983_v1 = vld [vmem:[#allocation2 + $0x3e8] sm:$0xff]   ;;  %vm8573_vm3 = vmpackc.low %vm2310_vm15, %vm2309_vm0 }
 0x20d   :  { %3189 = vperm.xlu1 %10775, %v12568_v53   ;;  %v2369_v38 = vpop.permute.xlu1 %2368  ;;  %v9712_v48 = vpop.f32.mrf.mxu0  ;;  %8566 = vmatmul.mubr.msk.bf16.vlgmr.msra.gmra.mxu1 %vm8565_vm5, %v15525_v59  ;;  %vm2312_vm5 = vcmp.eq.s32.totalorder %v12557_v21, %v11537_v9 }
 0x20e   :  { %vm2411_vm7 = vcmp.eq.s32.totalorder %v2369_v38, %v11537_v9  ;;  %v9713_v30 = vadd.f32 %v9712_v48, %v9711_v16  ;;  %10004 = vmatpush3.bf16.msra.mxu1 %v10980_v62 }
 0x20f   :  { %vm8567_vm8 = vmpackc.low %vm2412_vm6, %vm2411_vm7  ;;  %v9714_v29 = vpop.f32.mrf.mxu0  ;;  %v12636_v24 = vpop.permute.xlu0 %2731  ;;  %10005 = vmatprep.subr.bf16.mxu1 %v10981_v50  ;;  %vm2311_vm6 = vcmp.eq.s32.totalorder %v12392_v22, %v11537_v9 }
 0x210   :  { %v12639_v0 = vadd.f32 %v9713_v30, %v12378_v4  ;;  %8568 = vmatprep.mubr.msk.bf16.mxu1 %vm8567_vm8, %v15525_v59  ;;  %3629 = vperm.xlu0 %10780, %v12195_v26   ;;  %v10984_v4 = vld [vmem:[#allocation2 + $0x3a8] sm:$0xff]   ;;  %vm2418_vm8 = vcmp.eq.s32.totalorder %v12540_v15, %v11537_v9  ;;  %vm8577_vm9 = vmpackc.low %vm2312_vm5, %vm2311_vm6 }
 0x211   :  { %3195 = vperm.xlu1 %10775, %v12106_v43   ;;  %v2375_v62 = vpop.permute.xlu1 %2374  ;;  %v9715_v16 = vpop.f32.mrf.mxu0 }
 0x212   :  { %vm2413_vm10 = vcmp.eq.s32.totalorder %v2375_v62, %v11537_v9  ;;  %v9716_v38 = vadd.f32 %v9715_v16, %v9714_v29  ;;  %10006 = vmatpush3.bf16.msra.mxu1 %v10982_v28 }
 0x213   :  { %v9717_v50 = vpop.f32.mrf.mxu0  ;;  %v12651_v48 = vpop.permute.xlu0 %2737  ;;  %10007 = vmatprep.subr.bf16.mxu1 %v10983_v1  ;;  %vm8571_vm14 = vmpackc.low %vm2414_vm11, %vm2413_vm10  ;;  %vm2314_vm11 = vcmp.eq.s32.totalorder %v12571_v56, %v11537_v9 }
 0x214   :  { %v12654_v43 = vadd.f32 %v9716_v38, %v12397_v55  ;;  %3635 = vperm.xlu0 %10780, %v12215_v49   ;;  %v10987_v55 = vld [vmem:[#allocation2 + $0x3d8] sm:$0xff]   ;;  %vm8581_vm15 = vmpackc.low %vm2314_vm11, %vm2313_vm12 }
 0x215   :  { %3201 = vperm.xlu1 %10775, %v12123_v58   ;;  %v2381_v41 = vpop.permute.xlu1 %2380  ;;  %v9718_v30 = vpop.f32.mrf.mxu0  ;;  %8570 = vmatmul.mubr.msk.bf16.gmra.mxu1 %vm8569_vm13, %v15525_v59  ;;  %v15537_v58 = vmov 15  }
 0x216   :  { %v9719_v28 = vadd.f32 %v9718_v30, %v9717_v50  ;;  %8572 = vmatprep.mubr.msk.bf16.mxu1 %vm8571_vm14, %v15525_v59  ;;  %10008 = vmatpush3.bf16.msra.mxu1 %v10984_v4  ;;  %vm2415_vm1 = vcmp.eq.s32.totalorder %v2381_v41, %v11537_v9  ;;  %vm2420_vm14 = vcmp.eq.s32.totalorder %v12562_v11, %v11537_v9 }
 0x217   :  { %v9720_v29 = vpop.f32.mrf.mxu0  ;;  %v12660_v1 = vpop.permute.xlu0 %2743  ;;  %10009 = vmatprep.subr.bf16.mxu1 %v10985_v6  ;;  %v10989_v6 = vld [vmem:[#allocation2 + $0x3d0] sm:$0xff]   ;;  %vm8575_vm4 = vmpackc.low %vm2416_vm2, %vm2415_vm1  ;;  %vm2316_vm1 = vcmp.eq.s32.totalorder %v12587_v2, %v11537_v9  ;;  %vm2315_vm2 = vcmp.eq.s32.totalorder %v12420_v31, %v11537_v9 }
 0x218   :  { %v12663_v62 = vadd.f32 %v9719_v28, %v12406_v10  ;;  %3641 = vperm.xlu0 %10780, %v12232_v13   ;;  %v10990_v28 = vld [vmem:[#allocation2 + $0x390] sm:$0xff]   ;;  %vm8585_vm5 = vmpackc.low %vm2316_vm1, %vm2315_vm2  ;;  %vm2755_vm2 = vcmp.eq.s32.totalorder %v12600_v23, %v11537_v9 }
 0x219   :  { %10778 = vset.pattern.permute.xlu1 %v15537_v58  ;;  %v2387_v16 = vpop.permute.xlu1 %2386  ;;  %v9721_v38 = vpop.f32.mrf.mxu0  ;;  %v12881_v23 = vld [vmem:[%s15482_s0 + $0x50] sm:$0xff] }
 0x21a   :  { %v9722_v4 = vadd.f32 %v9721_v38, %v9720_v29  ;;  %3263 = vperm.xlu1 %10778, %v12146_v35   ;;  %10010 = vmatpush3.bf16.msra.mxu1 %v10986_v33  ;;  %v15490_v29 = vmov 17   ;;  %vm2417_vm7 = vcmp.eq.s32.totalorder %v2387_v16, %v11537_v9 }
 0x21b   :  { %v9723_v10 = vpop.f32.mrf.mxu0  ;;  %v12675_v50 = vpop.permute.xlu0 %2749  ;;  %10011 = vmatprep.subr.bf16.mxu1 %v10987_v55  ;;  %v10991_v55 = vld [vmem:[#allocation2 + $0x3c8] sm:$0xff]   ;;  %vm8579_vm10 = vmpackc.low %vm2418_vm8, %vm2417_vm7  ;;  %vm2318_vm7 = vcmp.eq.s32.totalorder %v12597_v27, %v11537_v9 }
 0x21c   :  { %v12678_v47 = vadd.f32 %v9722_v4, %v12422_v60  ;;  %3647 = vperm.xlu0 %10780, %v12252_v7  }
 0x21d   :  { %v2393_v41 = vpop.permute.xlu1 %2392  ;;  %v9724_v30 = vpop.f32.mrf.mxu0  ;;  %8574 = vmatmul.mubr.msk.bf16.gmra.mxu1 %vm8573_vm3, %v15525_v59 }
 0x21e   :  { %v9725_v57 = vadd.f32 %v9724_v30, %v9723_v10  ;;  %3266 = vperm.xlu1 %10778, %v12577_v8   ;;  %8576 = vmatprep.mubr.msk.bf16.mxu1 %vm8575_vm4, %v15525_v59  ;;  %v10992_v10 = vld [vmem:[#allocation2 + $0x388] sm:$0xff]   ;;  %vm2419_vm13 = vcmp.eq.s32.totalorder %v2393_v41, %v11537_v9  ;;  %vm2422_vm4 = vcmp.eq.s32.totalorder %v12580_v17, %v11537_v9 }
 0x21f   :  { %v9726_v35 = vpop.f32.mrf.mxu0  ;;  %10012 = vmatpush3.bf16.msra.mxu1 %v10988_v39  ;;  %v10993_v39 = vld [vmem:[#allocation2 + $0x3c0] sm:$0xff]   ;;  %vm8583_vm0 = vmpackc.low %vm2420_vm14, %vm2419_vm13  ;;  %vm2320_vm13 = vcmp.eq.s32.totalorder %v12606_v34, %v11537_v9 }
 0x220   :  { %v12685_v33 = vadd.f32 %v9725_v57, %v12433_v20  ;;  %v12687_v60 = vpop.permute.xlu0 %2811  ;;  %10781 = vset.pattern.permute.xlu0 %v15490_v29  ;;  %10013 = vmatprep.subr.bf16.mxu1 %v10989_v6 }
 0x221   :  { %v12694_v58 = vpop.permute.xlu1 %2398  ;;  %v9727_v38 = vpop.f32.mrf.mxu0  ;;  %3709 = vperm.xlu0 %10781, %v12471_v51  }
 0x222   :  { %v9728_v20 = vadd.f32 %v9727_v38, %v9726_v35  ;;  %3272 = vperm.xlu1 %10778, %v12161_v19   ;;  %vm2421_vm3 = vcmp.eq.s32.totalorder %v12694_v58, %v11537_v9 }
 0x223   :  { %v9729_v4 = vpop.f32.mrf.mxu0  ;;  %10014 = vmatpush3.bf16.msra.mxu1 %v10990_v28  ;;  %vm8587_vm6 = vmpackc.low %vm2422_vm4, %vm2421_vm3 }
 0x224   :  { %v12702_v21 = vadd.f32 %v9728_v20, %v12450_v37  ;;  %v12704_v22 = vpop.permute.xlu0 %2820  ;;  %10015 = vmatprep.subr.bf16.mxu1 %v10991_v55  ;;  %v10994_v37 = vld [vmem:[#allocation2 + $0x380] sm:$0xff]  }
 0x225   :  { %v12706_v6 = vpop.permute.xlu1 %2404  ;;  %v9730_v16 = vpop.f32.mrf.mxu0  ;;  %8578 = vmatmul.mubr.msk.bf16.gmra.mxu1 %vm8577_vm9, %v15525_v59  ;;  %3718 = vperm.xlu0 %10781, %v12491_v18  }
 0x226   :  { %v9731_v19 = vadd.f32 %v9730_v16, %v9729_v4  ;;  %3278 = vperm.xlu1 %10778, %v12180_v63   ;;  %8580 = vmatprep.mubr.msk.bf16.mxu1 %vm8579_vm10, %v15525_v59  ;;  %v15538_v16 = vld [vmem:[#allocation10_spill] sm:$0xff]  ;;  %vm2423_vm9 = vcmp.eq.s32.totalorder %v12706_v6, %v11537_v9  ;;  %v12799_v6 = vld [vmem:[%s15482_s0 + $0x78] sm:$0xff] }
 0x227   :  { %v9732_v15 = vpop.f32.mrf.mxu0  ;;  %10016 = vmatpush3.bf16.msra.mxu1 %v10992_v10  ;;  %vm2317_vm8 = vcmp.eq.s32.totalorder %v15538_v16, %v11537_v9  ;;  %v15543_v16 = vld [vmem:[#allocation9_spill] sm:$0xff] }
 0x228   :  { %v12713_v30 = vadd.f32 %v9731_v19, %v12459_v54  ;;  %v12715_v57 = vpop.permute.xlu0 %2826  ;;  %10017 = vmatprep.subr.bf16.mxu1 %v10993_v39  ;;  %vm8589_vm11 = vmpackc.low %vm2318_vm7, %vm2317_vm8 }
 0x229   :  { %v9733_v35 = vpop.f32.mrf.mxu0  ;;  %3724 = vperm.xlu0 %10781, %v12510_v12  }
 0x22a   :  { %v9734_v63 = vadd.f32 %v9733_v35, %v9732_v15  ;;  %3284 = vperm.xlu1 %10778, %v12195_v26   ;;  %v12726_v54 = vpop.permute.xlu1 %2707 }
 0x22b   :  { %v9735_v28 = vpop.f32.mrf.mxu0  ;;  %10018 = vmatpush3.bf16.msra.mxu1 %v10994_v37  ;;  %v15540_v37 = vld [vmem:[#allocation7_spill] sm:$0xff]  ;;  %vm2754_vm1 = vcmp.eq.s32.totalorder %v12726_v54, %v11537_v9 }
 0x22c   :  { %v12729_v56 = vadd.f32 %v9734_v63, %v12483_v44  ;;  %v12731_v3 = vpop.permute.xlu0 %2832 }
 0x22d   :  { %v9736_v55 = vpop.f32.mrf.mxu0  ;;  %8582 = vmatmul.mubr.msk.bf16.gmra.mxu1 %vm8581_vm15, %v15525_v59  ;;  %3730 = vperm.xlu0 %10781, %v12530_v61  }
 0x22e   :  { %v9737_v11 = vadd.f32 %v9736_v55, %v9735_v28  ;;  %3290 = vperm.xlu1 %10778, %v12215_v49   ;;  %v12736_v26 = vpop.permute.xlu1 %2713  ;;  %8584 = vmatprep.mubr.msk.bf16.mxu1 %vm8583_vm0, %v15525_v59  ;;  %v15541_v55 = vld [vmem:[#allocation11_spill] sm:$0xff]  ;;  %vm2858_vm0 = vcmp.eq.s32.totalorder %v12687_v60, %v11537_v9 }
 0x22f   :  { %v9738_v41 = vpop.f32.mrf.mxu0  ;;  %vm2319_vm14 = vcmp.eq.s32.totalorder %v15541_v55, %v11537_v9 }
 0x230   :  { %v12740_v38 = vadd.f32 %v9737_v11, %v12499_v36  ;;  %v12742_v44 = vpop.permute.xlu0 %2838  ;;  %vm8593_vm15 = vmpackc.low %vm2320_vm13, %vm2319_vm14 }
 0x231   :  { %v9739_v20 = vpop.f32.mrf.mxu0  ;;  %3736 = vperm.xlu0 %10781, %v12549_v45  }
 0x232   :  { %v9740_v49 = vadd.f32 %v9739_v20, %v9738_v41  ;;  %3296 = vperm.xlu1 %10778, %v12232_v13   ;;  %v12754_v36 = vpop.permute.xlu1 %2716  ;;  %v15489_v20 = vmov 18  }
 0x233   :  { %v9741_v4 = vpop.f32.mrf.mxu0 }
 0x234   :  { %v12757_v2 = vadd.f32 %v9740_v49, %v12522_v40  ;;  %v12759_v31 = vpop.permute.xlu0 %2844 }
 0x235   :  { %v9742_v10 = vpop.f32.mrf.mxu0  ;;  %8586 = vmatmul.mubr.msk.bf16.gmra.mxu1 %vm8585_vm5, %v15525_v59  ;;  %3742 = vperm.xlu0 %10781, %v12568_v53   ;;  %vm8645_vm5 = vmpackc.low %vm2755_vm2, %vm2754_vm1  ;;  %vm2865_vm2 = vcmp.eq.s32.totalorder %v12731_v3, %v11537_v9 }
 0x236   :  { %v9743_v58 = vadd.f32 %v9742_v10, %v9741_v4  ;;  %3302 = vperm.xlu1 %10778, %v12252_v7   ;;  %v12764_v17 = vpop.permute.xlu1 %2722  ;;  %8588 = vmatprep.mubr.msk.bf16.mxu1 %vm8587_vm6, %v15525_v59  ;;  %v12779_v7 = vld [vmem:[%s15482_s0 + $0x68] sm:$0xff]  ;;  %vm2861_vm6 = vcmp.eq.s32.totalorder %v12704_v22, %v11537_v9 }
 0x237   :  { %v9744_v13 = vpop.f32.mrf.mxu0  ;;  %v12818_v4 = vld [vmem:[%s15482_s0 + $0x8] sm:$0xff] }
 0x238   :  { %v12768_v39 = vadd.f32 %v9743_v58, %v12538_v14  ;;  %v12770_v40 = vpop.permute.xlu0 %2850  ;;  %v15539_v14 = vld [vmem:[#allocation8_spill] sm:$0xff] }
 0x239   :  { %v9745_v19 = vpop.f32.mrf.mxu0  ;;  %3748 = vperm.xlu0 %10781, %v12779_v7   ;;  %vm2424_vm10 = vcmp.eq.s32.totalorder %v15539_v14, %v11537_v9 }
 0x23a   :  { %v9746_v15 = vadd.f32 %v9745_v19, %v9744_v13  ;;  %10779 = vset.pattern.permute.xlu1 %v11301_v52  ;;  %v12787_v27 = vpop.permute.xlu1 %2728  ;;  %vm8591_vm12 = vmpackc.low %vm2424_vm10, %vm2423_vm9  ;;  %v10995_v52 = vld [vmem:[#allocation2 + $0x478] sm:$0xff]   ;;  %vm2757_vm9 = vcmp.eq.s32.totalorder %v12754_v36, %v11537_v9  ;;  %v11001_v36 = vld [vmem:[#allocation2 + $0x460] sm:$0xff]  }
 0x23b   :  { %3605 = vperm.xlu1 %10779, %v12471_v51   ;;  %10067 = vmatprep.subr.bf16.mxu0 %v10995_v52 }
 0x23c   :  { %v12791_v35 = vadd.f32 %v9746_v15, %v15540_v37  ;;  %v12793_v63 = vpop.permute.xlu0 %2856  ;;  %v12833_v15 = vld [vmem:[%s15482_s0 + $0x20] sm:$0xff] }
 0x23d   :  { %8590 = vmatmul.mubr.msk.bf16.gmra.mxu1 %vm8589_vm11, %v15525_v59  ;;  %3754 = vperm.xlu0 %10781, %v12799_v6   ;;  %vm2863_vm11 = vcmp.eq.s32.totalorder %v12715_v57, %v11537_v9 }
 0x23e   :  { %v12802_v28 = vpop.permute.xlu1 %2734  ;;  %8592 = vmatprep.mubr.msk.bf16.mxu1 %vm8591_vm12, %v15525_v59  ;;  %vm2756_vm12 = vcmp.eq.s32.totalorder %v12736_v26, %v11537_v9 }
 0x23f   :  { %3611 = vperm.xlu1 %10779, %v12577_v8   ;;  %vm8649_vm13 = vmpackc.low %vm2757_vm9, %vm2756_vm12  ;;  %vm2762_vm12 = vcmp.eq.s32.totalorder %v12636_v24, %v11537_v9 }
 0x241   :  { %v9763_v11 = vpop.f32.mrf.mxu1  ;;  %v12810_v41 = vpop.permute.xlu0 %3159  ;;  %10784 = vset.pattern.permute.xlu0 %v15489_v20 }
 0x242   :  { %v12813_v49 = vpop.permute.xlu1 %2740  ;;  %4057 = vperm.xlu0 %10784, %v12818_v4  }
 0x243   :  { %3614 = vperm.xlu1 %10779, %v12491_v18   ;;  %v9764_v34 = vpop.f32.mrf.mxu1 }
 0x244   :  { %v9765_v10 = vadd.f32 %v9764_v34, %v9763_v11 }
 0x245   :  { %v9766_v58 = vpop.f32.mrf.mxu1  ;;  %8594 = vmatmul.mubr.msk.bf16.gmra.mxu1 %vm8593_vm15, %v15525_v59  ;;  %v12823_v13 = vpop.permute.xlu0 %3168  ;;  %vm2759_vm15 = vcmp.eq.s32.totalorder %v12764_v17, %v11537_v9  ;;  %v11004_v17 = vld [vmem:[#allocation2 + $0x418] sm:$0xff]  }
 0x246   :  { %15542 = vst [vmem:[#allocation5_spill] sm:$0xff] %v12823_v13  ;;  %v12826_v19 = vadd.f32 %v9765_v10, %v15543_v16  ;;  %v12828_v14 = vpop.permute.xlu1 %2746  ;;  %4066 = vperm.xlu0 %10784, %v12833_v15   ;;  %v12847_v16 = vld [vmem:[%s15482_s0 + $0x30] sm:$0xff] }
 0x247   :  { %3620 = vperm.xlu1 %10779, %v12510_v12   ;;  %v9767_v37 = vpop.f32.mrf.mxu1 }
 0x248   :  { %v9768_v52 = vadd.f32 %v9767_v37, %v9766_v58 }
 0x249   :  { %v9769_v55 = vpop.f32.mrf.mxu1  ;;  %v12837_v11 = vpop.permute.xlu0 %3174 }
 0x24a   :  { %15544 = vst [vmem:[#allocation6_spill] sm:$0xff] %v12837_v11  ;;  %v12840_v34 = vadd.f32 %v9768_v52, %v12604_v42  ;;  %v12842_v10 = vpop.permute.xlu1 %2752  ;;  %4072 = vperm.xlu0 %10784, %v12847_v16   ;;  %v12861_v42 = vld [vmem:[%s15482_s0 + $0x40] sm:$0xff] }
 0x24b   :  { %3626 = vperm.xlu1 %10779, %v12530_v61   ;;  %v9770_v20 = vpop.f32.mrf.mxu1 }
 0x24c   :  { %v9771_v29 = vadd.f32 %v9770_v20, %v9769_v55  ;;  %v10996_v20 = vld [vmem:[#allocation2 + $0x438] sm:$0xff]  }
 0x24d   :  { %v9772_v58 = vpop.f32.mrf.mxu1  ;;  %v12851_v37 = vpop.permute.xlu0 %3180 }
 0x24e   :  { %15545 = vst [vmem:[#allocation10_spill] sm:$0xff] %v12851_v37  ;;  %v12854_v11 = vadd.f32 %v9771_v29, %v12613_v5  ;;  %4078 = vperm.xlu0 %10784, %v12861_v42   ;;  %v10997_v37 = vld [vmem:[#allocation2 + $0x470] sm:$0xff]  }
 0x24f   :  { %3632 = vperm.xlu1 %10779, %v12549_v45   ;;  %v2815_v5 = vpop.permute.xlu1 %2814  ;;  %v9773_v29 = vpop.f32.mrf.mxu1 }
 0x250   :  { %vm2859_vm3 = vcmp.eq.s32.totalorder %v2815_v5, %v11537_v9  ;;  %v9774_v60 = vadd.f32 %v9773_v29, %v9772_v58  ;;  %v10998_v5 = vld [vmem:[#allocation2 + $0x430] sm:$0xff]  }
 0x251   :  { %vm8643_vm4 = vmpackc.low %vm2859_vm3, %vm2858_vm0  ;;  %v9775_v52 = vpop.f32.mrf.mxu1  ;;  %v12870_v55 = vpop.permute.xlu0 %3186  ;;  %vm2758_vm0 = vcmp.eq.s32.totalorder %v12610_v25, %v11537_v9 }
 0x252   :  { %15546 = vst [vmem:[#allocation8_spill] sm:$0xff] %v12870_v55  ;;  %v12873_v13 = vadd.f32 %v9774_v60, %v12627_v46  ;;  %8644 = vmatprep.mubr.msk.bf16.mxu0 %vm8643_vm4, %v15525_v59  ;;  %4084 = vperm.xlu0 %10784, %v12881_v23   ;;  %v10999_v60 = vld [vmem:[#allocation2 + $0x468] sm:$0xff]   ;;  %vm8653_vm3 = vmpackc.low %vm2759_vm15, %vm2758_vm0 }
 0x253   :  { %3638 = vperm.xlu1 %10779, %v12568_v53   ;;  %v2818_v54 = vpop.permute.xlu1 %2817  ;;  %v9776_v58 = vpop.f32.mrf.mxu1  ;;  %8646 = vmatmul.mubr.msk.bf16.vlgmr.msra.gmra.mxu0 %vm8645_vm5, %v15525_v59  ;;  %vm2761_vm5 = vcmp.eq.s32.totalorder %v12787_v27, %v11537_v9 }
 0x254   :  { %15547 = vst [vmem:[#allocation7_spill] sm:$0xff] %v12873_v13  ;;  %vm2860_vm7 = vcmp.eq.s32.totalorder %v2818_v54, %v11537_v9  ;;  %v9777_v46 = vadd.f32 %v9776_v58, %v9775_v52  ;;  %10068 = vmatpush3.bf16.msra.mxu0 %v10996_v20  ;;  %v12896_v13 = vld [vmem:[%s15482_s0 + $0x60] sm:$0xff]  ;;  %v11000_v52 = vld [vmem:[#allocation2 + $0x428] sm:$0xff]  }
 0x255   :  { %vm8647_vm8 = vmpackc.low %vm2861_vm6, %vm2860_vm7  ;;  %v9778_v22 = vpop.f32.mrf.mxu1  ;;  %v12887_v29 = vpop.permute.xlu0 %3192  ;;  %10069 = vmatprep.subr.bf16.mxu0 %v10997_v37  ;;  %vm2760_vm6 = vcmp.eq.s32.totalorder %v12624_v32, %v11537_v9 }
 0x256   :  { %v12890_v55 = vadd.f32 %v9777_v46, %v12639_v0  ;;  %8648 = vmatprep.mubr.msk.bf16.mxu0 %vm8647_vm8, %v15525_v59  ;;  %4090 = vperm.xlu0 %10784, %v12896_v13   ;;  %vm2867_vm8 = vcmp.eq.s32.totalorder %v12742_v44, %v11537_v9  ;;  %vm8657_vm9 = vmpackc.low %vm2761_vm5, %vm2760_vm6 }
 0x257   :  { %3644 = vperm.xlu1 %10779, %v12779_v7   ;;  %v2824_v20 = vpop.permute.xlu1 %2823  ;;  %v9779_v37 = vpop.f32.mrf.mxu1 }
 0x258   :  { %vm2862_vm10 = vcmp.eq.s32.totalorder %v2824_v20, %v11537_v9  ;;  %v9780_v0 = vadd.f32 %v9779_v37, %v9778_v22  ;;  %10070 = vmatpush3.bf16.msra.mxu0 %v10998_v5  ;;  %v12915_v22 = vld [vmem:[%s15482_s0 + $0x70] sm:$0xff]  ;;  %v11003_v20 = vld [vmem:[#allocation2 + $0x458] sm:$0xff]  }
 0x259   :  { %v9781_v54 = vpop.f32.mrf.mxu1  ;;  %v12907_v58 = vpop.permute.xlu0 %3198  ;;  %10071 = vmatprep.subr.bf16.mxu0 %v10999_v60  ;;  %vm8651_vm14 = vmpackc.low %vm2863_vm11, %vm2862_vm10  ;;  %vm2763_vm11 = vcmp.eq.s32.totalorder %v12802_v28, %v11537_v9 }
 0x25a   :  { %15548 = vst [vmem:[#allocation11_spill] sm:$0xff] %v12907_v58  ;;  %v12910_v46 = vadd.f32 %v9780_v0, %v12654_v43  ;;  %4096 = vperm.xlu0 %10784, %v12915_v22   ;;  %v11002_v43 = vld [vmem:[#allocation2 + $0x420] sm:$0xff]   ;;  %v15492_v58 = vmov 19   ;;  %vm8661_vm15 = vmpackc.low %vm2763_vm11, %vm2762_vm12 }
 0x25b   :  { %3650 = vperm.xlu1 %10779, %v12799_v6   ;;  %v2830_v57 = vpop.permute.xlu1 %2829  ;;  %v9782_v26 = vpop.f32.mrf.mxu1  ;;  %8650 = vmatmul.mubr.msk.bf16.gmra.mxu0 %vm8649_vm13, %v15525_v59 }
 0x25c   :  { %v9783_v5 = vadd.f32 %v9782_v26, %v9781_v54  ;;  %8652 = vmatprep.mubr.msk.bf16.mxu0 %vm8651_vm14, %v15525_v59  ;;  %10072 = vmatpush3.bf16.msra.mxu0 %v11000_v52  ;;  %v15549_v54 = vmov 17   ;;  %vm2864_vm1 = vcmp.eq.s32.totalorder %v2830_v57, %v11537_v9  ;;  %vm2869_vm14 = vcmp.eq.s32.totalorder %v12759_v31, %v11537_v9 }
 0x25d   :  { %v9784_v60 = vpop.f32.mrf.mxu1  ;;  %10073 = vmatprep.subr.bf16.mxu0 %v11001_v36  ;;  %vm8655_vm4 = vmpackc.low %vm2865_vm2, %vm2864_vm1  ;;  %vm2765_vm1 = vcmp.eq.s32.totalorder %v12813_v49, %v11537_v9  ;;  %vm2764_vm2 = vcmp.eq.s32.totalorder %v12651_v48, %v11537_v9 }
 0x25e   :  { %v12922_v37 = vadd.f32 %v9783_v5, %v12663_v62  ;;  %v12924_v0 = vpop.permute.xlu0 %3260  ;;  %10785 = vset.pattern.permute.xlu0 %v15492_v58  ;;  %vm8665_vm5 = vmpackc.low %vm2765_vm1, %vm2764_vm2  ;;  %vm3204_vm2 = vcmp.eq.s32.totalorder %v12810_v41, %v11537_v9  ;;  %v15555_v41 = vld [vmem:[#allocation7_spill] sm:$0xff]  ;;  %v11015_v58 = vld [vmem:[#allocation2 + $0x4e8] sm:$0xff]  }
 0x25f   :  { %10782 = vset.pattern.permute.xlu1 %v15549_v54  ;;  %v2836_v52 = vpop.permute.xlu1 %2835  ;;  %v9785_v26 = vpop.f32.mrf.mxu1  ;;  %4158 = vperm.xlu0 %10785, %v12471_v51   ;;  %v11005_v54 = vld [vmem:[#allocation2 + $0x450] sm:$0xff]  }
 0x260   :  { %v9786_v62 = vadd.f32 %v9785_v26, %v9784_v60  ;;  %3712 = vperm.xlu1 %10782, %v12818_v4   ;;  %10074 = vmatpush3.bf16.msra.mxu0 %v11002_v43  ;;  %v11006_v60 = vld [vmem:[#allocation2 + $0x410] sm:$0xff]   ;;  %v11007_v26 = vld [vmem:[#allocation2 + $0x448] sm:$0xff]   ;;  %vm2866_vm7 = vcmp.eq.s32.totalorder %v2836_v52, %v11537_v9 }
 0x261   :  { %v9787_v36 = vpop.f32.mrf.mxu1  ;;  %10075 = vmatprep.subr.bf16.mxu0 %v11003_v20  ;;  %vm8659_vm10 = vmpackc.low %vm2867_vm8, %vm2866_vm7  ;;  %vm2767_vm7 = vcmp.eq.s32.totalorder %v12828_v14, %v11537_v9  ;;  %vm2766_vm8 = vcmp.eq.s32.totalorder %v12660_v1, %v11537_v9  ;;  %v13049_v1 = vld [vmem:[%s15482_s0] sm:$0xff] }
 0x262   :  { %v12938_v25 = vadd.f32 %v9786_v62, %v12678_v47  ;;  %v12940_v5 = vpop.permute.xlu0 %3269  ;;  %vm8669_vm11 = vmpackc.low %vm2767_vm7, %vm2766_vm8 }
 0x263   :  { %v2842_v51 = vpop.permute.xlu1 %2841  ;;  %v9788_v57 = vpop.f32.mrf.mxu1  ;;  %8654 = vmatmul.mubr.msk.bf16.gmra.mxu0 %vm8653_vm3, %v15525_v59  ;;  %4167 = vperm.xlu0 %10785, %v12491_v18  }
 0x264   :  { %v9789_v3 = vadd.f32 %v9788_v57, %v9787_v36  ;;  %3715 = vperm.xlu1 %10782, %v12577_v8   ;;  %8656 = vmatprep.mubr.msk.bf16.mxu0 %vm8655_vm4, %v15525_v59  ;;  %vm2868_vm13 = vcmp.eq.s32.totalorder %v2842_v51, %v11537_v9  ;;  %vm2871_vm4 = vcmp.eq.s32.totalorder %v12770_v40, %v11537_v9 }
 0x265   :  { %v9790_v43 = vpop.f32.mrf.mxu1  ;;  %10076 = vmatpush3.bf16.msra.mxu0 %v11004_v17  ;;  %v11008_v17 = vld [vmem:[#allocation2 + $0x408] sm:$0xff]   ;;  %vm8663_vm0 = vmpackc.low %vm2869_vm14, %vm2868_vm13  ;;  %vm2769_vm13 = vcmp.eq.s32.totalorder %v12842_v10, %v11537_v9  ;;  %vm2768_vm14 = vcmp.eq.s32.totalorder %v12675_v50, %v11537_v9 }
 0x266   :  { %v12947_v47 = vadd.f32 %v9789_v3, %v12685_v33  ;;  %v12949_v20 = vpop.permute.xlu0 %3275  ;;  %10077 = vmatprep.subr.bf16.mxu0 %v11005_v54  ;;  %v11009_v54 = vld [vmem:[#allocation2 + $0x440] sm:$0xff]  }
 0x267   :  { %v12955_v18 = vpop.permute.xlu1 %2847  ;;  %v9791_v62 = vpop.f32.mrf.mxu1  ;;  %4173 = vperm.xlu0 %10785, %v12510_v12  }
 0x268   :  { %v9792_v33 = vadd.f32 %v9791_v62, %v9790_v43  ;;  %3721 = vperm.xlu1 %10782, %v12833_v15   ;;  %vm2870_vm3 = vcmp.eq.s32.totalorder %v12955_v18, %v11537_v9 }
 0x269   :  { %v9793_v36 = vpop.f32.mrf.mxu1  ;;  %10078 = vmatpush3.bf16.msra.mxu0 %v11006_v60  ;;  %vm8667_vm6 = vmpackc.low %vm2871_vm4, %vm2870_vm3 }
 0x26a   :  { %v12963_v27 = vadd.f32 %v9792_v33, %v12702_v21  ;;  %v12965_v32 = vpop.permute.xlu0 %3281  ;;  %10079 = vmatprep.subr.bf16.mxu0 %v11007_v26  ;;  %v11010_v21 = vld [vmem:[#allocation2 + $0x400] sm:$0xff]  }
 0x26b   :  { %v12967_v12 = vpop.permute.xlu1 %2853  ;;  %v9794_v52 = vpop.f32.mrf.mxu1  ;;  %8658 = vmatmul.mubr.msk.bf16.gmra.mxu0 %vm8657_vm9, %v15525_v59  ;;  %4179 = vperm.xlu0 %10785, %v12530_v61  }
 0x26c   :  { %v9795_v44 = vadd.f32 %v9794_v52, %v9793_v36  ;;  %3727 = vperm.xlu1 %10782, %v12847_v16   ;;  %8660 = vmatprep.mubr.msk.bf16.mxu0 %vm8659_vm10, %v15525_v59  ;;  %vm2872_vm9 = vcmp.eq.s32.totalorder %v12967_v12, %v11537_v9  ;;  %vm2873_vm10 = vcmp.eq.s32.totalorder %v12793_v63, %v11537_v9  ;;  %v11011_v12 = vld [vmem:[#allocation2 + $0x4f8] sm:$0xff]  }
 0x26d   :  { %v9796_v57 = vpop.f32.mrf.mxu1  ;;  %10080 = vmatpush3.bf16.msra.mxu0 %v11008_v17  ;;  %vm8671_vm12 = vmpackc.low %vm2873_vm10, %vm2872_vm9  ;;  %10131 = vmatprep.subr.bf16.mxu1 %v11011_v12  ;;  %v13104_v12 = vld [vmem:[%s15482_s0 + $0x38] sm:$0xff] }
 0x26e   :  { %v12974_v3 = vadd.f32 %v9795_v44, %v12713_v30  ;;  %v12976_v43 = vpop.permute.xlu0 %3287  ;;  %10081 = vmatprep.subr.bf16.mxu0 %v11009_v54 }
 0x26f   :  { %v9797_v61 = vpop.f32.mrf.mxu1  ;;  %4185 = vperm.xlu0 %10785, %v12549_v45  }
 0x270   :  { %v9798_v60 = vadd.f32 %v9797_v61, %v9796_v57  ;;  %3733 = vperm.xlu1 %10782, %v12861_v42   ;;  %v12987_v30 = vpop.permute.xlu1 %3156  ;;  %v15550_v61 = vmov 18  }
 0x271   :  { %v9799_v26 = vpop.f32.mrf.mxu1  ;;  %10082 = vmatpush3.bf16.msra.mxu0 %v11010_v21  ;;  %v15491_v21 = vmov 20   ;;  %vm3203_vm1 = vcmp.eq.s32.totalorder %v12987_v30, %v11537_v9  ;;  %v11013_v30 = vld [vmem:[#allocation2 + $0x4f0] sm:$0xff]  }
 0x272   :  { %v12990_v28 = vadd.f32 %v9798_v60, %v12729_v56  ;;  %v12992_v24 = vpop.permute.xlu0 %3293 }
 0x273   :  { %v9800_v45 = vpop.f32.mrf.mxu1  ;;  %8662 = vmatmul.mubr.msk.bf16.gmra.mxu0 %vm8661_vm15, %v15525_v59  ;;  %4191 = vperm.xlu0 %10785, %v12568_v53   ;;  %vm8673_vm15 = vmpackc.low %vm2769_vm13, %vm2768_vm14 }
 0x274   :  { %v9801_v31 = vadd.f32 %v9800_v45, %v9799_v26  ;;  %3739 = vperm.xlu1 %10782, %v12881_v23   ;;  %v12997_v51 = vpop.permute.xlu1 %3162  ;;  %8664 = vmatprep.mubr.msk.bf16.mxu0 %vm8663_vm0, %v15525_v59  ;;  %vm3307_vm0 = vcmp.eq.s32.totalorder %v12924_v0, %v11537_v9 }
 0x275   :  { %v9802_v62 = vpop.f32.mrf.mxu1 }
 0x276   :  { %v13001_v33 = vadd.f32 %v9801_v31, %v12740_v38  ;;  %v13003_v56 = vpop.permute.xlu0 %3299 }
 0x277   :  { %v9803_v53 = vpop.f32.mrf.mxu1  ;;  %4197 = vperm.xlu0 %10785, %v12779_v7  }
 0x278   :  { %v9804_v36 = vadd.f32 %v9803_v53, %v9802_v62  ;;  %3745 = vperm.xlu1 %10782, %v12896_v13   ;;  %v13015_v38 = vpop.permute.xlu1 %3165  ;;  %v13075_v62 = vld [vmem:[%s15482_s0 + $0x18] sm:$0xff] }
 0x279   :  { %v9805_v17 = vpop.f32.mrf.mxu1  ;;  %vm3206_vm9 = vcmp.eq.s32.totalorder %v13015_v38, %v11537_v9 }
 0x27a   :  { %v13018_v49 = vadd.f32 %v9804_v36, %v12757_v2  ;;  %v13020_v48 = vpop.permute.xlu0 %3305 }
 0x27b   :  { %v9806_v54 = vpop.f32.mrf.mxu1  ;;  %8666 = vmatmul.mubr.msk.bf16.gmra.mxu0 %vm8665_vm5, %v15525_v59  ;;  %4203 = vperm.xlu0 %10785, %v12799_v6   ;;  %vm8725_vm5 = vmpackc.low %vm3204_vm2, %vm3203_vm1  ;;  %vm3314_vm2 = vcmp.eq.s32.totalorder %v12965_v32, %v11537_v9 }
 0x27c   :  { %v9807_v18 = vadd.f32 %v9806_v54, %v9805_v17  ;;  %3751 = vperm.xlu1 %10782, %v12915_v22   ;;  %v13025_v40 = vpop.permute.xlu1 %3171  ;;  %8668 = vmatprep.mubr.msk.bf16.mxu0 %vm8667_vm6, %v15525_v59  ;;  %v13090_v54 = vld [vmem:[%s15482_s0 + $0x28] sm:$0xff]  ;;  %vm3310_vm6 = vcmp.eq.s32.totalorder %v12940_v5, %v11537_v9 }
 0x27d   :  { %v9808_v52 = vpop.f32.mrf.mxu1 }
 0x27e   :  { %v13029_v44 = vadd.f32 %v9807_v18, %v12768_v39 }
 0x27f   :  { %v9809_v2 = vpop.f32.mrf.mxu1  ;;  %v13035_v57 = vpop.permute.xlu0 %3608  ;;  %10788 = vset.pattern.permute.xlu0 %v15491_v21 }
 0x280   :  { %v9810_v39 = vadd.f32 %v9809_v2, %v9808_v52  ;;  %10783 = vset.pattern.permute.xlu1 %v15550_v61  ;;  %v13043_v60 = vpop.permute.xlu1 %3177  ;;  %4506 = vperm.xlu0 %10788, %v12818_v4  }
 0x281   :  { %4054 = vperm.xlu1 %10783, %v13049_v1  }
 0x282   :  { %v13053_v14 = vadd.f32 %v9810_v39, %v12791_v35 }
 0x283   :  { %8670 = vmatmul.mubr.msk.bf16.gmra.mxu0 %vm8669_vm11, %v15525_v59  ;;  %v13056_v63 = vpop.permute.xlu0 %3617  ;;  %vm3312_vm11 = vcmp.eq.s32.totalorder %v12949_v20, %v11537_v9 }
 0x284   :  { %v13058_v26 = vpop.permute.xlu1 %3183  ;;  %8672 = vmatprep.mubr.msk.bf16.mxu0 %vm8671_vm12, %v15525_v59  ;;  %4515 = vperm.xlu0 %10788, %v12833_v15   ;;  %vm3205_vm12 = vcmp.eq.s32.totalorder %v12997_v51, %v11537_v9  ;;  %v11018_v51 = vld [vmem:[#allocation2 + $0x4a0] sm:$0xff]  }
 0x285   :  { %4060 = vperm.xlu1 %10783, %v12577_v8   ;;  %vm8729_vm13 = vmpackc.low %vm3206_vm9, %vm3205_vm12 }
 0x287   :  { %v9827_v35 = vpop.f32.mrf.mxu0  ;;  %v13067_v45 = vpop.permute.xlu0 %3623 }
 0x288   :  { %v13069_v31 = vpop.permute.xlu1 %3189  ;;  %4521 = vperm.xlu0 %10788, %v12847_v16  }
 0x289   :  { %4063 = vperm.xlu1 %10783, %v13075_v62   ;;  %v9828_v8 = vpop.f32.mrf.mxu0 }
 0x28a   :  { %v9829_v10 = vadd.f32 %v9828_v8, %v9827_v35 }
 0x28b   :  { %v9830_v53 = vpop.f32.mrf.mxu0  ;;  %8674 = vmatmul.mubr.msk.bf16.gmra.mxu0 %vm8673_vm15, %v15525_v59  ;;  %v13079_v50 = vpop.permute.xlu0 %3629  ;;  %vm3208_vm15 = vcmp.eq.s32.totalorder %v13025_v40, %v11537_v9  ;;  %v11020_v40 = vld [vmem:[#allocation2 + $0x498] sm:$0xff]  }
 0x28c   :  { %15551 = vst [vmem:[#allocation9_spill] sm:$0xff] %v13079_v50  ;;  %v13082_v36 = vadd.f32 %v9829_v10, %v12826_v19  ;;  %v13084_v17 = vpop.permute.xlu1 %3195  ;;  %4527 = vperm.xlu0 %10788, %v12861_v42  }
 0x28d   :  { %4069 = vperm.xlu1 %10783, %v13090_v54   ;;  %v9831_v18 = vpop.f32.mrf.mxu0 }
 0x28e   :  { %v9832_v52 = vadd.f32 %v9831_v18, %v9830_v53 }
 0x28f   :  { %v9833_v2 = vpop.f32.mrf.mxu0  ;;  %v13093_v39 = vpop.permute.xlu0 %3635 }
 0x290   :  { %15552 = vst [vmem:[#allocation12_spill] sm:$0xff] %v13093_v39  ;;  %v13096_v61 = vadd.f32 %v9832_v52, %v12840_v34  ;;  %v13098_v19 = vpop.permute.xlu1 %3201  ;;  %4533 = vperm.xlu0 %10788, %v12881_v23   ;;  %v13122_v34 = vld [vmem:[%s15482_s0 + $0x48] sm:$0xff]  ;;  %v15493_v39 = vmov 21  }
 0x291   :  { %4075 = vperm.xlu1 %10783, %v13104_v12   ;;  %v9834_v35 = vpop.f32.mrf.mxu0 }
 0x292   :  { %v9835_v8 = vadd.f32 %v9834_v35, %v9833_v2  ;;  %v11012_v2 = vld [vmem:[#allocation2 + $0x4b8] sm:$0xff]  }
 0x293   :  { %v9836_v10 = vpop.f32.mrf.mxu0  ;;  %v13107_v53 = vpop.permute.xlu0 %3641 }
 0x294   :  { %15553 = vst [vmem:[#allocation13_spill] sm:$0xff] %v13107_v53  ;;  %v13110_v18 = vadd.f32 %v9835_v8, %v12854_v11  ;;  %4539 = vperm.xlu0 %10788, %v12896_v13  }
 0x295   :  { %4081 = vperm.xlu1 %10783, %v13122_v34   ;;  %v3264_v11 = vpop.permute.xlu1 %3263  ;;  %v9837_v52 = vpop.f32.mrf.mxu0 }
 0x296   :  { %vm3308_vm3 = vcmp.eq.s32.totalorder %v3264_v11, %v11537_v9  ;;  %v9838_v0 = vadd.f32 %v9837_v52, %v9836_v10  ;;  %v13138_v10 = vld [vmem:[%s15482_s0 + $0x58] sm:$0xff] }
 0x297   :  { %vm8723_vm4 = vmpackc.low %vm3308_vm3, %vm3307_vm0  ;;  %v9839_v35 = vpop.f32.mrf.mxu0  ;;  %v13126_v8 = vpop.permute.xlu0 %3647 }
 0x298   :  { %15554 = vst [vmem:[#allocation14_spill] sm:$0xff] %v13126_v8  ;;  %v13129_v21 = vadd.f32 %v9838_v0, %v15555_v41  ;;  %8724 = vmatprep.mubr.msk.bf16.mxu1 %vm8723_vm4, %v15525_v59  ;;  %4545 = vperm.xlu0 %10788, %v12915_v22   ;;  %v11014_v41 = vld [vmem:[#allocation2 + $0x4b0] sm:$0xff]  }
 0x299   :  { %4087 = vperm.xlu1 %10783, %v13138_v10   ;;  %v3267_v11 = vpop.permute.xlu1 %3266  ;;  %v9840_v52 = vpop.f32.mrf.mxu0  ;;  %8726 = vmatmul.mubr.msk.bf16.vlgmr.msra.gmra.mxu1 %vm8725_vm5, %v15525_v59  ;;  %vm3210_vm5 = vcmp.eq.s32.totalorder %v13043_v60, %v11537_v9 }
 0x29a   :  { %vm3309_vm7 = vcmp.eq.s32.totalorder %v3267_v11, %v11537_v9  ;;  %v9841_v0 = vadd.f32 %v9840_v52, %v9839_v35  ;;  %10132 = vmatpush3.bf16.msra.mxu1 %v11012_v2  ;;  %v11016_v11 = vld [vmem:[#allocation2 + $0x4a8] sm:$0xff]  }
 0x29b   :  { %vm8727_vm8 = vmpackc.low %vm3310_vm6, %vm3309_vm7  ;;  %v9842_v5 = vpop.f32.mrf.mxu0  ;;  %10133 = vmatprep.subr.bf16.mxu1 %v11013_v30 }
 0x29c   :  { %v13144_v8 = vadd.f32 %v9841_v0, %v12890_v55  ;;  %8728 = vmatprep.mubr.msk.bf16.mxu1 %vm8727_vm8, %v15525_v59  ;;  %v13147_v53 = vpop.permute.xlu0 %3709  ;;  %10789 = vset.pattern.permute.xlu0 %v15493_v39  ;;  %v11017_v0 = vld [vmem:[#allocation2 + $0x4e0] sm:$0xff]   ;;  %vm3316_vm8 = vcmp.eq.s32.totalorder %v12976_v43, %v11537_v9 }
 0x29d   :  { %4093 = vperm.xlu1 %10783, %v12779_v7   ;;  %v3273_v2 = vpop.permute.xlu1 %3272  ;;  %v9843_v35 = vpop.f32.mrf.mxu0  ;;  %4607 = vperm.xlu0 %10789, %v13049_v1  }
 0x29e   :  { %vm3311_vm10 = vcmp.eq.s32.totalorder %v3273_v2, %v11537_v9  ;;  %v9844_v55 = vadd.f32 %v9843_v35, %v9842_v5  ;;  %10134 = vmatpush3.bf16.msra.mxu1 %v11014_v41  ;;  %v11019_v35 = vld [vmem:[#allocation2 + $0x4d8] sm:$0xff]  }
 0x29f   :  { %v9845_v30 = vpop.f32.mrf.mxu0  ;;  %10135 = vmatprep.subr.bf16.mxu1 %v11015_v58  ;;  %vm8731_vm14 = vmpackc.low %vm3312_vm11, %vm3311_vm10  ;;  %vm3212_vm11 = vcmp.eq.s32.totalorder %v13058_v26, %v11537_v9 }
 0x2a0   :  { %v13160_v38 = vadd.f32 %v9844_v55, %v12910_v46  ;;  %v13162_v52 = vpop.permute.xlu0 %3718  ;;  %v15556_v55 = vld [vmem:[#allocation5_spill] sm:$0xff] }
 0x2a1   :  { %4099 = vperm.xlu1 %10783, %v12799_v6   ;;  %v3279_v5 = vpop.permute.xlu1 %3278  ;;  %v9846_v2 = vpop.f32.mrf.mxu0  ;;  %8730 = vmatmul.mubr.msk.bf16.gmra.mxu1 %vm8729_vm13, %v15525_v59  ;;  %vm3207_vm0 = vcmp.eq.s32.totalorder %v15556_v55, %v11537_v9  ;;  %v11021_v55 = vld [vmem:[#allocation2 + $0x4d0] sm:$0xff]  }
 0x2a2   :  { %v9847_v20 = vadd.f32 %v9846_v2, %v9845_v30  ;;  %8732 = vmatprep.mubr.msk.bf16.mxu1 %vm8731_vm14, %v15525_v59  ;;  %4616 = vperm.xlu0 %10789, %v13075_v62   ;;  %v15557_v30 = vmov 19   ;;  %vm3313_vm1 = vcmp.eq.s32.totalorder %v3279_v5, %v11537_v9  ;;  %vm8733_vm3 = vmpackc.low %vm3208_vm15, %vm3207_vm0  ;;  %vm3318_vm14 = vcmp.eq.s32.totalorder %v12992_v24, %v11537_v9 }
 0x2a3   :  { %v9848_v58 = vpop.f32.mrf.mxu0  ;;  %10136 = vmatpush3.bf16.msra.mxu1 %v11016_v11  ;;  %vm8735_vm4 = vmpackc.low %vm3314_vm2, %vm3313_vm1  ;;  %vm3214_vm1 = vcmp.eq.s32.totalorder %v13069_v31, %v11537_v9 }
 0x2a4   :  { %v13169_v46 = vadd.f32 %v9847_v20, %v12922_v37  ;;  %v13171_v41 = vpop.permute.xlu0 %3724  ;;  %10137 = vmatprep.subr.bf16.mxu1 %v11017_v0 }
 0x2a5   :  { %10786 = vset.pattern.permute.xlu1 %v15557_v30  ;;  %v3285_v2 = vpop.permute.xlu1 %3284  ;;  %v9849_v39 = vpop.f32.mrf.mxu0 }
 0x2a6   :  { %v9850_v37 = vadd.f32 %v9849_v39, %v9848_v58  ;;  %4161 = vperm.xlu1 %10786, %v12818_v4   ;;  %4622 = vperm.xlu0 %10789, %v13090_v54   ;;  %v13192_v39 = vld [vmem:[%s15482_s0 + $0x10] sm:$0xff]  ;;  %vm3315_vm7 = vcmp.eq.s32.totalorder %v3285_v2, %v11537_v9 }
 0x2a7   :  { %v9851_v11 = vpop.f32.mrf.mxu0  ;;  %10138 = vmatpush3.bf16.msra.mxu1 %v11018_v51  ;;  %v11022_v58 = vld [vmem:[#allocation2 + $0x490] sm:$0xff]   ;;  %vm8739_vm10 = vmpackc.low %vm3316_vm8, %vm3315_vm7  ;;  %vm3216_vm7 = vcmp.eq.s32.totalorder %v13084_v17, %v11537_v9  ;;  %vm3215_vm8 = vcmp.eq.s32.totalorder %v12887_v29, %v11537_v9  ;;  %v11027_v17 = vld [vmem:[#allocation2 + $0x578] sm:$0xff]  }
 0x2a8   :  { %v13184_v0 = vadd.f32 %v9850_v37, %v12938_v25  ;;  %v13186_v20 = vpop.permute.xlu0 %3730  ;;  %10139 = vmatprep.subr.bf16.mxu1 %v11019_v35  ;;  %v11023_v37 = vld [vmem:[#allocation2 + $0x4c8] sm:$0xff]   ;;  %10195 = vmatprep.subr.bf16.mxu0 %v11027_v17 }
 0x2a9   :  { %v3291_v5 = vpop.permute.xlu1 %3290  ;;  %v9852_v30 = vpop.f32.mrf.mxu0  ;;  %8734 = vmatmul.mubr.msk.bf16.gmra.mxu1 %vm8733_vm3, %v15525_v59 }
 0x2aa   :  { %v9853_v32 = vadd.f32 %v9852_v30, %v9851_v11  ;;  %4164 = vperm.xlu1 %10786, %v13192_v39   ;;  %8736 = vmatprep.mubr.msk.bf16.mxu1 %vm8735_vm4, %v15525_v59  ;;  %v15558_v11 = vld [vmem:[#allocation6_spill] sm:$0xff]  ;;  %vm3317_vm13 = vcmp.eq.s32.totalorder %v3291_v5, %v11537_v9  ;;  %vm3320_vm4 = vcmp.eq.s32.totalorder %v13003_v56, %v11537_v9 }
 0x2ab   :  { %v9854_v25 = vpop.f32.mrf.mxu0  ;;  %4628 = vperm.xlu0 %10789, %v13104_v12   ;;  %10140 = vmatpush3.bf16.msra.mxu1 %v11020_v40  ;;  %vm3209_vm6 = vcmp.eq.s32.totalorder %v15558_v11, %v11537_v9  ;;  %v11025_v11 = vld [vmem:[#allocation2 + $0x4c0] sm:$0xff]   ;;  %vm8743_vm0 = vmpackc.low %vm3318_vm14, %vm3317_vm13  ;;  %vm3218_vm13 = vcmp.eq.s32.totalorder %v13098_v19, %v11537_v9 }
 0x2ac   :  { %v13198_v51 = vadd.f32 %v9853_v32, %v12947_v47  ;;  %v13200_v35 = vpop.permute.xlu0 %3736  ;;  %10141 = vmatprep.subr.bf16.mxu1 %v11021_v55  ;;  %v11024_v55 = vld [vmem:[#allocation2 + $0x488] sm:$0xff]   ;;  %vm8737_vm9 = vmpackc.low %vm3210_vm5, %vm3209_vm6 }
 0x2ad   :  { %v13206_v30 = vpop.permute.xlu1 %3296  ;;  %v9855_v50 = vpop.f32.mrf.mxu0 }
 0x2ae   :  { %v9856_v47 = vadd.f32 %v9855_v50, %v9854_v25  ;;  %4170 = vperm.xlu1 %10786, %v12833_v15   ;;  %vm3319_vm3 = vcmp.eq.s32.totalorder %v13206_v30, %v11537_v9 }
 0x2af   :  { %v9857_v40 = vpop.f32.mrf.mxu0  ;;  %4634 = vperm.xlu0 %10789, %v13122_v34   ;;  %10142 = vmatpush3.bf16.msra.mxu1 %v11022_v58  ;;  %vm8747_vm6 = vmpackc.low %vm3320_vm4, %vm3319_vm3 }
 0x2b0   :  { %v13214_v60 = vadd.f32 %v9856_v47, %v12963_v27  ;;  %v13216_v32 = vpop.permute.xlu0 %3742  ;;  %10143 = vmatprep.subr.bf16.mxu1 %v11023_v37  ;;  %v11026_v27 = vld [vmem:[#allocation2 + $0x480] sm:$0xff]   ;;  %v15559_v47 = vld [vmem:[#allocation10_spill] sm:$0xff] }
 0x2b1   :  { %v13218_v2 = vpop.permute.xlu1 %3302  ;;  %v9858_v43 = vpop.f32.mrf.mxu0  ;;  %8738 = vmatmul.mubr.msk.bf16.gmra.mxu1 %vm8737_vm9, %v15525_v59  ;;  %vm3211_vm12 = vcmp.eq.s32.totalorder %v15559_v47, %v11537_v9 }
 0x2b2   :  { %v9859_v50 = vadd.f32 %v9858_v43, %v9857_v40  ;;  %4176 = vperm.xlu1 %10786, %v12847_v16   ;;  %8740 = vmatprep.mubr.msk.bf16.mxu1 %vm8739_vm10, %v15525_v59  ;;  %vm8741_vm15 = vmpackc.low %vm3212_vm11, %vm3211_vm12  ;;  %vm3321_vm9 = vcmp.eq.s32.totalorder %v13218_v2, %v11537_v9  ;;  %vm3322_vm10 = vcmp.eq.s32.totalorder %v13020_v48, %v11537_v9 }
 0x2b3   :  { %v9860_v25 = vpop.f32.mrf.mxu0  ;;  %4640 = vperm.xlu0 %10789, %v13138_v10   ;;  %10144 = vmatpush3.bf16.msra.mxu1 %v11024_v55  ;;  %vm8749_vm11 = vmpackc.low %vm3216_vm7, %vm3215_vm8 }
 0x2b4   :  { %v13225_v58 = vadd.f32 %v9859_v50, %v12974_v3  ;;  %v13227_v37 = vpop.permute.xlu0 %3748  ;;  %10145 = vmatprep.subr.bf16.mxu1 %v11025_v11  ;;  %vm8751_vm12 = vmpackc.low %vm3322_vm10, %vm3321_vm9 }
 0x2b5   :  { %v9861_v40 = vpop.f32.mrf.mxu0 }
 0x2b6   :  { %v9862_v55 = vadd.f32 %v9861_v40, %v9860_v25  ;;  %4182 = vperm.xlu1 %10786, %v12861_v42   ;;  %v13237_v3 = vpop.permute.xlu1 %3605 }
 0x2b7   :  { %v9863_v43 = vpop.f32.mrf.mxu0  ;;  %4646 = vperm.xlu0 %10789, %v12779_v7   ;;  %10146 = vmatpush3.bf16.msra.mxu1 %v11026_v27 }
 0x2b8   :  { %v13241_v26 = vadd.f32 %v9862_v55, %v12990_v28  ;;  %v13243_v11 = vpop.permute.xlu0 %3754  ;;  %v15560_v28 = vld [vmem:[#allocation8_spill] sm:$0xff]  ;;  %v15495_v55 = vmov 22  }
 0x2b9   :  { %v9864_v5 = vpop.f32.mrf.mxu0  ;;  %8742 = vmatmul.mubr.msk.bf16.gmra.mxu1 %vm8741_vm15, %v15525_v59  ;;  %vm3213_vm2 = vcmp.eq.s32.totalorder %v15560_v28, %v11537_v9 }
 0x2ba   :  { %v9865_v24 = vadd.f32 %v9864_v5, %v9863_v43  ;;  %4188 = vperm.xlu1 %10786, %v12881_v23   ;;  %v13247_v50 = vpop.permute.xlu1 %3611  ;;  %8744 = vmatprep.mubr.msk.bf16.mxu1 %vm8743_vm0, %v15525_v59  ;;  %vm8745_vm5 = vmpackc.low %vm3214_vm1, %vm3213_vm2  ;;  %vm3756_vm0 = vcmp.eq.s32.totalorder %v13147_v53, %v11537_v9  ;;  %vm3652_vm1 = vcmp.eq.s32.totalorder %v13237_v3, %v11537_v9 }
 0x2bb   :  { %v9866_v25 = vpop.f32.mrf.mxu0  ;;  %4652 = vperm.xlu0 %10789, %v12799_v6   ;;  %vm3653_vm2 = vcmp.eq.s32.totalorder %v13035_v57, %v11537_v9 }
 0x2bc   :  { %v13252_v7 = vadd.f32 %v9865_v24, %v13001_v33 }
 0x2bd   :  { %v9867_v27 = vpop.f32.mrf.mxu0  ;;  %v13258_v47 = vpop.permute.xlu0 %4057 }
 0x2be   :  { %v9868_v40 = vadd.f32 %v9867_v27, %v9866_v25  ;;  %4194 = vperm.xlu1 %10786, %v12896_v13   ;;  %v13265_v6 = vpop.permute.xlu1 %3614 }
 0x2bf   :  { %v9869_v33 = vpop.f32.mrf.mxu0  ;;  %10792 = vset.pattern.permute.xlu0 %v15495_v55  ;;  %vm3655_vm9 = vcmp.eq.s32.totalorder %v13265_v6, %v11537_v9 }
 0x2c0   :  { %v13269_v31 = vadd.f32 %v9868_v40, %v13018_v49  ;;  %4955 = vperm.xlu0 %10792, %v12818_v4  }
 0x2c1   :  { %v9870_v30 = vpop.f32.mrf.mxu0  ;;  %8746 = vmatmul.mubr.msk.bf16.gmra.mxu1 %vm8745_vm5, %v15525_v59  ;;  %v13273_v56 = vpop.permute.xlu0 %4066  ;;  %vm8805_vm5 = vmpackc.low %vm3653_vm2, %vm3652_vm1  ;;  %vm3763_vm2 = vcmp.eq.s32.totalorder %v13186_v20, %v11537_v9 }
 0x2c2   :  { %v9871_v43 = vadd.f32 %v9870_v30, %v9869_v33  ;;  %4200 = vperm.xlu1 %10786, %v12915_v22   ;;  %v13276_v5 = vpop.permute.xlu1 %3620  ;;  %8748 = vmatprep.mubr.msk.bf16.mxu1 %vm8747_vm6, %v15525_v59  ;;  %vm3759_vm6 = vcmp.eq.s32.totalorder %v13162_v52, %v11537_v9 }
 0x2c3   :  { %v9872_v24 = vpop.f32.mrf.mxu0 }
 0x2c4   :  { %v13280_v25 = vadd.f32 %v9871_v43, %v13029_v44  ;;  %4964 = vperm.xlu0 %10792, %v12833_v15   ;;  %v15561_v44 = vmov 20  }
 0x2c5   :  { %v9873_v4 = vpop.f32.mrf.mxu0  ;;  %v13287_v49 = vpop.permute.xlu0 %4072 }
 0x2c6   :  { %v9874_v28 = vadd.f32 %v9873_v4, %v9872_v24  ;;  %10787 = vset.pattern.permute.xlu1 %v15561_v44  ;;  %v13294_v27 = vpop.permute.xlu1 %3626 }
 0x2c7   :  { %4503 = vperm.xlu1 %10787, %v13049_v1  }
 0x2c8   :  { %v13298_v15 = vadd.f32 %v9874_v28, %v13053_v14  ;;  %4970 = vperm.xlu0 %10792, %v12847_v16   ;;  %v15562_v16 = vld [vmem:[#allocation11_spill] sm:$0xff] }
 0x2c9   :  { %8750 = vmatmul.mubr.msk.bf16.gmra.mxu1 %vm8749_vm11, %v15525_v59  ;;  %v13302_v29 = vpop.permute.xlu0 %4078  ;;  %vm3217_vm14 = vcmp.eq.s32.totalorder %v15562_v16, %v11537_v9  ;;  %vm3761_vm11 = vcmp.eq.s32.totalorder %v13171_v41, %v11537_v9  ;;  %v13396_v41 = vld [vmem:[%s15482_s0 + $0x78] sm:$0xff] }
 0x2ca   :  { %v13304_v48 = vpop.permute.xlu1 %3632  ;;  %8752 = vmatprep.mubr.msk.bf16.mxu1 %vm8751_vm12, %v15525_v59  ;;  %vm8753_vm15 = vmpackc.low %vm3218_vm13, %vm3217_vm14  ;;  %vm3654_vm12 = vcmp.eq.s32.totalorder %v13247_v50, %v11537_v9 }
 0x2cb   :  { %4509 = vperm.xlu1 %10787, %v13192_v39   ;;  %vm8809_vm13 = vmpackc.low %vm3655_vm9, %vm3654_vm12 }
 0x2cc   :  { %4976 = vperm.xlu0 %10792, %v12861_v42  }
 0x2cd   :  { %v9891_v14 = vpop.f32.mrf.mxu1  ;;  %v13313_v2 = vpop.permute.xlu0 %4084 }
 0x2ce   :  { %v13315_v40 = vpop.permute.xlu1 %3638 }
 0x2cf   :  { %4512 = vperm.xlu1 %10787, %v13075_v62   ;;  %v9892_v33 = vpop.f32.mrf.mxu1 }
 0x2d0   :  { %v9893_v30 = vadd.f32 %v9892_v33, %v9891_v14  ;;  %4982 = vperm.xlu0 %10792, %v12881_v23  }
 0x2d1   :  { %v9894_v43 = vpop.f32.mrf.mxu1  ;;  %8754 = vmatmul.mubr.msk.bf16.gmra.mxu1 %vm8753_vm15, %v15525_v59  ;;  %v13320_v42 = vpop.permute.xlu0 %4090  ;;  %vm3657_vm15 = vcmp.eq.s32.totalorder %v13276_v5, %v11537_v9 }
 0x2d2   :  { %v13323_v19 = vadd.f32 %v9893_v30, %v13082_v36  ;;  %v13325_v24 = vpop.permute.xlu1 %3644 }
 0x2d3   :  { %4518 = vperm.xlu1 %10787, %v13090_v54   ;;  %v9895_v4 = vpop.f32.mrf.mxu1 }
 0x2d4   :  { %v9896_v28 = vadd.f32 %v9895_v4, %v9894_v43  ;;  %4988 = vperm.xlu0 %10792, %v12896_v13   ;;  %v11028_v4 = vld [vmem:[#allocation2 + $0x538] sm:$0xff]  }
 0x2d5   :  { %v9897_v44 = vpop.f32.mrf.mxu1  ;;  %v13329_v17 = vpop.permute.xlu0 %4096 }
 0x2d6   :  { %15563 = vst [vmem:[#allocation7_spill] sm:$0xff] %v13329_v17  ;;  %v13332_v23 = vadd.f32 %v9896_v28, %v13096_v61  ;;  %v13334_v16 = vpop.permute.xlu1 %3650  ;;  %v11029_v28 = vld [vmem:[#allocation2 + $0x570] sm:$0xff]  }
 0x2d7   :  { %4524 = vperm.xlu1 %10787, %v13104_v12   ;;  %v9898_v36 = vpop.f32.mrf.mxu1 }
 0x2d8   :  { %v9899_v14 = vadd.f32 %v9898_v36, %v9897_v44  ;;  %4994 = vperm.xlu0 %10792, %v12915_v22  }
 0x2d9   :  { %v9900_v33 = vpop.f32.mrf.mxu1 }
 0x2da   :  { %v13339_v30 = vadd.f32 %v9899_v14, %v13110_v18  ;;  %v13343_v13 = vpop.permute.xlu0 %4158  ;;  %v15494_v18 = vmov 23  }
 0x2db   :  { %4530 = vperm.xlu1 %10787, %v13122_v34   ;;  %v3713_v61 = vpop.permute.xlu1 %3712  ;;  %v9901_v43 = vpop.f32.mrf.mxu1 }
 0x2dc   :  { %vm3757_vm3 = vcmp.eq.s32.totalorder %v3713_v61, %v11537_v9  ;;  %v9902_v22 = vadd.f32 %v9901_v43, %v9900_v33  ;;  %10793 = vset.pattern.permute.xlu0 %v15494_v18  ;;  %v11030_v33 = vld [vmem:[#allocation2 + $0x530] sm:$0xff]   ;;  %v11031_v61 = vld [vmem:[#allocation2 + $0x568] sm:$0xff]  }
 0x2dd   :  { %vm8803_vm4 = vmpackc.low %vm3757_vm3, %vm3756_vm0  ;;  %v9903_v53 = vpop.f32.mrf.mxu1  ;;  %5056 = vperm.xlu0 %10793, %v13049_v1   ;;  %vm3656_vm0 = vcmp.eq.s32.totalorder %v13056_v63, %v11537_v9  ;;  %v11036_v63 = vld [vmem:[#allocation2 + $0x518] sm:$0xff]   ;;  %v11039_v18 = vld [vmem:[#allocation2 + $0x548] sm:$0xff]  }
 0x2de   :  { %v13354_v3 = vadd.f32 %v9902_v22, %v13129_v21  ;;  %8804 = vmatprep.mubr.msk.bf16.mxu0 %vm8803_vm4, %v15525_v59  ;;  %v13359_v57 = vpop.permute.xlu0 %4167  ;;  %v13376_v22 = vld [vmem:[%s15482_s0 + $0x68] sm:$0xff]  ;;  %vm8813_vm3 = vmpackc.low %vm3657_vm15, %vm3656_vm0 }
 0x2df   :  { %4536 = vperm.xlu1 %10787, %v13138_v10   ;;  %v3716_v44 = vpop.permute.xlu1 %3715  ;;  %v9904_v36 = vpop.f32.mrf.mxu1  ;;  %8806 = vmatmul.mubr.msk.bf16.vlgmr.msra.gmra.mxu0 %vm8805_vm5, %v15525_v59  ;;  %vm3659_vm5 = vcmp.eq.s32.totalorder %v13294_v27, %v11537_v9 }
 0x2e0   :  { %vm3758_vm7 = vcmp.eq.s32.totalorder %v3716_v44, %v11537_v9  ;;  %v9905_v14 = vadd.f32 %v9904_v36, %v9903_v53  ;;  %10196 = vmatpush3.bf16.msra.mxu0 %v11028_v4  ;;  %v11033_v36 = vld [vmem:[#allocation2 + $0x560] sm:$0xff]  }
 0x2e1   :  { %vm8807_vm8 = vmpackc.low %vm3759_vm6, %vm3758_vm7  ;;  %v9906_v21 = vpop.f32.mrf.mxu1  ;;  %5065 = vperm.xlu0 %10793, %v13075_v62   ;;  %10197 = vmatprep.subr.bf16.mxu0 %v11029_v28  ;;  %v11032_v28 = vld [vmem:[#allocation2 + $0x528] sm:$0xff]   ;;  %vm3658_vm6 = vcmp.eq.s32.totalorder %v13067_v45, %v11537_v9 }
 0x2e2   :  { %v13366_v52 = vadd.f32 %v9905_v14, %v13144_v8  ;;  %8808 = vmatprep.mubr.msk.bf16.mxu0 %vm8807_vm8, %v15525_v59  ;;  %v13369_v43 = vpop.permute.xlu0 %4173  ;;  %vm3765_vm8 = vcmp.eq.s32.totalorder %v13200_v35, %v11537_v9  ;;  %v11040_v45 = vld [vmem:[#allocation2 + $0x508] sm:$0xff]   ;;  %vm8817_vm9 = vmpackc.low %vm3659_vm5, %vm3658_vm6  ;;  %v11041_v35 = vld [vmem:[#allocation2 + $0x540] sm:$0xff]  }
 0x2e3   :  { %4542 = vperm.xlu1 %10787, %v13376_v22   ;;  %v3722_v4 = vpop.permute.xlu1 %3721  ;;  %v9907_v53 = vpop.f32.mrf.mxu1 }
 0x2e4   :  { %vm3760_vm10 = vcmp.eq.s32.totalorder %v3722_v4, %v11537_v9  ;;  %v9908_v8 = vadd.f32 %v9907_v53, %v9906_v21  ;;  %10198 = vmatpush3.bf16.msra.mxu0 %v11030_v33  ;;  %v11035_v4 = vld [vmem:[#allocation2 + $0x558] sm:$0xff]  }
 0x2e5   :  { %v9909_v44 = vpop.f32.mrf.mxu1  ;;  %5071 = vperm.xlu0 %10793, %v13090_v54   ;;  %10199 = vmatprep.subr.bf16.mxu0 %v11031_v61  ;;  %vm8811_vm14 = vmpackc.low %vm3761_vm11, %vm3760_vm10  ;;  %vm3661_vm11 = vcmp.eq.s32.totalorder %v13304_v48, %v11537_v9 }
 0x2e6   :  { %v13389_v14 = vadd.f32 %v9908_v8, %v13160_v38  ;;  %v13391_v21 = vpop.permute.xlu0 %4179  ;;  %v11034_v38 = vld [vmem:[#allocation2 + $0x520] sm:$0xff]  }
 0x2e7   :  { %4548 = vperm.xlu1 %10787, %v13396_v41   ;;  %v3728_v50 = vpop.permute.xlu1 %3727  ;;  %v9910_v33 = vpop.f32.mrf.mxu1  ;;  %8810 = vmatmul.mubr.msk.bf16.gmra.mxu0 %vm8809_vm13, %v15525_v59 }
 0x2e8   :  { %v9911_v61 = vadd.f32 %v9910_v33, %v9909_v44  ;;  %8812 = vmatprep.mubr.msk.bf16.mxu0 %vm8811_vm14, %v15525_v59  ;;  %10200 = vmatpush3.bf16.msra.mxu0 %v11032_v28  ;;  %v15564_v44 = vmov 21   ;;  %vm3762_vm1 = vcmp.eq.s32.totalorder %v3728_v50, %v11537_v9  ;;  %vm3767_vm14 = vcmp.eq.s32.totalorder %v13216_v32, %v11537_v9 }
 0x2e9   :  { %v9912_v6 = vpop.f32.mrf.mxu1  ;;  %5077 = vperm.xlu0 %10793, %v13104_v12   ;;  %10201 = vmatprep.subr.bf16.mxu0 %v11033_v36  ;;  %vm8815_vm4 = vmpackc.low %vm3763_vm2, %vm3762_vm1  ;;  %vm3663_vm1 = vcmp.eq.s32.totalorder %v13315_v40, %v11537_v9 }
 0x2ea   :  { %v13403_v53 = vadd.f32 %v9911_v61, %v13169_v46  ;;  %v13405_v8 = vpop.permute.xlu0 %4185  ;;  %v13418_v46 = vld [vmem:[%s15482_s0 + $0x8] sm:$0xff] }
 0x2eb   :  { %10790 = vset.pattern.permute.xlu1 %v15564_v44  ;;  %v3734_v28 = vpop.permute.xlu1 %3733  ;;  %v9913_v33 = vpop.f32.mrf.mxu1 }
 0x2ec   :  { %v9914_v36 = vadd.f32 %v9913_v33, %v9912_v6  ;;  %4610 = vperm.xlu1 %10790, %v13418_v46   ;;  %10202 = vmatpush3.bf16.msra.mxu0 %v11034_v38  ;;  %v11037_v6 = vld [vmem:[#allocation2 + $0x550] sm:$0xff]   ;;  %vm3764_vm7 = vcmp.eq.s32.totalorder %v3734_v28, %v11537_v9 }
 0x2ed   :  { %v9915_v61 = vpop.f32.mrf.mxu1  ;;  %5083 = vperm.xlu0 %10793, %v13122_v34   ;;  %10203 = vmatprep.subr.bf16.mxu0 %v11035_v4  ;;  %vm8819_vm10 = vmpackc.low %vm3765_vm8, %vm3764_vm7  ;;  %vm3665_vm7 = vcmp.eq.s32.totalorder %v13325_v24, %v11537_v9 }
 0x2ee   :  { %v13426_v20 = vadd.f32 %v9914_v36, %v13184_v0  ;;  %v13428_v50 = vpop.permute.xlu0 %4191  ;;  %v11038_v0 = vld [vmem:[#allocation2 + $0x510] sm:$0xff]  }
 0x2ef   :  { %v13430_v44 = vpop.permute.xlu1 %3739  ;;  %v9916_v33 = vpop.f32.mrf.mxu1  ;;  %8814 = vmatmul.mubr.msk.bf16.gmra.mxu0 %vm8813_vm3, %v15525_v59 }
 0x2f0   :  { %v9917_v38 = vadd.f32 %v9916_v33, %v9915_v61  ;;  %4613 = vperm.xlu1 %10790, %v13192_v39   ;;  %8816 = vmatprep.mubr.msk.bf16.mxu0 %vm8815_vm4, %v15525_v59  ;;  %vm3766_vm13 = vcmp.eq.s32.totalorder %v13430_v44, %v11537_v9  ;;  %vm3769_vm4 = vcmp.eq.s32.totalorder %v13227_v37, %v11537_v9 }
 0x2f1   :  { %v9918_v4 = vpop.f32.mrf.mxu1  ;;  %5089 = vperm.xlu0 %10793, %v13138_v10   ;;  %10204 = vmatpush3.bf16.msra.mxu0 %v11036_v63  ;;  %v13453_v63 = vld [vmem:[%s15482_s0 + $0x20] sm:$0xff]  ;;  %vm8823_vm0 = vmpackc.low %vm3767_vm14, %vm3766_vm13  ;;  %vm3667_vm13 = vcmp.eq.s32.totalorder %v13334_v16, %v11537_v9 }
 0x2f2   :  { %v13437_v5 = vadd.f32 %v9917_v38, %v13198_v51  ;;  %v13439_v36 = vpop.permute.xlu0 %4197  ;;  %10205 = vmatprep.subr.bf16.mxu0 %v11037_v6 }
 0x2f3   :  { %v13445_v61 = vpop.permute.xlu1 %3745  ;;  %v9919_v33 = vpop.f32.mrf.mxu1 }
 0x2f4   :  { %v9920_v51 = vadd.f32 %v9919_v33, %v9918_v4  ;;  %4619 = vperm.xlu1 %10790, %v13453_v63   ;;  %vm3768_vm3 = vcmp.eq.s32.totalorder %v13445_v61, %v11537_v9 }
 0x2f5   :  { %v9921_v27 = vpop.f32.mrf.mxu1  ;;  %5095 = vperm.xlu0 %10793, %v13376_v22   ;;  %10206 = vmatpush3.bf16.msra.mxu0 %v11038_v0  ;;  %v13468_v0 = vld [vmem:[%s15482_s0 + $0x30] sm:$0xff]  ;;  %vm8827_vm6 = vmpackc.low %vm3769_vm4, %vm3768_vm3 }
 0x2f6   :  { %v13458_v6 = vadd.f32 %v9920_v51, %v13214_v60  ;;  %v13460_v28 = vpop.permute.xlu0 %4203  ;;  %10207 = vmatprep.subr.bf16.mxu0 %v11039_v18  ;;  %v11042_v18 = vld [vmem:[#allocation2 + $0x500] sm:$0xff]  }
 0x2f7   :  { %15565 = vst [vmem:[#allocation5_spill] sm:$0xff] %v13460_v28  ;;  %v13462_v38 = vpop.permute.xlu1 %3751  ;;  %v9922_v4 = vpop.f32.mrf.mxu1  ;;  %8818 = vmatmul.mubr.msk.bf16.gmra.mxu0 %vm8817_vm9, %v15525_v59 }
 0x2f8   :  { %v9923_v33 = vadd.f32 %v9922_v4, %v9921_v27  ;;  %4625 = vperm.xlu1 %10790, %v13468_v0   ;;  %8820 = vmatprep.mubr.msk.bf16.mxu0 %vm8819_vm10, %v15525_v59  ;;  %v15566_v27 = vld [vmem:[#allocation9_spill] sm:$0xff]  ;;  %vm3770_vm9 = vcmp.eq.s32.totalorder %v13462_v38, %v11537_v9  ;;  %vm3771_vm10 = vcmp.eq.s32.totalorder %v13243_v11, %v11537_v9 }
 0x2f9   :  { %v9924_v60 = vpop.f32.mrf.mxu1  ;;  %5101 = vperm.xlu0 %10793, %v13396_v41   ;;  %10208 = vmatpush3.bf16.msra.mxu0 %v11040_v45  ;;  %vm3660_vm12 = vcmp.eq.s32.totalorder %v15566_v27, %v11537_v9 }
 0x2fa   :  { %v13474_v51 = vadd.f32 %v9923_v33, %v13225_v58  ;;  %10209 = vmatprep.subr.bf16.mxu0 %v11041_v35  ;;  %v13489_v58 = vld [vmem:[%s15482_s0 + $0x40] sm:$0xff]  ;;  %v15496_v33 = vmov 24   ;;  %vm8821_vm15 = vmpackc.low %vm3661_vm11, %vm3660_vm12 }
 0x2fb   :  { %v9925_v4 = vpop.f32.mrf.mxu1  ;;  %v13480_v55 = vpop.permute.xlu0 %4506  ;;  %vm8831_vm12 = vmpackc.low %vm3771_vm10, %vm3770_vm9 }
 0x2fc   :  { %15567 = vst [vmem:[#allocation6_spill] sm:$0xff] %v13480_v55  ;;  %v9926_v45 = vadd.f32 %v9925_v4, %v9924_v60  ;;  %4631 = vperm.xlu1 %10790, %v13489_v58   ;;  %v13492_v48 = vpop.permute.xlu1 %4054  ;;  %v13505_v4 = vld [vmem:[%s15482_s0 + $0x50] sm:$0xff] }
 0x2fd   :  { %v9927_v35 = vpop.f32.mrf.mxu1  ;;  %10796 = vset.pattern.permute.xlu0 %v15496_v33  ;;  %10210 = vmatpush3.bf16.msra.mxu0 %v11042_v18 }
 0x2fe   :  { %v13496_v44 = vadd.f32 %v9926_v45, %v13241_v26  ;;  %5404 = vperm.xlu0 %10796, %v13418_v46  }
 0x2ff   :  { %v9928_v32 = vpop.f32.mrf.mxu1  ;;  %8822 = vmatmul.mubr.msk.bf16.gmra.mxu0 %vm8821_vm15, %v15525_v59  ;;  %v13500_v60 = vpop.permute.xlu0 %4515 }
 0x300   :  { %15568 = vst [vmem:[#allocation10_spill] sm:$0xff] %v13500_v60  ;;  %v9929_v27 = vadd.f32 %v9928_v32, %v9927_v35  ;;  %4637 = vperm.xlu1 %10790, %v13505_v4   ;;  %v13508_v18 = vpop.permute.xlu1 %4060  ;;  %8824 = vmatprep.mubr.msk.bf16.mxu0 %vm8823_vm0, %v15525_v59  ;;  %v15569_v35 = vld [vmem:[#allocation12_spill] sm:$0xff]  ;;  %vm4205_vm0 = vcmp.eq.s32.totalorder %v13343_v13, %v11537_v9  ;;  %v11045_v13 = vld [vmem:[#allocation2 + $0x5f0] sm:$0xff]  }
 0x301   :  { %v9930_v26 = vpop.f32.mrf.mxu1  ;;  %vm3662_vm2 = vcmp.eq.s32.totalorder %v15569_v35, %v11537_v9 }
 0x302   :  { %v13512_v45 = vadd.f32 %v9929_v27, %v13252_v7  ;;  %5413 = vperm.xlu0 %10796, %v13453_v63   ;;  %v13528_v7 = vld [vmem:[%s15482_s0 + $0x60] sm:$0xff]  ;;  %vm8825_vm5 = vmpackc.low %vm3663_vm1, %vm3662_vm2  ;;  %vm4101_vm1 = vcmp.eq.s32.totalorder %v13492_v48, %v11537_v9  ;;  %vm4102_vm2 = vcmp.eq.s32.totalorder %v13258_v47, %v11537_v9 }
 0x303   :  { %v9931_v32 = vpop.f32.mrf.mxu1  ;;  %v13519_v33 = vpop.permute.xlu0 %4521 }
 0x304   :  { %15570 = vst [vmem:[#allocation8_spill] sm:$0xff] %v13519_v33  ;;  %v9932_v60 = vadd.f32 %v9931_v32, %v9930_v26  ;;  %4643 = vperm.xlu1 %10790, %v13528_v7   ;;  %v13531_v40 = vpop.permute.xlu1 %4063  ;;  %v13543_v32 = vld [vmem:[%s15482_s0 + $0x70] sm:$0xff] }
 0x305   :  { %v9933_v27 = vpop.f32.mrf.mxu1  ;;  %vm4104_vm9 = vcmp.eq.s32.totalorder %v13531_v40, %v11537_v9  ;;  %v11051_v40 = vld [vmem:[#allocation2 + $0x5d8] sm:$0xff]  }
 0x306   :  { %v13534_v35 = vadd.f32 %v9932_v60, %v13269_v31  ;;  %5419 = vperm.xlu0 %10796, %v13468_v0  }
 0x307   :  { %v9934_v61 = vpop.f32.mrf.mxu1  ;;  %8826 = vmatmul.mubr.msk.bf16.gmra.mxu0 %vm8825_vm5, %v15525_v59  ;;  %v13538_v37 = vpop.permute.xlu0 %4527  ;;  %vm8885_vm5 = vmpackc.low %vm4102_vm2, %vm4101_vm1  ;;  %vm4212_vm2 = vcmp.eq.s32.totalorder %v13391_v21, %v11537_v9 }
 0x308   :  { %15571 = vst [vmem:[#allocation11_spill] sm:$0xff] %v13538_v37  ;;  %v9935_v26 = vadd.f32 %v9934_v61, %v9933_v27  ;;  %4649 = vperm.xlu1 %10790, %v13543_v32   ;;  %v13546_v33 = vpop.permute.xlu1 %4069  ;;  %8828 = vmatprep.mubr.msk.bf16.mxu0 %vm8827_vm6, %v15525_v59  ;;  %v15572_v27 = vld [vmem:[#allocation13_spill] sm:$0xff]  ;;  %vm4208_vm6 = vcmp.eq.s32.totalorder %v13359_v57, %v11537_v9 }
 0x309   :  { %v9936_v31 = vpop.f32.mrf.mxu1  ;;  %vm3664_vm8 = vcmp.eq.s32.totalorder %v15572_v27, %v11537_v9  ;;  %v11043_v27 = vld [vmem:[#allocation2 + $0x5f8] sm:$0xff]  }
 0x30a   :  { %v13550_v60 = vadd.f32 %v9935_v26, %v13280_v25  ;;  %5425 = vperm.xlu0 %10796, %v13489_v58   ;;  %v15574_v25 = vmov 22   ;;  %vm8829_vm11 = vmpackc.low %vm3665_vm7, %vm3664_vm8  ;;  %10259 = vmatprep.subr.bf16.mxu1 %v11043_v27 }
 0x30b   :  { %v9937_v61 = vpop.f32.mrf.mxu1  ;;  %v13557_v37 = vpop.permute.xlu0 %4533 }
 0x30c   :  { %15573 = vst [vmem:[#allocation9_spill] sm:$0xff] %v13557_v37  ;;  %v9938_v55 = vadd.f32 %v9937_v61, %v9936_v31  ;;  %10791 = vset.pattern.permute.xlu1 %v15574_v25  ;;  %v13564_v26 = vpop.permute.xlu1 %4075 }
 0x30d   :  { %4952 = vperm.xlu1 %10791, %v13049_v1  }
 0x30e   :  { %v13568_v24 = vadd.f32 %v9938_v55, %v13298_v15  ;;  %5431 = vperm.xlu0 %10796, %v13505_v4   ;;  %v15577_v55 = vld [vmem:[#allocation14_spill] sm:$0xff] }
 0x30f   :  { %8830 = vmatmul.mubr.msk.bf16.gmra.mxu0 %vm8829_vm11, %v15525_v59  ;;  %v13572_v38 = vpop.permute.xlu0 %4539  ;;  %vm3666_vm14 = vcmp.eq.s32.totalorder %v15577_v55, %v11537_v9  ;;  %vm4210_vm11 = vcmp.eq.s32.totalorder %v13369_v43, %v11537_v9 }
 0x310   :  { %15575 = vst [vmem:[#allocation12_spill] sm:$0xff] %v13568_v24  ;;  %15576 = vst [vmem:[#allocation13_spill] sm:$0xff] %v13572_v38  ;;  %v13574_v11 = vpop.permute.xlu1 %4081  ;;  %8832 = vmatprep.mubr.msk.bf16.mxu0 %vm8831_vm12, %v15525_v59  ;;  %v15500_v24 = vmov 25   ;;  %vm4103_vm12 = vcmp.eq.s32.totalorder %v13508_v18, %v11537_v9 }
 0x311   :  { %4958 = vperm.xlu1 %10791, %v13192_v39   ;;  %vm8833_vm15 = vmpackc.low %vm3667_vm13, %vm3666_vm14 }
 0x312   :  { %5437 = vperm.xlu0 %10796, %v13528_v7   ;;  %vm8889_vm13 = vmpackc.low %vm4104_vm9, %vm4103_vm12  ;;  %vm4109_vm12 = vcmp.eq.s32.totalorder %v13302_v29, %v11537_v9 }
 0x313   :  { %v9955_v15 = vpop.f32.mrf.mxu0  ;;  %v13583_v31 = vpop.permute.xlu0 %4545 }
 0x314   :  { %15578 = vst [vmem:[#allocation14_spill] sm:$0xff] %v13583_v31  ;;  %v13585_v61 = vpop.permute.xlu1 %4087 }
 0x315   :  { %4961 = vperm.xlu1 %10791, %v13075_v62   ;;  %v9956_v25 = vpop.f32.mrf.mxu0 }
 0x316   :  { %v9957_v38 = vadd.f32 %v9956_v25, %v9955_v15  ;;  %5443 = vperm.xlu0 %10796, %v13543_v32  }
 0x317   :  { %v9958_v27 = vpop.f32.mrf.mxu0  ;;  %8834 = vmatmul.mubr.msk.bf16.gmra.mxu0 %vm8833_vm15, %v15525_v59  ;;  %vm4106_vm15 = vcmp.eq.s32.totalorder %v13546_v33, %v11537_v9  ;;  %v11054_v33 = vld [vmem:[#allocation2 + $0x590] sm:$0xff]  }
 0x318   :  { %v13591_v16 = vadd.f32 %v9957_v38, %v13323_v19  ;;  %v13593_v37 = vpop.permute.xlu1 %4093  ;;  %v13595_v55 = vpop.permute.xlu0 %4607 }
 0x319   :  { %15580 = vst [vmem:[#allocation16_spill] sm:$0xff] %v13595_v55  ;;  %4967 = vperm.xlu1 %10791, %v13090_v54   ;;  %v9959_v31 = vpop.f32.mrf.mxu0 }
 0x31a   :  { %15579 = vst [vmem:[#allocation15_spill] sm:$0xff] %v13591_v16  ;;  %v9960_v17 = vadd.f32 %v9959_v31, %v9958_v27  ;;  %10797 = vset.pattern.permute.xlu0 %v15500_v24 }
 0x31b   :  { %v9961_v15 = vpop.f32.mrf.mxu0  ;;  %5505 = vperm.xlu0 %10797, %v13049_v1  }
 0x31c   :  { %v13601_v25 = vadd.f32 %v9960_v17, %v13332_v23  ;;  %v13603_v28 = vpop.permute.xlu1 %4099 }
 0x31d   :  { %4973 = vperm.xlu1 %10791, %v13104_v12   ;;  %v9962_v19 = vpop.f32.mrf.mxu0  ;;  %v13606_v38 = vpop.permute.xlu0 %4616 }
 0x31e   :  { %v9963_v55 = vadd.f32 %v9962_v19, %v9961_v15  ;;  %v11046_v15 = vld [vmem:[#allocation2 + $0x5b0] sm:$0xff]   ;;  %v11047_v19 = vld [vmem:[#allocation2 + $0x5e8] sm:$0xff]  }
 0x31f   :  { %v9964_v16 = vpop.f32.mrf.mxu0  ;;  %5514 = vperm.xlu0 %10797, %v13075_v62  }
 0x320   :  { %v13610_v31 = vadd.f32 %v9963_v55, %v13339_v30  ;;  %v11044_v30 = vld [vmem:[#allocation2 + $0x5b8] sm:$0xff]  }
 0x321   :  { %4979 = vperm.xlu1 %10791, %v13122_v34   ;;  %v4162_v1 = vpop.permute.xlu1 %4161  ;;  %v9965_v17 = vpop.f32.mrf.mxu0 }
 0x322   :  { %vm4206_vm3 = vcmp.eq.s32.totalorder %v4162_v1, %v11537_v9  ;;  %v9966_v23 = vadd.f32 %v9965_v17, %v9964_v16  ;;  %v13620_v62 = vpop.permute.xlu0 %4622 }
 0x323   :  { %vm8883_vm4 = vmpackc.low %vm4206_vm3, %vm4205_vm0  ;;  %v9967_v27 = vpop.f32.mrf.mxu0  ;;  %5520 = vperm.xlu0 %10797, %v13090_v54   ;;  %vm4105_vm0 = vcmp.eq.s32.totalorder %v13273_v56, %v11537_v9  ;;  %v11052_v56 = vld [vmem:[#allocation2 + $0x598] sm:$0xff]  }
 0x324   :  { %v13624_v48 = vadd.f32 %v9966_v23, %v13354_v3  ;;  %8884 = vmatprep.mubr.msk.bf16.mxu1 %vm8883_vm4, %v15525_v59  ;;  %vm8893_vm3 = vmpackc.low %vm4106_vm15, %vm4105_vm0 }
 0x325   :  { %4985 = vperm.xlu1 %10791, %v13138_v10   ;;  %v4165_v47 = vpop.permute.xlu1 %4164  ;;  %v9968_v16 = vpop.f32.mrf.mxu0  ;;  %8886 = vmatmul.mubr.msk.bf16.vlgmr.msra.gmra.mxu1 %vm8885_vm5, %v15525_v59  ;;  %vm4108_vm5 = vcmp.eq.s32.totalorder %v13564_v26, %v11537_v9  ;;  %v11056_v26 = vld [vmem:[#allocation2 + $0x588] sm:$0xff]  }
 0x326   :  { %vm4207_vm7 = vcmp.eq.s32.totalorder %v4165_v47, %v11537_v9  ;;  %v9969_v55 = vadd.f32 %v9968_v16, %v9967_v27  ;;  %v13632_v54 = vpop.permute.xlu0 %4628  ;;  %10260 = vmatpush3.bf16.msra.mxu1 %v11044_v30  ;;  %v11049_v30 = vld [vmem:[#allocation2 + $0x5e0] sm:$0xff]  }
 0x327   :  { %vm8887_vm8 = vmpackc.low %vm4208_vm6, %vm4207_vm7  ;;  %v9970_v3 = vpop.f32.mrf.mxu0  ;;  %5526 = vperm.xlu0 %10797, %v13104_v12   ;;  %10261 = vmatprep.subr.bf16.mxu1 %v11045_v13  ;;  %v11050_v47 = vld [vmem:[#allocation2 + $0x5a0] sm:$0xff]   ;;  %vm4107_vm6 = vcmp.eq.s32.totalorder %v13287_v49, %v11537_v9 }
 0x328   :  { %v13636_v57 = vadd.f32 %v9969_v55, %v13366_v52  ;;  %8888 = vmatprep.mubr.msk.bf16.mxu1 %vm8887_vm8, %v15525_v59  ;;  %v11048_v52 = vld [vmem:[#allocation2 + $0x5a8] sm:$0xff]   ;;  %vm4214_vm8 = vcmp.eq.s32.totalorder %v13405_v8, %v11537_v9  ;;  %vm8897_vm9 = vmpackc.low %vm4108_vm5, %vm4107_vm6 }
 0x329   :  { %4991 = vperm.xlu1 %10791, %v13376_v22   ;;  %v4171_v10 = vpop.permute.xlu1 %4170  ;;  %v9971_v1 = vpop.f32.mrf.mxu0 }
 0x32a   :  { %vm4209_vm10 = vcmp.eq.s32.totalorder %v4171_v10, %v11537_v9  ;;  %v9972_v17 = vadd.f32 %v9971_v1, %v9970_v3  ;;  %v13645_v12 = vpop.permute.xlu0 %4634  ;;  %10262 = vmatpush3.bf16.msra.mxu1 %v11046_v15  ;;  %v15581_v15 = vmov 23  }
 0x32b   :  { %v9973_v23 = vpop.f32.mrf.mxu0  ;;  %5532 = vperm.xlu0 %10797, %v13122_v34   ;;  %10263 = vmatprep.subr.bf16.mxu1 %v11047_v19  ;;  %vm8891_vm14 = vmpackc.low %vm4210_vm11, %vm4209_vm10  ;;  %vm4110_vm11 = vcmp.eq.s32.totalorder %v13574_v11, %v11537_v9 }
 0x32c   :  { %v13654_v27 = vadd.f32 %v9972_v17, %v13389_v14  ;;  %v13664_v14 = vld [vmem:[%s15482_s0 + $0x58] sm:$0xff]  ;;  %vm8901_vm15 = vmpackc.low %vm4110_vm11, %vm4109_vm12 }
 0x32d   :  { %4997 = vperm.xlu1 %10791, %v13396_v41   ;;  %v4177_v43 = vpop.permute.xlu1 %4176  ;;  %v9974_v13 = vpop.f32.mrf.mxu0  ;;  %8890 = vmatmul.mubr.msk.bf16.gmra.mxu1 %vm8889_vm13, %v15525_v59 }
 0x32e   :  { %v9975_v18 = vadd.f32 %v9974_v13, %v9973_v23  ;;  %8892 = vmatprep.mubr.msk.bf16.mxu1 %vm8891_vm14, %v15525_v59  ;;  %v13659_v34 = vpop.permute.xlu0 %4640  ;;  %10264 = vmatpush3.bf16.msra.mxu1 %v11048_v52  ;;  %vm4211_vm1 = vcmp.eq.s32.totalorder %v4177_v43, %v11537_v9  ;;  %v11053_v52 = vld [vmem:[#allocation2 + $0x5d0] sm:$0xff]   ;;  %vm4216_vm14 = vcmp.eq.s32.totalorder %v13428_v50, %v11537_v9 }
 0x32f   :  { %v9976_v16 = vpop.f32.mrf.mxu0  ;;  %5538 = vperm.xlu0 %10797, %v13664_v14   ;;  %10265 = vmatprep.subr.bf16.mxu1 %v11049_v30  ;;  %vm8895_vm4 = vmpackc.low %vm4212_vm2, %vm4211_vm1  ;;  %vm4112_vm1 = vcmp.eq.s32.totalorder %v13585_v61, %v11537_v9  ;;  %vm4111_vm2 = vcmp.eq.s32.totalorder %v13313_v2, %v11537_v9 }
 0x330   :  { %v13668_v55 = vadd.f32 %v9975_v18, %v13403_v53  ;;  %v11055_v18 = vld [vmem:[#allocation2 + $0x5c8] sm:$0xff]   ;;  %vm8905_vm5 = vmpackc.low %vm4112_vm1, %vm4111_vm2 }
 0x331   :  { %10794 = vset.pattern.permute.xlu1 %v15581_v15  ;;  %v4183_v3 = vpop.permute.xlu1 %4182  ;;  %v9977_v19 = vpop.f32.mrf.mxu0  ;;  %v15499_v15 = vmov 26  }
 0x332   :  { %v9978_v10 = vadd.f32 %v9977_v19, %v9976_v16  ;;  %5059 = vperm.xlu1 %10794, %v13418_v46   ;;  %v13679_v53 = vpop.permute.xlu0 %4646  ;;  %10266 = vmatpush3.bf16.msra.mxu1 %v11050_v47  ;;  %vm4213_vm7 = vcmp.eq.s32.totalorder %v4183_v3, %v11537_v9  ;;  %v11057_v19 = vld [vmem:[#allocation2 + $0x5c0] sm:$0xff]  }
 0x333   :  { %v9979_v1 = vpop.f32.mrf.mxu0  ;;  %5544 = vperm.xlu0 %10797, %v13376_v22   ;;  %10267 = vmatprep.subr.bf16.mxu1 %v11051_v40  ;;  %vm8899_vm10 = vmpackc.low %vm4214_vm8, %vm4213_vm7  ;;  %vm4114_vm7 = vcmp.eq.s32.totalorder %v13593_v37, %v11537_v9  ;;  %vm4113_vm8 = vcmp.eq.s32.totalorder %v13320_v42, %v11537_v9  ;;  %v15589_v37 = vld [vmem:[#allocation12_spill] sm:$0xff] }
 0x334   :  { %v13686_v17 = vadd.f32 %v9978_v10, %v13426_v20  ;;  %vm8909_vm11 = vmpackc.low %vm4114_vm7, %vm4113_vm8 }
 0x335   :  { %v4189_v21 = vpop.permute.xlu1 %4188  ;;  %v9980_v23 = vpop.f32.mrf.mxu0  ;;  %8894 = vmatmul.mubr.msk.bf16.gmra.mxu1 %vm8893_vm3, %v15525_v59 }
 0x336   :  { %v9981_v30 = vadd.f32 %v9980_v23, %v9979_v1  ;;  %5062 = vperm.xlu1 %10794, %v13192_v39   ;;  %8896 = vmatprep.mubr.msk.bf16.mxu1 %vm8895_vm4, %v15525_v59  ;;  %v13691_v43 = vpop.permute.xlu0 %4652  ;;  %vm4215_vm13 = vcmp.eq.s32.totalorder %v4189_v21, %v11537_v9  ;;  %vm4218_vm4 = vcmp.eq.s32.totalorder %v13439_v36, %v11537_v9 }
 0x337   :  { %v9982_v13 = vpop.f32.mrf.mxu0  ;;  %5550 = vperm.xlu0 %10797, %v13396_v41   ;;  %10268 = vmatpush3.bf16.msra.mxu1 %v11052_v56  ;;  %vm8903_vm0 = vmpackc.low %vm4216_vm14, %vm4215_vm13  ;;  %vm4116_vm13 = vcmp.eq.s32.totalorder %v13603_v28, %v11537_v9 }
 0x338   :  { %v13695_v20 = vadd.f32 %v9981_v30, %v13437_v5  ;;  %10269 = vmatprep.subr.bf16.mxu1 %v11053_v52  ;;  %v11058_v52 = vld [vmem:[#allocation2 + $0x580] sm:$0xff]  }
 0x339   :  { %v13701_v39 = vpop.permute.xlu1 %4194  ;;  %v9983_v47 = vpop.f32.mrf.mxu0 }
 0x33a   :  { %v9984_v16 = vadd.f32 %v9983_v47, %v9982_v13  ;;  %5068 = vperm.xlu1 %10794, %v13453_v63   ;;  %vm4217_vm3 = vcmp.eq.s32.totalorder %v13701_v39, %v11537_v9 }
 0x33b   :  { %v9985_v5 = vpop.f32.mrf.mxu0  ;;  %v13707_v40 = vpop.permute.xlu0 %4955  ;;  %10800 = vset.pattern.permute.xlu0 %v15499_v15  ;;  %10270 = vmatpush3.bf16.msra.mxu1 %v11054_v33  ;;  %vm8907_vm6 = vmpackc.low %vm4218_vm4, %vm4217_vm3 }
 0x33c   :  { %v13711_v49 = vadd.f32 %v9984_v16, %v13458_v6  ;;  %5853 = vperm.xlu0 %10800, %v13418_v46   ;;  %10271 = vmatprep.subr.bf16.mxu1 %v11055_v18 }
 0x33d   :  { %v13716_v8 = vpop.permute.xlu1 %4200  ;;  %v9986_v10 = vpop.f32.mrf.mxu0  ;;  %8898 = vmatmul.mubr.msk.bf16.gmra.mxu1 %vm8897_vm9, %v15525_v59 }
 0x33e   :  { %v9987_v1 = vadd.f32 %v9986_v10, %v9985_v5  ;;  %5074 = vperm.xlu1 %10794, %v13468_v0   ;;  %8900 = vmatprep.mubr.msk.bf16.mxu1 %vm8899_vm10, %v15525_v59  ;;  %vm4219_vm9 = vcmp.eq.s32.totalorder %v13716_v8, %v11537_v9 }
 0x33f   :  { %v9988_v56 = vpop.f32.mrf.mxu0  ;;  %v13721_v6 = vpop.permute.xlu0 %4964  ;;  %10272 = vmatpush3.bf16.msra.mxu1 %v11056_v26 }
 0x340   :  { %v13724_v23 = vadd.f32 %v9987_v1, %v13474_v51  ;;  %5862 = vperm.xlu0 %10800, %v13453_v63   ;;  %10273 = vmatprep.subr.bf16.mxu1 %v11057_v19 }
 0x341   :  { %v9989_v3 = vpop.f32.mrf.mxu0 }
 0x342   :  { %v9990_v30 = vadd.f32 %v9989_v3, %v9988_v56  ;;  %5080 = vperm.xlu1 %10794, %v13489_v58   ;;  %v13735_v51 = vpop.permute.xlu1 %4503 }
 0x343   :  { %v9991_v13 = vpop.f32.mrf.mxu0  ;;  %v13737_v33 = vpop.permute.xlu0 %4970  ;;  %10274 = vmatpush3.bf16.msra.mxu1 %v11058_v52  ;;  %v15586_v52 = vld [vmem:[#allocation5_spill] sm:$0xff]  ;;  %vm4550_vm1 = vcmp.eq.s32.totalorder %v13735_v51, %v11537_v9 }
 0x344   :  { %15582 = vst [vmem:[#allocation17_spill] sm:$0xff] %v13737_v33  ;;  %v13740_v11 = vadd.f32 %v9990_v30, %v13496_v44  ;;  %5868 = vperm.xlu0 %10800, %v13468_v0   ;;  %vm4220_vm10 = vcmp.eq.s32.totalorder %v15586_v52, %v11537_v9  ;;  %v15587_v30 = vmov 24  }
 0x345   :  { %v9992_v29 = vpop.f32.mrf.mxu0  ;;  %8902 = vmatmul.mubr.msk.bf16.gmra.mxu1 %vm8901_vm15, %v15525_v59  ;;  %vm8911_vm12 = vmpackc.low %vm4220_vm10, %vm4219_vm9 }
 0x346   :  { %v9993_v50 = vadd.f32 %v9992_v29, %v9991_v13  ;;  %5086 = vperm.xlu1 %10794, %v13505_v4   ;;  %v13745_v21 = vpop.permute.xlu1 %4509  ;;  %8904 = vmatprep.mubr.msk.bf16.mxu1 %vm8903_vm0, %v15525_v59  ;;  %v13796_v13 = vld [vmem:[%s15482_s0] sm:$0xff]  ;;  %v11059_v29 = vld [vmem:[#allocation2 + $0x678] sm:$0xff]  }
 0x347   :  { %v9994_v18 = vpop.f32.mrf.mxu0  ;;  %v13748_v47 = vpop.permute.xlu0 %4976  ;;  %10323 = vmatprep.subr.bf16.mxu0 %v11059_v29 }
 0x348   :  { %15583 = vst [vmem:[#allocation18_spill] sm:$0xff] %v13748_v47  ;;  %v13751_v16 = vadd.f32 %v9993_v50, %v13512_v45  ;;  %5874 = vperm.xlu0 %10800, %v13489_v58  }
 0x349   :  { %v9995_v44 = vpop.f32.mrf.mxu0 }
 0x34a   :  { %v9996_v5 = vadd.f32 %v9995_v44, %v9994_v18  ;;  %5092 = vperm.xlu1 %10794, %v13528_v7   ;;  %v13763_v45 = vpop.permute.xlu1 %4512  ;;  %v13812_v18 = vld [vmem:[%s15482_s0 + $0x10] sm:$0xff]  ;;  %v15498_v44 = vmov 27  }
 0x34b   :  { %v9997_v26 = vpop.f32.mrf.mxu0  ;;  %v13765_v19 = vpop.permute.xlu0 %4982  ;;  %vm4553_vm9 = vcmp.eq.s32.totalorder %v13763_v45, %v11537_v9 }
 0x34c   :  { %15584 = vst [vmem:[#allocation19_spill] sm:$0xff] %v13765_v19  ;;  %v13768_v61 = vadd.f32 %v9996_v5, %v13534_v35  ;;  %5880 = vperm.xlu0 %10800, %v13505_v4  }
 0x34d   :  { %v9998_v2 = vpop.f32.mrf.mxu0  ;;  %8906 = vmatmul.mubr.msk.bf16.gmra.mxu1 %vm8905_vm5, %v15525_v59 }
 0x34e   :  { %v9999_v39 = vadd.f32 %v9998_v2, %v9997_v26  ;;  %5098 = vperm.xlu1 %10794, %v13543_v32   ;;  %v13773_v36 = vpop.permute.xlu1 %4518  ;;  %8908 = vmatprep.mubr.msk.bf16.mxu1 %vm8907_vm6, %v15525_v59  ;;  %v15590_v26 = vld [vmem:[#allocation7_spill] sm:$0xff]  ;;  %vm4657_vm6 = vcmp.eq.s32.totalorder %v13606_v38, %v11537_v9 }
 0x34f   :  { %v10000_v10 = vpop.f32.mrf.mxu0  ;;  %v13776_v1 = vpop.permute.xlu0 %4988  ;;  %vm4115_vm14 = vcmp.eq.s32.totalorder %v15590_v26, %v11537_v9  ;;  %v13843_v26 = vld [vmem:[%s15482_s0 + $0x28] sm:$0xff] }
 0x350   :  { %15585 = vst [vmem:[#allocation20_spill] sm:$0xff] %v13776_v1  ;;  %v13779_v56 = vadd.f32 %v9999_v39, %v13550_v60  ;;  %5886 = vperm.xlu0 %10800, %v13528_v7   ;;  %vm8913_vm15 = vmpackc.low %vm4116_vm13, %vm4115_vm14 }
 0x351   :  { %v10001_v35 = vpop.f32.mrf.mxu0 }
 0x352   :  { %v10002_v3 = vadd.f32 %v10001_v35, %v10000_v10  ;;  %10795 = vset.pattern.permute.xlu1 %v15587_v30  ;;  %v13791_v60 = vpop.permute.xlu1 %4524  ;;  %v13828_v10 = vld [vmem:[%s15482_s0 + $0x18] sm:$0xff]  ;;  %v15591_v30 = vld [vmem:[#allocation15_spill] sm:$0xff] }
 0x353   :  { %5401 = vperm.xlu1 %10795, %v13796_v13   ;;  %v13799_v42 = vpop.permute.xlu0 %4994 }
 0x354   :  { %15588 = vst [vmem:[#allocation5_spill] sm:$0xff] %v13799_v42  ;;  %v13802_v8 = vadd.f32 %v10002_v3, %v15589_v37  ;;  %5892 = vperm.xlu0 %10800, %v13543_v32  }
 0x355   :  { %8910 = vmatmul.mubr.msk.bf16.gmra.mxu1 %vm8909_vm11, %v15525_v59  ;;  %vm4659_vm11 = vcmp.eq.s32.totalorder %v13620_v62, %v11537_v9 }
 0x356   :  { %v13806_v50 = vpop.permute.xlu1 %4530  ;;  %8912 = vmatprep.mubr.msk.bf16.mxu1 %vm8911_vm12, %v15525_v59  ;;  %vm4552_vm12 = vcmp.eq.s32.totalorder %v13745_v21, %v11537_v9 }
 0x357   :  { %5407 = vperm.xlu1 %10795, %v13812_v18   ;;  %vm8969_vm13 = vmpackc.low %vm4553_vm9, %vm4552_vm12 }
 0x358   :  { %10801 = vset.pattern.permute.xlu0 %v15498_v44  ;;  %v13816_v5 = vpop.permute.xlu0 %5056 }
 0x359   :  { %v10019_v2 = vpop.f32.mrf.mxu1  ;;  %5954 = vperm.xlu0 %10801, %v13796_v13  }
 0x35a   :  { %v13823_v39 = vpop.permute.xlu1 %4536 }
 0x35b   :  { %5410 = vperm.xlu1 %10795, %v13828_v10   ;;  %v10020_v35 = vpop.f32.mrf.mxu1 }
 0x35c   :  { %v10021_v52 = vadd.f32 %v10020_v35, %v10019_v2  ;;  %v13831_v3 = vpop.permute.xlu0 %5065 }
 0x35d   :  { %v10022_v28 = vpop.f32.mrf.mxu1  ;;  %8914 = vmatmul.mubr.msk.bf16.gmra.mxu1 %vm8913_vm15, %v15525_v59  ;;  %5963 = vperm.xlu0 %10801, %v13828_v10   ;;  %vm4555_vm15 = vcmp.eq.s32.totalorder %v13773_v36, %v11537_v9 }
 0x35e   :  { %v13836_v37 = vadd.f32 %v10021_v52, %v15591_v30  ;;  %v13838_v29 = vpop.permute.xlu1 %4542  ;;  %v13857_v30 = vld [vmem:[%s15482_s0 + $0x38] sm:$0xff] }
 0x35f   :  { %5416 = vperm.xlu1 %10795, %v13843_v26   ;;  %v10023_v2 = vpop.f32.mrf.mxu1 }
 0x360   :  { %v10024_v35 = vadd.f32 %v10023_v2, %v10022_v28  ;;  %v13846_v44 = vpop.permute.xlu0 %5071 }
 0x361   :  { %v10025_v15 = vpop.f32.mrf.mxu1  ;;  %5969 = vperm.xlu0 %10801, %v13843_v26  }
 0x362   :  { %v13850_v24 = vadd.f32 %v10024_v35, %v13601_v25  ;;  %v13852_v52 = vpop.permute.xlu1 %4548  ;;  %v15593_v25 = vld [vmem:[#allocation16_spill] sm:$0xff]  ;;  %v15594_v35 = vld [vmem:[#allocation6_spill] sm:$0xff] }
 0x363   :  { %5422 = vperm.xlu1 %10795, %v13857_v30   ;;  %v10026_v42 = vpop.f32.mrf.mxu1  ;;  %vm4654_vm0 = vcmp.eq.s32.totalorder %v15593_v25, %v11537_v9  ;;  %vm4551_vm2 = vcmp.eq.s32.totalorder %v15594_v35, %v11537_v9  ;;  %v11060_v25 = vld [vmem:[#allocation2 + $0x638] sm:$0xff]   ;;  %v11061_v35 = vld [vmem:[#allocation2 + $0x670] sm:$0xff]  }
 0x364   :  { %v10027_v1 = vadd.f32 %v10026_v42, %v10025_v15  ;;  %v13860_v28 = vpop.permute.xlu0 %5077  ;;  %v13875_v15 = vld [vmem:[%s15482_s0 + $0x48] sm:$0xff]  ;;  %vm8965_vm5 = vmpackc.low %vm4551_vm2, %vm4550_vm1  ;;  %vm4661_vm2 = vcmp.eq.s32.totalorder %v13632_v54, %v11537_v9 }
 0x365   :  { %15592 = vst [vmem:[#allocation12_spill] sm:$0xff] %v13860_v28  ;;  %v10028_v2 = vpop.f32.mrf.mxu1  ;;  %5975 = vperm.xlu0 %10801, %v13857_v30   ;;  %v11062_v28 = vld [vmem:[#allocation2 + $0x630] sm:$0xff]  }
 0x366   :  { %v13864_v19 = vadd.f32 %v10027_v1, %v13610_v31 }
 0x367   :  { %5428 = vperm.xlu1 %10795, %v13875_v15   ;;  %v4611_v42 = vpop.permute.xlu1 %4610  ;;  %v10029_v47 = vpop.f32.mrf.mxu1 }
 0x368   :  { %vm4655_vm3 = vcmp.eq.s32.totalorder %v4611_v42, %v11537_v9  ;;  %v10030_v31 = vadd.f32 %v10029_v47, %v10028_v2  ;;  %v13879_v1 = vpop.permute.xlu0 %5083 }
 0x369   :  { %15595 = vst [vmem:[#allocation7_spill] sm:$0xff] %v13879_v1  ;;  %vm8963_vm4 = vmpackc.low %vm4655_vm3, %vm4654_vm0  ;;  %v10031_v51 = vpop.f32.mrf.mxu1  ;;  %5981 = vperm.xlu0 %10801, %v13875_v15  }
 0x36a   :  { %v13883_v33 = vadd.f32 %v10030_v31, %v13624_v48  ;;  %8964 = vmatprep.mubr.msk.bf16.mxu0 %vm8963_vm4, %v15525_v59  ;;  %v11063_v31 = vld [vmem:[#allocation2 + $0x668] sm:$0xff]  }
 0x36b   :  { %5434 = vperm.xlu1 %10795, %v13664_v14   ;;  %v4614_v47 = vpop.permute.xlu1 %4613  ;;  %v10032_v2 = vpop.f32.mrf.mxu1  ;;  %8966 = vmatmul.mubr.msk.bf16.vlgmr.msra.gmra.mxu0 %vm8965_vm5, %v15525_v59  ;;  %vm4557_vm5 = vcmp.eq.s32.totalorder %v13791_v60, %v11537_v9 }
 0x36c   :  { %vm4656_vm7 = vcmp.eq.s32.totalorder %v4614_v47, %v11537_v9  ;;  %v10033_v42 = vadd.f32 %v10032_v2, %v10031_v51  ;;  %v13891_v1 = vpop.permute.xlu0 %5089  ;;  %10324 = vmatpush3.bf16.msra.mxu0 %v11060_v25 }
 0x36d   :  { %vm8967_vm8 = vmpackc.low %vm4657_vm6, %vm4656_vm7  ;;  %v10034_v48 = vpop.f32.mrf.mxu1  ;;  %5987 = vperm.xlu0 %10801, %v13664_v14   ;;  %10325 = vmatprep.subr.bf16.mxu0 %v11061_v35 }
 0x36e   :  { %v13895_v38 = vadd.f32 %v10033_v42, %v13636_v57  ;;  %8968 = vmatprep.mubr.msk.bf16.mxu0 %vm8967_vm8, %v15525_v59  ;;  %v11064_v57 = vld [vmem:[#allocation2 + $0x628] sm:$0xff]   ;;  %v11065_v42 = vld [vmem:[#allocation2 + $0x660] sm:$0xff]   ;;  %vm4663_vm8 = vcmp.eq.s32.totalorder %v13645_v12, %v11537_v9 }
 0x36f   :  { %5440 = vperm.xlu1 %10795, %v13376_v22   ;;  %v4620_v51 = vpop.permute.xlu1 %4619  ;;  %v10035_v47 = vpop.f32.mrf.mxu1 }
 0x370   :  { %vm4658_vm10 = vcmp.eq.s32.totalorder %v4620_v51, %v11537_v9  ;;  %v10036_v25 = vadd.f32 %v10035_v47, %v10034_v48  ;;  %v13904_v35 = vpop.permute.xlu0 %5095  ;;  %10326 = vmatpush3.bf16.msra.mxu0 %v11062_v28  ;;  %v15596_v47 = vld [vmem:[#allocation10_spill] sm:$0xff] }
 0x371   :  { %v10037_v2 = vpop.f32.mrf.mxu1  ;;  %5993 = vperm.xlu0 %10801, %v13376_v22   ;;  %10327 = vmatprep.subr.bf16.mxu0 %v11063_v31  ;;  %vm8971_vm14 = vmpackc.low %vm4659_vm11, %vm4658_vm10  ;;  %v11066_v31 = vld [vmem:[#allocation2 + $0x620] sm:$0xff]   ;;  %vm4554_vm0 = vcmp.eq.s32.totalorder %v15596_v47, %v11537_v9  ;;  %vm4559_vm11 = vcmp.eq.s32.totalorder %v13806_v50, %v11537_v9 }
 0x372   :  { %v13913_v48 = vadd.f32 %v10036_v25, %v13654_v27  ;;  %v11067_v27 = vld [vmem:[#allocation2 + $0x658] sm:$0xff]   ;;  %v15597_v25 = vmov 25   ;;  %vm8973_vm3 = vmpackc.low %vm4555_vm15, %vm4554_vm0 }
 0x373   :  { %5446 = vperm.xlu1 %10795, %v13396_v41   ;;  %v4626_v62 = vpop.permute.xlu1 %4625  ;;  %v10038_v28 = vpop.f32.mrf.mxu1  ;;  %8970 = vmatmul.mubr.msk.bf16.gmra.mxu0 %vm8969_vm13, %v15525_v59 }
 0x374   :  { %v10039_v21 = vadd.f32 %v10038_v28, %v10037_v2  ;;  %8972 = vmatprep.mubr.msk.bf16.mxu0 %vm8971_vm14, %v15525_v59  ;;  %v13918_v22 = vpop.permute.xlu0 %5101  ;;  %10328 = vmatpush3.bf16.msra.mxu0 %v11064_v57  ;;  %vm4660_vm1 = vcmp.eq.s32.totalorder %v4626_v62, %v11537_v9  ;;  %v15505_v57 = vmov 28   ;;  %v11071_v62 = vld [vmem:[#allocation2 + $0x648] sm:$0xff]   ;;  %vm4665_vm14 = vcmp.eq.s32.totalorder %v13659_v34, %v11537_v9 }
 0x375   :  { %v10040_v51 = vpop.f32.mrf.mxu1  ;;  %5999 = vperm.xlu0 %10801, %v13396_v41   ;;  %10329 = vmatprep.subr.bf16.mxu0 %v11065_v42  ;;  %vm8975_vm4 = vmpackc.low %vm4661_vm2, %vm4660_vm1  ;;  %vm4561_vm1 = vcmp.eq.s32.totalorder %v13823_v39, %v11537_v9 }
 0x376   :  { %v13922_v45 = vadd.f32 %v10039_v21, %v13668_v55  ;;  %v11068_v21 = vld [vmem:[#allocation2 + $0x618] sm:$0xff]  }
 0x377   :  { %10798 = vset.pattern.permute.xlu1 %v15597_v25  ;;  %v4632_v2 = vpop.permute.xlu1 %4631  ;;  %v10041_v28 = vpop.f32.mrf.mxu1 }
 0x378   :  { %v10042_v41 = vadd.f32 %v10041_v28, %v10040_v51  ;;  %5508 = vperm.xlu1 %10798, %v13418_v46   ;;  %10330 = vmatpush3.bf16.msra.mxu0 %v11066_v31  ;;  %v11069_v31 = vld [vmem:[#allocation2 + $0x650] sm:$0xff]   ;;  %v15598_v28 = vld [vmem:[#allocation8_spill] sm:$0xff]  ;;  %vm4662_vm7 = vcmp.eq.s32.totalorder %v4632_v2, %v11537_v9 }
 0x379   :  { %v10043_v55 = vpop.f32.mrf.mxu1  ;;  %10804 = vset.pattern.permute.xlu0 %v15505_v57  ;;  %v13934_v42 = vpop.permute.xlu0 %5404  ;;  %10331 = vmatprep.subr.bf16.mxu0 %v11067_v27  ;;  %vm4556_vm6 = vcmp.eq.s32.totalorder %v15598_v28, %v11537_v9  ;;  %vm8979_vm10 = vmpackc.low %vm4663_vm8, %vm4662_vm7  ;;  %vm4563_vm7 = vcmp.eq.s32.totalorder %v13838_v29, %v11537_v9 }
 0x37a   :  { %v13943_v54 = vadd.f32 %v10042_v41, %v13686_v17  ;;  %6302 = vperm.xlu0 %10804, %v13418_v46   ;;  %v11070_v17 = vld [vmem:[#allocation2 + $0x610] sm:$0xff]   ;;  %vm8977_vm9 = vmpackc.low %vm4557_vm5, %vm4556_vm6 }
 0x37b   :  { %v4638_v51 = vpop.permute.xlu1 %4637  ;;  %v10044_v25 = vpop.f32.mrf.mxu1  ;;  %8974 = vmatmul.mubr.msk.bf16.gmra.mxu0 %vm8973_vm3, %v15525_v59 }
 0x37c   :  { %v10045_v27 = vadd.f32 %v10044_v25, %v10043_v55  ;;  %5511 = vperm.xlu1 %10798, %v13812_v18   ;;  %8976 = vmatprep.mubr.msk.bf16.mxu0 %vm8975_vm4, %v15525_v59  ;;  %v11072_v25 = vld [vmem:[#allocation2 + $0x608] sm:$0xff]   ;;  %vm4664_vm13 = vcmp.eq.s32.totalorder %v4638_v51, %v11537_v9  ;;  %vm4667_vm4 = vcmp.eq.s32.totalorder %v13679_v53, %v11537_v9 }
 0x37d   :  { %v10046_v36 = vpop.f32.mrf.mxu1  ;;  %v13951_v47 = vpop.permute.xlu0 %5413  ;;  %10332 = vmatpush3.bf16.msra.mxu0 %v11068_v21  ;;  %vm8983_vm0 = vmpackc.low %vm4665_vm14, %vm4664_vm13  ;;  %vm4565_vm13 = vcmp.eq.s32.totalorder %v13852_v52, %v11537_v9 }
 0x37e   :  { %v13954_v46 = vadd.f32 %v10045_v27, %v13695_v20  ;;  %6311 = vperm.xlu0 %10804, %v13453_v63   ;;  %10333 = vmatprep.subr.bf16.mxu0 %v11069_v31  ;;  %v11073_v27 = vld [vmem:[#allocation2 + $0x640] sm:$0xff]  }
 0x37f   :  { %v13961_v41 = vpop.permute.xlu1 %4643  ;;  %v10047_v55 = vpop.f32.mrf.mxu1 }
 0x380   :  { %v10048_v20 = vadd.f32 %v10047_v55, %v10046_v36  ;;  %5517 = vperm.xlu1 %10798, %v13453_v63   ;;  %vm4666_vm3 = vcmp.eq.s32.totalorder %v13961_v41, %v11537_v9 }
 0x381   :  { %v10049_v21 = vpop.f32.mrf.mxu1  ;;  %v13967_v31 = vpop.permute.xlu0 %5419  ;;  %10334 = vmatpush3.bf16.msra.mxu0 %v11070_v17  ;;  %vm8987_vm6 = vmpackc.low %vm4667_vm4, %vm4666_vm3 }
 0x382   :  { %v13970_v60 = vadd.f32 %v10048_v20, %v13711_v49  ;;  %6317 = vperm.xlu0 %10804, %v13468_v0   ;;  %10335 = vmatprep.subr.bf16.mxu0 %v11071_v62  ;;  %v11074_v49 = vld [vmem:[#allocation2 + $0x600] sm:$0xff]   ;;  %v15599_v62 = vld [vmem:[#allocation11_spill] sm:$0xff] }
 0x383   :  { %v13973_v2 = vpop.permute.xlu1 %4649  ;;  %v10050_v12 = vpop.f32.mrf.mxu1  ;;  %8978 = vmatmul.mubr.msk.bf16.gmra.mxu0 %vm8977_vm9, %v15525_v59  ;;  %vm4558_vm12 = vcmp.eq.s32.totalorder %v15599_v62, %v11537_v9 }
 0x384   :  { %v10051_v63 = vadd.f32 %v10050_v12, %v10049_v21  ;;  %5523 = vperm.xlu1 %10798, %v13468_v0   ;;  %8980 = vmatprep.mubr.msk.bf16.mxu0 %vm8979_vm10, %v15525_v59  ;;  %vm8981_vm15 = vmpackc.low %vm4559_vm11, %vm4558_vm12  ;;  %vm4668_vm9 = vcmp.eq.s32.totalorder %v13973_v2, %v11537_v9  ;;  %vm4669_vm10 = vcmp.eq.s32.totalorder %v13691_v43, %v11537_v9  ;;  %v11075_v2 = vld [vmem:[#allocation2 + $0x6f8] sm:$0xff]  }
 0x385   :  { %v10052_v36 = vpop.f32.mrf.mxu1  ;;  %v13978_v17 = vpop.permute.xlu0 %5425  ;;  %10336 = vmatpush3.bf16.msra.mxu0 %v11072_v25  ;;  %vm8991_vm12 = vmpackc.low %vm4669_vm10, %vm4668_vm9  ;;  %10387 = vmatprep.subr.bf16.mxu1 %v11075_v2 }
 0x386   :  { %v13981_v28 = vadd.f32 %v10051_v63, %v13724_v23  ;;  %6323 = vperm.xlu0 %10804, %v13489_v58   ;;  %10337 = vmatprep.subr.bf16.mxu0 %v11073_v27 }
 0x387   :  { %v10053_v0 = vpop.f32.mrf.mxu1 }
 0x388   :  { %v10054_v55 = vadd.f32 %v10053_v0, %v10052_v36  ;;  %5529 = vperm.xlu1 %10798, %v13489_v58   ;;  %v13992_v23 = vpop.permute.xlu1 %4952 }
 0x389   :  { %v10055_v20 = vpop.f32.mrf.mxu1  ;;  %v13994_v21 = vpop.permute.xlu0 %5431  ;;  %10338 = vmatpush3.bf16.msra.mxu0 %v11074_v49 }
 0x38a   :  { %v13997_v50 = vadd.f32 %v10054_v55, %v13740_v11  ;;  %6329 = vperm.xlu0 %10804, %v13505_v4   ;;  %v15600_v11 = vld [vmem:[#allocation9_spill] sm:$0xff]  ;;  %v15503_v55 = vmov 29  }
 0x38b   :  { %v10056_v51 = vpop.f32.mrf.mxu1  ;;  %8982 = vmatmul.mubr.msk.bf16.gmra.mxu0 %vm8981_vm15, %v15525_v59  ;;  %vm4560_vm2 = vcmp.eq.s32.totalorder %v15600_v11, %v11537_v9 }
 0x38c   :  { %v10057_v34 = vadd.f32 %v10056_v51, %v10055_v20  ;;  %5535 = vperm.xlu1 %10798, %v13505_v4   ;;  %v14002_v58 = vpop.permute.xlu1 %4958  ;;  %8984 = vmatprep.mubr.msk.bf16.mxu0 %vm8983_vm0, %v15525_v59  ;;  %vm8985_vm5 = vmpackc.low %vm4561_vm1, %vm4560_vm2  ;;  %v15602_v20 = vld [vmem:[#allocation13_spill] sm:$0xff]  ;;  %v15603_v51 = vmov 26   ;;  %vm5103_vm0 = vcmp.eq.s32.totalorder %v13816_v5, %v11537_v9  ;;  %vm4999_vm1 = vcmp.eq.s32.totalorder %v13992_v23, %v11537_v9  ;;  %v14107_v5 = vld [vmem:[%s15482_s0 + $0x68] sm:$0xff] }
 0x38d   :  { %v10058_v25 = vpop.f32.mrf.mxu1  ;;  %v14005_v27 = vpop.permute.xlu0 %5437  ;;  %vm4562_vm8 = vcmp.eq.s32.totalorder %v15602_v20, %v11537_v9  ;;  %vm5000_vm2 = vcmp.eq.s32.totalorder %v13707_v40, %v11537_v9  ;;  %v11077_v23 = vld [vmem:[#allocation2 + $0x6f0] sm:$0xff]  }
 0x38e   :  { %v14008_v12 = vadd.f32 %v10057_v34, %v13751_v16  ;;  %6335 = vperm.xlu0 %10804, %v13528_v7   ;;  %vm8989_vm11 = vmpackc.low %vm4563_vm7, %vm4562_vm8 }
 0x38f   :  { %v10059_v63 = vpop.f32.mrf.mxu1 }
 0x390   :  { %v10060_v4 = vadd.f32 %v10059_v63, %v10058_v25  ;;  %5541 = vperm.xlu1 %10798, %v13528_v7   ;;  %v14020_v16 = vpop.permute.xlu1 %4961 }
 0x391   :  { %v10061_v36 = vpop.f32.mrf.mxu1  ;;  %v14022_v49 = vpop.permute.xlu0 %5443  ;;  %vm5002_vm9 = vcmp.eq.s32.totalorder %v14020_v16, %v11537_v9 }
 0x392   :  { %15601 = vst [vmem:[#allocation15_spill] sm:$0xff] %v14022_v49  ;;  %v14025_v39 = vadd.f32 %v10060_v4, %v13768_v61  ;;  %6341 = vperm.xlu0 %10804, %v13543_v32  }
 0x393   :  { %v10062_v62 = vpop.f32.mrf.mxu1  ;;  %8986 = vmatmul.mubr.msk.bf16.gmra.mxu0 %vm8985_vm5, %v15525_v59  ;;  %vm9045_vm5 = vmpackc.low %vm5000_vm2, %vm4999_vm1 }
 0x394   :  { %v10063_v41 = vadd.f32 %v10062_v62, %v10061_v36  ;;  %5547 = vperm.xlu1 %10798, %v13543_v32   ;;  %v14030_v53 = vpop.permute.xlu1 %4967  ;;  %8988 = vmatprep.mubr.msk.bf16.mxu0 %vm8987_vm6, %v15525_v59  ;;  %vm5106_vm6 = vcmp.eq.s32.totalorder %v13831_v3, %v11537_v9  ;;  %v11079_v3 = vld [vmem:[#allocation2 + $0x6e8] sm:$0xff]  }
 0x395   :  { %v10064_v7 = vpop.f32.mrf.mxu1 }
 0x396   :  { %v14034_v0 = vadd.f32 %v10063_v41, %v13779_v56  ;;  %10805 = vset.pattern.permute.xlu0 %v15503_v55  ;;  %v14037_v61 = vpop.permute.xlu0 %5505  ;;  %v11087_v55 = vld [vmem:[#allocation2 + $0x6c8] sm:$0xff]  }
 0x397   :  { %v10065_v32 = vpop.f32.mrf.mxu1  ;;  %6403 = vperm.xlu0 %10805, %v13796_v13  }
 0x398   :  { %v10066_v56 = vadd.f32 %v10065_v32, %v10064_v7  ;;  %10799 = vset.pattern.permute.xlu1 %v15603_v51  ;;  %v14049_v34 = vpop.permute.xlu1 %4973 }
 0x399   :  { %5850 = vperm.xlu1 %10799, %v13796_v13  }
 0x39a   :  { %v14053_v29 = vadd.f32 %v10066_v56, %v13802_v8  ;;  %v14055_v25 = vpop.permute.xlu0 %5514  ;;  %v15604_v8 = vld [vmem:[#allocation14_spill] sm:$0xff] }
 0x39b   :  { %8990 = vmatmul.mubr.msk.bf16.gmra.mxu0 %vm8989_vm11, %v15525_v59  ;;  %6412 = vperm.xlu0 %10805, %v13828_v10   ;;  %vm4564_vm14 = vcmp.eq.s32.totalorder %v15604_v8, %v11537_v9  ;;  %vm5108_vm11 = vcmp.eq.s32.totalorder %v13846_v44, %v11537_v9  ;;  %v14149_v44 = vld [vmem:[%s15482_s0 + $0x78] sm:$0xff] }
 0x39c   :  { %v14059_v43 = vpop.permute.xlu1 %4979  ;;  %8992 = vmatprep.mubr.msk.bf16.mxu0 %vm8991_vm12, %v15525_v59  ;;  %vm8993_vm15 = vmpackc.low %vm4565_vm13, %vm4564_vm14  ;;  %vm5001_vm12 = vcmp.eq.s32.totalorder %v14002_v58, %v11537_v9 }
 0x39d   :  { %5856 = vperm.xlu1 %10799, %v13812_v18   ;;  %vm9049_vm13 = vmpackc.low %vm5002_vm9, %vm5001_vm12 }
 0x39e   :  { %v14070_v4 = vpop.permute.xlu0 %5520 }
 0x39f   :  { %v10083_v11 = vpop.f32.mrf.mxu0  ;;  %6418 = vperm.xlu0 %10805, %v13843_v26  }
 0x3a0   :  { %v14068_v63 = vpop.permute.xlu1 %4985 }
 0x3a1   :  { %5859 = vperm.xlu1 %10799, %v13828_v10   ;;  %v10084_v36 = vpop.f32.mrf.mxu0 }
 0x3a2   :  { %v10085_v62 = vadd.f32 %v10084_v36, %v10083_v11  ;;  %v14081_v56 = vpop.permute.xlu0 %5526 }
 0x3a3   :  { %v10086_v41 = vpop.f32.mrf.mxu0  ;;  %8994 = vmatmul.mubr.msk.bf16.gmra.mxu0 %vm8993_vm15, %v15525_v59  ;;  %6424 = vperm.xlu0 %10805, %v13857_v30   ;;  %vm5004_vm15 = vcmp.eq.s32.totalorder %v14030_v53, %v11537_v9  ;;  %v11084_v53 = vld [vmem:[#allocation2 + $0x698] sm:$0xff]  }
 0x3a4   :  { %v14076_v52 = vadd.f32 %v10085_v62, %v13836_v37  ;;  %v14078_v7 = vpop.permute.xlu1 %4991 }
 0x3a5   :  { %5865 = vperm.xlu1 %10799, %v13843_v26   ;;  %v10087_v20 = vpop.f32.mrf.mxu0 }
 0x3a6   :  { %v10088_v32 = vadd.f32 %v10087_v20, %v10086_v41  ;;  %v14096_v41 = vpop.permute.xlu0 %5532 }
 0x3a7   :  { %v10089_v51 = vpop.f32.mrf.mxu0  ;;  %6430 = vperm.xlu0 %10805, %v13875_v15  }
 0x3a8   :  { %v14085_v2 = vadd.f32 %v10088_v32, %v13850_v24  ;;  %v14087_v8 = vpop.permute.xlu1 %4997 }
 0x3a9   :  { %5871 = vperm.xlu1 %10799, %v13857_v30   ;;  %v10090_v37 = vpop.f32.mrf.mxu0 }
 0x3aa   :  { %v10091_v11 = vadd.f32 %v10090_v37, %v10089_v51 }
 0x3ab   :  { %v10092_v36 = vpop.f32.mrf.mxu0  ;;  %6436 = vperm.xlu0 %10805, %v13664_v14  }
 0x3ac   :  { %v14092_v62 = vadd.f32 %v10091_v11, %v13864_v19  ;;  %v11076_v19 = vld [vmem:[#allocation2 + $0x6b8] sm:$0xff]  }
 0x3ad   :  { %5877 = vperm.xlu1 %10799, %v13875_v15   ;;  %v5060_v24 = vpop.permute.xlu1 %5059  ;;  %v10093_v20 = vpop.f32.mrf.mxu0 }
 0x3ae   :  { %vm5104_vm3 = vcmp.eq.s32.totalorder %v5060_v24, %v11537_v9  ;;  %v10094_v32 = vadd.f32 %v10093_v20, %v10092_v36  ;;  %v14119_v24 = vpop.permute.xlu0 %5538  ;;  %v11078_v20 = vld [vmem:[#allocation2 + $0x6b0] sm:$0xff]  }
 0x3af   :  { %vm9043_vm4 = vmpackc.low %vm5104_vm3, %vm5103_vm0  ;;  %v10095_v51 = vpop.f32.mrf.mxu0  ;;  %6442 = vperm.xlu0 %10805, %v14107_v5   ;;  %vm5003_vm0 = vcmp.eq.s32.totalorder %v13721_v6, %v11537_v9 }
 0x3b0   :  { %v14111_v40 = vadd.f32 %v10094_v32, %v13883_v33  ;;  %9044 = vmatprep.mubr.msk.bf16.mxu1 %vm9043_vm4, %v15525_v59  ;;  %v15501_v32 = vmov 30   ;;  %vm9053_vm3 = vmpackc.low %vm5004_vm15, %vm5003_vm0 }
 0x3b1   :  { %5883 = vperm.xlu1 %10799, %v13664_v14   ;;  %v5063_v37 = vpop.permute.xlu1 %5062  ;;  %v10096_v11 = vpop.f32.mrf.mxu0  ;;  %9046 = vmatmul.mubr.msk.bf16.vlgmr.msra.gmra.mxu1 %vm9045_vm5, %v15525_v59  ;;  %vm5006_vm5 = vcmp.eq.s32.totalorder %v14049_v34, %v11537_v9 }
 0x3b2   :  { %vm5105_vm7 = vcmp.eq.s32.totalorder %v5063_v37, %v11537_v9  ;;  %v10097_v36 = vadd.f32 %v10096_v11, %v10095_v51  ;;  %10388 = vmatpush3.bf16.msra.mxu1 %v11076_v19  ;;  %v14129_v51 = vld [vmem:[%s15482_s0 + $0x8] sm:$0xff] }
 0x3b3   :  { %vm9047_vm8 = vmpackc.low %vm5106_vm6, %vm5105_vm7  ;;  %v10098_v33 = vpop.f32.mrf.mxu0  ;;  %10809 = vset.pattern.permute.xlu0 %v15501_v32  ;;  %10389 = vmatprep.subr.bf16.mxu1 %v11077_v23  ;;  %v11080_v37 = vld [vmem:[#allocation2 + $0x6a8] sm:$0xff]   ;;  %v14143_v32 = vpop.permute.xlu0 %5544 }
 0x3b4   :  { %v14123_v14 = vadd.f32 %v10097_v36, %v13895_v38  ;;  %9048 = vmatprep.mubr.msk.bf16.mxu1 %vm9047_vm8, %v15525_v59  ;;  %6751 = vperm.xlu0 %10809, %v14129_v51   ;;  %v11081_v36 = vld [vmem:[#allocation2 + $0x6e0] sm:$0xff]  }
 0x3b5   :  { %5889 = vperm.xlu1 %10799, %v14107_v5   ;;  %v5069_v19 = vpop.permute.xlu1 %5068  ;;  %v10099_v23 = vpop.f32.mrf.mxu0 }
 0x3b6   :  { %vm5107_vm10 = vcmp.eq.s32.totalorder %v5069_v19, %v11537_v9  ;;  %v10100_v38 = vadd.f32 %v10099_v23, %v10098_v33  ;;  %10390 = vmatpush3.bf16.msra.mxu1 %v11078_v20  ;;  %v11083_v19 = vld [vmem:[#allocation2 + $0x6d8] sm:$0xff]  }
 0x3b7   :  { %v10101_v11 = vpop.f32.mrf.mxu0  ;;  %10391 = vmatprep.subr.bf16.mxu1 %v11079_v3  ;;  %vm9051_vm14 = vmpackc.low %vm5108_vm11, %vm5107_vm10  ;;  %vm5008_vm11 = vcmp.eq.s32.totalorder %v14059_v43, %v11537_v9 }
 0x3b8   :  { %v14141_v16 = vadd.f32 %v10100_v38, %v13913_v48  ;;  %6754 = vperm.xlu0 %10809, %v13812_v18   ;;  %v11082_v48 = vld [vmem:[#allocation2 + $0x6a0] sm:$0xff]   ;;  %v15605_v38 = vmov 27  }
 0x3b9   :  { %5895 = vperm.xlu1 %10799, %v14149_v44   ;;  %v5075_v58 = vpop.permute.xlu1 %5074  ;;  %v10102_v20 = vpop.f32.mrf.mxu0  ;;  %9050 = vmatmul.mubr.msk.bf16.gmra.mxu1 %vm9049_vm13, %v15525_v59 }
 0x3ba   :  { %v10103_v33 = vadd.f32 %v10102_v20, %v10101_v11  ;;  %9052 = vmatprep.mubr.msk.bf16.mxu1 %vm9051_vm14, %v15525_v59  ;;  %10392 = vmatpush3.bf16.msra.mxu1 %v11080_v37  ;;  %vm5109_vm1 = vcmp.eq.s32.totalorder %v5075_v58, %v11537_v9  ;;  %v15606_v37 = vld [vmem:[#allocation12_spill] sm:$0xff]  ;;  %v14175_v58 = vld [vmem:[%s15482_s0 + $0x30] sm:$0xff]  ;;  %vm5114_vm14 = vcmp.eq.s32.totalorder %v13891_v1, %v11537_v9 }
 0x3bb   :  { %v10104_v3 = vpop.f32.mrf.mxu0  ;;  %10393 = vmatprep.subr.bf16.mxu1 %v11081_v36  ;;  %vm5110_vm2 = vcmp.eq.s32.totalorder %v15606_v37, %v11537_v9 }
 0x3bc   :  { %v14155_v23 = vadd.f32 %v10103_v33, %v13922_v45  ;;  %6763 = vperm.xlu0 %10809, %v13843_v26   ;;  %v14167_v45 = vpop.permute.xlu0 %5550  ;;  %vm9055_vm4 = vmpackc.low %vm5110_vm2, %vm5109_vm1  ;;  %vm5010_vm1 = vcmp.eq.s32.totalorder %v14068_v63, %v11537_v9 }
 0x3bd   :  { %10802 = vset.pattern.permute.xlu1 %v15605_v38  ;;  %v5081_v11 = vpop.permute.xlu1 %5080  ;;  %v10105_v20 = vpop.f32.mrf.mxu0 }
 0x3be   :  { %v10106_v36 = vadd.f32 %v10105_v20, %v10104_v3  ;;  %5957 = vperm.xlu1 %10802, %v14129_v51   ;;  %10394 = vmatpush3.bf16.msra.mxu1 %v11082_v48  ;;  %v11085_v3 = vld [vmem:[#allocation2 + $0x6d0] sm:$0xff]   ;;  %vm5111_vm7 = vcmp.eq.s32.totalorder %v5081_v11, %v11537_v9 }
 0x3bf   :  { %v10107_v33 = vpop.f32.mrf.mxu0  ;;  %10395 = vmatprep.subr.bf16.mxu1 %v11083_v19  ;;  %v11086_v19 = vld [vmem:[#allocation2 + $0x690] sm:$0xff]  }
 0x3c0   :  { %v14170_v6 = vadd.f32 %v10106_v36, %v13943_v54  ;;  %6766 = vperm.xlu0 %10809, %v14175_v58   ;;  %v14184_v36 = vpop.permute.xlu0 %5853  ;;  %v14208_v11 = vld [vmem:[%s15482_s0 + $0x50] sm:$0xff] }
 0x3c1   :  { %v5087_v38 = vpop.permute.xlu1 %5086  ;;  %v10108_v20 = vpop.f32.mrf.mxu0  ;;  %9054 = vmatmul.mubr.msk.bf16.gmra.mxu1 %vm9053_vm3, %v15525_v59  ;;  %15607 = vst [vmem:[#allocation16_spill] sm:$0xff] %v14184_v36  ;;  %v11090_v36 = vld [vmem:[#allocation2 + $0x680] sm:$0xff]  }
 0x3c2   :  { %v10109_v48 = vadd.f32 %v10108_v20, %v10107_v33  ;;  %5960 = vperm.xlu1 %10802, %v13812_v18   ;;  %9056 = vmatprep.mubr.msk.bf16.mxu1 %vm9055_vm4, %v15525_v59  ;;  %v15608_v33 = vld [vmem:[#allocation17_spill] sm:$0xff]  ;;  %vm5113_vm13 = vcmp.eq.s32.totalorder %v5087_v38, %v11537_v9  ;;  %vm5116_vm4 = vcmp.eq.s32.totalorder %v13904_v35, %v11537_v9 }
 0x3c3   :  { %v10110_v54 = vpop.f32.mrf.mxu0  ;;  %10396 = vmatpush3.bf16.msra.mxu1 %v11084_v53  ;;  %vm5005_vm6 = vcmp.eq.s32.totalorder %v15608_v33, %v11537_v9  ;;  %vm9063_vm0 = vmpackc.low %vm5114_vm14, %vm5113_vm13  ;;  %vm5014_vm13 = vcmp.eq.s32.totalorder %v14087_v8, %v11537_v9 }
 0x3c4   :  { %v14182_v37 = vadd.f32 %v10109_v48, %v13954_v46  ;;  %6775 = vperm.xlu0 %10809, %v13875_v15   ;;  %10397 = vmatprep.subr.bf16.mxu1 %v11085_v3  ;;  %v15609_v46 = vld [vmem:[#allocation7_spill] sm:$0xff]  ;;  %v14199_v3 = vld [vmem:[%s15482_s0 + $0x20] sm:$0xff]  ;;  %v11088_v48 = vld [vmem:[#allocation2 + $0x688] sm:$0xff]  }
 0x3c5   :  { %v14191_v20 = vpop.permute.xlu1 %5092  ;;  %v10111_v57 = vpop.f32.mrf.mxu0  ;;  %vm5112_vm8 = vcmp.eq.s32.totalorder %v15609_v46, %v11537_v9  ;;  %vm9057_vm9 = vmpackc.low %vm5006_vm5, %vm5005_vm6 }
 0x3c6   :  { %v10112_v53 = vadd.f32 %v10111_v57, %v10110_v54  ;;  %5966 = vperm.xlu1 %10802, %v14199_v3   ;;  %v11089_v57 = vld [vmem:[#allocation2 + $0x6c0] sm:$0xff]   ;;  %vm9059_vm10 = vmpackc.low %vm5112_vm8, %vm5111_vm7  ;;  %vm5115_vm3 = vcmp.eq.s32.totalorder %v14191_v20, %v11537_v9  ;;  %vm5012_vm7 = vcmp.eq.s32.totalorder %v14078_v7, %v11537_v9 }
 0x3c7   :  { %v10113_v34 = vpop.f32.mrf.mxu0  ;;  %10398 = vmatpush3.bf16.msra.mxu1 %v11086_v19  ;;  %vm9067_vm6 = vmpackc.low %vm5116_vm4, %vm5115_vm3 }
 0x3c8   :  { %v14203_v33 = vadd.f32 %v10112_v53, %v13970_v60  ;;  %6778 = vperm.xlu0 %10809, %v14208_v11   ;;  %10399 = vmatprep.subr.bf16.mxu1 %v11087_v55  ;;  %v14216_v60 = vpop.permute.xlu0 %5862  ;;  %v15611_v55 = vld [vmem:[#allocation18_spill] sm:$0xff] }
 0x3c9   :  { %v14211_v54 = vpop.permute.xlu1 %5098  ;;  %v10114_v46 = vpop.f32.mrf.mxu0  ;;  %9058 = vmatmul.mubr.msk.bf16.gmra.mxu1 %vm9057_vm9, %v15525_v59  ;;  %15610 = vst [vmem:[#allocation6_spill] sm:$0xff] %v14216_v60  ;;  %vm5007_vm12 = vcmp.eq.s32.totalorder %v15611_v55, %v11537_v9 }
 0x3ca   :  { %v10115_v19 = vadd.f32 %v10114_v46, %v10113_v34  ;;  %5972 = vperm.xlu1 %10802, %v14175_v58   ;;  %9060 = vmatprep.mubr.msk.bf16.mxu1 %vm9059_vm10, %v15525_v59  ;;  %vm9061_vm15 = vmpackc.low %vm5008_vm11, %vm5007_vm12  ;;  %vm5117_vm9 = vcmp.eq.s32.totalorder %v14211_v54, %v11537_v9  ;;  %vm5118_vm10 = vcmp.eq.s32.totalorder %v13918_v22, %v11537_v9  ;;  %v11091_v54 = vld [vmem:[#allocation2 + $0x778] sm:$0xff]  }
 0x3cb   :  { %v10116_v53 = vpop.f32.mrf.mxu0  ;;  %10400 = vmatpush3.bf16.msra.mxu1 %v11088_v48  ;;  %vm9071_vm12 = vmpackc.low %vm5118_vm10, %vm5117_vm9  ;;  %10451 = vmatprep.subr.bf16.mxu0 %v11091_v54  ;;  %vm5557_vm10 = vcmp.eq.s32.totalorder %v14070_v4, %v11537_v9 }
 0x3cc   :  { %v14219_v49 = vadd.f32 %v10115_v19, %v13981_v28  ;;  %6787 = vperm.xlu0 %10809, %v14107_v5   ;;  %10401 = vmatprep.subr.bf16.mxu1 %v11089_v57  ;;  %v14232_v28 = vld [vmem:[%s15482_s0 + $0x40] sm:$0xff]  ;;  %v14240_v38 = vpop.permute.xlu0 %5868  ;;  %v15506_v19 = vmov 31  }
 0x3cd   :  { %v10117_v34 = vpop.f32.mrf.mxu0  ;;  %15612 = vst [vmem:[#allocation10_spill] sm:$0xff] %v14240_v38 }
 0x3ce   :  { %v10118_v48 = vadd.f32 %v10117_v34, %v10116_v53  ;;  %5978 = vperm.xlu1 %10802, %v14232_v28   ;;  %v14235_v57 = vpop.permute.xlu1 %5401  ;;  %v15613_v34 = vld [vmem:[#allocation19_spill] sm:$0xff] }
 0x3cf   :  { %v10119_v43 = vpop.f32.mrf.mxu0  ;;  %10402 = vmatpush3.bf16.msra.mxu1 %v11090_v36  ;;  %vm5009_vm2 = vcmp.eq.s32.totalorder %v15613_v34, %v11537_v9 }
 0x3d0   :  { %v14238_v46 = vadd.f32 %v10118_v48, %v13997_v50  ;;  %10822 = vset.pattern.permute.xlu0 %v15506_v19  ;;  %vm9065_vm5 = vmpackc.low %vm5010_vm1, %vm5009_vm2  ;;  %vm5448_vm1 = vcmp.eq.s32.totalorder %v14235_v57, %v11537_v9  ;;  %vm5449_vm2 = vcmp.eq.s32.totalorder %v13934_v42, %v11537_v9 }
 0x3d1   :  { %v10120_v1 = vpop.f32.mrf.mxu0  ;;  %9062 = vmatmul.mubr.msk.bf16.gmra.mxu1 %vm9061_vm15, %v15525_v59  ;;  %6852 = vperm.xlu0 %10822, %v13796_v13  }
 0x3d2   :  { %v10121_v53 = vadd.f32 %v10120_v1, %v10119_v43  ;;  %5984 = vperm.xlu1 %10802, %v14208_v11   ;;  %v14246_v55 = vpop.permute.xlu1 %5407  ;;  %9064 = vmatprep.mubr.msk.bf16.mxu1 %vm9063_vm0, %v15525_v59  ;;  %v14269_v1 = vpop.permute.xlu0 %5874  ;;  %vm5552_vm0 = vcmp.eq.s32.totalorder %v14037_v61, %v11537_v9 }
 0x3d3   :  { %v10122_v50 = vpop.f32.mrf.mxu0  ;;  %15614 = vst [vmem:[#allocation8_spill] sm:$0xff] %v14269_v1 }
 0x3d4   :  { %v14250_v36 = vadd.f32 %v10121_v53, %v14008_v12  ;;  %v14264_v12 = vld [vmem:[%s15482_s0 + $0x60] sm:$0xff] }
 0x3d5   :  { %v10123_v48 = vpop.f32.mrf.mxu0  ;;  %6864 = vperm.xlu0 %10822, %v14199_v3  }
 0x3d6   :  { %v10124_v43 = vadd.f32 %v10123_v48, %v10122_v50  ;;  %5990 = vperm.xlu1 %10802, %v14264_v12   ;;  %v14267_v63 = vpop.permute.xlu1 %5410  ;;  %v14279_v50 = vld [vmem:[%s15482_s0 + $0x70] sm:$0xff]  ;;  %v14288_v19 = vpop.permute.xlu0 %5880 }
 0x3d7   :  { %v10125_v53 = vpop.f32.mrf.mxu0  ;;  %15615 = vst [vmem:[#allocation11_spill] sm:$0xff] %v14288_v19  ;;  %vm5451_vm9 = vcmp.eq.s32.totalorder %v14267_v63, %v11537_v9  ;;  %v11097_v63 = vld [vmem:[#allocation2 + $0x760] sm:$0xff]  }
 0x3d8   :  { %v14272_v34 = vadd.f32 %v10124_v43, %v14025_v39 }
 0x3d9   :  { %v10126_v20 = vpop.f32.mrf.mxu0  ;;  %9066 = vmatmul.mubr.msk.bf16.gmra.mxu1 %vm9065_vm5, %v15525_v59  ;;  %6876 = vperm.xlu0 %10822, %v14232_v28   ;;  %vm9125_vm5 = vmpackc.low %vm5449_vm2, %vm5448_vm1  ;;  %vm5559_vm1 = vcmp.eq.s32.totalorder %v14081_v56, %v11537_v9 }
 0x3da   :  { %v10127_v35 = vadd.f32 %v10126_v20, %v10125_v53  ;;  %5996 = vperm.xlu1 %10802, %v14279_v50   ;;  %v14282_v48 = vpop.permute.xlu1 %5416  ;;  %9068 = vmatprep.mubr.msk.bf16.mxu1 %vm9067_vm6, %v15525_v59  ;;  %v15616_v53 = vld [vmem:[#allocation20_spill] sm:$0xff]  ;;  %v14311_v22 = vpop.permute.xlu0 %5886  ;;  %vm5555_vm6 = vcmp.eq.s32.totalorder %v14055_v25, %v11537_v9 }
 0x3db   :  { %v10128_v39 = vpop.f32.mrf.mxu0  ;;  %vm5011_vm8 = vcmp.eq.s32.totalorder %v15616_v53, %v11537_v9  ;;  %15618 = vst [vmem:[#allocation9_spill] sm:$0xff] %v14311_v22 }
 0x3dc   :  { %v14286_v43 = vadd.f32 %v10127_v35, %v14034_v0  ;;  %v15617_v0 = vmov 28   ;;  %vm9069_vm11 = vmpackc.low %vm5012_vm7, %vm5011_vm8 }
 0x3dd   :  { %v10129_v20 = vpop.f32.mrf.mxu0  ;;  %6888 = vperm.xlu0 %10822, %v14264_v12  }
 0x3de   :  { %v10130_v1 = vadd.f32 %v10129_v20, %v10128_v39  ;;  %10803 = vset.pattern.permute.xlu1 %v15617_v0  ;;  %v14300_v35 = vpop.permute.xlu1 %5422  ;;  %v15508_v39 = vmov 34   ;;  %v14323_v54 = vpop.permute.xlu0 %5892 }
 0x3df   :  { %6299 = vperm.xlu1 %10803, %v13796_v13   ;;  %15620 = vst [vmem:[#allocation13_spill] sm:$0xff] %v14323_v54  ;;  %v15514_v54 = vmov 33  }
 0x3e0   :  { %v14304_v7 = vadd.f32 %v10130_v1, %v14053_v29  ;;  %v15619_v29 = vld [vmem:[#allocation5_spill] sm:$0xff] }
 0x3e1   :  { %9070 = vmatmul.mubr.msk.bf16.gmra.mxu1 %vm9069_vm11, %v15525_v59  ;;  %6897 = vperm.xlu0 %10822, %v14149_v44   ;;  %vm5013_vm14 = vcmp.eq.s32.totalorder %v15619_v29, %v11537_v9 }
 0x3e2   :  { %v14308_v53 = vpop.permute.xlu1 %5428  ;;  %9072 = vmatprep.mubr.msk.bf16.mxu1 %vm9071_vm12, %v15525_v59  ;;  %vm9073_vm15 = vmpackc.low %vm5014_vm13, %vm5013_vm14  ;;  %vm5450_vm12 = vcmp.eq.s32.totalorder %v14246_v55, %v11537_v9  ;;  %v11098_v55 = vld [vmem:[#allocation2 + $0x720] sm:$0xff]  }
 0x3e3   :  { %6305 = vperm.xlu1 %10803, %v13812_v18   ;;  %vm9129_vm13 = vmpackc.low %vm5451_vm9, %vm5450_vm12  ;;  %vm5457_vm12 = vcmp.eq.s32.totalorder %v14308_v53, %v11537_v9 }
 0x3e5   :  { %v10147_v1 = vpop.f32.mrf.mxu1  ;;  %10829 = vset.pattern.permute.xlu0 %v15508_v39 }
 0x3e6   :  { %v14319_v20 = vpop.permute.xlu1 %5434  ;;  %7646 = vperm.xlu0 %10829, %v13796_v13  }
 0x3e7   :  { %6308 = vperm.xlu1 %10803, %v13828_v10   ;;  %v10148_v0 = vpop.f32.mrf.mxu1 }
 0x3e8   :  { %v10149_v18 = vadd.f32 %v10148_v0, %v10147_v1  ;;  %v14338_v0 = vpop.permute.xlu0 %5954 }
 0x3e9   :  { %v10150_v22 = vpop.f32.mrf.mxu1  ;;  %9074 = vmatmul.mubr.msk.bf16.gmra.mxu1 %vm9073_vm15, %v15525_v59  ;;  %vm5452_vm15 = vcmp.eq.s32.totalorder %v13951_v47, %v11537_v9 }
 0x3ea   :  { %v14327_v8 = vadd.f32 %v10149_v18, %v14076_v52  ;;  %v14329_v29 = vpop.permute.xlu1 %5440  ;;  %7655 = vperm.xlu0 %10829, %v13828_v10  }
 0x3eb   :  { %6314 = vperm.xlu1 %10803, %v13843_v26   ;;  %v10151_v39 = vpop.f32.mrf.mxu1 }
 0x3ec   :  { %v10152_v19 = vadd.f32 %v10151_v39, %v10150_v22 }
 0x3ed   :  { %v10153_v38 = vpop.f32.mrf.mxu1 }
 0x3ee   :  { %v14334_v60 = vadd.f32 %v10152_v19, %v14085_v2  ;;  %v14336_v1 = vpop.permute.xlu1 %5446  ;;  %10835 = vset.pattern.permute.xlu0 %v15514_v54  ;;  %v11093_v19 = vld [vmem:[#allocation2 + $0x770] sm:$0xff]  }
 0x3ef   :  { %6320 = vperm.xlu1 %10803, %v13857_v30   ;;  %v10154_v52 = vpop.f32.mrf.mxu1  ;;  %7301 = vperm.xlu0 %10835, %v13796_v13  }
 0x3f0   :  { %v10155_v18 = vadd.f32 %v10154_v52, %v10153_v38  ;;  %v11092_v38 = vld [vmem:[#allocation2 + $0x738] sm:$0xff]   ;;  %v11094_v52 = vld [vmem:[#allocation2 + $0x730] sm:$0xff]  }
 0x3f1   :  { %v10156_v26 = vpop.f32.mrf.mxu1 }
 0x3f2   :  { %v14344_v22 = vadd.f32 %v10155_v18, %v14092_v62  ;;  %v14355_v62 = vpop.permute.xlu0 %5963  ;;  %v11095_v18 = vld [vmem:[#allocation2 + $0x768] sm:$0xff]  }
 0x3f3   :  { %6326 = vperm.xlu1 %10803, %v13875_v15   ;;  %v5509_v30 = vpop.permute.xlu1 %5508  ;;  %v10157_v2 = vpop.f32.mrf.mxu1  ;;  %7310 = vperm.xlu0 %10835, %v13828_v10   ;;  %v14366_v10 = vld [vmem:[%s15482_s0 + $0x58] sm:$0xff] }
 0x3f4   :  { %vm5553_vm3 = vcmp.eq.s32.totalorder %v5509_v30, %v11537_v9  ;;  %v10158_v13 = vadd.f32 %v10157_v2, %v10156_v26 }
 0x3f5   :  { %vm9123_vm4 = vmpackc.low %vm5553_vm3, %vm5552_vm0  ;;  %v10159_v61 = vpop.f32.mrf.mxu1  ;;  %vm5453_vm0 = vcmp.eq.s32.totalorder %v14282_v48, %v11537_v9 }
 0x3f6   :  { %v14358_v57 = vadd.f32 %v10158_v13, %v14111_v40  ;;  %9124 = vmatprep.mubr.msk.bf16.mxu0 %vm9123_vm4, %v15525_v59  ;;  %v14376_v30 = vpop.permute.xlu0 %5969  ;;  %vm9133_vm3 = vmpackc.low %vm5453_vm0, %vm5452_vm15 }
 0x3f7   :  { %6332 = vperm.xlu1 %10803, %v14366_v10   ;;  %v5512_v42 = vpop.permute.xlu1 %5511  ;;  %v10160_v39 = vpop.f32.mrf.mxu1  ;;  %9126 = vmatmul.mubr.msk.bf16.vlgmr.msra.gmra.mxu0 %vm9125_vm5, %v15525_v59  ;;  %vm5454_vm5 = vcmp.eq.s32.totalorder %v13967_v31, %v11537_v9 }
 0x3f8   :  { %vm5554_vm7 = vcmp.eq.s32.totalorder %v5512_v42, %v11537_v9  ;;  %v10161_v40 = vadd.f32 %v10160_v39, %v10159_v61  ;;  %10452 = vmatpush3.bf16.msra.mxu0 %v11092_v38  ;;  %7319 = vperm.xlu0 %10835, %v14175_v58  }
 0x3f9   :  { %vm9127_vm8 = vmpackc.low %vm5555_vm6, %vm5554_vm7  ;;  %v10162_v25 = vpop.f32.mrf.mxu1  ;;  %10453 = vmatprep.subr.bf16.mxu0 %v11093_v19  ;;  %vm5455_vm6 = vcmp.eq.s32.totalorder %v14300_v35, %v11537_v9  ;;  %vm5561_vm7 = vcmp.eq.s32.totalorder %v14096_v41, %v11537_v9  ;;  %v11105_v35 = vld [vmem:[#allocation2 + $0x740] sm:$0xff]  }
 0x3fa   :  { %v14373_v26 = vadd.f32 %v10161_v40, %v14123_v14  ;;  %9128 = vmatprep.mubr.msk.bf16.mxu0 %vm9127_vm8, %v15525_v59  ;;  %v11096_v14 = vld [vmem:[#allocation2 + $0x728] sm:$0xff]   ;;  %vm9137_vm9 = vmpackc.low %vm5455_vm6, %vm5454_vm5 }
 0x3fb   :  { %6338 = vperm.xlu1 %10803, %v14107_v5   ;;  %v5518_v2 = vpop.permute.xlu1 %5517  ;;  %v10163_v13 = vpop.f32.mrf.mxu1 }
 0x3fc   :  { %vm5556_vm11 = vcmp.eq.s32.totalorder %v5518_v2, %v11537_v9  ;;  %v10164_v38 = vadd.f32 %v10163_v13, %v10162_v25  ;;  %10454 = vmatpush3.bf16.msra.mxu0 %v11094_v52  ;;  %7328 = vperm.xlu0 %10835, %v13875_v15   ;;  %v14393_v15 = vpop.permute.xlu0 %5975  ;;  %v11099_v52 = vld [vmem:[#allocation2 + $0x758] sm:$0xff]   ;;  %v15512_v25 = vmov 35   ;;  %v15621_v2 = vmov 29  }
 0x3fd   :  { %v10165_v61 = vpop.f32.mrf.mxu1  ;;  %10455 = vmatprep.subr.bf16.mxu0 %v11095_v18  ;;  %vm9131_vm14 = vmpackc.low %vm5557_vm10, %vm5556_vm11  ;;  %v14402_v18 = vld [vmem:[%s15482_s0 + $0x10] sm:$0xff]  ;;  %vm5456_vm11 = vcmp.eq.s32.totalorder %v13978_v17, %v11537_v9 }
 0x3fe   :  { %v14388_v19 = vadd.f32 %v10164_v38, %v14141_v16  ;;  %vm9141_vm15 = vmpackc.low %vm5457_vm12, %vm5456_vm11 }
 0x3ff   :  { %6344 = vperm.xlu1 %10803, %v14149_v44   ;;  %v5524_v4 = vpop.permute.xlu1 %5523  ;;  %v10166_v42 = vpop.f32.mrf.mxu1  ;;  %9130 = vmatmul.mubr.msk.bf16.gmra.mxu0 %vm9129_vm13, %v15525_v59  ;;  %vm5563_vm13 = vcmp.eq.s32.totalorder %v14119_v24, %v11537_v9 }
 0x400   :  { %v10167_v39 = vadd.f32 %v10166_v42, %v10165_v61  ;;  %9132 = vmatprep.mubr.msk.bf16.mxu0 %vm9131_vm14, %v15525_v59  ;;  %10456 = vmatpush3.bf16.msra.mxu0 %v11096_v14  ;;  %vm5558_vm2 = vcmp.eq.s32.totalorder %v5524_v4, %v11537_v9  ;;  %v11100_v61 = vld [vmem:[#allocation2 + $0x718] sm:$0xff]   ;;  %v14417_v48 = vpop.permute.xlu0 %5981  ;;  %v14422_v42 = vld [vmem:[%s15482_s0 + $0x28] sm:$0xff] }
 0x401   :  { %v10168_v40 = vpop.f32.mrf.mxu1  ;;  %10457 = vmatprep.subr.bf16.mxu0 %v11097_v63  ;;  %10845 = vset.pattern.permute.xlu0 %v15512_v25  ;;  %v11101_v63 = vld [vmem:[#allocation2 + $0x750] sm:$0xff]   ;;  %v11107_v4 = vld [vmem:[#allocation2 + $0x7f8] sm:$0xff]   ;;  %vm9135_vm4 = vmpackc.low %vm5559_vm1, %vm5558_vm2  ;;  %vm5458_vm1 = vcmp.eq.s32.totalorder %v13994_v21, %v11537_v9  ;;  %vm5459_vm2 = vcmp.eq.s32.totalorder %v14319_v20, %v11537_v9 }
 0x402   :  { %v14397_v16 = vadd.f32 %v10167_v39, %v14155_v23  ;;  %7756 = vperm.xlu0 %10845, %v14402_v18   ;;  %10515 = vmatprep.subr.bf16.mxu1 %v11107_v4  ;;  %v11104_v4 = vld [vmem:[#allocation2 + $0x708] sm:$0xff]   ;;  %vm9145_vm5 = vmpackc.low %vm5459_vm2, %vm5458_vm1 }
 0x403   :  { %10806 = vset.pattern.permute.xlu1 %v15621_v2  ;;  %v5530_v13 = vpop.permute.xlu1 %5529  ;;  %v10169_v38 = vpop.f32.mrf.mxu1 }
 0x404   :  { %v10170_v23 = vadd.f32 %v10169_v38, %v10168_v40  ;;  %6406 = vperm.xlu1 %10806, %v14129_v51   ;;  %10458 = vmatpush3.bf16.msra.mxu0 %v11098_v55  ;;  %vm5560_vm8 = vcmp.eq.s32.totalorder %v5530_v13, %v11537_v9 }
 0x405   :  { %v10171_v14 = vpop.f32.mrf.mxu1  ;;  %10459 = vmatprep.subr.bf16.mxu0 %v11099_v52  ;;  %v11102_v52 = vld [vmem:[#allocation2 + $0x710] sm:$0xff]   ;;  %vm9139_vm10 = vmpackc.low %vm5561_vm7, %vm5560_vm8  ;;  %vm5460_vm7 = vcmp.eq.s32.totalorder %v14005_v27, %v11537_v9  ;;  %vm5461_vm8 = vcmp.eq.s32.totalorder %v14329_v29, %v11537_v9  ;;  %v15624_v29 = vmov 30  }
 0x406   :  { %v14415_v47 = vadd.f32 %v10170_v23, %v14170_v6  ;;  %7765 = vperm.xlu0 %10845, %v14422_v42   ;;  %v11103_v23 = vld [vmem:[#allocation2 + $0x748] sm:$0xff]   ;;  %vm9149_vm11 = vmpackc.low %vm5461_vm8, %vm5460_vm7 }
 0x407   :  { %v5536_v39 = vpop.permute.xlu1 %5535  ;;  %v10172_v55 = vpop.f32.mrf.mxu1  ;;  %9134 = vmatmul.mubr.msk.bf16.gmra.mxu0 %vm9133_vm3, %v15525_v59  ;;  %vm5565_vm3 = vcmp.eq.s32.totalorder %v14143_v32, %v11537_v9 }
 0x408   :  { %v10173_v6 = vadd.f32 %v10172_v55, %v10171_v14  ;;  %6409 = vperm.xlu1 %10806, %v14402_v18   ;;  %9136 = vmatprep.mubr.msk.bf16.mxu0 %vm9135_vm4, %v15525_v59  ;;  %vm5562_vm14 = vcmp.eq.s32.totalorder %v5536_v39, %v11537_v9 }
 0x409   :  { %v10174_v40 = vpop.f32.mrf.mxu1  ;;  %10460 = vmatpush3.bf16.msra.mxu0 %v11100_v61  ;;  %v14445_v61 = vpop.permute.xlu0 %5987  ;;  %vm9143_vm0 = vmpackc.low %vm5563_vm13, %vm5562_vm14  ;;  %vm5463_vm14 = vcmp.eq.s32.totalorder %v14336_v1, %v11537_v9 }
 0x40a   :  { %v14432_v38 = vadd.f32 %v10173_v6, %v14182_v37  ;;  %10461 = vmatprep.subr.bf16.mxu0 %v11101_v63  ;;  %7774 = vperm.xlu0 %10845, %v14232_v28  }
 0x40b   :  { %v14439_v56 = vpop.permute.xlu1 %5541  ;;  %v10175_v14 = vpop.f32.mrf.mxu1 }
 0x40c   :  { %v10176_v37 = vadd.f32 %v10175_v14, %v10174_v40  ;;  %6415 = vperm.xlu1 %10806, %v14199_v3   ;;  %v11106_v40 = vld [vmem:[#allocation2 + $0x700] sm:$0xff]   ;;  %vm5564_vm4 = vcmp.eq.s32.totalorder %v14439_v56, %v11537_v9 }
 0x40d   :  { %v10177_v63 = vpop.f32.mrf.mxu1  ;;  %10462 = vmatpush3.bf16.msra.mxu0 %v11102_v52  ;;  %v14459_v52 = vpop.permute.xlu0 %5993  ;;  %vm9147_vm6 = vmpackc.low %vm5565_vm3, %vm5564_vm4 }
 0x40e   :  { %v14448_v31 = vadd.f32 %v10176_v37, %v14203_v33  ;;  %10463 = vmatprep.subr.bf16.mxu0 %v11103_v23  ;;  %7783 = vperm.xlu0 %10845, %v14366_v10   ;;  %v15510_v23 = vmov 32  }
 0x40f   :  { %v14451_v41 = vpop.permute.xlu1 %5547  ;;  %v10178_v13 = vpop.f32.mrf.mxu1  ;;  %9138 = vmatmul.mubr.msk.bf16.gmra.mxu0 %vm9137_vm9, %v15525_v59  ;;  %vm5567_vm9 = vcmp.eq.s32.totalorder %v14167_v45, %v11537_v9 }
 0x410   :  { %v10179_v55 = vadd.f32 %v10178_v13, %v10177_v63  ;;  %6421 = vperm.xlu1 %10806, %v14175_v58   ;;  %9140 = vmatprep.mubr.msk.bf16.mxu0 %vm9139_vm10, %v15525_v59  ;;  %vm5566_vm10 = vcmp.eq.s32.totalorder %v14451_v41, %v11537_v9  ;;  %v15625_v41 = vld [vmem:[#allocation15_spill] sm:$0xff] }
 0x411   :  { %v10180_v6 = vpop.f32.mrf.mxu1  ;;  %10464 = vmatpush3.bf16.msra.mxu0 %v11104_v4  ;;  %v14482_v4 = vpop.permute.xlu0 %5999  ;;  %vm9151_vm12 = vmpackc.low %vm5567_vm9, %vm5566_vm10  ;;  %vm5462_vm13 = vcmp.eq.s32.totalorder %v15625_v41, %v11537_v9  ;;  %vm6006_vm10 = vcmp.eq.s32.totalorder %v14376_v30, %v11537_v9  ;;  %v11115_v30 = vld [vmem:[#allocation2 + $0x7d8] sm:$0xff]  }
 0x412   :  { %v14457_v33 = vadd.f32 %v10179_v55, %v14219_v49  ;;  %10465 = vmatprep.subr.bf16.mxu0 %v11105_v35  ;;  %10852 = vset.pattern.permute.xlu0 %v15510_v23  ;;  %v14494_v55 = vld [vmem:[%s15482_s0 + $0x38] sm:$0xff] }
 0x413   :  { %v10181_v14 = vpop.f32.mrf.mxu1  ;;  %7200 = vperm.xlu0 %10852, %v14129_v51  }
 0x414   :  { %v10182_v49 = vadd.f32 %v10181_v14, %v10180_v6  ;;  %6427 = vperm.xlu1 %10806, %v14232_v28   ;;  %v14471_v37 = vpop.permute.xlu1 %5850 }
 0x415   :  { %v10183_v63 = vpop.f32.mrf.mxu1  ;;  %10466 = vmatpush3.bf16.msra.mxu0 %v11106_v40  ;;  %v14507_v40 = vpop.permute.xlu0 %6302  ;;  %vm5897_vm2 = vcmp.eq.s32.totalorder %v14471_v37, %v11537_v9 }
 0x416   :  { %v14474_v17 = vadd.f32 %v10182_v49, %v14238_v46 }
 0x417   :  { %v10184_v53 = vpop.f32.mrf.mxu1  ;;  %9142 = vmatmul.mubr.msk.bf16.gmra.mxu0 %vm9141_vm15, %v15525_v59  ;;  %7209 = vperm.xlu0 %10852, %v14199_v3   ;;  %vm9153_vm15 = vmpackc.low %vm5463_vm14, %vm5462_vm13 }
 0x418   :  { %v10185_v24 = vadd.f32 %v10184_v53, %v10183_v63  ;;  %6433 = vperm.xlu1 %10806, %v14208_v11   ;;  %v14479_v39 = vpop.permute.xlu1 %5856  ;;  %9144 = vmatprep.mubr.msk.bf16.mxu0 %vm9143_vm0, %v15525_v59  ;;  %vm6001_vm0 = vcmp.eq.s32.totalorder %v14338_v0, %v11537_v9 }
 0x419   :  { %v10186_v35 = vpop.f32.mrf.mxu1 }
 0x41a   :  { %v14485_v13 = vadd.f32 %v10185_v24, %v14250_v36  ;;  %v15622_v24 = vmov 31  }
 0x41b   :  { %v10187_v46 = vpop.f32.mrf.mxu1  ;;  %7218 = vperm.xlu0 %10852, %v14494_v55  }
 0x41c   :  { %v10188_v36 = vadd.f32 %v10187_v46, %v10186_v35  ;;  %6439 = vperm.xlu1 %10806, %v14264_v12   ;;  %v14502_v21 = vpop.permute.xlu1 %5859  ;;  %v14530_v35 = vpop.permute.xlu0 %6311 }
 0x41d   :  { %v10189_v20 = vpop.f32.mrf.mxu1  ;;  %vm5900_vm9 = vcmp.eq.s32.totalorder %v14502_v21, %v11537_v9  ;;  %v11114_v21 = vld [vmem:[#allocation2 + $0x7a0] sm:$0xff]  }
 0x41e   :  { %v14505_v6 = vadd.f32 %v10188_v36, %v14272_v34 }
 0x41f   :  { %v10190_v14 = vpop.f32.mrf.mxu1  ;;  %9146 = vmatmul.mubr.msk.bf16.gmra.mxu0 %vm9145_vm5, %v15525_v59  ;;  %7227 = vperm.xlu0 %10852, %v14208_v11  }
 0x420   :  { %v10191_v32 = vadd.f32 %v10190_v14, %v10189_v20  ;;  %6445 = vperm.xlu1 %10806, %v14279_v50   ;;  %v14512_v56 = vpop.permute.xlu1 %5865  ;;  %9148 = vmatprep.mubr.msk.bf16.mxu0 %vm9147_vm6, %v15525_v59  ;;  %v14560_v20 = vld [vmem:[%s15482_s0 + $0x48] sm:$0xff]  ;;  %vm6004_vm6 = vcmp.eq.s32.totalorder %v14355_v62, %v11537_v9  ;;  %v11110_v62 = vld [vmem:[#allocation2 + $0x7b0] sm:$0xff]  }
 0x421   :  { %v10192_v49 = vpop.f32.mrf.mxu1 }
 0x422   :  { %v14516_v63 = vadd.f32 %v10191_v32, %v14286_v43 }
 0x423   :  { %v10193_v34 = vpop.f32.mrf.mxu1  ;;  %7236 = vperm.xlu0 %10852, %v14107_v5   ;;  %v15623_v5 = vmov 34  }
 0x424   :  { %v10194_v53 = vadd.f32 %v10193_v34, %v10192_v49  ;;  %10807 = vset.pattern.permute.xlu1 %v15622_v24  ;;  %v14528_v43 = vpop.permute.xlu1 %5871 }
 0x425   :  { %6855 = vperm.xlu1 %10807, %v14129_v51   ;;  %v14546_v51 = vld [vmem:[%s15482_s0] sm:$0xff] }
 0x426   :  { %v14534_v27 = vadd.f32 %v10194_v53, %v14304_v7  ;;  %v14549_v7 = vpop.permute.xlu0 %6317 }
 0x427   :  { %9150 = vmatmul.mubr.msk.bf16.gmra.mxu0 %vm9149_vm11, %v15525_v59  ;;  %10856 = vset.pattern.permute.xlu0 %v15623_v5 }
 0x428   :  { %v14538_v45 = vpop.permute.xlu1 %5877  ;;  %9152 = vmatprep.mubr.msk.bf16.mxu0 %vm9151_vm12, %v15525_v59  ;;  %7664 = vperm.xlu0 %10856, %v14175_v58   ;;  %vm5899_vm12 = vcmp.eq.s32.totalorder %v14479_v39, %v11537_v9 }
 0x429   :  { %10808 = vset.pattern.permute.xlu1 %v15624_v29  ;;  %vm9209_vm13 = vmpackc.low %vm5900_vm9, %vm5899_vm12  ;;  %vm5906_vm12 = vcmp.eq.s32.totalorder %v14538_v45, %v11537_v9 }
 0x42a   :  { %6748 = vperm.xlu1 %10808, %v14546_v51   ;;  %v14571_v53 = vpop.permute.xlu0 %6323 }
 0x42b   :  { %v10211_v46 = vpop.f32.mrf.mxu0  ;;  %15626 = vst [vmem:[#allocation14_spill] sm:$0xff] %v14571_v53 }
 0x42c   :  { %v14555_v36 = vpop.permute.xlu1 %5883  ;;  %7673 = vperm.xlu0 %10856, %v14560_v20  }
 0x42d   :  { %v10212_v14 = vpop.f32.mrf.mxu0 }
 0x42e   :  { %v10213_v32 = vadd.f32 %v10212_v14, %v10211_v46  ;;  %10810 = vset.pattern.permute.xlu1 %v15622_v24  ;;  %v14577_v46 = vld [vmem:[%s15482_s0 + $0x18] sm:$0xff] }
 0x42f   :  { %6858 = vperm.xlu1 %10810, %v14402_v18   ;;  %v10214_v49 = vpop.f32.mrf.mxu0  ;;  %9154 = vmatmul.mubr.msk.bf16.gmra.mxu0 %vm9153_vm15, %v15525_v59 }
 0x430   :  { %v14567_v1 = vadd.f32 %v10213_v32, %v14327_v8  ;;  %v14569_v34 = vpop.permute.xlu1 %5889  ;;  %7682 = vperm.xlu0 %10856, %v14264_v12  }
 0x431   :  { %v10215_v41 = vpop.f32.mrf.mxu0 }
 0x432   :  { %v10216_v23 = vadd.f32 %v10215_v41, %v10214_v49  ;;  %v14587_v49 = vpop.permute.xlu0 %6329 }
 0x433   :  { %6861 = vperm.xlu1 %10810, %v14577_v46   ;;  %v10217_v18 = vpop.f32.mrf.mxu0 }
 0x434   :  { %v14581_v14 = vadd.f32 %v10216_v23, %v14334_v60  ;;  %v14583_v8 = vpop.permute.xlu1 %5895  ;;  %10858 = vset.pattern.permute.xlu0 %v15514_v54  ;;  %v15627_v60 = vld [vmem:[#allocation16_spill] sm:$0xff] }
 0x435   :  { %v10218_v32 = vpop.f32.mrf.mxu0  ;;  %7337 = vperm.xlu0 %10858, %v14264_v12   ;;  %vm5898_vm1 = vcmp.eq.s32.totalorder %v15627_v60, %v11537_v9  ;;  %v11108_v54 = vld [vmem:[#allocation2 + $0x7b8] sm:$0xff]  }
 0x436   :  { %v10219_v25 = vadd.f32 %v10218_v32, %v10217_v18  ;;  %vm9205_vm5 = vmpackc.low %vm5898_vm1, %vm5897_vm2  ;;  %v14609_v37 = vpop.permute.xlu0 %6335  ;;  %vm6008_vm1 = vcmp.eq.s32.totalorder %v14393_v15, %v11537_v9 }
 0x437   :  { %10811 = vset.pattern.permute.xlu1 %v15624_v29  ;;  %v10220_v41 = vpop.f32.mrf.mxu0  ;;  %15628 = vst [vmem:[#allocation12_spill] sm:$0xff] %v14609_v37 }
 0x438   :  { %v14593_v53 = vadd.f32 %v10219_v25, %v14344_v22  ;;  %6757 = vperm.xlu1 %10811, %v14577_v46   ;;  %v11109_v22 = vld [vmem:[#allocation2 + $0x7f0] sm:$0xff]  }
 0x439   :  { %v5958_v23 = vpop.permute.xlu1 %5957  ;;  %v10221_v18 = vpop.f32.mrf.mxu0  ;;  %7346 = vperm.xlu0 %10858, %v14149_v44  }
 0x43a   :  { %vm6002_vm3 = vcmp.eq.s32.totalorder %v5958_v23, %v11537_v9  ;;  %v10222_v32 = vadd.f32 %v10221_v18, %v10220_v41  ;;  %v15629_v18 = vmov 35  }
 0x43b   :  { %vm9203_vm4 = vmpackc.low %vm6002_vm3, %vm6001_vm0  ;;  %v10223_v0 = vpop.f32.mrf.mxu0  ;;  %vm5902_vm0 = vcmp.eq.s32.totalorder %v14512_v56, %v11537_v9 }
 0x43c   :  { %v14605_v25 = vadd.f32 %v10222_v32, %v14358_v57  ;;  %10812 = vset.pattern.permute.xlu1 %v15622_v24  ;;  %9204 = vmatprep.mubr.msk.bf16.mxu1 %vm9203_vm4, %v15525_v59  ;;  %v11111_v32 = vld [vmem:[#allocation2 + $0x7e8] sm:$0xff]  }
 0x43d   :  { %6867 = vperm.xlu1 %10812, %v14422_v42   ;;  %v5961_v41 = vpop.permute.xlu1 %5960  ;;  %v10224_v60 = vpop.f32.mrf.mxu0  ;;  %9206 = vmatmul.mubr.msk.bf16.vlgmr.msra.gmra.mxu1 %vm9205_vm5, %v15525_v59 }
 0x43e   :  { %vm6003_vm7 = vcmp.eq.s32.totalorder %v5961_v41, %v11537_v9  ;;  %v10225_v23 = vadd.f32 %v10224_v60, %v10223_v0  ;;  %10516 = vmatpush3.bf16.msra.mxu1 %v11108_v54  ;;  %10862 = vset.pattern.permute.xlu0 %v15629_v18  ;;  %v11112_v41 = vld [vmem:[#allocation2 + $0x7a8] sm:$0xff]  }
 0x43f   :  { %vm9207_vm8 = vmpackc.low %vm6004_vm6, %vm6003_vm7  ;;  %v10226_v57 = vpop.f32.mrf.mxu0  ;;  %10517 = vmatprep.subr.bf16.mxu1 %v11109_v22  ;;  %7792 = vperm.xlu0 %10862, %v14279_v50   ;;  %v14627_v22 = vpop.permute.xlu0 %6341  ;;  %vm5904_vm6 = vcmp.eq.s32.totalorder %v14528_v43, %v11537_v9  ;;  %vm6010_vm7 = vcmp.eq.s32.totalorder %v14417_v48, %v11537_v9  ;;  %v11121_v43 = vld [vmem:[#allocation2 + $0x7c0] sm:$0xff]  }
 0x440   :  { %v14617_v37 = vadd.f32 %v10225_v23, %v14373_v26  ;;  %9208 = vmatprep.mubr.msk.bf16.mxu1 %vm9207_vm8, %v15525_v59  ;;  %v11113_v23 = vld [vmem:[#allocation2 + $0x7e0] sm:$0xff]  }
 0x441   :  { %10813 = vset.pattern.permute.xlu1 %v15624_v29  ;;  %v5967_v54 = vpop.permute.xlu1 %5966  ;;  %v10227_v42 = vpop.f32.mrf.mxu0 }
 0x442   :  { %vm6005_vm11 = vcmp.eq.s32.totalorder %v5967_v54, %v11537_v9  ;;  %v10228_v0 = vadd.f32 %v10227_v42, %v10226_v57  ;;  %6760 = vperm.xlu1 %10813, %v14199_v3   ;;  %10518 = vmatpush3.bf16.msra.mxu1 %v11110_v62 }
 0x443   :  { %v10229_v26 = vpop.f32.mrf.mxu0  ;;  %10519 = vmatprep.subr.bf16.mxu1 %v11111_v32  ;;  %10865 = vset.pattern.permute.xlu0 %v15623_v5  ;;  %vm9211_vm14 = vmpackc.low %vm6006_vm10, %vm6005_vm11  ;;  %v14649_v57 = vpop.permute.xlu0 %6403  ;;  %v15630_v32 = vld [vmem:[#allocation6_spill] sm:$0xff] }
 0x444   :  { %v14636_v60 = vadd.f32 %v10228_v0, %v14388_v19  ;;  %7691 = vperm.xlu0 %10865, %v14149_v44   ;;  %vm5901_vm15 = vcmp.eq.s32.totalorder %v15630_v32, %v11537_v9  ;;  %v11116_v0 = vld [vmem:[#allocation2 + $0x798] sm:$0xff]  }
 0x445   :  { %v5973_v3 = vpop.permute.xlu1 %5972  ;;  %v10230_v39 = vpop.f32.mrf.mxu0  ;;  %9210 = vmatmul.mubr.msk.bf16.gmra.mxu1 %vm9209_vm13, %v15525_v59  ;;  %vm9213_vm3 = vmpackc.low %vm5902_vm0, %vm5901_vm15  ;;  %vm6012_vm13 = vcmp.eq.s32.totalorder %v14445_v61, %v11537_v9 }
 0x446   :  { %v10231_v62 = vadd.f32 %v10230_v39, %v10229_v26  ;;  %10814 = vset.pattern.permute.xlu1 %v15622_v24  ;;  %9212 = vmatprep.mubr.msk.bf16.mxu1 %vm9211_vm14, %v15525_v59  ;;  %vm6007_vm2 = vcmp.eq.s32.totalorder %v5973_v3, %v11537_v9 }
 0x447   :  { %6870 = vperm.xlu1 %10814, %v14175_v58   ;;  %v10232_v19 = vpop.f32.mrf.mxu0  ;;  %10520 = vmatpush3.bf16.msra.mxu1 %v11112_v41  ;;  %v11117_v41 = vld [vmem:[#allocation2 + $0x7d0] sm:$0xff]   ;;  %vm9215_vm4 = vmpackc.low %vm6008_vm1, %vm6007_vm2  ;;  %v14665_v3 = vpop.permute.xlu0 %6412  ;;  %vm5908_vm2 = vcmp.eq.s32.totalorder %v14555_v36, %v11537_v9 }
 0x448   :  { %v14647_v44 = vadd.f32 %v10231_v62, %v14397_v16  ;;  %10521 = vmatprep.subr.bf16.mxu1 %v11113_v23  ;;  %10866 = vset.pattern.permute.xlu0 %v15629_v18  ;;  %v11118_v62 = vld [vmem:[#allocation2 + $0x790] sm:$0xff]  }
 0x449   :  { %v5979_v54 = vpop.permute.xlu1 %5978  ;;  %v10233_v58 = vpop.f32.mrf.mxu0 }
 0x44a   :  { %v10234_v16 = vadd.f32 %v10233_v58, %v10232_v19  ;;  %v11119_v19 = vld [vmem:[#allocation2 + $0x7c8] sm:$0xff]   ;;  %vm6009_vm8 = vcmp.eq.s32.totalorder %v5979_v54, %v11537_v9 }
 0x44b   :  { %6873 = vperm.xlu1 %10814, %v14494_v55   ;;  %v10235_v42 = vpop.f32.mrf.mxu0  ;;  %10522 = vmatpush3.bf16.msra.mxu1 %v11114_v21  ;;  %v15631_v21 = vld [vmem:[#allocation10_spill] sm:$0xff]  ;;  %vm9219_vm10 = vmpackc.low %vm6010_vm7, %vm6009_vm8  ;;  %vm5910_vm8 = vcmp.eq.s32.totalorder %v14569_v34, %v11537_v9 }
 0x44c   :  { %v14661_v26 = vadd.f32 %v10234_v16, %v14415_v47  ;;  %10523 = vmatprep.subr.bf16.mxu1 %v11115_v30  ;;  %vm5903_vm5 = vcmp.eq.s32.totalorder %v15631_v21, %v11537_v9  ;;  %v11120_v16 = vld [vmem:[#allocation2 + $0x788] sm:$0xff]  }
 0x44d   :  { %v5985_v56 = vpop.permute.xlu1 %5984  ;;  %v10236_v23 = vpop.f32.mrf.mxu0  ;;  %9214 = vmatmul.mubr.msk.bf16.gmra.mxu1 %vm9213_vm3, %v15525_v59  ;;  %vm9217_vm9 = vmpackc.low %vm5904_vm6, %vm5903_vm5  ;;  %vm6014_vm3 = vcmp.eq.s32.totalorder %v14459_v52, %v11537_v9 }
 0x44e   :  { %v10237_v15 = vadd.f32 %v10236_v23, %v10235_v42  ;;  %9216 = vmatprep.mubr.msk.bf16.mxu1 %vm9215_vm4, %v15525_v59  ;;  %v14683_v42 = vpop.permute.xlu0 %6418  ;;  %vm6011_vm14 = vcmp.eq.s32.totalorder %v5985_v56, %v11537_v9 }
 0x44f   :  { %10815 = vset.pattern.permute.xlu1 %v15624_v29  ;;  %v10238_v39 = vpop.f32.mrf.mxu0  ;;  %10524 = vmatpush3.bf16.msra.mxu1 %v11116_v0  ;;  %vm9223_vm0 = vmpackc.low %vm6012_vm13, %vm6011_vm14  ;;  %vm5912_vm14 = vcmp.eq.s32.totalorder %v14583_v8, %v11537_v9 }
 0x450   :  { %v14669_v47 = vadd.f32 %v10237_v15, %v14432_v38  ;;  %6769 = vperm.xlu1 %10815, %v14494_v55   ;;  %10525 = vmatprep.subr.bf16.mxu1 %v11117_v41  ;;  %v15632_v15 = vld [vmem:[#allocation8_spill] sm:$0xff] }
 0x451   :  { %v5991_v30 = vpop.permute.xlu1 %5990  ;;  %v10239_v32 = vpop.f32.mrf.mxu0  ;;  %vm5905_vm11 = vcmp.eq.s32.totalorder %v15632_v15, %v11537_v9 }
 0x452   :  { %v10240_v58 = vadd.f32 %v10239_v32, %v10238_v39  ;;  %vm9221_vm15 = vmpackc.low %vm5906_vm12, %vm5905_vm11  ;;  %vm6013_vm4 = vcmp.eq.s32.totalorder %v5991_v30, %v11537_v9 }
 0x453   :  { %v10241_v38 = vpop.f32.mrf.mxu0  ;;  %10526 = vmatpush3.bf16.msra.mxu1 %v11118_v62  ;;  %v14704_v62 = vpop.permute.xlu0 %6424  ;;  %vm9227_vm6 = vmpackc.low %vm6014_vm3, %vm6013_vm4 }
 0x454   :  { %v14680_v55 = vadd.f32 %v10240_v58, %v14448_v31  ;;  %10816 = vset.pattern.permute.xlu1 %v15622_v24  ;;  %10527 = vmatprep.subr.bf16.mxu1 %v11119_v19  ;;  %v11122_v31 = vld [vmem:[#allocation2 + $0x780] sm:$0xff]  }
 0x455   :  { %6879 = vperm.xlu1 %10816, %v14560_v20   ;;  %v14686_v48 = vpop.permute.xlu1 %5996  ;;  %v10242_v54 = vpop.f32.mrf.mxu0  ;;  %9218 = vmatmul.mubr.msk.bf16.gmra.mxu1 %vm9217_vm9, %v15525_v59  ;;  %vm6016_vm9 = vcmp.eq.s32.totalorder %v14482_v4, %v11537_v9  ;;  %v14763_v4 = vld [vmem:[%s15482_s0 + $0x68] sm:$0xff] }
 0x456   :  { %v10243_v0 = vadd.f32 %v10242_v54, %v10241_v38  ;;  %9220 = vmatprep.mubr.msk.bf16.mxu1 %vm9219_vm10, %v15525_v59  ;;  %vm6015_vm10 = vcmp.eq.s32.totalorder %v14686_v48, %v11537_v9 }
 0x457   :  { %v10244_v41 = vpop.f32.mrf.mxu0  ;;  %10528 = vmatpush3.bf16.msra.mxu1 %v11120_v16  ;;  %v14718_v58 = vpop.permute.xlu0 %6430  ;;  %vm9231_vm12 = vmpackc.low %vm6016_vm9, %vm6015_vm10  ;;  %vm6455_vm10 = vcmp.eq.s32.totalorder %v14683_v42, %v11537_v9 }
 0x458   :  { %v14691_v23 = vadd.f32 %v10243_v0, %v14457_v33  ;;  %10529 = vmatprep.subr.bf16.mxu1 %v11121_v43 }
 0x459   :  { %10817 = vset.pattern.permute.xlu1 %v15624_v29  ;;  %v10245_v20 = vpop.f32.mrf.mxu0 }
 0x45a   :  { %v10246_v39 = vadd.f32 %v10245_v20, %v10244_v41  ;;  %6772 = vperm.xlu1 %10817, %v14232_v28   ;;  %v14702_v33 = vpop.permute.xlu1 %6299 }
 0x45b   :  { %v10247_v19 = vpop.f32.mrf.mxu0  ;;  %10530 = vmatpush3.bf16.msra.mxu1 %v11122_v31  ;;  %v14737_v52 = vpop.permute.xlu0 %6436 }
 0x45c   :  { %v14707_v45 = vadd.f32 %v10246_v39, %v14474_v17  ;;  %v15633_v17 = vld [vmem:[#allocation11_spill] sm:$0xff] }
 0x45d   :  { %v10248_v21 = vpop.f32.mrf.mxu0  ;;  %9222 = vmatmul.mubr.msk.bf16.gmra.mxu1 %vm9221_vm15, %v15525_v59  ;;  %vm5907_vm1 = vcmp.eq.s32.totalorder %v15633_v17, %v11537_v9 }
 0x45e   :  { %v10249_v61 = vadd.f32 %v10248_v21, %v10247_v19  ;;  %10818 = vset.pattern.permute.xlu1 %v15622_v24  ;;  %v14711_v56 = vpop.permute.xlu1 %6305  ;;  %9224 = vmatprep.mubr.msk.bf16.mxu1 %vm9223_vm0, %v15525_v59  ;;  %vm9225_vm5 = vmpackc.low %vm5908_vm2, %vm5907_vm1  ;;  %vm6450_vm0 = vcmp.eq.s32.totalorder %v14649_v57, %v11537_v9  ;;  %vm6347_vm1 = vcmp.eq.s32.totalorder %v14507_v40, %v11537_v9 }
 0x45f   :  { %6882 = vperm.xlu1 %10818, %v14208_v11   ;;  %v10250_v28 = vpop.f32.mrf.mxu0  ;;  %v14758_v39 = vpop.permute.xlu0 %6442  ;;  %vm6346_vm2 = vcmp.eq.s32.totalorder %v14702_v33, %v11537_v9 }
 0x460   :  { %v14716_v32 = vadd.f32 %v10249_v61, %v14485_v13 }
 0x461   :  { %v10251_v38 = vpop.f32.mrf.mxu0 }
 0x462   :  { %v10252_v16 = vadd.f32 %v10251_v38, %v10250_v28  ;;  %v14727_v11 = vpop.permute.xlu1 %6308 }
 0x463   :  { %6885 = vperm.xlu1 %10818, %v14366_v10   ;;  %v10253_v13 = vpop.f32.mrf.mxu0  ;;  %v14778_v21 = vpop.permute.xlu0 %6751  ;;  %vm6349_vm9 = vcmp.eq.s32.totalorder %v14727_v11, %v11537_v9 }
 0x464   :  { %v14731_v43 = vadd.f32 %v10252_v16, %v14505_v6  ;;  %v15634_v6 = vld [vmem:[#allocation9_spill] sm:$0xff] }
 0x465   :  { %v10254_v54 = vpop.f32.mrf.mxu0  ;;  %9226 = vmatmul.mubr.msk.bf16.gmra.mxu1 %vm9225_vm5, %v15525_v59  ;;  %vm5909_vm7 = vcmp.eq.s32.totalorder %v15634_v6, %v11537_v9  ;;  %vm9285_vm5 = vmpackc.low %vm6347_vm1, %vm6346_vm2  ;;  %vm6457_vm1 = vcmp.eq.s32.totalorder %v14704_v62, %v11537_v9 }
 0x466   :  { %v10255_v36 = vadd.f32 %v10254_v54, %v10253_v13  ;;  %v14734_v0 = vpop.permute.xlu1 %6314  ;;  %9228 = vmatprep.mubr.msk.bf16.mxu1 %vm9227_vm6, %v15525_v59  ;;  %vm9229_vm11 = vmpackc.low %vm5910_vm8, %vm5909_vm7  ;;  %vm6453_vm6 = vcmp.eq.s32.totalorder %v14665_v3, %v11537_v9  ;;  %v11127_v3 = vld [vmem:[#allocation2 + $0x868] sm:$0xff]  }
 0x467   :  { %10819 = vset.pattern.permute.xlu1 %v15624_v29  ;;  %v10256_v30 = vpop.f32.mrf.mxu0  ;;  %v14790_v54 = vpop.permute.xlu0 %6754 }
 0x468   :  { %v14741_v41 = vadd.f32 %v10255_v36, %v14516_v63  ;;  %6781 = vperm.xlu1 %10819, %v14366_v10   ;;  %v11123_v63 = vld [vmem:[#allocation2 + $0x878] sm:$0xff]  }
 0x469   :  { %v10257_v31 = vpop.f32.mrf.mxu0  ;;  %10579 = vmatprep.subr.bf16.mxu0 %v11123_v63 }
 0x46a   :  { %v10258_v15 = vadd.f32 %v10257_v31, %v10256_v30  ;;  %v14752_v20 = vpop.permute.xlu1 %6320  ;;  %v11131_v30 = vld [vmem:[#allocation2 + $0x8f8] sm:$0xff]  }
 0x46b   :  { %10643 = vmatprep.subr.bf16.mxu1 %v11131_v30 }
 0x46c   :  { %v14755_v10 = vadd.f32 %v10258_v15, %v14534_v27  ;;  %10820 = vset.pattern.permute.xlu1 %v15622_v24  ;;  %v15635_v27 = vld [vmem:[#allocation13_spill] sm:$0xff] }
 0x46d   :  { %6891 = vperm.xlu1 %10820, %v14763_v4   ;;  %9230 = vmatmul.mubr.msk.bf16.gmra.mxu1 %vm9229_vm11, %v15525_v59  ;;  %vm5911_vm13 = vcmp.eq.s32.totalorder %v15635_v27, %v11537_v9  ;;  %v14804_v27 = vpop.permute.xlu0 %6763 }
 0x46e   :  { %v14767_v34 = vpop.permute.xlu1 %6326  ;;  %9232 = vmatprep.mubr.msk.bf16.mxu1 %vm9231_vm12, %v15525_v59  ;;  %vm9233_vm15 = vmpackc.low %vm5912_vm14, %vm5911_vm13  ;;  %vm6348_vm12 = vcmp.eq.s32.totalorder %v14711_v56, %v11537_v9 }
 0x46f   :  { %vm9289_vm13 = vmpackc.low %vm6349_vm9, %vm6348_vm12  ;;  %vm6355_vm12 = vcmp.eq.s32.totalorder %v14767_v34, %v11537_v9 }
 0x471   :  { %10821 = vset.pattern.permute.xlu1 %v15624_v29  ;;  %v10275_v48 = vpop.f32.mrf.mxu1 }
 0x472   :  { %6784 = vperm.xlu1 %10821, %v14264_v12   ;;  %v14776_v19 = vpop.permute.xlu1 %6332  ;;  %v11243_v12 = vld [vmem:[%s15482_s0 + $0x78] sm:$0xff] }
 0x473   :  { %v10276_v61 = vpop.f32.mrf.mxu1 }
 0x474   :  { %v10277_v28 = vadd.f32 %v10276_v61, %v10275_v48  ;;  %v11124_v48 = vld [vmem:[#allocation2 + $0x838] sm:$0xff]   ;;  %v11125_v61 = vld [vmem:[#allocation2 + $0x870] sm:$0xff]  }
 0x475   :  { %v10278_v17 = vpop.f32.mrf.mxu1  ;;  %9234 = vmatmul.mubr.msk.bf16.gmra.mxu1 %vm9233_vm15, %v15525_v59  ;;  %vm6350_vm15 = vcmp.eq.s32.totalorder %v14530_v35, %v11537_v9 }
 0x476   :  { %v14782_v38 = vadd.f32 %v10277_v28, %v14567_v1  ;;  %10823 = vset.pattern.permute.xlu1 %v15621_v2  ;;  %v14785_v8 = vpop.permute.xlu1 %6338 }
 0x477   :  { %6448 = vperm.xlu1 %10823, %v11243_v12   ;;  %v10279_v16 = vpop.f32.mrf.mxu1 }
 0x478   :  { %v10280_v13 = vadd.f32 %v10279_v16, %v10278_v17  ;;  %v14823_v17 = vpop.permute.xlu0 %6766  ;;  %v11126_v16 = vld [vmem:[#allocation2 + $0x830] sm:$0xff]  }
 0x479   :  { %v10281_v36 = vpop.f32.mrf.mxu1 }
 0x47a   :  { %v14793_v6 = vadd.f32 %v10280_v13, %v14581_v14  ;;  %v14795_v1 = vpop.permute.xlu1 %6344 }
 0x47b   :  { %10824 = vset.pattern.permute.xlu1 %v15622_v24  ;;  %v10282_v2 = vpop.f32.mrf.mxu1 }
 0x47c   :  { %v10283_v31 = vadd.f32 %v10282_v2, %v10281_v36  ;;  %6894 = vperm.xlu1 %10824, %v14279_v50  }
 0x47d   :  { %v10284_v15 = vpop.f32.mrf.mxu1 }
 0x47e   :  { %v14802_v63 = vadd.f32 %v10283_v31, %v14593_v53  ;;  %v11244_v53 = vld [vmem:[%s15482_s0 + $0x70] sm:$0xff] }
 0x47f   :  { %v6407_v24 = vpop.permute.xlu1 %6406  ;;  %v10285_v14 = vpop.f32.mrf.mxu1 }
 0x480   :  { %vm6451_vm3 = vcmp.eq.s32.totalorder %v6407_v24, %v11537_v9  ;;  %v10286_v50 = vadd.f32 %v10285_v14, %v10284_v15  ;;  %10825 = vset.pattern.permute.xlu1 %v15624_v29  ;;  %v11129_v15 = vld [vmem:[#allocation2 + $0x860] sm:$0xff]   ;;  %v14843_v24 = vld [vmem:[%s15482_s0 + $0x8] sm:$0xff]  ;;  %v14846_v14 = vpop.permute.xlu0 %6775 }
 0x481   :  { %vm9283_vm4 = vmpackc.low %vm6451_vm3, %vm6450_vm0  ;;  %6790 = vperm.xlu1 %10825, %v11244_v53   ;;  %v10287_v57 = vpop.f32.mrf.mxu1  ;;  %vm6351_vm0 = vcmp.eq.s32.totalorder %v14734_v0, %v11537_v9  ;;  %v11137_v0 = vld [vmem:[#allocation2 + $0x850] sm:$0xff]  }
 0x482   :  { %v14818_v40 = vadd.f32 %v10286_v50, %v14605_v25  ;;  %9284 = vmatprep.mubr.msk.bf16.mxu0 %vm9283_vm4, %v15525_v59  ;;  %vm9293_vm3 = vmpackc.low %vm6351_vm0, %vm6350_vm15 }
 0x483   :  { %v6410_v33 = vpop.permute.xlu1 %6409  ;;  %v10288_v29 = vpop.f32.mrf.mxu1  ;;  %9286 = vmatmul.mubr.msk.bf16.vlgmr.msra.gmra.mxu0 %vm9285_vm5, %v15525_v59  ;;  %vm6352_vm5 = vcmp.eq.s32.totalorder %v14549_v7, %v11537_v9 }
 0x484   :  { %vm6452_vm7 = vcmp.eq.s32.totalorder %v6410_v33, %v11537_v9  ;;  %v10289_v28 = vadd.f32 %v10288_v29, %v10287_v57  ;;  %10580 = vmatpush3.bf16.msra.mxu0 %v11124_v48  ;;  %v11133_v57 = vld [vmem:[#allocation2 + $0x858] sm:$0xff]   ;;  %v15637_v33 = vmov 32  }
 0x485   :  { %vm9287_vm8 = vmpackc.low %vm6453_vm6, %vm6452_vm7  ;;  %6793 = vperm.xlu1 %10825, %v11243_v12   ;;  %v10290_v13 = vpop.f32.mrf.mxu1  ;;  %10581 = vmatprep.subr.bf16.mxu0 %v11125_v61  ;;  %v11128_v12 = vld [vmem:[#allocation2 + $0x828] sm:$0xff]   ;;  %vm6353_vm6 = vcmp.eq.s32.totalorder %v14752_v20, %v11537_v9  ;;  %vm6459_vm7 = vcmp.eq.s32.totalorder %v14718_v58, %v11537_v9  ;;  %v11145_v20 = vld [vmem:[#allocation2 + $0x840] sm:$0xff]  }
 0x486   :  { %v14826_v25 = vadd.f32 %v10289_v28, %v14617_v37  ;;  %9288 = vmatprep.mubr.msk.bf16.mxu0 %vm9287_vm8, %v15525_v59  ;;  %v15636_v37 = vmov 33   ;;  %vm9297_vm9 = vmpackc.low %vm6353_vm6, %vm6352_vm5  ;;  %vm6356_vm6 = vcmp.eq.s32.totalorder %v14587_v49, %v11537_v9 }
 0x487   :  { %v6416_v36 = vpop.permute.xlu1 %6415  ;;  %v10291_v30 = vpop.f32.mrf.mxu1 }
 0x488   :  { %vm6454_vm11 = vcmp.eq.s32.totalorder %v6416_v36, %v11537_v9  ;;  %v10292_v2 = vadd.f32 %v10291_v30, %v10290_v13  ;;  %10582 = vmatpush3.bf16.msra.mxu0 %v11126_v16  ;;  %v11134_v13 = vld [vmem:[#allocation2 + $0x818] sm:$0xff]  }
 0x489   :  { %10826 = vset.pattern.permute.xlu1 %v15636_v37  ;;  %v10293_v31 = vpop.f32.mrf.mxu1  ;;  %10583 = vmatprep.subr.bf16.mxu0 %v11127_v3  ;;  %vm9291_vm14 = vmpackc.low %vm6455_vm10, %vm6454_vm11 }
 0x48a   :  { %v14838_v11 = vadd.f32 %v10292_v2, %v14636_v60  ;;  %7304 = vperm.xlu1 %10826, %v14843_v24   ;;  %v11130_v60 = vld [vmem:[#allocation2 + $0x820] sm:$0xff]   ;;  %v11138_v2 = vld [vmem:[#allocation2 + $0x810] sm:$0xff]  }
 0x48b   :  { %v6422_v56 = vpop.permute.xlu1 %6421  ;;  %v10294_v50 = vpop.f32.mrf.mxu1  ;;  %9290 = vmatmul.mubr.msk.bf16.gmra.mxu0 %vm9289_vm13, %v15525_v59 }
 0x48c   :  { %v10295_v48 = vadd.f32 %v10294_v50, %v10293_v31  ;;  %9292 = vmatprep.mubr.msk.bf16.mxu0 %vm9291_vm14, %v15525_v59  ;;  %10584 = vmatpush3.bf16.msra.mxu0 %v11128_v12  ;;  %vm6456_vm2 = vcmp.eq.s32.totalorder %v6422_v56, %v11537_v9  ;;  %v11141_v31 = vld [vmem:[#allocation2 + $0x848] sm:$0xff]   ;;  %vm6461_vm14 = vcmp.eq.s32.totalorder %v14737_v52, %v11537_v9 }
 0x48d   :  { %v10296_v53 = vpop.f32.mrf.mxu1  ;;  %10585 = vmatprep.subr.bf16.mxu0 %v11129_v15  ;;  %vm9295_vm4 = vmpackc.low %vm6457_vm1, %vm6456_vm2  ;;  %v11142_v50 = vld [vmem:[#allocation2 + $0x808] sm:$0xff]  }
 0x48e   :  { %v14854_v61 = vadd.f32 %v10295_v48, %v14647_v44  ;;  %10827 = vset.pattern.permute.xlu1 %v15637_v33  ;;  %v14865_v44 = vpop.permute.xlu0 %6778 }
 0x48f   :  { %7197 = vperm.xlu1 %10827, %v14546_v51   ;;  %v6428_v42 = vpop.permute.xlu1 %6427  ;;  %v10297_v29 = vpop.f32.mrf.mxu1 }
 0x490   :  { %v10298_v28 = vadd.f32 %v10297_v29, %v10296_v53  ;;  %10586 = vmatpush3.bf16.msra.mxu0 %v11130_v60  ;;  %vm6458_vm8 = vcmp.eq.s32.totalorder %v6428_v42, %v11537_v9  ;;  %v15638_v42 = vld [vmem:[#allocation14_spill] sm:$0xff] }
 0x491   :  { %v10299_v16 = vpop.f32.mrf.mxu1  ;;  %10587 = vmatprep.subr.bf16.mxu0 %v11133_v57  ;;  %vm9299_vm10 = vmpackc.low %vm6459_vm7, %vm6458_vm8  ;;  %vm6354_vm11 = vcmp.eq.s32.totalorder %v15638_v42, %v11537_v9  ;;  %vm6357_vm7 = vcmp.eq.s32.totalorder %v14776_v19, %v11537_v9  ;;  %v11148_v42 = vld [vmem:[#allocation2 + $0x898] sm:$0xff]  }
 0x492   :  { %v14868_v35 = vadd.f32 %v10298_v28, %v14661_v26  ;;  %v14877_v26 = vpop.permute.xlu0 %6787  ;;  %vm9301_vm0 = vmpackc.low %vm6355_vm12, %vm6354_vm11 }
 0x493   :  { %10828 = vset.pattern.permute.xlu1 %v15629_v18  ;;  %v6434_v3 = vpop.permute.xlu1 %6433  ;;  %v10300_v36 = vpop.f32.mrf.mxu1  ;;  %9294 = vmatmul.mubr.msk.bf16.gmra.mxu0 %vm9293_vm3, %v15525_v59  ;;  %vm9305_vm11 = vmpackc.low %vm6357_vm7, %vm6356_vm6 }
 0x494   :  { %v10301_v62 = vadd.f32 %v10300_v36, %v10299_v16  ;;  %7750 = vperm.xlu1 %10828, %v14546_v51   ;;  %9296 = vmatprep.mubr.msk.bf16.mxu0 %vm9295_vm4, %v15525_v59  ;;  %vm6460_vm15 = vcmp.eq.s32.totalorder %v6434_v3, %v11537_v9  ;;  %vm6796_vm4 = vcmp.eq.s32.totalorder %v14778_v21, %v11537_v9  ;;  %v11132_v36 = vld [vmem:[#allocation2 + $0x8b8] sm:$0xff]  }
 0x495   :  { %v10302_v30 = vpop.f32.mrf.mxu1  ;;  %10588 = vmatpush3.bf16.msra.mxu0 %v11134_v13  ;;  %v14917_v13 = vld [vmem:[%s15482_s0 + $0x10] sm:$0xff]  ;;  %vm9303_vm3 = vmpackc.low %vm6461_vm14, %vm6460_vm15  ;;  %vm6359_vm14 = vcmp.eq.s32.totalorder %v14785_v8, %v11537_v9 }
 0x496   :  { %v14875_v12 = vadd.f32 %v10301_v62, %v14669_v47  ;;  %10589 = vmatprep.subr.bf16.mxu0 %v11137_v0  ;;  %v6853_v53 = vpop.permute.xlu0 %6852 }
 0x497   :  { %v14883_v15 = vpop.permute.xlu1 %6439  ;;  %v10303_v51 = vpop.f32.mrf.mxu1  ;;  %vm6899_vm13 = vcmp.eq.s32.totalorder %v6853_v53, %v11537_v9 }
 0x498   :  { %v10304_v47 = vadd.f32 %v10303_v51, %v10302_v30  ;;  %7753 = vperm.xlu1 %10828, %v14843_v24   ;;  %v11135_v30 = vld [vmem:[#allocation2 + $0x8f0] sm:$0xff]   ;;  %v11139_v51 = vld [vmem:[#allocation2 + $0x8e8] sm:$0xff]  }
 0x499   :  { %v10305_v56 = vpop.f32.mrf.mxu1  ;;  %10590 = vmatpush3.bf16.msra.mxu0 %v11138_v2 }
 0x49a   :  { %v14890_v7 = vadd.f32 %v10304_v47, %v14680_v55  ;;  %10591 = vmatprep.subr.bf16.mxu0 %v11141_v31  ;;  %v11146_v55 = vld [vmem:[#allocation2 + $0x800] sm:$0xff]   ;;  %v11136_v31 = vld [vmem:[#allocation2 + $0x8b0] sm:$0xff]  }
 0x49b   :  { %v14892_v48 = vpop.permute.xlu1 %6445  ;;  %v10306_v60 = vpop.f32.mrf.mxu1  ;;  %9298 = vmatmul.mubr.msk.bf16.gmra.mxu0 %vm9297_vm9, %v15525_v59  ;;  %vm6463_vm9 = vcmp.eq.s32.totalorder %v14758_v39, %v11537_v9 }
 0x49c   :  { %v10307_v58 = vadd.f32 %v10306_v60, %v10305_v56  ;;  %10830 = vset.pattern.permute.xlu1 %v15623_v5  ;;  %9300 = vmatprep.mubr.msk.bf16.mxu0 %vm9299_vm10, %v15525_v59  ;;  %vm6462_vm10 = vcmp.eq.s32.totalorder %v14883_v15, %v11537_v9  ;;  %v11140_v56 = vld [vmem:[#allocation2 + $0x8a8] sm:$0xff]   ;;  %v15639_v60 = vld [vmem:[#allocation12_spill] sm:$0xff] }
 0x49d   :  { %7649 = vperm.xlu1 %10830, %v14843_v24   ;;  %v10308_v57 = vpop.f32.mrf.mxu1  ;;  %10592 = vmatpush3.bf16.msra.mxu0 %v11142_v50  ;;  %vm9307_vm12 = vmpackc.low %vm6463_vm9, %vm6462_vm10  ;;  %vm6800_vm9 = vcmp.eq.s32.totalorder %v14804_v27, %v11537_v9 }
 0x49e   :  { %v14903_v29 = vadd.f32 %v10307_v58, %v14691_v23  ;;  %10593 = vmatprep.subr.bf16.mxu0 %v11145_v20  ;;  %v11143_v20 = vld [vmem:[#allocation2 + $0x8e0] sm:$0xff]  }
 0x49f   :  { %v10309_v28 = vpop.f32.mrf.mxu1 }
 0x4a0   :  { %v10310_v24 = vadd.f32 %v10309_v28, %v10308_v57  ;;  %v6856_v16 = vpop.permute.xlu1 %6855  ;;  %v11147_v57 = vld [vmem:[#allocation2 + $0x8d8] sm:$0xff]  }
 0x4a1   :  { %vm6900_vm1 = vcmp.eq.s32.totalorder %v6856_v16, %v11537_v9  ;;  %10831 = vset.pattern.permute.xlu1 %v15636_v37  ;;  %v10311_v34 = vpop.f32.mrf.mxu1  ;;  %10594 = vmatpush3.bf16.msra.mxu0 %v11146_v55  ;;  %v11150_v16 = vld [vmem:[#allocation2 + $0x890] sm:$0xff]  }
 0x4a2   :  { %v14912_v23 = vadd.f32 %v10310_v24, %v14707_v45  ;;  %vm9363_vm2 = vmpackc.low %vm6900_vm1, %vm6899_vm13  ;;  %7307 = vperm.xlu1 %10831, %v14917_v13   ;;  %vm6358_vm13 = vcmp.eq.s32.totalorder %v15639_v60, %v11537_v9 }
 0x4a3   :  { %v10312_v52 = vpop.f32.mrf.mxu1  ;;  %9302 = vmatmul.mubr.msk.bf16.gmra.mxu0 %vm9301_vm0, %v15525_v59  ;;  %9364 = vmatprep.mubr.msk.bf16.mxu1 %vm9363_vm2, %v15525_v59  ;;  %vm9309_vm2 = vmpackc.low %vm6359_vm14, %vm6358_vm13 }
 0x4a4   :  { %v10313_v0 = vadd.f32 %v10312_v52, %v10311_v34  ;;  %9304 = vmatprep.mubr.msk.bf16.mxu0 %vm9303_vm3, %v15525_v59  ;;  %vm6797_vm3 = vcmp.eq.s32.totalorder %v14790_v54, %v11537_v9 }
 0x4a5   :  { %v6749_v45 = vpop.permute.xlu1 %6748  ;;  %v10314_v3 = vpop.f32.mrf.mxu1 }
 0x4a6   :  { %v14926_v62 = vadd.f32 %v10313_v0, %v14716_v32  ;;  %vm6795_vm5 = vcmp.eq.s32.totalorder %v6749_v45, %v11537_v9  ;;  %10832 = vset.pattern.permute.xlu1 %v15637_v33  ;;  %v11151_v0 = vld [vmem:[#allocation2 + $0x8c8] sm:$0xff]  }
 0x4a7   :  { %vm9365_vm8 = vmpackc.low %vm6796_vm4, %vm6795_vm5  ;;  %7203 = vperm.xlu1 %10832, %v14917_v13   ;;  %v10315_v21 = vpop.f32.mrf.mxu1 }
 0x4a8   :  { %v10316_v32 = vadd.f32 %v10315_v21, %v10314_v3  ;;  %9366 = vmatmul.mubr.msk.bf16.vlgmr.msra.gmra.mxu1 %vm9365_vm8, %v15525_v59  ;;  %v11152_v21 = vld [vmem:[#allocation2 + $0x888] sm:$0xff]  }
 0x4a9   :  { %v10317_v2 = vpop.f32.mrf.mxu1  ;;  %10644 = vmatpush3.bf16.msra.mxu1 %v11132_v36 }
 0x4aa   :  { %v14941_v49 = vadd.f32 %v10316_v32, %v14731_v43  ;;  %v6859_v19 = vpop.permute.xlu1 %6858  ;;  %10645 = vmatprep.subr.bf16.mxu1 %v11135_v30 }
 0x4ab   :  { %7206 = vperm.xlu1 %10832, %v14577_v46   ;;  %v10318_v39 = vpop.f32.mrf.mxu1  ;;  %9306 = vmatmul.mubr.msk.bf16.gmra.mxu0 %vm9305_vm11, %v15525_v59  ;;  %vm6901_vm15 = vcmp.eq.s32.totalorder %v6859_v19, %v11537_v9  ;;  %v11153_v19 = vld [vmem:[#allocation2 + $0x8c0] sm:$0xff]  }
 0x4ac   :  { %v10319_v15 = vadd.f32 %v10318_v39, %v10317_v2  ;;  %9308 = vmatprep.mubr.msk.bf16.mxu0 %vm9307_vm12, %v15525_v59  ;;  %v11248_v2 = vld [vmem:[%s15482_s0 + $0x28] sm:$0xff]  ;;  %v11154_v39 = vld [vmem:[#allocation2 + $0x880] sm:$0xff]  }
 0x4ad   :  { %v10320_v47 = vpop.f32.mrf.mxu1  ;;  %10646 = vmatpush3.bf16.msra.mxu1 %v11136_v31 }
 0x4ae   :  { %v14947_v50 = vadd.f32 %v10319_v15, %v14741_v41  ;;  %v6862_v43 = vpop.permute.xlu1 %6861  ;;  %10647 = vmatprep.subr.bf16.mxu1 %v11139_v51  ;;  %v11144_v41 = vld [vmem:[#allocation2 + $0x8a0] sm:$0xff]  }
 0x4af   :  { %vm6902_vm0 = vcmp.eq.s32.totalorder %v6862_v43, %v11537_v9  ;;  %10833 = vset.pattern.permute.xlu1 %v15629_v18  ;;  %v10321_v58 = vpop.f32.mrf.mxu1 }
 0x4b0   :  { %vm9367_vm1 = vmpackc.low %vm6902_vm0, %vm6901_vm15  ;;  %v10322_v53 = vadd.f32 %v10321_v58, %v10320_v47  ;;  %7759 = vperm.xlu1 %10833, %v14577_v46   ;;  %v6865_v46 = vpop.permute.xlu0 %6864  ;;  %vm6801_vm15 = vcmp.eq.s32.totalorder %v14823_v17, %v11537_v9 }
 0x4b1   :  { %9368 = vmatprep.mubr.msk.bf16.mxu1 %vm9367_vm1, %v15525_v59  ;;  %10648 = vmatpush3.bf16.msra.mxu1 %v11140_v56  ;;  %vm6903_vm6 = vcmp.eq.s32.totalorder %v6865_v46, %v11537_v9 }
 0x4b2   :  { %v14961_v8 = vadd.f32 %v10322_v53, %v14755_v10  ;;  %10649 = vmatprep.subr.bf16.mxu1 %v11143_v20  ;;  %v11149_v10 = vld [vmem:[#allocation2 + $0x8d0] sm:$0xff]  }
 0x4b3   :  { %v6758_v55 = vpop.permute.xlu1 %6757  ;;  %9310 = vmatmul.mubr.msk.bf16.gmra.mxu0 %vm9309_vm2, %v15525_v59 }
 0x4b4   :  { %vm6798_vm4 = vcmp.eq.s32.totalorder %v6758_v55, %v11537_v9  ;;  %10834 = vset.pattern.permute.xlu1 %v15623_v5  ;;  %v14974_v52 = vpop.permute.xlu0 %6876 }
 0x4b5   :  { %vm9369_vm5 = vmpackc.low %vm6798_vm4, %vm6797_vm3  ;;  %7652 = vperm.xlu1 %10834, %v14917_v13   ;;  %10650 = vmatpush3.bf16.msra.mxu1 %v11144_v41  ;;  %v11247_v13 = vld [vmem:[%s15482_s0 + $0x20] sm:$0xff]  ;;  %vm6907_vm2 = vcmp.eq.s32.totalorder %v14974_v52, %v11537_v9 }
 0x4b6   :  { %9370 = vmatmul.mubr.msk.bf16.gmra.mxu1 %vm9369_vm5, %v15525_v59  ;;  %10651 = vmatprep.subr.bf16.mxu1 %v11147_v57  ;;  %vm6804_vm5 = vcmp.eq.s32.totalorder %v14846_v14, %v11537_v9 }
 0x4b7   :  { %v10339_v54 = vpop.f32.mrf.mxu0 }
 0x4b8   :  { %v6868_v28 = vpop.permute.xlu1 %6867  ;;  %v14986_v31 = vpop.permute.xlu0 %6888 }
 0x4b9   :  { %vm6904_vm7 = vcmp.eq.s32.totalorder %v6868_v28, %v11537_v9  ;;  %10836 = vset.pattern.permute.xlu1 %v15636_v37  ;;  %v10340_v24 = vpop.f32.mrf.mxu0  ;;  %10652 = vmatpush3.bf16.msra.mxu1 %v11148_v42 }
 0x4ba   :  { %vm9371_vm8 = vmpackc.low %vm6904_vm7, %vm6903_vm6  ;;  %v10341_v34 = vadd.f32 %v10340_v24, %v10339_v54  ;;  %7313 = vperm.xlu1 %10836, %v11247_v13   ;;  %10653 = vmatprep.subr.bf16.mxu1 %v11149_v10 }
 0x4bb   :  { %v10342_v45 = vpop.f32.mrf.mxu0  ;;  %9372 = vmatprep.mubr.msk.bf16.mxu1 %vm9371_vm8, %v15525_v59 }
 0x4bc   :  { %v14980_v3 = vadd.f32 %v10341_v34, %v14782_v38  ;;  %v14996_v20 = vpop.permute.xlu0 %6897 }
 0x4bd   :  { %v6761_v36 = vpop.permute.xlu1 %6760  ;;  %v10343_v30 = vpop.f32.mrf.mxu0  ;;  %10654 = vmatpush3.bf16.msra.mxu1 %v11150_v16 }
 0x4be   :  { %vm6799_vm10 = vcmp.eq.s32.totalorder %v6761_v36, %v11537_v9  ;;  %v10344_v32 = vadd.f32 %v10343_v30, %v10342_v45  ;;  %7316 = vperm.xlu1 %10836, %v11248_v2   ;;  %10655 = vmatprep.subr.bf16.mxu1 %v11151_v0  ;;  %v11249_v36 = vld [vmem:[%s15482_s0 + $0x38] sm:$0xff] }
 0x4bf   :  { %vm9373_vm11 = vmpackc.low %vm6800_vm9, %vm6799_vm10  ;;  %v10345_v27 = vpop.f32.mrf.mxu0 }
 0x4c0   :  { %v14989_v38 = vadd.f32 %v10344_v32, %v14793_v6  ;;  %9374 = vmatmul.mubr.msk.bf16.gmra.mxu1 %vm9373_vm11, %v15525_v59  ;;  %v15007_v55 = vpop.permute.xlu0 %7646  ;;  %vm6805_vm11 = vcmp.eq.s32.totalorder %v14865_v44, %v11537_v9 }
 0x4c1   :  { %v10346_v51 = vpop.f32.mrf.mxu0  ;;  %10656 = vmatpush3.bf16.msra.mxu1 %v11152_v21 }
 0x4c2   :  { %v10347_v15 = vadd.f32 %v10346_v51, %v10345_v27  ;;  %10837 = vset.pattern.permute.xlu1 %v15637_v33  ;;  %v6871_v47 = vpop.permute.xlu1 %6870  ;;  %10657 = vmatprep.subr.bf16.mxu1 %v11153_v19  ;;  %v11250_v19 = vld [vmem:[%s15482_s0 + $0x30] sm:$0xff] }
 0x4c3   :  { %7212 = vperm.xlu1 %10837, %v11248_v2   ;;  %v10348_v56 = vpop.f32.mrf.mxu0  ;;  %vm6905_vm12 = vcmp.eq.s32.totalorder %v6871_v47, %v11537_v9 }
 0x4c4   :  { %v14994_v43 = vadd.f32 %v10347_v15, %v14802_v63 }
 0x4c5   :  { %v10349_v60 = vpop.f32.mrf.mxu0  ;;  %10658 = vmatpush3.bf16.msra.mxu1 %v11154_v39 }
 0x4c6   :  { %v10350_v6 = vadd.f32 %v10349_v60, %v10348_v56  ;;  %v6874_v58 = vpop.permute.xlu1 %6873 }
 0x4c7   :  { %vm6906_vm13 = vcmp.eq.s32.totalorder %v6874_v58, %v11537_v9  ;;  %10838 = vset.pattern.permute.xlu1 %v15629_v18  ;;  %v10351_v53 = vpop.f32.mrf.mxu0 }
 0x4c8   :  { %v15002_v41 = vadd.f32 %v10350_v6, %v14818_v40  ;;  %vm9375_vm14 = vmpackc.low %vm6906_vm13, %vm6905_vm12  ;;  %7762 = vperm.xlu1 %10838, %v11247_v13  }
 0x4c9   :  { %v10352_v63 = vpop.f32.mrf.mxu0  ;;  %9376 = vmatprep.mubr.msk.bf16.mxu1 %vm9375_vm14, %v15525_v59  ;;  %vm6911_vm14 = vcmp.eq.s32.totalorder %v14986_v31, %v11537_v9 }
 0x4ca   :  { %v10353_v57 = vadd.f32 %v10352_v63, %v10351_v53 }
 0x4cb   :  { %v6770_v46 = vpop.permute.xlu1 %6769  ;;  %v10354_v42 = vpop.f32.mrf.mxu0 }
 0x4cc   :  { %v15010_v10 = vadd.f32 %v10353_v57, %v14826_v25  ;;  %vm6802_vm0 = vcmp.eq.s32.totalorder %v6770_v46, %v11537_v9  ;;  %10839 = vset.pattern.permute.xlu1 %v15623_v5  ;;  %v15020_v25 = vpop.permute.xlu0 %7655 }
 0x4cd   :  { %vm9377_vm1 = vmpackc.low %vm6802_vm0, %vm6801_vm15  ;;  %7658 = vperm.xlu1 %10839, %v11247_v13   ;;  %v10355_v40 = vpop.f32.mrf.mxu0 }
 0x4ce   :  { %v10356_v54 = vadd.f32 %v10355_v40, %v10354_v42  ;;  %9378 = vmatmul.mubr.msk.bf16.gmra.mxu1 %vm9377_vm1, %v15525_v59  ;;  %vm6808_vm1 = vcmp.eq.s32.totalorder %v14877_v26, %v11537_v9 }
 0x4cf   :  { %v10357_v28 = vpop.f32.mrf.mxu0 }
 0x4d0   :  { %v15018_v17 = vadd.f32 %v10356_v54, %v14838_v11  ;;  %v6880_v24 = vpop.permute.xlu1 %6879  ;;  %v15034_v30 = vpop.permute.xlu0 %7301 }
 0x4d1   :  { %vm6908_vm3 = vcmp.eq.s32.totalorder %v6880_v24, %v11537_v9  ;;  %7661 = vperm.xlu1 %10839, %v11248_v2   ;;  %v10358_v16 = vpop.f32.mrf.mxu0 }
 0x4d2   :  { %vm9379_vm4 = vmpackc.low %vm6908_vm3, %vm6907_vm2  ;;  %v10359_v34 = vadd.f32 %v10358_v16, %v10357_v28 }
 0x4d3   :  { %v10360_v13 = vpop.f32.mrf.mxu0  ;;  %9380 = vmatprep.mubr.msk.bf16.mxu1 %vm9379_vm4, %v15525_v59  ;;  %vm6360_vm4 = vcmp.eq.s32.totalorder %v14627_v22, %v11537_v9 }
 0x4d4   :  { %v15027_v52 = vadd.f32 %v10359_v34, %v14854_v61  ;;  %v15047_v39 = vpop.permute.xlu0 %7310 }
 0x4d5   :  { %10840 = vset.pattern.permute.xlu1 %v15636_v37  ;;  %v6773_v11 = vpop.permute.xlu1 %6772  ;;  %v10361_v0 = vpop.f32.mrf.mxu0 }
 0x4d6   :  { %vm6803_vm6 = vcmp.eq.s32.totalorder %v6773_v11, %v11537_v9  ;;  %v10362_v45 = vadd.f32 %v10361_v0, %v10360_v13  ;;  %7322 = vperm.xlu1 %10840, %v11249_v36   ;;  %v11251_v13 = vld [vmem:[%s15482_s0 + $0x40] sm:$0xff] }
 0x4d7   :  { %vm9381_vm7 = vmpackc.low %vm6804_vm5, %vm6803_vm6  ;;  %v10363_v21 = vpop.f32.mrf.mxu0  ;;  %vm6361_vm5 = vcmp.eq.s32.totalorder %v14795_v1, %v11537_v9  ;;  %vm6464_vm6 = vcmp.eq.s32.totalorder %v14892_v48, %v11537_v9  ;;  %v11252_v48 = vld [vmem:[%s15482_s0 + $0x48] sm:$0xff] }
 0x4d8   :  { %v15037_v14 = vadd.f32 %v10362_v45, %v14868_v35  ;;  %9382 = vmatmul.mubr.msk.bf16.gmra.mxu1 %vm9381_vm7, %v15525_v59  ;;  %v15058_v58 = vpop.permute.xlu0 %7319 }
 0x4d9   :  { %v10364_v61 = vpop.f32.mrf.mxu0 }
 0x4da   :  { %v10365_v32 = vadd.f32 %v10364_v61, %v10363_v21  ;;  %10841 = vset.pattern.permute.xlu1 %v15637_v33  ;;  %v6883_v2 = vpop.permute.xlu1 %6882 }
 0x4db   :  { %7215 = vperm.xlu1 %10841, %v11250_v19   ;;  %v10366_v27 = vpop.f32.mrf.mxu0  ;;  %vm6909_vm8 = vcmp.eq.s32.totalorder %v6883_v2, %v11537_v9 }
 0x4dc   :  { %v15045_v51 = vadd.f32 %v10365_v32, %v14875_v12 }
 0x4dd   :  { %v10367_v35 = vpop.f32.mrf.mxu0 }
 0x4de   :  { %v10368_v15 = vadd.f32 %v10367_v35, %v10366_v27  ;;  %v6886_v47 = vpop.permute.xlu1 %6885 }
 0x4df   :  { %vm6910_vm9 = vcmp.eq.s32.totalorder %v6886_v47, %v11537_v9  ;;  %10842 = vset.pattern.permute.xlu1 %v15629_v18  ;;  %v10369_v56 = vpop.f32.mrf.mxu0 }
 0x4e0   :  { %v15053_v60 = vadd.f32 %v10368_v15, %v14890_v7  ;;  %vm9383_vm10 = vmpackc.low %vm6910_vm9, %vm6909_vm8  ;;  %7768 = vperm.xlu1 %10842, %v11250_v19  }
 0x4e1   :  { %v10370_v6 = vpop.f32.mrf.mxu0  ;;  %9384 = vmatprep.mubr.msk.bf16.mxu1 %vm9383_vm10, %v15525_v59  ;;  %vm9313_vm9 = vmpackc.low %vm6361_vm5, %vm6360_vm4  ;;  %vm6914_vm10 = vcmp.eq.s32.totalorder %v14996_v20, %v11537_v9 }
 0x4e2   :  { %v10371_v12 = vadd.f32 %v10370_v6, %v10369_v56 }
 0x4e3   :  { %v6782_v53 = vpop.permute.xlu1 %6781  ;;  %v10372_v63 = vpop.f32.mrf.mxu0 }
 0x4e4   :  { %v15061_v57 = vadd.f32 %v10371_v12, %v14903_v29  ;;  %vm6806_vm12 = vcmp.eq.s32.totalorder %v6782_v53, %v11537_v9  ;;  %7771 = vperm.xlu1 %10842, %v11249_v36   ;;  %v15071_v29 = vpop.permute.xlu0 %7328 }
 0x4e5   :  { %vm9385_vm13 = vmpackc.low %vm6806_vm12, %vm6805_vm11  ;;  %v10373_v7 = vpop.f32.mrf.mxu0 }
 0x4e6   :  { %v10374_v46 = vadd.f32 %v10373_v7, %v10372_v63  ;;  %9386 = vmatmul.mubr.msk.bf16.gmra.mxu1 %vm9385_vm13, %v15525_v59 }
 0x4e7   :  { %v10375_v44 = vpop.f32.mrf.mxu0 }
 0x4e8   :  { %v15068_v42 = vadd.f32 %v10374_v46, %v14912_v23  ;;  %10843 = vset.pattern.permute.xlu1 %v15623_v5  ;;  %v6892_v40 = vpop.permute.xlu1 %6891  ;;  %v15085_v11 = vpop.permute.xlu0 %7756 }
 0x4e9   :  { %vm6912_vm15 = vcmp.eq.s32.totalorder %v6892_v40, %v11537_v9  ;;  %7667 = vperm.xlu1 %10843, %v11249_v36   ;;  %v10376_v54 = vpop.f32.mrf.mxu0 }
 0x4ea   :  { %vm9387_vm0 = vmpackc.low %vm6912_vm15, %vm6911_vm14  ;;  %v10377_v28 = vadd.f32 %v10376_v54, %v10375_v44 }
 0x4eb   :  { %v10378_v24 = vpop.f32.mrf.mxu0  ;;  %9388 = vmatprep.mubr.msk.bf16.mxu1 %vm9387_vm0, %v15525_v59  ;;  %vm7348_vm0 = vcmp.eq.s32.totalorder %v15034_v30, %v11537_v9 }
 0x4ec   :  { %v15078_v23 = vadd.f32 %v10377_v28, %v14926_v62  ;;  %v15102_v61 = vpop.permute.xlu0 %7765 }
 0x4ed   :  { %10844 = vset.pattern.permute.xlu1 %v15636_v37  ;;  %v6785_v31 = vpop.permute.xlu1 %6784  ;;  %v10379_v16 = vpop.f32.mrf.mxu0 }
 0x4ee   :  { %vm6807_vm2 = vcmp.eq.s32.totalorder %v6785_v31, %v11537_v9  ;;  %v10380_v34 = vadd.f32 %v10379_v16, %v10378_v24  ;;  %7325 = vperm.xlu1 %10844, %v11251_v13  }
 0x4ef   :  { %vm9389_vm3 = vmpackc.low %vm6808_vm1, %vm6807_vm2  ;;  %v10381_v0 = vpop.f32.mrf.mxu0 }
 0x4f0   :  { %v15088_v26 = vadd.f32 %v10380_v34, %v14941_v49  ;;  %9390 = vmatmul.mubr.msk.bf16.gmra.mxu1 %vm9389_vm3, %v15525_v59  ;;  %v15116_v2 = vpop.permute.xlu0 %7774 }
 0x4f1   :  { %v10382_v62 = vpop.f32.mrf.mxu0 }
 0x4f2   :  { %v10383_v45 = vadd.f32 %v10382_v62, %v10381_v0  ;;  %10846 = vset.pattern.permute.xlu1 %v15637_v33  ;;  %v6449_v36 = vpop.permute.xlu1 %6448 }
 0x4f3   :  { %vm6465_vm7 = vcmp.eq.s32.totalorder %v6449_v36, %v11537_v9  ;;  %7221 = vperm.xlu1 %10846, %v11251_v13   ;;  %v10384_v49 = vpop.f32.mrf.mxu0 }
 0x4f4   :  { %v15100_v21 = vadd.f32 %v10383_v45, %v14947_v50  ;;  %vm9311_vm8 = vmpackc.low %vm6465_vm7, %vm6464_vm6  ;;  %v15120_v47 = vpop.permute.xlu0 %7783 }
 0x4f5   :  { %v10385_v22 = vpop.f32.mrf.mxu0  ;;  %9312 = vmatprep.mubr.msk.bf16.mxu0 %vm9311_vm8, %v15525_v59 }
 0x4f6   :  { %v10386_v1 = vadd.f32 %v10385_v22, %v10384_v49  ;;  %9314 = vmatmul.mubr.msk.bf16.gmra.mxu0 %vm9313_vm9, %v15525_v59  ;;  %vm7693_vm9 = vcmp.eq.s32.totalorder %v15007_v55, %v11537_v9 }
 0x4f7   :  { %7224 = vperm.xlu1 %10846, %v11252_v48   ;;  %v6895_v50 = vpop.permute.xlu1 %6894 }
 0x4f8   :  { %v15112_v32 = vadd.f32 %v10386_v1, %v14961_v8  ;;  %vm6913_vm11 = vcmp.eq.s32.totalorder %v6895_v50, %v11537_v9  ;;  %v7201_v46 = vpop.permute.xlu0 %7200 }
 0x4f9   :  { %vm9391_vm12 = vmpackc.low %vm6914_vm10, %vm6913_vm11  ;;  %vm7245_vm3 = vcmp.eq.s32.totalorder %v7201_v46, %v11537_v9 }
 0x4fa   :  { %9392 = vmatprep.mubr.msk.bf16.mxu1 %vm9391_vm12, %v15525_v59  ;;  %vm7351_vm12 = vcmp.eq.s32.totalorder %v15047_v39, %v11537_v9 }
 0x4fb   :  { %10847 = vset.pattern.permute.xlu1 %v15629_v18 }
 0x4fc   :  { %7777 = vperm.xlu1 %10847, %v11252_v48   ;;  %v6791_v20 = vpop.permute.xlu1 %6790 }
 0x4fd   :  { %v10403_v19 = vpop.f32.mrf.mxu1  ;;  %vm6809_vm13 = vcmp.eq.s32.totalorder %v6791_v20, %v11537_v9 }
 0x4ff   :  { %v10404_v27 = vpop.f32.mrf.mxu1 }
 0x500   :  { %v10405_v35 = vadd.f32 %v10404_v27, %v10403_v19  ;;  %10848 = vset.pattern.permute.xlu1 %v15623_v5  ;;  %v6794_v15 = vpop.permute.xlu1 %6793 }
 0x501   :  { %vm6810_vm14 = vcmp.eq.s32.totalorder %v6794_v15, %v11537_v9  ;;  %7670 = vperm.xlu1 %10848, %v11251_v13   ;;  %v10406_v8 = vpop.f32.mrf.mxu1 }
 0x502   :  { %v15125_v56 = vadd.f32 %v10405_v35, %v14980_v3  ;;  %vm9393_vm15 = vmpackc.low %vm6810_vm14, %vm6809_vm13  ;;  %v11253_v3 = vld [vmem:[%s15482_s0 + $0x50] sm:$0xff] }
 0x503   :  { %v10407_v6 = vpop.f32.mrf.mxu1  ;;  %9394 = vmatmul.mubr.msk.bf16.gmra.mxu1 %vm9393_vm15, %v15525_v59 }
 0x504   :  { %v10408_v12 = vadd.f32 %v10407_v6, %v10406_v8 }
 0x505   :  { %10849 = vset.pattern.permute.xlu1 %v15636_v37  ;;  %v7305_v53 = vpop.permute.xlu1 %7304  ;;  %v10409_v63 = vpop.f32.mrf.mxu1 }
 0x506   :  { %v15132_v7 = vadd.f32 %v10408_v12, %v14989_v38  ;;  %vm7349_vm1 = vcmp.eq.s32.totalorder %v7305_v53, %v11537_v9  ;;  %7331 = vperm.xlu1 %10849, %v11253_v3   ;;  %v11254_v38 = vld [vmem:[%s15482_s0 + $0x58] sm:$0xff] }
 0x507   :  { %vm9443_vm2 = vmpackc.low %vm7349_vm1, %vm7348_vm0  ;;  %v10410_v44 = vpop.f32.mrf.mxu1 }
 0x508   :  { %v10411_v40 = vadd.f32 %v10410_v44, %v10409_v63  ;;  %9444 = vmatprep.mubr.msk.bf16.mxu0 %vm9443_vm2, %v15525_v59  ;;  %vm7799_vm2 = vcmp.eq.s32.totalorder %v15085_v11, %v11537_v9 }
 0x509   :  { %v10412_v30 = vpop.f32.mrf.mxu1 }
 0x50a   :  { %v15141_v54 = vadd.f32 %v10411_v40, %v14994_v43  ;;  %7334 = vperm.xlu1 %10849, %v11254_v38   ;;  %v7198_v28 = vpop.permute.xlu1 %7197 }
 0x50b   :  { %vm7244_vm4 = vcmp.eq.s32.totalorder %v7198_v28, %v11537_v9  ;;  %v10413_v24 = vpop.f32.mrf.mxu1 }
 0x50c   :  { %vm9445_vm5 = vmpackc.low %vm7245_vm3, %vm7244_vm4  ;;  %v10414_v31 = vadd.f32 %v10413_v24, %v10412_v30 }
 0x50d   :  { %v10415_v16 = vpop.f32.mrf.mxu1  ;;  %9446 = vmatmul.mubr.msk.bf16.vlgmr.msra.gmra.mxu0 %vm9445_vm5, %v15525_v59  ;;  %vm7696_vm5 = vcmp.eq.s32.totalorder %v15020_v25, %v11537_v9 }
 0x50e   :  { %v15149_v34 = vadd.f32 %v10414_v31, %v15002_v41  ;;  %10850 = vset.pattern.permute.xlu1 %v15637_v33 }
 0x50f   :  { %7230 = vperm.xlu1 %10850, %v11254_v38   ;;  %v7751_v43 = vpop.permute.xlu1 %7750  ;;  %v10416_v13 = vpop.f32.mrf.mxu1 }
 0x510   :  { %v10417_v0 = vadd.f32 %v10416_v13, %v10415_v16  ;;  %vm7797_vm6 = vcmp.eq.s32.totalorder %v7751_v43, %v11537_v9  ;;  %v11256_v16 = vld [vmem:[%s15482_s0 + $0x68] sm:$0xff] }
 0x511   :  { %v10418_v62 = vpop.f32.mrf.mxu1 }
 0x512   :  { %v15153_v45 = vadd.f32 %v10417_v0, %v15010_v10 }
 0x513   :  { %10851 = vset.pattern.permute.xlu1 %v15629_v18  ;;  %v7754_v36 = vpop.permute.xlu1 %7753  ;;  %v10419_v49 = vpop.f32.mrf.mxu1 }
 0x514   :  { %vm7798_vm7 = vcmp.eq.s32.totalorder %v7754_v36, %v11537_v9  ;;  %v10420_v41 = vadd.f32 %v10419_v49, %v10418_v62  ;;  %7780 = vperm.xlu1 %10851, %v11253_v3  }
 0x515   :  { %vm9523_vm8 = vmpackc.low %vm7798_vm7, %vm7797_vm6  ;;  %v10421_v22 = vpop.f32.mrf.mxu1 }
 0x516   :  { %v15159_v1 = vadd.f32 %v10420_v41, %v15018_v17  ;;  %9524 = vmatprep.mubr.msk.bf16.mxu1 %vm9523_vm8, %v15525_v59 }
 0x517   :  { %v10422_v10 = vpop.f32.mrf.mxu1 }
 0x518   :  { %v10423_v48 = vadd.f32 %v10422_v10, %v10421_v22  ;;  %10853 = vset.pattern.permute.xlu1 %v15623_v5  ;;  %v7650_v50 = vpop.permute.xlu1 %7649 }
 0x519   :  { %vm7694_vm10 = vcmp.eq.s32.totalorder %v7650_v50, %v11537_v9  ;;  %7676 = vperm.xlu1 %10853, %v11253_v3   ;;  %v10424_v20 = vpop.f32.mrf.mxu1  ;;  %v11257_v50 = vld [vmem:[%s15482_s0 + $0x70] sm:$0xff] }
 0x51a   :  { %v15167_v19 = vadd.f32 %v10423_v48, %v15027_v52  ;;  %vm9525_vm11 = vmpackc.low %vm7694_vm10, %vm7693_vm9 }
 0x51b   :  { %v10425_v17 = vpop.f32.mrf.mxu1  ;;  %9526 = vmatmul.mubr.msk.bf16.vlgmr.msra.gmra.mxu1 %vm9525_vm11, %v15525_v59 }
 0x51c   :  { %v10426_v55 = vadd.f32 %v10425_v17, %v10424_v20 }
 0x51d   :  { %7679 = vperm.xlu1 %10853, %v11254_v38   ;;  %v7308_v27 = vpop.permute.xlu1 %7307  ;;  %v10427_v35 = vpop.f32.mrf.mxu1 }
 0x51e   :  { %v15173_v15 = vadd.f32 %v10426_v55, %v15037_v14  ;;  %vm7350_vm13 = vcmp.eq.s32.totalorder %v7308_v27, %v11537_v9  ;;  %v11258_v55 = vld [vmem:[%s15482_s0 + $0x78] sm:$0xff] }
 0x51f   :  { %vm9447_vm14 = vmpackc.low %vm7351_vm12, %vm7350_vm13  ;;  %v10428_v8 = vpop.f32.mrf.mxu1 }
 0x520   :  { %v10429_v52 = vadd.f32 %v10428_v8, %v10427_v35  ;;  %9448 = vmatprep.mubr.msk.bf16.mxu0 %vm9447_vm14, %v15525_v59  ;;  %vm7802_vm14 = vcmp.eq.s32.totalorder %v15102_v61, %v11537_v9 }
 0x521   :  { %10854 = vset.pattern.permute.xlu1 %v15636_v37  ;;  %v10430_v6 = vpop.f32.mrf.mxu1 }
 0x522   :  { %v15179_v12 = vadd.f32 %v10429_v52, %v15045_v51  ;;  %7340 = vperm.xlu1 %10854, %v14763_v4   ;;  %v7204_v39 = vpop.permute.xlu1 %7203  ;;  %v11255_v51 = vld [vmem:[%s15482_s0 + $0x60] sm:$0xff] }
 0x523   :  { %v10431_v53 = vpop.f32.mrf.mxu1  ;;  %vm7246_vm15 = vcmp.eq.s32.totalorder %v7204_v39, %v11537_v9 }
 0x524   :  { %v10432_v63 = vadd.f32 %v10431_v53, %v10430_v6 }
 0x525   :  { %v10433_v14 = vpop.f32.mrf.mxu1 }
 0x526   :  { %v15183_v3 = vadd.f32 %v10432_v63, %v15053_v60  ;;  %10855 = vset.pattern.permute.xlu1 %v15637_v33  ;;  %v7207_v46 = vpop.permute.xlu1 %7206 }
 0x527   :  { %vm7247_vm0 = vcmp.eq.s32.totalorder %v7207_v46, %v11537_v9  ;;  %7233 = vperm.xlu1 %10855, %v11255_v51   ;;  %v10434_v4 = vpop.f32.mrf.mxu1 }
 0x528   :  { %vm9449_vm1 = vmpackc.low %vm7247_vm0, %vm7246_vm15  ;;  %v10435_v44 = vadd.f32 %v10434_v4, %v10433_v14 }
 0x529   :  { %v10436_v40 = vpop.f32.mrf.mxu1  ;;  %9450 = vmatmul.mubr.msk.bf16.gmra.mxu0 %vm9449_vm1, %v15525_v59 }
 0x52a   :  { %v15195_v60 = vadd.f32 %v10435_v44, %v15061_v57 }
 0x52b   :  { %10857 = vset.pattern.permute.xlu1 %v15629_v18  ;;  %v7760_v30 = vpop.permute.xlu1 %7759  ;;  %v10437_v38 = vpop.f32.mrf.mxu1 }
 0x52c   :  { %vm7800_vm3 = vcmp.eq.s32.totalorder %v7760_v30, %v11537_v9  ;;  %v10438_v28 = vadd.f32 %v10437_v38, %v10436_v40  ;;  %7786 = vperm.xlu1 %10857, %v11255_v51  }
 0x52d   :  { %vm9527_vm4 = vmpackc.low %vm7800_vm3, %vm7799_vm2  ;;  %v10439_v24 = vpop.f32.mrf.mxu1 }
 0x52e   :  { %v15200_v31 = vadd.f32 %v10438_v28, %v15068_v42  ;;  %9528 = vmatprep.mubr.msk.bf16.mxu1 %vm9527_vm4, %v15525_v59  ;;  %vm7354_vm4 = vcmp.eq.s32.totalorder %v15058_v58, %v11537_v9 }
 0x52f   :  { %v10440_v57 = vpop.f32.mrf.mxu1 }
 0x530   :  { %v10441_v11 = vadd.f32 %v10440_v57, %v10439_v24  ;;  %7789 = vperm.xlu1 %10857, %v11256_v16   ;;  %v7653_v43 = vpop.permute.xlu1 %7652 }
 0x531   :  { %vm7695_vm6 = vcmp.eq.s32.totalorder %v7653_v43, %v11537_v9  ;;  %v10442_v13 = vpop.f32.mrf.mxu1 }
 0x532   :  { %v15210_v0 = vadd.f32 %v10441_v11, %v15078_v23  ;;  %vm9529_vm7 = vmpackc.low %vm7696_vm5, %vm7695_vm6 }
 0x533   :  { %v10443_v42 = vpop.f32.mrf.mxu1  ;;  %9530 = vmatmul.mubr.msk.bf16.gmra.mxu1 %vm9529_vm7, %v15525_v59 }
 0x534   :  { %v10444_v62 = vadd.f32 %v10443_v42, %v10442_v13  ;;  %10859 = vset.pattern.permute.xlu1 %v15623_v5 }
 0x535   :  { %7685 = vperm.xlu1 %10859, %v11256_v16   ;;  %v7314_v25 = vpop.permute.xlu1 %7313  ;;  %v10445_v36 = vpop.f32.mrf.mxu1 }
 0x536   :  { %v15215_v49 = vadd.f32 %v10444_v62, %v15088_v26  ;;  %vm7352_vm8 = vcmp.eq.s32.totalorder %v7314_v25, %v11537_v9  ;;  %v7210_v26 = vpop.permute.xlu0 %7209 }
 0x537   :  { %v10446_v41 = vpop.f32.mrf.mxu1  ;;  %vm7248_vm11 = vcmp.eq.s32.totalorder %v7210_v26, %v11537_v9 }
 0x538   :  { %v10447_v22 = vadd.f32 %v10446_v41, %v10445_v36 }
 0x539   :  { %10860 = vset.pattern.permute.xlu1 %v15636_v37  ;;  %v7317_v10 = vpop.permute.xlu1 %7316  ;;  %v10448_v23 = vpop.f32.mrf.mxu1 }
 0x53a   :  { %v15220_v48 = vadd.f32 %v10447_v22, %v15100_v21  ;;  %vm7353_vm9 = vcmp.eq.s32.totalorder %v7317_v10, %v11537_v9  ;;  %7343 = vperm.xlu1 %10860, %v11257_v50   ;;  %v7219_v14 = vpop.permute.xlu0 %7218 }
 0x53b   :  { %vm9451_vm10 = vmpackc.low %vm7353_vm9, %vm7352_vm8  ;;  %v10449_v20 = vpop.f32.mrf.mxu1  ;;  %vm7251_vm7 = vcmp.eq.s32.totalorder %v7219_v14, %v11537_v9 }
 0x53c   :  { %v10450_v17 = vadd.f32 %v10449_v20, %v10448_v23  ;;  %9452 = vmatprep.mubr.msk.bf16.mxu0 %vm9451_vm10, %v15525_v59 }
 0x53e   :  { %v15229_v37 = vadd.f32 %v10450_v17, %v15112_v32  ;;  %10861 = vset.pattern.permute.xlu1 %v15637_v33  ;;  %v7213_v21 = vpop.permute.xlu1 %7212  ;;  %v15264_v40 = vpop.permute.xlu0 %7227 }
 0x53f   :  { %vm7249_vm12 = vcmp.eq.s32.totalorder %v7213_v21, %v11537_v9  ;;  %7239 = vperm.xlu1 %10861, %v11257_v50  }
 0x540   :  { %vm9453_vm13 = vmpackc.low %vm7249_vm12, %vm7248_vm11 }
 0x541   :  { %9454 = vmatmul.mubr.msk.bf16.gmra.mxu0 %vm9453_vm13, %v15525_v59 }
 0x542   :  { %v15272_v57 = vpop.permute.xlu0 %7236 }
 0x543   :  { %7242 = vperm.xlu1 %10861, %v11258_v55   ;;  %v7763_v27 = vpop.permute.xlu1 %7762  ;;  %v15239_v32 = vpop.f32.mrf.mxu0 }
 0x544   :  { %vm7801_vm15 = vcmp.eq.s32.totalorder %v7763_v27, %v11537_v9 }
 0x545   :  { %vm9531_vm0 = vmpackc.low %vm7802_vm14, %vm7801_vm15  ;;  %v15242_v33 = vpop.f32.mrf.mxu0 }
 0x546   :  { %9532 = vmatprep.mubr.msk.bf16.mxu1 %vm9531_vm0, %v15525_v59  ;;  %v7665_v36 = vpop.permute.xlu0 %7664  ;;  %vm7357_vm0 = vcmp.eq.s32.totalorder %v15071_v29, %v11537_v9 }
 0x547   :  { %10863 = vset.pattern.permute.xlu1 %v15629_v18  ;;  %v15246_v35 = vpop.f32.mrf.mxu0  ;;  %vm7699_vm13 = vcmp.eq.s32.totalorder %v7665_v36, %v11537_v9 }
 0x548   :  { %7795 = vperm.xlu1 %10863, %v11258_v55   ;;  %v7659_v61 = vpop.permute.xlu1 %7658 }
 0x549   :  { %v15248_v8 = vpop.f32.mrf.mxu0  ;;  %vm7697_vm1 = vcmp.eq.s32.totalorder %v7659_v61, %v11537_v9 }
 0x54b   :  { %v10473_v52 = vpop.f32.mrf.mxu0 }
 0x54c   :  { %10864 = vset.pattern.permute.xlu1 %v15623_v5  ;;  %v7662_v6 = vpop.permute.xlu1 %7661 }
 0x54d   :  { %vm7698_vm2 = vcmp.eq.s32.totalorder %v7662_v6, %v11537_v9  ;;  %7688 = vperm.xlu1 %10864, %v11257_v50   ;;  %v10474_v39 = vpop.f32.mrf.mxu0 }
 0x54e   :  { %vm9533_vm3 = vmpackc.low %vm7698_vm2, %vm7697_vm1  ;;  %v10475_v53 = vadd.f32 %v10474_v39, %v10473_v52 }
 0x54f   :  { %v10476_v63 = vpop.f32.mrf.mxu0  ;;  %9534 = vmatmul.mubr.msk.bf16.gmra.mxu1 %vm9533_vm3, %v15525_v59 }
 0x550   :  { %v15257_v18 = vadd.f32 %v10475_v53, %v15141_v54 }
 0x551   :  { %v7323_v5 = vpop.permute.xlu1 %7322  ;;  %v10477_v46 = vpop.f32.mrf.mxu0 }
 0x552   :  { %vm7355_vm5 = vcmp.eq.s32.totalorder %v7323_v5, %v11537_v9  ;;  %v10478_v51 = vadd.f32 %v10477_v46, %v10476_v63 }
 0x553   :  { %vm9455_vm6 = vmpackc.low %vm7355_vm5, %vm7354_vm4  ;;  %v10479_v4 = vpop.f32.mrf.mxu0 }
 0x554   :  { %v15261_v44 = vadd.f32 %v10478_v51, %v15149_v34  ;;  %9456 = vmatprep.mubr.msk.bf16.mxu0 %vm9455_vm6, %v15525_v59  ;;  %vm7805_vm6 = vcmp.eq.s32.totalorder %v15116_v2, %v11537_v9 }
 0x555   :  { %v10480_v30 = vpop.f32.mrf.mxu0 }
 0x556   :  { %v10481_v58 = vadd.f32 %v10480_v30, %v10479_v4  ;;  %v7216_v54 = vpop.permute.xlu1 %7215 }
 0x557   :  { %vm7250_vm8 = vcmp.eq.s32.totalorder %v7216_v54, %v11537_v9  ;;  %v10482_v38 = vpop.f32.mrf.mxu0 }
 0x558   :  { %v15269_v28 = vadd.f32 %v10481_v58, %v15153_v45  ;;  %vm9457_vm9 = vmpackc.low %vm7251_vm7, %vm7250_vm8 }
 0x559   :  { %v10483_v24 = vpop.f32.mrf.mxu0  ;;  %9458 = vmatmul.mubr.msk.bf16.gmra.mxu0 %vm9457_vm9, %v15525_v59 }
 0x55a   :  { %v10484_v34 = vadd.f32 %v10483_v24, %v10482_v38 }
 0x55b   :  { %v7769_v11 = vpop.permute.xlu1 %7768  ;;  %v10485_v16 = vpop.f32.mrf.mxu0 }
 0x55c   :  { %v15275_v43 = vadd.f32 %v10484_v34, %v15159_v1  ;;  %vm7803_vm10 = vcmp.eq.s32.totalorder %v7769_v11, %v11537_v9  ;;  %v7674_v11 = vpop.permute.xlu0 %7673 }
 0x55d   :  { %v10486_v13 = vpop.f32.mrf.mxu0  ;;  %vm7702_vm9 = vcmp.eq.s32.totalorder %v7674_v11, %v11537_v9 }
 0x55e   :  { %v10487_v42 = vadd.f32 %v10486_v13, %v10485_v16 }
 0x55f   :  { %v7772_v62 = vpop.permute.xlu1 %7771  ;;  %v10488_v25 = vpop.f32.mrf.mxu0 }
 0x560   :  { %v15279_v45 = vadd.f32 %v10487_v42, %v15167_v19  ;;  %vm7804_vm11 = vcmp.eq.s32.totalorder %v7772_v62, %v11537_v9 }
 0x561   :  { %vm9535_vm12 = vmpackc.low %vm7804_vm11, %vm7803_vm10  ;;  %v10489_v41 = vpop.f32.mrf.mxu0 }
 0x562   :  { %v10490_v22 = vadd.f32 %v10489_v41, %v10488_v25  ;;  %9536 = vmatprep.mubr.msk.bf16.mxu1 %vm9535_vm12, %v15525_v59 }
 0x563   :  { %v10491_v10 = vpop.f32.mrf.mxu0 }
 0x564   :  { %v15285_v1 = vadd.f32 %v10490_v22, %v15173_v15  ;;  %v7668_v23 = vpop.permute.xlu1 %7667 }
 0x565   :  { %vm7700_vm14 = vcmp.eq.s32.totalorder %v7668_v23, %v11537_v9  ;;  %v10492_v50 = vpop.f32.mrf.mxu0 }
 0x566   :  { %vm9537_vm15 = vmpackc.low %vm7700_vm14, %vm7699_vm13  ;;  %v10493_v19 = vadd.f32 %v10492_v50, %v10491_v10 }
 0x567   :  { %v10494_v26 = vpop.f32.mrf.mxu0  ;;  %9538 = vmatmul.mubr.msk.bf16.gmra.mxu1 %vm9537_vm15, %v15525_v59  ;;  %vm7254_vm15 = vcmp.eq.s32.totalorder %v15264_v40, %v11537_v9 }
 0x568   :  { %v15292_v20 = vadd.f32 %v10493_v19, %v15179_v12  ;;  %v15294_v17 = vpop.f32.mrf.mxu1 }
 0x569   :  { %v7326_v21 = vpop.permute.xlu1 %7325  ;;  %v10495_v15 = vpop.f32.mrf.mxu0 }
 0x56a   :  { %vm7356_vm1 = vcmp.eq.s32.totalorder %v7326_v21, %v11537_v9  ;;  %v10496_v55 = vadd.f32 %v10495_v15, %v10494_v26  ;;  %v15300_v52 = vpop.f32.mrf.mxu1 }
 0x56b   :  { %vm9459_vm2 = vmpackc.low %vm7357_vm0, %vm7356_vm1  ;;  %v10497_v27 = vpop.f32.mrf.mxu0 }
 0x56c   :  { %v15298_v61 = vadd.f32 %v10496_v55, %v15183_v3  ;;  %9460 = vmatprep.mubr.msk.bf16.mxu0 %vm9459_vm2, %v15525_v59  ;;  %v15303_v53 = vpop.f32.mrf.mxu1  ;;  %vm7808_vm2 = vcmp.eq.s32.totalorder %v15120_v47, %v11537_v9 }
 0x56d   :  { %v10498_v29 = vpop.f32.mrf.mxu0 }
 0x56e   :  { %v10499_v6 = vadd.f32 %v10498_v29, %v10497_v27  ;;  %v7222_v12 = vpop.permute.xlu1 %7221  ;;  %v15310_v51 = vpop.f32.mrf.mxu1 }
 0x56f   :  { %v10500_v39 = vpop.f32.mrf.mxu0  ;;  %vm7252_vm3 = vcmp.eq.s32.totalorder %v7222_v12, %v11537_v9 }
 0x570   :  { %v15306_v63 = vadd.f32 %v10499_v6, %v15195_v60  ;;  %v7683_v6 = vpop.permute.xlu0 %7682 }
 0x571   :  { %v10501_v14 = vpop.f32.mrf.mxu0 }
 0x572   :  { %v10502_v5 = vadd.f32 %v10501_v14, %v10500_v39  ;;  %v7225_v46 = vpop.permute.xlu1 %7224 }
 0x573   :  { %vm7253_vm4 = vcmp.eq.s32.totalorder %v7225_v46, %v11537_v9  ;;  %v10503_v3 = vpop.f32.mrf.mxu0 }
 0x574   :  { %v15313_v4 = vadd.f32 %v10502_v5, %v15200_v31  ;;  %vm9461_vm5 = vmpackc.low %vm7253_vm4, %vm7252_vm3 }
 0x575   :  { %v10504_v30 = vpop.f32.mrf.mxu0  ;;  %9462 = vmatmul.mubr.msk.bf16.gmra.mxu0 %vm9461_vm5, %v15525_v59 }
 0x576   :  { %v10505_v60 = vadd.f32 %v10504_v30, %v10503_v3  ;;  %v10537_v58 = vpop.f32.mrf.mxu1  ;;  %v7338_v3 = vpop.permute.xlu0 %7337 }
 0x577   :  { %v7778_v54 = vpop.permute.xlu1 %7777  ;;  %v10506_v38 = vpop.f32.mrf.mxu0 }
 0x578   :  { %v15319_v24 = vadd.f32 %v10505_v60, %v15210_v0  ;;  %vm7806_vm7 = vcmp.eq.s32.totalorder %v7778_v54, %v11537_v9  ;;  %v10538_v34 = vpop.f32.mrf.mxu1 }
 0x579   :  { %vm9539_vm8 = vmpackc.low %vm7806_vm7, %vm7805_vm6  ;;  %v10539_v31 = vadd.f32 %v10538_v34, %v10537_v58  ;;  %v10507_v16 = vpop.f32.mrf.mxu0 }
 0x57a   :  { %v10508_v13 = vadd.f32 %v10507_v16, %v10506_v38  ;;  %v10540_v42 = vpop.f32.mrf.mxu1  ;;  %9540 = vmatprep.mubr.msk.bf16.mxu1 %vm9539_vm8, %v15525_v59  ;;  %vm7360_vm8 = vcmp.eq.s32.totalorder %v7338_v3, %v11537_v9 }
 0x57b   :  { %v15324_v2 = vadd.f32 %v10539_v31, %v15257_v18 }
 0x57c   :  { %v15328_v62 = vadd.f32 %v10508_v13, %v15215_v49  ;;  %v7671_v0 = vpop.permute.xlu1 %7670  ;;  %v10541_v25 = vpop.f32.mrf.mxu1 }
 0x57d   :  { %vm7701_vm10 = vcmp.eq.s32.totalorder %v7671_v0, %v11537_v9  ;;  %v10542_v36 = vadd.f32 %v10541_v25, %v10540_v42 }
 0x57e   :  { %vm9541_vm11 = vmpackc.low %vm7702_vm9, %vm7701_vm10 }
 0x57f   :  { %v15332_v41 = vadd.f32 %v10542_v36, %v15261_v44  ;;  %9542 = vmatmul.mubr.msk.bf16.gmra.mxu1 %vm9541_vm11, %v15525_v59  ;;  %vm7257_vm11 = vcmp.eq.s32.totalorder %v15272_v57, %v11537_v9 }
 0x580   :  { %v10543_v22 = vpop.f32.mrf.mxu1 }
 0x581   :  { %v7332_v10 = vpop.permute.xlu1 %7331 }
 0x582   :  { %v10544_v18 = vpop.f32.mrf.mxu1  ;;  %vm7358_vm12 = vcmp.eq.s32.totalorder %v7332_v10, %v11537_v9 }
 0x583   :  { %v10545_v23 = vadd.f32 %v10544_v18, %v10543_v22 }
 0x584   :  { %v10546_v50 = vpop.f32.mrf.mxu1 }
 0x585   :  { %v15336_v19 = vadd.f32 %v10545_v23, %v15269_v28  ;;  %v7335_v49 = vpop.permute.xlu1 %7334 }
 0x586   :  { %vm7359_vm13 = vcmp.eq.s32.totalorder %v7335_v49, %v11537_v9  ;;  %v10547_v26 = vpop.f32.mrf.mxu1 }
 0x587   :  { %vm9463_vm14 = vmpackc.low %vm7359_vm13, %vm7358_vm12  ;;  %v10548_v21 = vadd.f32 %v10547_v26, %v10546_v50 }
 0x588   :  { %9464 = vmatprep.mubr.msk.bf16.mxu0 %vm9463_vm14, %v15525_v59 }
 0x589   :  { %v15344_v44 = vadd.f32 %v10548_v21, %v15275_v43 }
 0x58a   :  { %v7231_v15 = vpop.permute.xlu1 %7230 }
 0x58b   :  { %vm7255_vm0 = vcmp.eq.s32.totalorder %v7231_v15, %v11537_v9 }
 0x58c   :  { %vm9465_vm1 = vmpackc.low %vm7255_vm0, %vm7254_vm15 }
 0x58d   :  { %9466 = vmatmul.mubr.msk.bf16.gmra.mxu0 %vm9465_vm1, %v15525_v59  ;;  %vm7705_vm1 = vcmp.eq.s32.totalorder %v7683_v6, %v11537_v9 }
 0x58e   :  { %v10549_v28 = vpop.f32.mrf.mxu1 }
 0x58f   :  { %v7781_v55 = vpop.permute.xlu1 %7780 }
 0x590   :  { %vm7807_vm3 = vcmp.eq.s32.totalorder %v7781_v55, %v11537_v9  ;;  %v10550_v27 = vpop.f32.mrf.mxu1 }
 0x591   :  { %vm9543_vm4 = vmpackc.low %vm7808_vm2, %vm7807_vm3  ;;  %v10551_v29 = vadd.f32 %v10550_v27, %v10549_v28 }
 0x592   :  { %v10552_v40 = vpop.f32.mrf.mxu1  ;;  %9544 = vmatprep.mubr.msk.bf16.mxu1 %vm9543_vm4, %v15525_v59 }
 0x593   :  { %v15353_v43 = vadd.f32 %v10551_v29, %v15279_v45 }
 0x594   :  { %v7677_v12 = vpop.permute.xlu1 %7676  ;;  %v10553_v39 = vpop.f32.mrf.mxu1 }
 0x595   :  { %v10554_v14 = vadd.f32 %v10553_v39, %v10552_v40  ;;  %vm7703_vm5 = vcmp.eq.s32.totalorder %v7677_v12, %v11537_v9 }
 0x597   :  { %v15356_v5 = vadd.f32 %v10554_v14, %v15285_v1 }
 0x598   :  { %v7680_v46 = vpop.permute.xlu1 %7679  ;;  %v10555_v47 = vpop.f32.mrf.mxu1 }
 0x599   :  { %vm7704_vm6 = vcmp.eq.s32.totalorder %v7680_v46, %v11537_v9 }
 0x59a   :  { %vm9545_vm7 = vmpackc.low %vm7704_vm6, %vm7703_vm5  ;;  %v10556_v30 = vpop.f32.mrf.mxu1 }
 0x59b   :  { %v10557_v60 = vadd.f32 %v10556_v30, %v10555_v47  ;;  %9546 = vmatmul.mubr.msk.bf16.gmra.mxu1 %vm9545_vm7, %v15525_v59 }
 0x59c   :  { %v10558_v45 = vpop.f32.mrf.mxu1 }
 0x59d   :  { %v15363_v58 = vadd.f32 %v10557_v60, %v15292_v20  ;;  %v7341_v1 = vpop.permute.xlu1 %7340 }
 0x59e   :  { %vm7361_vm9 = vcmp.eq.s32.totalorder %v7341_v1, %v11537_v9  ;;  %v10559_v54 = vpop.f32.mrf.mxu1 }
 0x59f   :  { %vm9467_vm10 = vmpackc.low %vm7361_vm9, %vm7360_vm8  ;;  %v10560_v38 = vadd.f32 %v10559_v54, %v10558_v45 }
 0x5a0   :  { %9468 = vmatprep.mubr.msk.bf16.mxu0 %vm9467_vm10, %v15525_v59 }
 0x5a1   :  { %v15368_v34 = vadd.f32 %v10560_v38, %v15298_v61 }
 0x5a2   :  { %v7234_v11 = vpop.permute.xlu1 %7233 }
 0x5a3   :  { %vm7256_vm12 = vcmp.eq.s32.totalorder %v7234_v11, %v11537_v9 }
 0x5a4   :  { %vm9469_vm13 = vmpackc.low %vm7257_vm11, %vm7256_vm12 }
 0x5a5   :  { %9470 = vmatmul.mubr.msk.bf16.gmra.mxu0 %vm9469_vm13, %v15525_v59 }
 0x5a6   :  { %v10561_v20 = vpop.f32.mrf.mxu1 }
 0x5a7   :  { %v7787_v31 = vpop.permute.xlu1 %7786 }
 0x5a8   :  { %v10562_v16 = vpop.f32.mrf.mxu1  ;;  %vm7809_vm14 = vcmp.eq.s32.totalorder %v7787_v31, %v11537_v9  ;;  %v10469_v31 = vadd.f32 %v15242_v33, %v15239_v32 }
 0x5a9   :  { %v10563_v13 = vadd.f32 %v10562_v16, %v10561_v20 }
 0x5aa   :  { %v10564_v42 = vpop.f32.mrf.mxu1 }
 0x5ab   :  { %v15375_v0 = vadd.f32 %v10563_v13, %v15306_v63  ;;  %v7790_v25 = vpop.permute.xlu1 %7789  ;;  %v7347_v63 = vpop.permute.xlu0 %7346  ;;  %v10533_v13 = vadd.f32 %v15300_v52, %v15294_v17 }
 0x5ac   :  { %vm7810_vm15 = vcmp.eq.s32.totalorder %v7790_v25, %v11537_v9  ;;  %v10565_v61 = vpop.f32.mrf.mxu1  ;;  %vm7363_vm4 = vcmp.eq.s32.totalorder %v7347_v63, %v11537_v9 }
 0x5ad   :  { %vm9547_vm0 = vmpackc.low %vm7810_vm15, %vm7809_vm14  ;;  %v10566_v57 = vadd.f32 %v10565_v61, %v10564_v42  ;;  %v6731_v42 = vadd.f32 %v10469_v31, %v15125_v56 }
 0x5ae   :  { %9548 = vmatprep.mubr.msk.bf16.mxu1 %vm9547_vm0, %v15525_v59 }
 0x5af   :  { %v15381_v36 = vadd.f32 %v10566_v57, %v15313_v4  ;;  %v7793_v14 = vpop.permute.xlu0 %7792 }
 0x5b0   :  { %v7686_v22 = vpop.permute.xlu1 %7685  ;;  %v10567_v10 = vpop.f32.mrf.mxu1  ;;  %vm7811_vm10 = vcmp.eq.s32.totalorder %v7793_v14, %v11537_v9 }
 0x5b1   :  { %vm7706_vm2 = vcmp.eq.s32.totalorder %v7686_v22, %v11537_v9  ;;  %v10536_v22 = vadd.f32 %v15310_v51, %v15303_v53 }
 0x5b2   :  { %vm9549_vm3 = vmpackc.low %vm7706_vm2, %vm7705_vm1  ;;  %v10568_v18 = vpop.f32.mrf.mxu1 }
 0x5b3   :  { %v10569_v23 = vadd.f32 %v10568_v18, %v10567_v10  ;;  %9550 = vmatmul.mubr.msk.bf16.gmra.mxu1 %vm9549_vm3, %v15525_v59 }
 0x5b4   :  { %v10570_v50 = vpop.f32.mrf.mxu1 }
 0x5b5   :  { %v15388_v49 = vadd.f32 %v10569_v23, %v15319_v24  ;;  %v7344_v4 = vpop.permute.xlu1 %7343 }
 0x5b6   :  { %vm7362_vm5 = vcmp.eq.s32.totalorder %v7344_v4, %v11537_v9  ;;  %v10509_v26 = vpop.f32.mrf.mxu0  ;;  %v10571_v21 = vpop.f32.mrf.mxu1 }
 0x5b7   :  { %vm9471_vm6 = vmpackc.low %vm7363_vm4, %vm7362_vm5  ;;  %v10572_v15 = vadd.f32 %v10571_v21, %v10570_v50 }
 0x5b8   :  { %v10510_v28 = vpop.f32.mrf.mxu0  ;;  %9472 = vmatprep.mubr.msk.bf16.mxu0 %vm9471_vm6, %v15525_v59 }
 0x5b9   :  { %v15393_v55 = vadd.f32 %v10572_v15, %v15328_v62  ;;  %v10511_v27 = vadd.f32 %v10510_v28, %v10509_v26 }
 0x5ba   :  { %v7240_v29 = vpop.permute.xlu1 %7239  ;;  %v10512_v40 = vpop.f32.mrf.mxu0 }
 0x5bb   :  { %v6745_v6 = vadd.f32 %v10511_v27, %v15220_v48  ;;  %vm7258_vm7 = vcmp.eq.s32.totalorder %v7240_v29, %v11537_v9  ;;  %v7692_v48 = vpop.permute.xlu0 %7691 }
 0x5bc   :  { %v10513_v24 = vpop.f32.mrf.mxu0  ;;  %vm7708_vm13 = vcmp.eq.s32.totalorder %v7692_v48, %v11537_v9 }
 0x5bd   :  { %v10514_v12 = vadd.f32 %v10513_v24, %v10512_v40 }
 0x5be   :  { %v7243_v39 = vpop.permute.xlu1 %7242 }
 0x5bf   :  { %v6746_v46 = vadd.f32 %v10514_v12, %v15229_v37  ;;  %vm7259_vm8 = vcmp.eq.s32.totalorder %v7243_v39, %v11537_v9 }
 0x5c0   :  { %vm9473_vm9 = vmpackc.low %vm7259_vm8, %vm7258_vm7 }
 0x5c1   :  { %9474 = vmatmul.mubr.msk.bf16.gmra.mxu0 %vm9473_vm9, %v15525_v59 }
 0x5c3   :  { %v7796_v62 = vpop.permute.xlu1 %7795  ;;  %v10573_v47 = vpop.f32.mrf.mxu1 }
 0x5c4   :  { %vm7812_vm11 = vcmp.eq.s32.totalorder %v7796_v62, %v11537_v9 }
 0x5c5   :  { %vm9551_vm12 = vmpackc.low %vm7812_vm11, %vm7811_vm10  ;;  %v10574_v3 = vpop.f32.mrf.mxu1 }
 0x5c6   :  { %v10575_v30 = vadd.f32 %v10574_v3, %v10573_v47  ;;  %9552 = vmatprep.mubr.msk.bf16.mxu1 %vm9551_vm12, %v15525_v59 }
 0x5c7   :  { %v10576_v60 = vpop.f32.mrf.mxu1 }
 0x5c8   :  { %v15404_v37 = vadd.f32 %v10575_v30, %v6745_v6  ;;  %v7689_v45 = vpop.permute.xlu1 %7688 }
 0x5c9   :  { %vm7707_vm14 = vcmp.eq.s32.totalorder %v7689_v45, %v11537_v9  ;;  %v10577_v1 = vpop.f32.mrf.mxu1  ;;  %v10472_v9 = vadd.f32 %v15248_v8, %v15246_v35 }
 0x5ca   :  { %vm9553_vm15 = vmpackc.low %vm7708_vm13, %vm7707_vm14  ;;  %v10578_v54 = vadd.f32 %v10577_v1, %v10576_v60 }
 0x5cb   :  { %9554 = vmatmul.mubr.msk.bf16.gmra.mxu1 %vm9553_vm15, %v15525_v59  ;;  %v7180_v59 = vadd.f32 %v10533_v13, %v6731_v42  ;;  %v6732_v63 = vadd.f32 %v10472_v9, %v15132_v7 }
 0x5cc   :  { %v15408_v38 = vadd.f32 %v10578_v54, %v6746_v46 }
 0x5cd   :  { %v10595_v11 = vpop.f32.mrf.mxu0  ;;  %v7181_v17 = vadd.f32 %v10536_v22, %v6732_v63 }
 0x5cf   :  { %v10596_v20 = vpop.f32.mrf.mxu0 }
 0x5d0   :  { %v10597_v25 = vadd.f32 %v10596_v20, %v10595_v11 }
 0x5d1   :  { %v10598_v16 = vpop.f32.mrf.mxu0 }
 0x5d2   :  { %v7629_v32 = vadd.f32 %v10597_v25, %v7180_v59 }
 0x5d3   :  { %v10599_v61 = vpop.f32.mrf.mxu0 }
 0x5d4   :  { %v10600_v33 = vadd.f32 %v10599_v61, %v10598_v16 }
 0x5d6   :  { %v7630_v50 = vadd.f32 %v10600_v33, %v7181_v17 }
 0x5db   :  { %v10659_v57 = vpop.f32.mrf.mxu1 }
 0x5dd   :  { %v10660_v10 = vpop.f32.mrf.mxu1 }
 0x5de   :  { %v10661_v18 = vadd.f32 %v10660_v10, %v10659_v57 }
 0x5df   :  { %v10662_v23 = vpop.f32.mrf.mxu1 }
 0x5e0   :  { %v8078_v52 = vadd.f32 %v10661_v18, %v7629_v32 }
 0x5e1   :  { %v10663_v56 = vpop.f32.mrf.mxu1 }
 0x5e2   :  { %8094 = vst [vmem:[%s15484_s2] sm:$0xff] %v8078_v52  ;;  %v10664_v35 = vadd.f32 %v10663_v56, %v10662_v23 }
 0x5e4   :  { %v8079_v8 = vadd.f32 %v10664_v35, %v7630_v50 }
 0x5e6   :  { %8095 = vst [vmem:[%s15484_s2 + $0x8] sm:$0xff] %v8079_v8 }
 0x5e9   :  { %v10601_v53 = vpop.f32.mrf.mxu0 }
 0x5eb   :  { %v10602_v7 = vpop.f32.mrf.mxu0 }
 0x5ec   :  { %v10603_v4 = vadd.f32 %v10602_v7, %v10601_v53 }
 0x5ed   :  { %v10604_v51 = vpop.f32.mrf.mxu0 }
 0x5ee   :  { %v7631_v28 = vadd.f32 %v10603_v4, %v15324_v2 }
 0x5ef   :  { %v10605_v26 = vpop.f32.mrf.mxu0 }
 0x5f0   :  { %v10606_v27 = vadd.f32 %v10605_v26, %v10604_v51 }
 0x5f2   :  { %v7632_v12 = vadd.f32 %v10606_v27, %v15332_v41 }
 0x5f3   :  { %v10665_v21 = vpop.f32.mrf.mxu1 }
 0x5f5   :  { %v10666_v15 = vpop.f32.mrf.mxu1 }
 0x5f6   :  { %v10667_v29 = vadd.f32 %v10666_v15, %v10665_v21 }
 0x5f7   :  { %v10668_v40 = vpop.f32.mrf.mxu1 }
 0x5f8   :  { %v8080_v6 = vadd.f32 %v10667_v29, %v7631_v28 }
 0x5f9   :  { %v10669_v24 = vpop.f32.mrf.mxu1 }
 0x5fa   :  { %8096 = vst [vmem:[%s15484_s2 + $0x10] sm:$0xff] %v8080_v6  ;;  %v10670_v39 = vadd.f32 %v10669_v24, %v10668_v40 }
 0x5fc   :  { %v8081_v14 = vadd.f32 %v10670_v39, %v7632_v12 }
 0x5fe   :  { %8097 = vst [vmem:[%s15484_s2 + $0x18] sm:$0xff] %v8081_v14 }
 0x601   :  { %v10607_v46 = vpop.f32.mrf.mxu0 }
 0x603   :  { %v10608_v62 = vpop.f32.mrf.mxu0 }
 0x604   :  { %v10609_v47 = vadd.f32 %v10608_v62, %v10607_v46 }
 0x605   :  { %v10610_v2 = vpop.f32.mrf.mxu0 }
 0x606   :  { %v7633_v60 = vadd.f32 %v10609_v47, %v15336_v19 }
 0x607   :  { %v10611_v48 = vpop.f32.mrf.mxu0 }
 0x608   :  { %v10612_v41 = vadd.f32 %v10611_v48, %v10610_v2 }
 0x60a   :  { %v7634_v20 = vadd.f32 %v10612_v41, %v15344_v44 }
 0x60f   :  { %v10671_v3 = vpop.f32.mrf.mxu1 }
 0x611   :  { %v10672_v30 = vpop.f32.mrf.mxu1 }
 0x612   :  { %v10673_v45 = vadd.f32 %v10672_v30, %v10671_v3 }
 0x613   :  { %v10674_v1 = vpop.f32.mrf.mxu1 }
 0x614   :  { %v8082_v54 = vadd.f32 %v10673_v45, %v7633_v60 }
 0x615   :  { %v10675_v11 = vpop.f32.mrf.mxu1 }
 0x616   :  { %8098 = vst [vmem:[%s15484_s2 + $0x20] sm:$0xff] %v8082_v54  ;;  %v10676_v31 = vadd.f32 %v10675_v11, %v10674_v1 }
 0x618   :  { %v8083_v16 = vadd.f32 %v10676_v31, %v7634_v20 }
 0x619   :  { %v10613_v13 = vpop.f32.mrf.mxu0 }
 0x61a   :  { %8099 = vst [vmem:[%s15484_s2 + $0x28] sm:$0xff] %v8083_v16 }
 0x61b   :  { %v10614_v42 = vpop.f32.mrf.mxu0 }
 0x61c   :  { %v10615_v9 = vadd.f32 %v10614_v42, %v10613_v13 }
 0x61d   :  { %v10616_v19 = vpop.f32.mrf.mxu0 }
 0x61e   :  { %v7635_v59 = vadd.f32 %v10615_v9, %v15353_v43 }
 0x61f   :  { %v10617_v25 = vpop.f32.mrf.mxu0 }
 0x620   :  { %v10618_v44 = vadd.f32 %v10617_v25, %v10616_v19 }
 0x622   :  { %v7636_v33 = vadd.f32 %v10618_v44, %v15356_v5 }
 0x627   :  { %v10677_v61 = vpop.f32.mrf.mxu1 }
 0x629   :  { %v10678_v57 = vpop.f32.mrf.mxu1 }
 0x62a   :  { %v10679_v22 = vadd.f32 %v10678_v57, %v10677_v61 }
 0x62b   :  { %v10680_v10 = vpop.f32.mrf.mxu1 }
 0x62c   :  { %v8084_v63 = vadd.f32 %v10679_v22, %v7635_v59 }
 0x62d   :  { %v10681_v32 = vpop.f32.mrf.mxu1 }
 0x62e   :  { %8100 = vst [vmem:[%s15484_s2 + $0x30] sm:$0xff] %v8084_v63  ;;  %v10682_v18 = vadd.f32 %v10681_v32, %v10680_v10 }
 0x630   :  { %v8085_v23 = vadd.f32 %v10682_v18, %v7636_v33 }
 0x632   :  { %8101 = vst [vmem:[%s15484_s2 + $0x38] sm:$0xff] %v8085_v23 }
 0x635   :  { %v10619_v17 = vpop.f32.mrf.mxu0 }
 0x637   :  { %v10620_v52 = vpop.f32.mrf.mxu0 }
 0x638   :  { %v10621_v56 = vadd.f32 %v10620_v52, %v10619_v17 }
 0x639   :  { %v10622_v43 = vpop.f32.mrf.mxu0 }
 0x63a   :  { %v7637_v53 = vadd.f32 %v10621_v56, %v15363_v58 }
 0x63b   :  { %v10623_v50 = vpop.f32.mrf.mxu0 }
 0x63c   :  { %v10624_v5 = vadd.f32 %v10623_v50, %v10622_v43 }
 0x63e   :  { %v7638_v21 = vadd.f32 %v10624_v5, %v15368_v34 }
 0x63f   :  { %v10683_v35 = vpop.f32.mrf.mxu1 }
 0x641   :  { %v10684_v8 = vpop.f32.mrf.mxu1 }
 0x642   :  { %v10685_v7 = vadd.f32 %v10684_v8, %v10683_v35 }
 0x643   :  { %v10686_v51 = vpop.f32.mrf.mxu1 }
 0x644   :  { %v8086_v4 = vadd.f32 %v10685_v7, %v7637_v53 }
 0x645   :  { %v10687_v26 = vpop.f32.mrf.mxu1 }
 0x646   :  { %8102 = vst [vmem:[%s15484_s2 + $0x40] sm:$0xff] %v8086_v4  ;;  %v10688_v15 = vadd.f32 %v10687_v26, %v10686_v51 }
 0x648   :  { %v8087_v28 = vadd.f32 %v10688_v15, %v7638_v21 }
 0x64a   :  { %8103 = vst [vmem:[%s15484_s2 + $0x48] sm:$0xff] %v8087_v28 }
 0x64d   :  { %v10625_v27 = vpop.f32.mrf.mxu0 }
 0x64f   :  { %v10626_v29 = vpop.f32.mrf.mxu0 }
 0x650   :  { %v10627_v40 = vadd.f32 %v10626_v29, %v10625_v27 }
 0x651   :  { %v10628_v58 = vpop.f32.mrf.mxu0 }
 0x652   :  { %v7639_v39 = vadd.f32 %v10627_v40, %v15375_v0 }
 0x653   :  { %v10629_v6 = vpop.f32.mrf.mxu0 }
 0x654   :  { %v10630_v34 = vadd.f32 %v10629_v6, %v10628_v58 }
 0x656   :  { %v7640_v47 = vadd.f32 %v10630_v34, %v15381_v36 }
 0x65b   :  { %v10689_v24 = vpop.f32.mrf.mxu1 }
 0x65d   :  { %v10690_v12 = vpop.f32.mrf.mxu1 }
 0x65e   :  { %v10691_v14 = vadd.f32 %v10690_v12, %v10689_v24 }
 0x65f   :  { %v10692_v46 = vpop.f32.mrf.mxu1 }
 0x660   :  { %v8088_v62 = vadd.f32 %v10691_v14, %v7639_v39 }
 0x661   :  { %v10693_v2 = vpop.f32.mrf.mxu1 }
 0x662   :  { %8104 = vst [vmem:[%s15484_s2 + $0x50] sm:$0xff] %v8088_v62  ;;  %v10694_v48 = vadd.f32 %v10693_v2, %v10692_v46 }
 0x664   :  { %v8089_v3 = vadd.f32 %v10694_v48, %v7640_v47 }
 0x665   :  { %v10631_v30 = vpop.f32.mrf.mxu0 }
 0x666   :  { %8105 = vst [vmem:[%s15484_s2 + $0x58] sm:$0xff] %v8089_v3 }
 0x667   :  { %v10632_v60 = vpop.f32.mrf.mxu0 }
 0x668   :  { %v10633_v41 = vadd.f32 %v10632_v60, %v10631_v30 }
 0x669   :  { %v10634_v0 = vpop.f32.mrf.mxu0 }
 0x66a   :  { %v7641_v11 = vadd.f32 %v10633_v41, %v15388_v49 }
 0x66b   :  { %v10635_v45 = vpop.f32.mrf.mxu0 }
 0x66c   :  { %v10636_v36 = vadd.f32 %v10635_v45, %v10634_v0 }
 0x66e   :  { %v7642_v42 = vadd.f32 %v10636_v36, %v15393_v55 }
 0x673   :  { %v10695_v1 = vpop.f32.mrf.mxu1 }
 0x675   :  { %v10696_v54 = vpop.f32.mrf.mxu1 }
 0x676   :  { %v10697_v20 = vadd.f32 %v10696_v54, %v10695_v1 }
 0x677   :  { %v10698_v31 = vpop.f32.mrf.mxu1 }
 0x678   :  { %v8090_v16 = vadd.f32 %v10697_v20, %v7641_v11 }
 0x679   :  { %v10699_v13 = vpop.f32.mrf.mxu1 }
 0x67a   :  { %8106 = vst [vmem:[%s15484_s2 + $0x60] sm:$0xff] %v8090_v16  ;;  %v10700_v19 = vadd.f32 %v10699_v13, %v10698_v31 }
 0x67c   :  { %v8091_v9 = vadd.f32 %v10700_v19, %v7642_v42 }
 0x67e   :  { %8107 = vst [vmem:[%s15484_s2 + $0x68] sm:$0xff] %v8091_v9 }
 0x681   :  { %v10637_v25 = vpop.f32.mrf.mxu0 }
 0x683   :  { %v10638_v61 = vpop.f32.mrf.mxu0 }
 0x684   :  { %v10639_v57 = vadd.f32 %v10638_v61, %v10637_v25 }
 0x685   :  { %v10640_v49 = vpop.f32.mrf.mxu0 }
 0x686   :  { %v7643_v10 = vadd.f32 %v10639_v57, %v15404_v37 }
 0x687   :  { %v10641_v59 = vpop.f32.mrf.mxu0 }
 0x688   :  { %v10642_v55 = vadd.f32 %v10641_v59, %v10640_v49 }
 0x68a   :  { %v7644_v23 = vadd.f32 %v10642_v55, %v15408_v38 }
 0x68b   :  { %v10701_v44 = vpop.f32.mrf.mxu1 }
 0x68d   :  { %v10702_v22 = vpop.f32.mrf.mxu1 }
 0x68e   :  { %v10703_v63 = vadd.f32 %v10702_v22, %v10701_v44 }
 0x68f   :  { %v10704_v32 = vpop.f32.mrf.mxu1 }
 0x690   :  { %v8092_v33 = vadd.f32 %v10703_v63, %v7643_v10 }
 0x691   :  { %v10705_v18 = vpop.f32.mrf.mxu1 }
 0x692   :  { %8108 = vst [vmem:[%s15484_s2 + $0x70] sm:$0xff] %v8092_v33  ;;  %v10706_v17 = vadd.f32 %v10705_v18, %v10704_v32 }
 0x694   :  { %v8093_v52 = vadd.f32 %v10706_v17, %v7644_v23 }
 0x696   :  { %8109 = vst [vmem:[%s15484_s2 + $0x78] sm:$0xff] %v8093_v52 }
 0x697   :  { %8114 = vsyncpa [#allocation3], 1 }

</bundles_post_ra>
